<compile_context>
chip_gen: v6e
topology: v6e:2x2x1
jax: 0.10.0
libtpu: 0.0.40
codegen_flags: <defaults>
</compile_context>

<pallas_src>
import functools

import jax
import jax.numpy as jnp
from jax.experimental import pallas as pl
from jax.experimental.pallas import tpu as pltpu


# ----------------------------------------------------------------------------- helpers

def _gelu(x):
    # TODO(synk): exact-erf GELU (PyTorch default) approximated with tanh form.
    return 0.5 * x * (1.0 + jnp.tanh(0.7978845608028654 * (x + 0.044715 * x * x * x)))


def _round_up(n, m):
    return ((n + m - 1) // m) * m


def _pick_time_tile(T, target):
    """Time tile: multiple of 8, <= target; T gets zero-padded (and masked) to a multiple."""
    target = max(8, (int(target) // 8) * 8)
    if T <= target:
        return _round_up(T, 8)
    return target


def _build_halo(x, tT):
    """Merged 3-left/3-right halo rows per time tile -> [B, nT, 8, C] (rows 0..2 left, 3..5 right).

    Only the 6 boundary rows per tile are copied (no full pad+reshape of the activation)."""
    B, Tp, C = x.shape
    nT = Tp // tT
    xt = x.reshape(B, nT, tT, C)
    z3 = jnp.zeros((B, 1, 3, C), x.dtype)
    left = jnp.concatenate([z3, xt[:, :-1, tT - 3:, :]], axis=1)      # [B, nT, 3, C]
    right = jnp.concatenate([xt[:, 1:, :3, :], z3], axis=1)           # [B, nT, 3, C]
    z2 = jnp.zeros((B, nT, 2, C), x.dtype)
    return jnp.concatenate([left, right, z2], axis=2)                 # [B, nT, 8, C]


def _instance_norm_t(x, g, b, eps):
    """InstanceNorm1d over time (axis 0), affine, centered two-pass statistics (f32)."""
    m = jnp.mean(x, axis=0, keepdims=True)
    d = x - m
    v = jnp.mean(d * d, axis=0, keepdims=True)
    return d * jax.lax.rsqrt(v + eps) * g + b


# ----------------------------------------------------------------------------- kernels

def _convnext_kernel(*refs, nseg, proj, activation, eps_ln, t_valid, mask):
    """Fused style-conditioned ConvNeXt block on channel segments (concat-free in HBM).

    Per (b, time-tile): dwconv7 per segment -> AdaLayerNorm over the virtual channel concat ->
    pw1 (per-segment bf16 MXU dots, f32 acc) -> GELU -> pw2 -> residual (identity or split 1x1)."""
    K = nseg
    x_r = refs[0:K]
    halo = refs[K:2 * K]
    dw_w = refs[2 * K:3 * K]
    dw_b = refs[3 * K:4 * K]
    g_r = refs[4 * K:5 * K]
    be_r = refs[5 * K:6 * K]
    w1_r = refs[6 * K:7 * K]
    b1_r = refs[7 * K]
    w2_r = refs[7 * K + 1]
    b2_r = refs[7 * K + 2]
    base = 7 * K + 3
    if proj:
        rw_r = refs[base:base + K]
        rb_r = refs[base + K]
        base += K + 1
    o_ref = refs[base]

    tT = x_r[0].shape[0]
    seg_dims = [x_r[k].shape[1] for k in range(K)]
    c_tot = float(sum(seg_dims))

    # depthwise conv (k=7, 'same') per segment, f32 VPU accumulation
    # TODO(synk): roll-based taps would avoid the [tT+6, C] staging copy below.
    h_segs = []
    x32_first = None
    ssum = None
    for k in range(K):
        x32 = x_r[k][...].astype(jnp.float32)                       # [tT, c_k]
        if k == 0:
            x32_first = x32
        hblk = halo[k][...].astype(jnp.float32)                     # [8, c_k]
        xp = jnp.concatenate([hblk[0:3], x32, hblk[3:6]], axis=0)   # [tT+6, c_k]
        w = dw_w[k][...]                                            # [7, c_k] f32
        h = xp[0:tT] * w[0:1]
        for j in range(1, 7):
            h = h + xp[j:j + tT] * w[j:j + 1]
        h = h + dw_b[k][...]
        h_segs.append(h)
        s1 = jnp.sum(h, axis=-1, keepdims=True)
        ssum = s1 if ssum is None else ssum + s1

    # AdaLayerNorm statistics over the full (virtual) channel dim — centered two-pass.
    mean = ssum / c_tot
    ssq = None
    for k in range(K):
        d = h_segs[k] - mean
        h_segs[k] = d
        s2 = jnp.sum(d * d, axis=-1, keepdims=True)
        ssq = s2 if ssq is None else ssq + s2
    inv = jax.lax.rsqrt(ssq / c_tot + eps_ln)

    # modulated LN + pointwise-1 (per-segment bf16 MXU dots accumulated in f32)
    acc1 = None
    for k in range(K):
        hn = h_segs[k] * inv * g_r[k][...] + be_r[k][...]
        d = jnp.dot(hn.astype(jnp.bfloat16), w1_r[k][...],
                    preferred_element_type=jnp.float32)
        acc1 = d if acc1 is None else acc1 + d
    acc1 = acc1 + b1_r[...]
    if activation:
        acc1 = _gelu(acc1)

    # pointwise-2
    y = jnp.dot(acc1.astype(jnp.bfloat16), w2_r[...],
                preferred_element_type=jnp.float32) + b2_r[...]

    # residual
    if proj:
        r = None
        for k in range(K):
            d = jnp.dot(x_r[k][...], rw_r[k][...],
                        preferred_element_type=jnp.float32)
            r = d if r is None else r + d
        y = y + r + rb_r[...]
    else:
        y = y + x32_first

    # zero padded rows so the next block's dwconv sees exact zero padding (matches PyTorch).
    if mask:
        rows = (jax.lax.broadcasted_iota(jnp.int32, (tT, 1), 0)
                + pl.program_id(1) * tT)
        y = jnp.where(rows < t_valid, y, 0.0)

    o_ref[...] = y.astype(o_ref.dtype)


def _curve_feature(c_ref, w, eps_ln, eps_in):
    """Conv1d(1,rd,1) -> BasicConvNeXtBlock(rd, 2rd) -> InstanceNorm1d(rd, affine)."""
    (conv_w, conv_b, dw_w, dw_b, ln_g, ln_b,
     pw1_w, pw1_b, pw2_w, pw2_b, in_g, in_b) = w
    T = c_ref.shape[0]
    rd = conv_w.shape[1]
    c = c_ref[...]                                                   # [T, 1] f32
    h0 = c * conv_w[...] + conv_b[...]                               # [T, rd]
    z = jnp.zeros((3, rd), jnp.float32)
    xp = jnp.concatenate([z, h0, z], axis=0)                         # [T+6, rd]
    wv = dw_w[...]
    h = xp[0:T] * wv[0:1]
    for j in range(1, 7):
        h = h + xp[j:j + T] * wv[j:j + 1]
    h = h + dw_b[...]
    # LayerNorm over channels (centered two-pass, f32)
    mean = jnp.mean(h, axis=-1, keepdims=True)
    d = h - mean
    var = jnp.mean(d * d, axis=-1, keepdims=True)
    hn = d * jax.lax.rsqrt(var + eps_ln) * ln_g[...] + ln_b[...]
    a1 = jnp.dot(hn.astype(jnp.bfloat16), pw1_w[...],
                 preferred_element_type=jnp.float32) + pw1_b[...]
    a1 = _gelu(a1)
    h2 = jnp.dot(a1.astype(jnp.bfloat16), pw2_w[...],
                 preferred_element_type=jnp.float32) + pw2_b[...]
    h2 = h2 + h0                                                     # residual
    return _instance_norm_t(h2, in_g[...], in_b[...], eps_in)        # [T, rd] f32


def _residual_kernel(*refs, eps_ln, eps_in):
    """Fused residual paths: F0 encoder + N encoder + asr_res, one kernel, two lane-dense outputs:
       FN = [F0 | N]  (for encode[0])  and  res3 = [asr_res | F0 | N]  (for decode1)."""
    f0_ref, n_ref, asr_ref = refs[0], refs[1], refs[2]
    f0_w = refs[3:15]
    n_w = refs[15:27]
    arw, arb, arg, arbb = refs[27:31]
    fn_o, res3_o = refs[31], refs[32]

    f0_feat = _curve_feature(f0_ref, f0_w, eps_ln, eps_in)           # [T, rd]
    n_feat = _curve_feature(n_ref, n_w, eps_ln, eps_in)              # [T, rd]

    ar = jnp.dot(asr_ref[...], arw[...],
                 preferred_element_type=jnp.float32) + arb[...]      # [T, rd]
    ar = _instance_norm_t(ar, arg[...], arbb[...], eps_in)

    fn = jnp.concatenate([f0_feat, n_feat], axis=-1)                 # [T, 2rd]
    fn_o[...] = fn.astype(fn_o.dtype)
    res3_o[...] = jnp.concatenate([ar, fn], axis=-1).astype(res3_o.dtype)


def _pw_out_kernel(x_ref, w_ref, b_ref, o_ref):
    """to_out: 1x1 conv (Linear over channels), bf16 MXU / f32 out."""
    y = jnp.dot(x_ref[...], w_ref[...],
                preferred_element_type=jnp.float32) + b_ref[...]
    o_ref[...] = y.astype(o_ref.dtype)


# ----------------------------------------------------------------------------- wrappers

_VMEM_LIMIT = 64 * 1024 * 1024  # working set at production dims is ~20-25 MiB; ample headroom


def convnext_block(blk, segments, s, *, t_valid, activation=True, eps_ln=1e-6):
    """segments: list of (x [B,Tp,c_k] bf16, halo [B,nT,8,c_k] bf16); virtual concat = block input."""
    x0, h0 = segments[0]
    B, Tp, _ = x0.shape
    nT = int(h0.shape[1])
    tT = Tp // nT
    K = len(segments)
    seg_dims = tuple(int(w.shape[0]) for w in blk["pw1_w"])
    assert seg_dims == tuple(int(xs.shape[-1]) for xs, _ in segments)
    c_tot = sum(seg_dims)
    cout = int(blk["pw2_w"].shape[1])
    proj = "res_w" in blk
    assert proj or (K == 1 and seg_dims[0] == cout)

    # per-sample AdaLayerNorm modulation (tiny style FC done in plain JAX)
    gb = s.astype(jnp.float32) @ blk["style_w"] + blk["style_b"]     # [B, 2*c_tot]
    gamma = (1.0 + gb[:, :c_tot])[:, None, :]                        # [B, 1, c_tot]
    beta = gb[:, c_tot:][:, None, :]

    offs, o = [], 0
    for c in seg_dims:
        offs.append(o)
        o += c

    args, specs = [], []

    def add(a, spec):
        args.append(a)
        specs.append(spec)

    def wconst(shape):
        n = len(shape)
        return pl.BlockSpec(tuple(shape), lambda b, t: (0,) * n)

    for xs, _ in segments:
        c = int(xs.shape[-1])
        add(xs, pl.BlockSpec((None, tT, c), lambda b, t: (b, t, 0)))
    for _, hs in segments:
        c = int(hs.shape[-1])
        add(hs, pl.BlockSpec((None, None, 8, c), lambda b, t: (b, t, 0, 0)))
    for w in blk["dw_w"]:
        add(w, wconst(w.shape))
    for w in blk["dw_b"]:
        add(w, wconst(w.shape))
    for off, c in zip(offs, seg_dims):
        add(gamma[:, :, off:off + c], pl.BlockSpec((None, 1, c), lambda b, t: (b, 0, 0)))
    for off, c in zip(offs, seg_dims):
        add(beta[:, :, off:off + c], pl.BlockSpec((None, 1, c), lambda b, t: (b, 0, 0)))
    for w in blk["pw1_w"]:
        add(w, wconst(w.shape))
    add(blk["pw1_b"], wconst(blk["pw1_b"].shape))
    add(blk["pw2_w"], wconst(blk["pw2_w"].shape))
    add(blk["pw2_b"], wconst(blk["pw2_b"].shape))
    if proj:
        for w in blk["res_w"]:
            add(w, wconst(w.shape))
        add(blk["res_b"], wconst(blk["res_b"].shape))

    kernel = functools.partial(
        _convnext_kernel, nseg=K, proj=proj, activation=activation,
        eps_ln=eps_ln, t_valid=int(t_valid), mask=(int(t_valid) != int(Tp)))

    return pl.pallas_call(
        kernel,
        out_shape=jax.ShapeDtypeStruct((B, Tp, cout), jnp.bfloat16),
        grid=(B, nT),
        in_specs=specs,
        out_specs=pl.BlockSpec((None, tT, cout), lambda b, t: (b, t, 0)),
        compiler_params=pltpu.CompilerParams(
            dimension_semantics=("parallel", "parallel"),
            vmem_limit_bytes=_VMEM_LIMIT),
    )(*args)


_CURVE_KEYS = ("conv_w", "conv_b", "dw_w", "dw_b", "ln_g", "ln_b",
               "pw1_w", "pw1_b", "pw2_w", "pw2_b", "in_g", "in_b")


def residual_paths(rp, F0_curve, N_curve, x_asr):
    """One fused kernel: F0 enc + N enc + asr_res.  Returns (FN [B,T,2rd], res3 [B,T,3rd]) bf16."""
    B, T = F0_curve.shape
    dim_in = int(x_asr.shape[-1])
    rd = int(rp["f0"]["conv_w"].shape[1])
    f0 = F0_curve[..., None].astype(jnp.float32)                     # [B, T, 1]
    n = N_curve[..., None].astype(jnp.float32)

    args, specs = [], []

    def add(a, spec):
        args.append(a)
        specs.append(spec)

    def cfull(a):
        nd = a.ndim
        return pl.BlockSpec(a.shape, lambda b: (0,) * nd)

    add(f0, pl.BlockSpec((None, T, 1), lambda b: (b, 0, 0)))
    add(n, pl.BlockSpec((None, T, 1), lambda b: (b, 0, 0)))
    add(x_asr, pl.BlockSpec((None, T, dim_in), lambda b: (b, 0, 0)))
    for path in ("f0", "n"):
        p = rp[path]
        for name in _CURVE_KEYS:
            a = p[name]
            add(a, cfull(a))
    pa = rp["asr"]
    for name in ("w", "b", "in_g", "in_b"):
        a = pa[name]
        add(a, cfull(a))

    out_shape = (jax.ShapeDtypeStruct((B, T, 2 * rd), jnp.bfloat16),
                 jax.ShapeDtypeStruct((B, T, 3 * rd), jnp.bfloat16))
    out_specs = (pl.BlockSpec((None, T, 2 * rd), lambda b: (b, 0, 0)),
                 pl.BlockSpec((None, T, 3 * rd), lambda b: (b, 0, 0)))

    # TODO(synk): tile T with a streaming InstanceNorm for very large T / small B.
    return pl.pallas_call(
        functools.partial(_residual_kernel, eps_ln=1e-6, eps_in=1e-5),
        out_shape=out_shape,
        grid=(B,),
        in_specs=specs,
        out_specs=out_specs,
        compiler_params=pltpu.CompilerParams(
            dimension_semantics=("parallel",),
            vmem_limit_bytes=_VMEM_LIMIT),
    )(*args)


def to_out_linear(p, x, tT):
    B, Tp, cin = x.shape
    cout = int(p["w"].shape[1])
    nT = Tp // tT
    return pl.pallas_call(
        _pw_out_kernel,
        out_shape=jax.ShapeDtypeStruct((B, Tp, cout), jnp.float32),
        grid=(B, nT),
        in_specs=[pl.BlockSpec((None, tT, cin), lambda b, t: (b, t, 0)),
                  pl.BlockSpec((cin, cout), lambda b, t: (0, 0)),
                  pl.BlockSpec((1, cout), lambda b, t: (0, 0))],
        out_specs=pl.BlockSpec((None, tT, cout), lambda b, t: (b, t, 0)),
        compiler_params=pltpu.CompilerParams(
            dimension_semantics=("parallel", "parallel"),
            vmem_limit_bytes=_VMEM_LIMIT),
    )(x, p["w"], p["b"])


# ----------------------------------------------------------------------------- forward

def mel_decoder_forward(prepared, asr, F0_curve, N_curve, s, *, time_tile=256):
    """asr: [B, dim_in, T]; F0_curve, N_curve: [B, T]; s: [B, style_dim].
    Returns [B, dim_out, T] (PyTorch NCT convention)."""
    B, dim_in, T = asr.shape
    x_asr = jnp.transpose(asr, (0, 2, 1)).astype(jnp.bfloat16)       # [B, T, dim_in]

    # Residual paths at original T (InstanceNorm over time needs unpadded length).
    FN, res3 = residual_paths(prepared["residual"], F0_curve, N_curve, x_asr)

    tT = _pick_time_tile(T, time_tile)
    Tp = _round_up(T, tT)
    pad = Tp - T

    def padT(a):
        return jnp.pad(a, ((0, 0), (0, pad), (0, 0))) if pad else a

    x_asr = padT(x_asr)
    FN = padT(FN)
    res3 = padT(res3)

    asr_seg = (x_asr, _build_halo(x_asr, tT))
    fn_seg = (FN, _build_halo(FN, tT))
    res3_seg = (res3, _build_halo(res3, tT))       # reused by all 3 decode1 blocks

    # encode: first block consumes [asr | F0 | N] as two segments (concat-free)
    x = convnext_block(prepared["encode"][0], [asr_seg, fn_seg], s, t_valid=T)
    x = convnext_block(prepared["encode"][1], [(x, _build_halo(x, tT))], s, t_valid=T)

    # decode1: [x | asr_res | F0 | N] as two segments (x, res3)
    for blk in prepared["decode1"]:
        x = convnext_block(blk, [(x, _build_halo(x, tT)), res3_seg], s, t_valid=T)
    for blk in prepared["decode2"]:
        x = convnext_block(blk, [(x, _build_halo(x, tT))], s, t_valid=T)

    out = to_out_linear(prepared["to_out"], x, tT)                   # [B, Tp, dim_out] f32
    return jnp.transpose(out[:, :T, :], (0, 2, 1))                   # [B, dim_out, T]


# ----------------------------------------------------------------------------- params

def _make_keys(key):
    while True:
        key, sub = jax.random.split(key)
        yield sub


def _w(kit, shape, scale=0.02):
    return scale * jax.random.normal(next(kit), shape, jnp.float32)


def make_convnext_params(kit, cin, cout, inter, style_dim):
    p = {
        "dw_w": _w(kit, (7, cin)),
        "dw_b": jnp.zeros((cin,), jnp.float32),
        "style_w": _w(kit, (style_dim, 2 * cin)),
        "style_b": jnp.zeros((2 * cin,), jnp.float32),
        "pw1_w": _w(kit, (cin, inter)),
        "pw1_b": jnp.zeros((inter,), jnp.float32),
        "pw2_w": _w(kit, (inter, cout), scale=0.02 * 0.1),
        "pw2_b": jnp.zeros((cout,), jnp.float32),
    }
    if cin != cout:
        p["res_w"] = _w(kit, (cin, cout))
        p["res_b"] = jnp.zeros((cout,), jnp.float32)
    return p


def make_basic_params(kit, dim, inter):
    return {
        "dw_w": _w(kit, (7, dim)),
        "dw_b": jnp.zeros((dim,), jnp.float32),
        "ln_g": jnp.ones((dim,), jnp.float32),
        "ln_b": jnp.zeros((dim,), jnp.float32),
        "pw1_w": _w(kit, (dim, inter)),
        "pw1_b": jnp.zeros((inter,), jnp.float32),
        "pw2_w": _w(kit, (inter, dim), scale=0.02 * 0.1),
        "pw2_b": jnp.zeros((dim,), jnp.float32),
    }


def make_mel_decoder_params(key, dim_in, style_dim, residual_dim, dim_out,
                            intermediate_dim=1536):
    """Note: matching the reference module, all ConvNeXt blocks use intermediate_dim =
    bottleneck_dim (= 2*dim_in); the constructor's `intermediate_dim` is accepted only for
    signature parity (the PyTorch module never uses it for its blocks)."""
    del intermediate_dim
    kit = _make_keys(key)
    bneck = dim_in * 2
    rd = residual_dim

    def curve_p():
        return {
            "conv_w": _w(kit, (1, rd)),
            "conv_b": jnp.zeros((rd,), jnp.float32),
            "block": make_basic_params(kit, rd, rd * 2),
            "in_g": jnp.ones((rd,), jnp.float32),
            "in_b": jnp.zeros((rd,), jnp.float32),
        }

    return {
        "encode": [
            make_convnext_params(kit, dim_in + 2 * rd, bneck, bneck, style_dim),
            make_convnext_params(kit, bneck, bneck, bneck, style_dim),
        ],
        "decode1": [
            make_convnext_params(kit, bneck + 3 * rd, bneck, bneck, style_dim),
            make_convnext_params(kit, bneck + 3 * rd, bneck, bneck, style_dim),
            make_convnext_params(kit, bneck + 3 * rd, dim_in, bneck, style_dim),
        ],
        "decode2": [
            make_convnext_params(kit, dim_in, dim_in, bneck, style_dim),
            make_convnext_params(kit, dim_in, dim_in, bneck, style_dim),
        ],
        "F0_conv": curve_p(),
        "N_conv": curve_p(),
        "asr_res": {
            "w": _w(kit, (dim_in, rd)),
            "b": jnp.zeros((rd,), jnp.float32),
            "in_g": jnp.ones((rd,), jnp.float32),
            "in_b": jnp.zeros((rd,), jnp.float32),
        },
        "to_out": {
            "w": _w(kit, (dim_in, dim_out)),
            "b": jnp.zeros((dim_out,), jnp.float32),
        },
    }


def prepare_mel_decoder_params(raw):
    """One-time host prep: bf16 pre-cast of all MXU weights, per-segment weight splits,
    bias reshapes.  Run OUTSIDE jit so no slicing/casting happens per forward pass."""
    dim_in, rd = raw["asr_res"]["w"].shape
    dim_in, rd = int(dim_in), int(rd)
    bneck = int(raw["encode"][0]["pw2_w"].shape[1])

    def prep_block(p, seg_dims):
        c_tot = sum(seg_dims)
        assert int(p["dw_w"].shape[1]) == c_tot
        offs, o = [], 0
        for c in seg_dims:
            offs.append(o)
            o += c
        blk = {
            "dw_w": [p["dw_w"][:, o:o + c] for o, c in zip(offs, seg_dims)],
            "dw_b": [p["dw_b"][o:o + c].reshape(1, c) for o, c in zip(offs, seg_dims)],
            "style_w": p["style_w"],
            "style_b": p["style_b"],
            "pw1_w": [p["pw1_w"][o:o + c, :].astype(jnp.bfloat16)
                      for o, c in zip(offs, seg_dims)],
            "pw1_b": p["pw1_b"].reshape(1, -1),
            "pw2_w": p["pw2_w"].astype(jnp.bfloat16),
            "pw2_b": p["pw2_b"].reshape(1, -1),
        }
        if "res_w" in p:
            blk["res_w"] = [p["res_w"][o:o + c, :].astype(jnp.bfloat16)
                            for o, c in zip(offs, seg_dims)]
            blk["res_b"] = p["res_b"].reshape(1, -1)
        return blk

    def prep_curve(p):
        bl = p["block"]
        rdp = int(p["conv_w"].shape[1])
        return {
            "conv_w": p["conv_w"].reshape(1, rdp),
            "conv_b": p["conv_b"].reshape(1, rdp),
            "dw_w": bl["dw_w"],
            "dw_b": bl["dw_b"].reshape(1, rdp),
            "ln_g": bl["ln_g"].reshape(1, rdp),
            "ln_b": bl["ln_b"].reshape(1, rdp),
            "pw1_w": bl["pw1_w"].astype(jnp.bfloat16),
            "pw1_b": bl["pw1_b"].reshape(1, -1),
            "pw2_w": bl["pw2_w"].astype(jnp.bfloat16),
            "pw2_b": bl["pw2_b"].reshape(1, rdp),
            "in_g": p["in_g"].reshape(1, rdp),
            "in_b": p["in_b"].reshape(1, rdp),
        }

    return {
        "encode": [prep_block(raw["encode"][0], (dim_in, 2 * rd)),
                   prep_block(raw["encode"][1], (bneck,))],
        "decode1": [prep_block(bp, (bneck, 3 * rd)) for bp in raw["decode1"]],
        "decode2": [prep_block(bp, (dim_in,)) for bp in raw["decode2"]],
        "residual": {
            "f0": prep_curve(raw["F0_conv"]),
            "n": prep_curve(raw["N_conv"]),
            "asr": {
                "w": raw["asr_res"]["w"].astype(jnp.bfloat16),
                "b": raw["asr_res"]["b"].reshape(1, -1),
                "in_g": raw["asr_res"]["in_g"].reshape(1, -1),
                "in_b": raw["asr_res"]["in_b"].reshape(1, -1),
            },
        },
        "to_out": {"w": raw["to_out"]["w"].astype(jnp.bfloat16),
                   "b": raw["to_out"]["b"].reshape(1, -1)},
    }


# ----------------------------------------------------------------------------- main

if __name__ == "__main__":
    # Small but structurally faithful config (original: 512/128/64/512).
    DIM_IN, STYLE_DIM, RES_DIM, DIM_OUT = 64, 32, 16, 64
    B, T = 2, 40                 # T=40 with time_tile=16 exercises padding + masking (Tp=48)

    key = jax.random.PRNGKey(0)
    kp, ka, kf, kn, ks = jax.random.split(key, 5)

    raw_params = make_mel_decoder_params(kp, DIM_IN, STYLE_DIM, RES_DIM, DIM_OUT)
    prepared = prepare_mel_decoder_params(raw_params)   # one-time bf16 cast + segment splits

    asr = jax.random.normal(ka, (B, DIM_IN, T), jnp.float32)      # PyTorch NCT layout
    F0_curve = jax.random.normal(kf, (B, T), jnp.float32)
    N_curve = jax.random.normal(kn, (B, T), jnp.float32)
    s = jax.random.normal(ks, (B, STYLE_DIM), jnp.float32)

    fwd = jax.jit(functools.partial(mel_decoder_forward, time_tile=16))
    out = fwd(prepared, asr, F0_curve, N_curve, s)
    out = jax.block_until_ready(out)

    assert out.shape == (B, DIM_OUT, T), out.shape
    assert bool(jnp.all(jnp.isfinite(out)))
    print("KERNEL_OK")
</pallas_src>

<mosaic_0001>
module attributes {stable_mosaic.version = 11 : i64} {
  func.func @_residual_kernel(%arg0: i32, %arg1: memref<1x40x1xf32, #tpu.memory_space<vmem>>, %arg2: memref<1x40x1xf32, #tpu.memory_space<vmem>>, %arg3: memref<1x40x64xbf16, #tpu.memory_space<vmem>>, %arg4: memref<1x16xf32, #tpu.memory_space<vmem>>, %arg5: memref<1x16xf32, #tpu.memory_space<vmem>>, %arg6: memref<7x16xf32, #tpu.memory_space<vmem>>, %arg7: memref<1x16xf32, #tpu.memory_space<vmem>>, %arg8: memref<1x16xf32, #tpu.memory_space<vmem>>, %arg9: memref<1x16xf32, #tpu.memory_space<vmem>>, %arg10: memref<16x32xbf16, #tpu.memory_space<vmem>>, %arg11: memref<1x32xf32, #tpu.memory_space<vmem>>, %arg12: memref<32x16xbf16, #tpu.memory_space<vmem>>, %arg13: memref<1x16xf32, #tpu.memory_space<vmem>>, %arg14: memref<1x16xf32, #tpu.memory_space<vmem>>, %arg15: memref<1x16xf32, #tpu.memory_space<vmem>>, %arg16: memref<1x16xf32, #tpu.memory_space<vmem>>, %arg17: memref<1x16xf32, #tpu.memory_space<vmem>>, %arg18: memref<7x16xf32, #tpu.memory_space<vmem>>, %arg19: memref<1x16xf32, #tpu.memory_space<vmem>>, %arg20: memref<1x16xf32, #tpu.memory_space<vmem>>, %arg21: memref<1x16xf32, #tpu.memory_space<vmem>>, %arg22: memref<16x32xbf16, #tpu.memory_space<vmem>>, %arg23: memref<1x32xf32, #tpu.memory_space<vmem>>, %arg24: memref<32x16xbf16, #tpu.memory_space<vmem>>, %arg25: memref<1x16xf32, #tpu.memory_space<vmem>>, %arg26: memref<1x16xf32, #tpu.memory_space<vmem>>, %arg27: memref<1x16xf32, #tpu.memory_space<vmem>>, %arg28: memref<64x16xbf16, #tpu.memory_space<vmem>>, %arg29: memref<1x16xf32, #tpu.memory_space<vmem>>, %arg30: memref<1x16xf32, #tpu.memory_space<vmem>>, %arg31: memref<1x16xf32, #tpu.memory_space<vmem>>, %arg32: memref<1x40x32xbf16, #tpu.memory_space<vmem>>, %arg33: memref<1x40x48xbf16, #tpu.memory_space<vmem>>) attributes {dimension_semantics = [#tpu.dimension_semantics<parallel>], iteration_bounds = array<i64: 2>, scalar_prefetch = 0 : i64, scratch_operands = 0 : i64, tpu.core_type = #tpu.core_type<tc>, window_params = [{transform_indices = @transform_0, window_bounds = array<i64: 1, 40, 1>}, {transform_indices = @transform_1, window_bounds = array<i64: 1, 40, 1>}, {transform_indices = @transform_2, window_bounds = array<i64: 1, 40, 64>}, {pipeline_mode = #tpu.pipeline_mode<synchronous>, transform_indices = @transform_3, window_bounds = array<i64: 1, 16>}, {pipeline_mode = #tpu.pipeline_mode<synchronous>, transform_indices = @transform_4, window_bounds = array<i64: 1, 16>}, {pipeline_mode = #tpu.pipeline_mode<synchronous>, transform_indices = @transform_5, window_bounds = array<i64: 7, 16>}, {pipeline_mode = #tpu.pipeline_mode<synchronous>, transform_indices = @transform_6, window_bounds = array<i64: 1, 16>}, {pipeline_mode = #tpu.pipeline_mode<synchronous>, transform_indices = @transform_7, window_bounds = array<i64: 1, 16>}, {pipeline_mode = #tpu.pipeline_mode<synchronous>, transform_indices = @transform_8, window_bounds = array<i64: 1, 16>}, {pipeline_mode = #tpu.pipeline_mode<synchronous>, transform_indices = @transform_9, window_bounds = array<i64: 16, 32>}, {pipeline_mode = #tpu.pipeline_mode<synchronous>, transform_indices = @transform_10, window_bounds = array<i64: 1, 32>}, {pipeline_mode = #tpu.pipeline_mode<synchronous>, transform_indices = @transform_11, window_bounds = array<i64: 32, 16>}, {pipeline_mode = #tpu.pipeline_mode<synchronous>, transform_indices = @transform_12, window_bounds = array<i64: 1, 16>}, {pipeline_mode = #tpu.pipeline_mode<synchronous>, transform_indices = @transform_13, window_bounds = array<i64: 1, 16>}, {pipeline_mode = #tpu.pipeline_mode<synchronous>, transform_indices = @transform_14, window_bounds = array<i64: 1, 16>}, {pipeline_mode = #tpu.pipeline_mode<synchronous>, transform_indices = @transform_15, window_bounds = array<i64: 1, 16>}, {pipeline_mode = #tpu.pipeline_mode<synchronous>, transform_indices = @transform_16, window_bounds = array<i64: 1, 16>}, {pipeline_mode = #tpu.pipeline_mode<synchronous>, transform_indices = @transform_17, window_bounds = array<i64: 7, 16>}, {pipeline_mode = #tpu.pipeline_mode<synchronous>, transform_indices = @transform_18, window_bounds = array<i64: 1, 16>}, {pipeline_mode = #tpu.pipeline_mode<synchronous>, transform_indices = @transform_19, window_bounds = array<i64: 1, 16>}, {pipeline_mode = #tpu.pipeline_mode<synchronous>, transform_indices = @transform_20, window_bounds = array<i64: 1, 16>}, {pipeline_mode = #tpu.pipeline_mode<synchronous>, transform_indices = @transform_21, window_bounds = array<i64: 16, 32>}, {pipeline_mode = #tpu.pipeline_mode<synchronous>, transform_indices = @transform_22, window_bounds = array<i64: 1, 32>}, {pipeline_mode = #tpu.pipeline_mode<synchronous>, transform_indices = @transform_23, window_bounds = array<i64: 32, 16>}, {pipeline_mode = #tpu.pipeline_mode<synchronous>, transform_indices = @transform_24, window_bounds = array<i64: 1, 16>}, {pipeline_mode = #tpu.pipeline_mode<synchronous>, transform_indices = @transform_25, window_bounds = array<i64: 1, 16>}, {pipeline_mode = #tpu.pipeline_mode<synchronous>, transform_indices = @transform_26, window_bounds = array<i64: 1, 16>}, {pipeline_mode = #tpu.pipeline_mode<synchronous>, transform_indices = @transform_27, window_bounds = array<i64: 64, 16>}, {pipeline_mode = #tpu.pipeline_mode<synchronous>, transform_indices = @transform_28, window_bounds = array<i64: 1, 16>}, {pipeline_mode = #tpu.pipeline_mode<synchronous>, transform_indices = @transform_29, window_bounds = array<i64: 1, 16>}, {pipeline_mode = #tpu.pipeline_mode<synchronous>, transform_indices = @transform_30, window_bounds = array<i64: 1, 16>}, {transform_indices = @transform_31, window_bounds = array<i64: 1, 40, 32>}, {transform_indices = @transform_32, window_bounds = array<i64: 1, 40, 48>}]} {
    %c0 = arith.constant 0 : index
    %c0_0 = arith.constant 0 : index
    %c0_1 = arith.constant 0 : index
    %0 = vector.load %arg1[%c0, %c0_0, %c0_1] : memref<1x40x1xf32, #tpu.memory_space<vmem>>, vector<1x40x1xf32>
    %1 = vector.shape_cast %0 : vector<1x40x1xf32> to vector<40x1xf32>
    %c0_2 = arith.constant 0 : index
    %c0_3 = arith.constant 0 : index
    %2 = vector.load %arg4[%c0_2, %c0_3] : memref<1x16xf32, #tpu.memory_space<vmem>>, vector<1x16xf32>
    %3 = vector.broadcast %1 : vector<40x1xf32> to vector<40x16xf32>
    %4 = vector.broadcast %2 : vector<1x16xf32> to vector<40x16xf32>
    %5 = arith.mulf %3, %4 : vector<40x16xf32>
    %c0_4 = arith.constant 0 : index
    %c0_5 = arith.constant 0 : index
    %6 = vector.load %arg5[%c0_4, %c0_5] : memref<1x16xf32, #tpu.memory_space<vmem>>, vector<1x16xf32>
    %7 = vector.broadcast %6 : vector<1x16xf32> to vector<40x16xf32>
    %8 = arith.addf %5, %7 : vector<40x16xf32>
    %cst = arith.constant 0.000000e+00 : f32
    %9 = vector.broadcast %cst : f32 to vector<3x16xf32>
    %10 = tpu.concatenate %9, %8, %9 in 0 : vector<3x16xf32>, vector<40x16xf32>, vector<3x16xf32> -> vector<46x16xf32>
    %c0_6 = arith.constant 0 : index
    %c0_7 = arith.constant 0 : index
    %11 = vector.load %arg6[%c0_6, %c0_7] : memref<7x16xf32, #tpu.memory_space<vmem>>, vector<7x16xf32>
    %12 = vector.extract_strided_slice %10 {offsets = [0, 0], sizes = [40, 16], strides = [1, 1]} : vector<46x16xf32> to vector<40x16xf32>
    %13 = vector.extract_strided_slice %11 {offsets = [0, 0], sizes = [1, 16], strides = [1, 1]} : vector<7x16xf32> to vector<1x16xf32>
    %14 = vector.broadcast %13 : vector<1x16xf32> to vector<40x16xf32>
    %15 = arith.mulf %12, %14 : vector<40x16xf32>
    %16 = vector.extract_strided_slice %10 {offsets = [1, 0], sizes = [40, 16], strides = [1, 1]} : vector<46x16xf32> to vector<40x16xf32>
    %17 = vector.extract_strided_slice %11 {offsets = [1, 0], sizes = [1, 16], strides = [1, 1]} : vector<7x16xf32> to vector<1x16xf32>
    %18 = vector.broadcast %17 : vector<1x16xf32> to vector<40x16xf32>
    %19 = arith.mulf %16, %18 : vector<40x16xf32>
    %20 = arith.addf %15, %19 : vector<40x16xf32>
    %21 = vector.extract_strided_slice %10 {offsets = [2, 0], sizes = [40, 16], strides = [1, 1]} : vector<46x16xf32> to vector<40x16xf32>
    %22 = vector.extract_strided_slice %11 {offsets = [2, 0], sizes = [1, 16], strides = [1, 1]} : vector<7x16xf32> to vector<1x16xf32>
    %23 = vector.broadcast %22 : vector<1x16xf32> to vector<40x16xf32>
    %24 = arith.mulf %21, %23 : vector<40x16xf32>
    %25 = arith.addf %20, %24 : vector<40x16xf32>
    %26 = vector.extract_strided_slice %10 {offsets = [3, 0], sizes = [40, 16], strides = [1, 1]} : vector<46x16xf32> to vector<40x16xf32>
    %27 = vector.extract_strided_slice %11 {offsets = [3, 0], sizes = [1, 16], strides = [1, 1]} : vector<7x16xf32> to vector<1x16xf32>
    %28 = vector.broadcast %27 : vector<1x16xf32> to vector<40x16xf32>
    %29 = arith.mulf %26, %28 : vector<40x16xf32>
    %30 = arith.addf %25, %29 : vector<40x16xf32>
    %31 = vector.extract_strided_slice %10 {offsets = [4, 0], sizes = [40, 16], strides = [1, 1]} : vector<46x16xf32> to vector<40x16xf32>
    %32 = vector.extract_strided_slice %11 {offsets = [4, 0], sizes = [1, 16], strides = [1, 1]} : vector<7x16xf32> to vector<1x16xf32>
    %33 = vector.broadcast %32 : vector<1x16xf32> to vector<40x16xf32>
    %34 = arith.mulf %31, %33 : vector<40x16xf32>
    %35 = arith.addf %30, %34 : vector<40x16xf32>
    %36 = vector.extract_strided_slice %10 {offsets = [5, 0], sizes = [40, 16], strides = [1, 1]} : vector<46x16xf32> to vector<40x16xf32>
    %37 = vector.extract_strided_slice %11 {offsets = [5, 0], sizes = [1, 16], strides = [1, 1]} : vector<7x16xf32> to vector<1x16xf32>
    %38 = vector.broadcast %37 : vector<1x16xf32> to vector<40x16xf32>
    %39 = arith.mulf %36, %38 : vector<40x16xf32>
    %40 = arith.addf %35, %39 : vector<40x16xf32>
    %41 = vector.extract_strided_slice %10 {offsets = [6, 0], sizes = [40, 16], strides = [1, 1]} : vector<46x16xf32> to vector<40x16xf32>
    %42 = vector.extract_strided_slice %11 {offsets = [6, 0], sizes = [1, 16], strides = [1, 1]} : vector<7x16xf32> to vector<1x16xf32>
    %43 = vector.broadcast %42 : vector<1x16xf32> to vector<40x16xf32>
    %44 = arith.mulf %41, %43 : vector<40x16xf32>
    %45 = arith.addf %40, %44 : vector<40x16xf32>
    %c0_8 = arith.constant 0 : index
    %c0_9 = arith.constant 0 : index
    %46 = vector.load %arg7[%c0_8, %c0_9] : memref<1x16xf32, #tpu.memory_space<vmem>>, vector<1x16xf32>
    %47 = vector.broadcast %46 : vector<1x16xf32> to vector<40x16xf32>
    %48 = arith.addf %45, %47 : vector<40x16xf32>
    %cst_10 = arith.constant dense<0.000000e+00> : vector<40xf32>
    %49 = vector.multi_reduction <add>, %48, %cst_10 [1] : vector<40x16xf32> to vector<40xf32>
    %50 = vector.shape_cast %49 : vector<40xf32> to vector<40x1xf32>
    %cst_11 = arith.constant 1.600000e+01 : f32
    %51 = vector.broadcast %cst_11 : f32 to vector<40x1xf32>
    %52 = arith.divf %50, %51 : vector<40x1xf32>
    %53 = vector.broadcast %52 : vector<40x1xf32> to vector<40x16xf32>
    %54 = arith.subf %48, %53 : vector<40x16xf32>
    %55 = arith.mulf %54, %54 : vector<40x16xf32>
    %cst_12 = arith.constant dense<0.000000e+00> : vector<40xf32>
    %56 = vector.multi_reduction <add>, %55, %cst_12 [1] : vector<40x16xf32> to vector<40xf32>
    %57 = vector.shape_cast %56 : vector<40xf32> to vector<40x1xf32>
    %cst_13 = arith.constant 1.600000e+01 : f32
    %58 = vector.broadcast %cst_13 : f32 to vector<40x1xf32>
    %59 = arith.divf %57, %58 : vector<40x1xf32>
    %cst_14 = arith.constant 9.99999997E-7 : f32
    %60 = vector.broadcast %cst_14 : f32 to vector<40x1xf32>
    %61 = arith.addf %59, %60 : vector<40x1xf32>
    %62 = math.rsqrt %61 : vector<40x1xf32>
    %63 = vector.broadcast %62 : vector<40x1xf32> to vector<40x16xf32>
    %64 = arith.mulf %54, %63 : vector<40x16xf32>
    %c0_15 = arith.constant 0 : index
    %c0_16 = arith.constant 0 : index
    %65 = vector.load %arg8[%c0_15, %c0_16] : memref<1x16xf32, #tpu.memory_space<vmem>>, vector<1x16xf32>
    %66 = vector.broadcast %65 : vector<1x16xf32> to vector<40x16xf32>
    %67 = arith.mulf %64, %66 : vector<40x16xf32>
    %c0_17 = arith.constant 0 : index
    %c0_18 = arith.constant 0 : index
    %68 = vector.load %arg9[%c0_17, %c0_18] : memref<1x16xf32, #tpu.memory_space<vmem>>, vector<1x16xf32>
    %69 = vector.broadcast %68 : vector<1x16xf32> to vector<40x16xf32>
    %70 = arith.addf %67, %69 : vector<40x16xf32>
    %71 = arith.truncf %70 : vector<40x16xf32> to vector<40x16xbf16>
    %c0_19 = arith.constant 0 : index
    %c0_20 = arith.constant 0 : index
    %72 = vector.load %arg10[%c0_19, %c0_20] : memref<16x32xbf16, #tpu.memory_space<vmem>>, vector<16x32xbf16>
    %cst_21 = arith.constant dense<0.000000e+00> : vector<40x32xf32>
    %73 = tpu.matmul %71, %72, %cst_21 {dimension_numbers = #tpu.dot_dimension_numbers<[1], [0], [0], [1], [0, 0, 1, 1], [], []>} : vector<40x16xbf16>, vector<16x32xbf16>, vector<40x32xf32> -> vector<40x32xf32>
    %c0_22 = arith.constant 0 : index
    %c0_23 = arith.constant 0 : index
    %74 = vector.load %arg11[%c0_22, %c0_23] : memref<1x32xf32, #tpu.memory_space<vmem>>, vector<1x32xf32>
    %75 = vector.broadcast %74 : vector<1x32xf32> to vector<40x32xf32>
    %76 = arith.addf %73, %75 : vector<40x32xf32>
    %cst_24 = arith.constant 5.000000e-01 : f32
    %77 = vector.broadcast %cst_24 : f32 to vector<40x32xf32>
    %78 = arith.mulf %77, %76 : vector<40x32xf32>
    %cst_25 = arith.constant 4.471500e-02 : f32
    %79 = vector.broadcast %cst_25 : f32 to vector<40x32xf32>
    %80 = arith.mulf %79, %76 : vector<40x32xf32>
    %81 = arith.mulf %80, %76 : vector<40x32xf32>
    %82 = arith.mulf %81, %76 : vector<40x32xf32>
    %83 = arith.addf %76, %82 : vector<40x32xf32>
    %cst_26 = arith.constant 0.797884583 : f32
    %84 = vector.broadcast %cst_26 : f32 to vector<40x32xf32>
    %85 = arith.mulf %84, %83 : vector<40x32xf32>
    %86 = math.tanh %85 : vector<40x32xf32>
    %cst_27 = arith.constant 1.000000e+00 : f32
    %87 = vector.broadcast %cst_27 : f32 to vector<40x32xf32>
    %88 = arith.addf %87, %86 : vector<40x32xf32>
    %89 = arith.mulf %78, %88 : vector<40x32xf32>
    %90 = arith.truncf %89 : vector<40x32xf32> to vector<40x32xbf16>
    %c0_28 = arith.constant 0 : index
    %c0_29 = arith.constant 0 : index
    %91 = vector.load %arg12[%c0_28, %c0_29] : memref<32x16xbf16, #tpu.memory_space<vmem>>, vector<32x16xbf16>
    %cst_30 = arith.constant dense<0.000000e+00> : vector<40x16xf32>
    %92 = tpu.matmul %90, %91, %cst_30 {dimension_numbers = #tpu.dot_dimension_numbers<[1], [0], [0], [1], [0, 0, 1, 1], [], []>} : vector<40x32xbf16>, vector<32x16xbf16>, vector<40x16xf32> -> vector<40x16xf32>
    %c0_31 = arith.constant 0 : index
    %c0_32 = arith.constant 0 : index
    %93 = vector.load %arg13[%c0_31, %c0_32] : memref<1x16xf32, #tpu.memory_space<vmem>>, vector<1x16xf32>
    %94 = vector.broadcast %93 : vector<1x16xf32> to vector<40x16xf32>
    %95 = arith.addf %92, %94 : vector<40x16xf32>
    %96 = arith.addf %95, %8 : vector<40x16xf32>
    %c0_33 = arith.constant 0 : index
    %c0_34 = arith.constant 0 : index
    %97 = vector.load %arg14[%c0_33, %c0_34] : memref<1x16xf32, #tpu.memory_space<vmem>>, vector<1x16xf32>
    %c0_35 = arith.constant 0 : index
    %c0_36 = arith.constant 0 : index
    %98 = vector.load %arg15[%c0_35, %c0_36] : memref<1x16xf32, #tpu.memory_space<vmem>>, vector<1x16xf32>
    %cst_37 = arith.constant dense<0.000000e+00> : vector<16xf32>
    %99 = vector.multi_reduction <add>, %96, %cst_37 [0] : vector<40x16xf32> to vector<16xf32>
    %100 = vector.shape_cast %99 : vector<16xf32> to vector<1x16xf32>
    %cst_38 = arith.constant 4.000000e+01 : f32
    %101 = vector.broadcast %cst_38 : f32 to vector<1x16xf32>
    %102 = arith.divf %100, %101 : vector<1x16xf32>
    %103 = vector.broadcast %102 : vector<1x16xf32> to vector<40x16xf32>
    %104 = arith.subf %96, %103 : vector<40x16xf32>
    %105 = arith.mulf %104, %104 : vector<40x16xf32>
    %cst_39 = arith.constant dense<0.000000e+00> : vector<16xf32>
    %106 = vector.multi_reduction <add>, %105, %cst_39 [0] : vector<40x16xf32> to vector<16xf32>
    %107 = vector.shape_cast %106 : vector<16xf32> to vector<1x16xf32>
    %cst_40 = arith.constant 4.000000e+01 : f32
    %108 = vector.broadcast %cst_40 : f32 to vector<1x16xf32>
    %109 = arith.divf %107, %108 : vector<1x16xf32>
    %cst_41 = arith.constant 9.99999974E-6 : f32
    %110 = vector.broadcast %cst_41 : f32 to vector<1x16xf32>
    %111 = arith.addf %109, %110 : vector<1x16xf32>
    %112 = math.rsqrt %111 : vector<1x16xf32>
    %113 = vector.broadcast %112 : vector<1x16xf32> to vector<40x16xf32>
    %114 = arith.mulf %104, %113 : vector<40x16xf32>
    %115 = vector.broadcast %97 : vector<1x16xf32> to vector<40x16xf32>
    %116 = arith.mulf %114, %115 : vector<40x16xf32>
    %117 = vector.broadcast %98 : vector<1x16xf32> to vector<40x16xf32>
    %118 = arith.addf %116, %117 : vector<40x16xf32>
    %c0_42 = arith.constant 0 : index
    %c0_43 = arith.constant 0 : index
    %c0_44 = arith.constant 0 : index
    %119 = vector.load %arg2[%c0_42, %c0_43, %c0_44] : memref<1x40x1xf32, #tpu.memory_space<vmem>>, vector<1x40x1xf32>
    %120 = vector.shape_cast %119 : vector<1x40x1xf32> to vector<40x1xf32>
    %c0_45 = arith.constant 0 : index
    %c0_46 = arith.constant 0 : index
    %121 = vector.load %arg16[%c0_45, %c0_46] : memref<1x16xf32, #tpu.memory_space<vmem>>, vector<1x16xf32>
    %122 = vector.broadcast %120 : vector<40x1xf32> to vector<40x16xf32>
    %123 = vector.broadcast %121 : vector<1x16xf32> to vector<40x16xf32>
    %124 = arith.mulf %122, %123 : vector<40x16xf32>
    %c0_47 = arith.constant 0 : index
    %c0_48 = arith.constant 0 : index
    %125 = vector.load %arg17[%c0_47, %c0_48] : memref<1x16xf32, #tpu.memory_space<vmem>>, vector<1x16xf32>
    %126 = vector.broadcast %125 : vector<1x16xf32> to vector<40x16xf32>
    %127 = arith.addf %124, %126 : vector<40x16xf32>
    %cst_49 = arith.constant 0.000000e+00 : f32
    %128 = vector.broadcast %cst_49 : f32 to vector<3x16xf32>
    %129 = tpu.concatenate %128, %127, %128 in 0 : vector<3x16xf32>, vector<40x16xf32>, vector<3x16xf32> -> vector<46x16xf32>
    %c0_50 = arith.constant 0 : index
    %c0_51 = arith.constant 0 : index
    %130 = vector.load %arg18[%c0_50, %c0_51] : memref<7x16xf32, #tpu.memory_space<vmem>>, vector<7x16xf32>
    %131 = vector.extract_strided_slice %129 {offsets = [0, 0], sizes = [40, 16], strides = [1, 1]} : vector<46x16xf32> to vector<40x16xf32>
    %132 = vector.extract_strided_slice %130 {offsets = [0, 0], sizes = [1, 16], strides = [1, 1]} : vector<7x16xf32> to vector<1x16xf32>
    %133 = vector.broadcast %132 : vector<1x16xf32> to vector<40x16xf32>
    %134 = arith.mulf %131, %133 : vector<40x16xf32>
    %135 = vector.extract_strided_slice %129 {offsets = [1, 0], sizes = [40, 16], strides = [1, 1]} : vector<46x16xf32> to vector<40x16xf32>
    %136 = vector.extract_strided_slice %130 {offsets = [1, 0], sizes = [1, 16], strides = [1, 1]} : vector<7x16xf32> to vector<1x16xf32>
    %137 = vector.broadcast %136 : vector<1x16xf32> to vector<40x16xf32>
    %138 = arith.mulf %135, %137 : vector<40x16xf32>
    %139 = arith.addf %134, %138 : vector<40x16xf32>
    %140 = vector.extract_strided_slice %129 {offsets = [2, 0], sizes = [40, 16], strides = [1, 1]} : vector<46x16xf32> to vector<40x16xf32>
    %141 = vector.extract_strided_slice %130 {offsets = [2, 0], sizes = [1, 16], strides = [1, 1]} : vector<7x16xf32> to vector<1x16xf32>
    %142 = vector.broadcast %141 : vector<1x16xf32> to vector<40x16xf32>
    %143 = arith.mulf %140, %142 : vector<40x16xf32>
    %144 = arith.addf %139, %143 : vector<40x16xf32>
    %145 = vector.extract_strided_slice %129 {offsets = [3, 0], sizes = [40, 16], strides = [1, 1]} : vector<46x16xf32> to vector<40x16xf32>
    %146 = vector.extract_strided_slice %130 {offsets = [3, 0], sizes = [1, 16], strides = [1, 1]} : vector<7x16xf32> to vector<1x16xf32>
    %147 = vector.broadcast %146 : vector<1x16xf32> to vector<40x16xf32>
    %148 = arith.mulf %145, %147 : vector<40x16xf32>
    %149 = arith.addf %144, %148 : vector<40x16xf32>
    %150 = vector.extract_strided_slice %129 {offsets = [4, 0], sizes = [40, 16], strides = [1, 1]} : vector<46x16xf32> to vector<40x16xf32>
    %151 = vector.extract_strided_slice %130 {offsets = [4, 0], sizes = [1, 16], strides = [1, 1]} : vector<7x16xf32> to vector<1x16xf32>
    %152 = vector.broadcast %151 : vector<1x16xf32> to vector<40x16xf32>
    %153 = arith.mulf %150, %152 : vector<40x16xf32>
    %154 = arith.addf %149, %153 : vector<40x16xf32>
    %155 = vector.extract_strided_slice %129 {offsets = [5, 0], sizes = [40, 16], strides = [1, 1]} : vector<46x16xf32> to vector<40x16xf32>
    %156 = vector.extract_strided_slice %130 {offsets = [5, 0], sizes = [1, 16], strides = [1, 1]} : vector<7x16xf32> to vector<1x16xf32>
    %157 = vector.broadcast %156 : vector<1x16xf32> to vector<40x16xf32>
    %158 = arith.mulf %155, %157 : vector<40x16xf32>
    %159 = arith.addf %154, %158 : vector<40x16xf32>
    %160 = vector.extract_strided_slice %129 {offsets = [6, 0], sizes = [40, 16], strides = [1, 1]} : vector<46x16xf32> to vector<40x16xf32>
    %161 = vector.extract_strided_slice %130 {offsets = [6, 0], sizes = [1, 16], strides = [1, 1]} : vector<7x16xf32> to vector<1x16xf32>
    %162 = vector.broadcast %161 : vector<1x16xf32> to vector<40x16xf32>
    %163 = arith.mulf %160, %162 : vector<40x16xf32>
    %164 = arith.addf %159, %163 : vector<40x16xf32>
    %c0_52 = arith.constant 0 : index
    %c0_53 = arith.constant 0 : index
    %165 = vector.load %arg19[%c0_52, %c0_53] : memref<1x16xf32, #tpu.memory_space<vmem>>, vector<1x16xf32>
    %166 = vector.broadcast %165 : vector<1x16xf32> to vector<40x16xf32>
    %167 = arith.addf %164, %166 : vector<40x16xf32>
    %cst_54 = arith.constant dense<0.000000e+00> : vector<40xf32>
    %168 = vector.multi_reduction <add>, %167, %cst_54 [1] : vector<40x16xf32> to vector<40xf32>
    %169 = vector.shape_cast %168 : vector<40xf32> to vector<40x1xf32>
    %cst_55 = arith.constant 1.600000e+01 : f32
    %170 = vector.broadcast %cst_55 : f32 to vector<40x1xf32>
    %171 = arith.divf %169, %170 : vector<40x1xf32>
    %172 = vector.broadcast %171 : vector<40x1xf32> to vector<40x16xf32>
    %173 = arith.subf %167, %172 : vector<40x16xf32>
    %174 = arith.mulf %173, %173 : vector<40x16xf32>
    %cst_56 = arith.constant dense<0.000000e+00> : vector<40xf32>
    %175 = vector.multi_reduction <add>, %174, %cst_56 [1] : vector<40x16xf32> to vector<40xf32>
    %176 = vector.shape_cast %175 : vector<40xf32> to vector<40x1xf32>
    %cst_57 = arith.constant 1.600000e+01 : f32
    %177 = vector.broadcast %cst_57 : f32 to vector<40x1xf32>
    %178 = arith.divf %176, %177 : vector<40x1xf32>
    %cst_58 = arith.constant 9.99999997E-7 : f32
    %179 = vector.broadcast %cst_58 : f32 to vector<40x1xf32>
    %180 = arith.addf %178, %179 : vector<40x1xf32>
    %181 = math.rsqrt %180 : vector<40x1xf32>
    %182 = vector.broadcast %181 : vector<40x1xf32> to vector<40x16xf32>
    %183 = arith.mulf %173, %182 : vector<40x16xf32>
    %c0_59 = arith.constant 0 : index
    %c0_60 = arith.constant 0 : index
    %184 = vector.load %arg20[%c0_59, %c0_60] : memref<1x16xf32, #tpu.memory_space<vmem>>, vector<1x16xf32>
    %185 = vector.broadcast %184 : vector<1x16xf32> to vector<40x16xf32>
    %186 = arith.mulf %183, %185 : vector<40x16xf32>
    %c0_61 = arith.constant 0 : index
    %c0_62 = arith.constant 0 : index
    %187 = vector.load %arg21[%c0_61, %c0_62] : memref<1x16xf32, #tpu.memory_space<vmem>>, vector<1x16xf32>
    %188 = vector.broadcast %187 : vector<1x16xf32> to vector<40x16xf32>
    %189 = arith.addf %186, %188 : vector<40x16xf32>
    %190 = arith.truncf %189 : vector<40x16xf32> to vector<40x16xbf16>
    %c0_63 = arith.constant 0 : index
    %c0_64 = arith.constant 0 : index
    %191 = vector.load %arg22[%c0_63, %c0_64] : memref<16x32xbf16, #tpu.memory_space<vmem>>, vector<16x32xbf16>
    %cst_65 = arith.constant dense<0.000000e+00> : vector<40x32xf32>
    %192 = tpu.matmul %190, %191, %cst_65 {dimension_numbers = #tpu.dot_dimension_numbers<[1], [0], [0], [1], [0, 0, 1, 1], [], []>} : vector<40x16xbf16>, vector<16x32xbf16>, vector<40x32xf32> -> vector<40x32xf32>
    %c0_66 = arith.constant 0 : index
    %c0_67 = arith.constant 0 : index
    %193 = vector.load %arg23[%c0_66, %c0_67] : memref<1x32xf32, #tpu.memory_space<vmem>>, vector<1x32xf32>
    %194 = vector.broadcast %193 : vector<1x32xf32> to vector<40x32xf32>
    %195 = arith.addf %192, %194 : vector<40x32xf32>
    %cst_68 = arith.constant 5.000000e-01 : f32
    %196 = vector.broadcast %cst_68 : f32 to vector<40x32xf32>
    %197 = arith.mulf %196, %195 : vector<40x32xf32>
    %cst_69 = arith.constant 4.471500e-02 : f32
    %198 = vector.broadcast %cst_69 : f32 to vector<40x32xf32>
    %199 = arith.mulf %198, %195 : vector<40x32xf32>
    %200 = arith.mulf %199, %195 : vector<40x32xf32>
    %201 = arith.mulf %200, %195 : vector<40x32xf32>
    %202 = arith.addf %195, %201 : vector<40x32xf32>
    %cst_70 = arith.constant 0.797884583 : f32
    %203 = vector.broadcast %cst_70 : f32 to vector<40x32xf32>
    %204 = arith.mulf %203, %202 : vector<40x32xf32>
    %205 = math.tanh %204 : vector<40x32xf32>
    %cst_71 = arith.constant 1.000000e+00 : f32
    %206 = vector.broadcast %cst_71 : f32 to vector<40x32xf32>
    %207 = arith.addf %206, %205 : vector<40x32xf32>
    %208 = arith.mulf %197, %207 : vector<40x32xf32>
    %209 = arith.truncf %208 : vector<40x32xf32> to vector<40x32xbf16>
    %c0_72 = arith.constant 0 : index
    %c0_73 = arith.constant 0 : index
    %210 = vector.load %arg24[%c0_72, %c0_73] : memref<32x16xbf16, #tpu.memory_space<vmem>>, vector<32x16xbf16>
    %cst_74 = arith.constant dense<0.000000e+00> : vector<40x16xf32>
    %211 = tpu.matmul %209, %210, %cst_74 {dimension_numbers = #tpu.dot_dimension_numbers<[1], [0], [0], [1], [0, 0, 1, 1], [], []>} : vector<40x32xbf16>, vector<32x16xbf16>, vector<40x16xf32> -> vector<40x16xf32>
    %c0_75 = arith.constant 0 : index
    %c0_76 = arith.constant 0 : index
    %212 = vector.load %arg25[%c0_75, %c0_76] : memref<1x16xf32, #tpu.memory_space<vmem>>, vector<1x16xf32>
    %213 = vector.broadcast %212 : vector<1x16xf32> to vector<40x16xf32>
    %214 = arith.addf %211, %213 : vector<40x16xf32>
    %215 = arith.addf %214, %127 : vector<40x16xf32>
    %c0_77 = arith.constant 0 : index
    %c0_78 = arith.constant 0 : index
    %216 = vector.load %arg26[%c0_77, %c0_78] : memref<1x16xf32, #tpu.memory_space<vmem>>, vector<1x16xf32>
    %c0_79 = arith.constant 0 : index
    %c0_80 = arith.constant 0 : index
    %217 = vector.load %arg27[%c0_79, %c0_80] : memref<1x16xf32, #tpu.memory_space<vmem>>, vector<1x16xf32>
    %cst_81 = arith.constant dense<0.000000e+00> : vector<16xf32>
    %218 = vector.multi_reduction <add>, %215, %cst_81 [0] : vector<40x16xf32> to vector<16xf32>
    %219 = vector.shape_cast %218 : vector<16xf32> to vector<1x16xf32>
    %cst_82 = arith.constant 4.000000e+01 : f32
    %220 = vector.broadcast %cst_82 : f32 to vector<1x16xf32>
    %221 = arith.divf %219, %220 : vector<1x16xf32>
    %222 = vector.broadcast %221 : vector<1x16xf32> to vector<40x16xf32>
    %223 = arith.subf %215, %222 : vector<40x16xf32>
    %224 = arith.mulf %223, %223 : vector<40x16xf32>
    %cst_83 = arith.constant dense<0.000000e+00> : vector<16xf32>
    %225 = vector.multi_reduction <add>, %224, %cst_83 [0] : vector<40x16xf32> to vector<16xf32>
    %226 = vector.shape_cast %225 : vector<16xf32> to vector<1x16xf32>
    %cst_84 = arith.constant 4.000000e+01 : f32
    %227 = vector.broadcast %cst_84 : f32 to vector<1x16xf32>
    %228 = arith.divf %226, %227 : vector<1x16xf32>
    %cst_85 = arith.constant 9.99999974E-6 : f32
    %229 = vector.broadcast %cst_85 : f32 to vector<1x16xf32>
    %230 = arith.addf %228, %229 : vector<1x16xf32>
    %231 = math.rsqrt %230 : vector<1x16xf32>
    %232 = vector.broadcast %231 : vector<1x16xf32> to vector<40x16xf32>
    %233 = arith.mulf %223, %232 : vector<40x16xf32>
    %234 = vector.broadcast %216 : vector<1x16xf32> to vector<40x16xf32>
    %235 = arith.mulf %233, %234 : vector<40x16xf32>
    %236 = vector.broadcast %217 : vector<1x16xf32> to vector<40x16xf32>
    %237 = arith.addf %235, %236 : vector<40x16xf32>
    %c0_86 = arith.constant 0 : index
    %c0_87 = arith.constant 0 : index
    %c0_88 = arith.constant 0 : index
    %238 = vector.load %arg3[%c0_86, %c0_87, %c0_88] : memref<1x40x64xbf16, #tpu.memory_space<vmem>>, vector<1x40x64xbf16>
    %239 = vector.shape_cast %238 : vector<1x40x64xbf16> to vector<40x64xbf16>
    %c0_89 = arith.constant 0 : index
    %c0_90 = arith.constant 0 : index
    %240 = vector.load %arg28[%c0_89, %c0_90] : memref<64x16xbf16, #tpu.memory_space<vmem>>, vector<64x16xbf16>
    %cst_91 = arith.constant dense<0.000000e+00> : vector<40x16xf32>
    %241 = tpu.matmul %239, %240, %cst_91 {dimension_numbers = #tpu.dot_dimension_numbers<[1], [0], [0], [1], [0, 0, 1, 1], [], []>} : vector<40x64xbf16>, vector<64x16xbf16>, vector<40x16xf32> -> vector<40x16xf32>
    %c0_92 = arith.constant 0 : index
    %c0_93 = arith.constant 0 : index
    %242 = vector.load %arg29[%c0_92, %c0_93] : memref<1x16xf32, #tpu.memory_space<vmem>>, vector<1x16xf32>
    %243 = vector.broadcast %242 : vector<1x16xf32> to vector<40x16xf32>
    %244 = arith.addf %241, %243 : vector<40x16xf32>
    %c0_94 = arith.constant 0 : index
    %c0_95 = arith.constant 0 : index
    %245 = vector.load %arg30[%c0_94, %c0_95] : memref<1x16xf32, #tpu.memory_space<vmem>>, vector<1x16xf32>
    %c0_96 = arith.constant 0 : index
    %c0_97 = arith.constant 0 : index
    %246 = vector.load %arg31[%c0_96, %c0_97] : memref<1x16xf32, #tpu.memory_space<vmem>>, vector<1x16xf32>
    %cst_98 = arith.constant dense<0.000000e+00> : vector<16xf32>
    %247 = vector.multi_reduction <add>, %244, %cst_98 [0] : vector<40x16xf32> to vector<16xf32>
    %248 = vector.shape_cast %247 : vector<16xf32> to vector<1x16xf32>
    %cst_99 = arith.constant 4.000000e+01 : f32
    %249 = vector.broadcast %cst_99 : f32 to vector<1x16xf32>
    %250 = arith.divf %248, %249 : vector<1x16xf32>
    %251 = vector.broadcast %250 : vector<1x16xf32> to vector<40x16xf32>
    %252 = arith.subf %244, %251 : vector<40x16xf32>
    %253 = arith.mulf %252, %252 : vector<40x16xf32>
    %cst_100 = arith.constant dense<0.000000e+00> : vector<16xf32>
    %254 = vector.multi_reduction <add>, %253, %cst_100 [0] : vector<40x16xf32> to vector<16xf32>
    %255 = vector.shape_cast %254 : vector<16xf32> to vector<1x16xf32>
    %cst_101 = arith.constant 4.000000e+01 : f32
    %256 = vector.broadcast %cst_101 : f32 to vector<1x16xf32>
    %257 = arith.divf %255, %256 : vector<1x16xf32>
    %cst_102 = arith.constant 9.99999974E-6 : f32
    %258 = vector.broadcast %cst_102 : f32 to vector<1x16xf32>
    %259 = arith.addf %257, %258 : vector<1x16xf32>
    %260 = math.rsqrt %259 : vector<1x16xf32>
    %261 = vector.broadcast %260 : vector<1x16xf32> to vector<40x16xf32>
    %262 = arith.mulf %252, %261 : vector<40x16xf32>
    %263 = vector.broadcast %245 : vector<1x16xf32> to vector<40x16xf32>
    %264 = arith.mulf %262, %263 : vector<40x16xf32>
    %265 = vector.broadcast %246 : vector<1x16xf32> to vector<40x16xf32>
    %266 = arith.addf %264, %265 : vector<40x16xf32>
    %267 = tpu.concatenate %118, %237 in 1 : vector<40x16xf32>, vector<40x16xf32> -> vector<40x32xf32>
    %268 = arith.truncf %267 : vector<40x32xf32> to vector<40x32xbf16>
    %c0_103 = arith.constant 0 : index
    %c0_104 = arith.constant 0 : index
    %c0_105 = arith.constant 0 : index
    %269 = vector.load %arg32[%c0_103, %c0_104, %c0_105] : memref<1x40x32xbf16, #tpu.memory_space<vmem>>, vector<1x40x32xbf16>
    %270 = vector.shape_cast %269 : vector<1x40x32xbf16> to vector<40x32xbf16>
    %271 = vector.shape_cast %268 : vector<40x32xbf16> to vector<1x40x32xbf16>
    tpu.vector_store %arg32[%c0_103, %c0_104, %c0_105], %271 {strides = array<i32>} : memref<1x40x32xbf16, #tpu.memory_space<vmem>>, vector<1x40x32xbf16>,
    %272 = tpu.concatenate %266, %267 in 1 : vector<40x16xf32>, vector<40x32xf32> -> vector<40x48xf32>
    %273 = arith.truncf %272 : vector<40x48xf32> to vector<40x48xbf16>
    %c0_106 = arith.constant 0 : index
    %c0_107 = arith.constant 0 : index
    %c0_108 = arith.constant 0 : index
    %274 = vector.load %arg33[%c0_106, %c0_107, %c0_108] : memref<1x40x48xbf16, #tpu.memory_space<vmem>>, vector<1x40x48xbf16>
    %275 = vector.shape_cast %274 : vector<1x40x48xbf16> to vector<40x48xbf16>
    %276 = vector.shape_cast %273 : vector<40x48xbf16> to vector<1x40x48xbf16>
    tpu.vector_store %arg33[%c0_106, %c0_107, %c0_108], %276 {strides = array<i32>} : memref<1x40x48xbf16, #tpu.memory_space<vmem>>, vector<1x40x48xbf16>,
    return
  }
  func.func @transform_0(%arg0: i32) -> (i32, i32, i32) {
    %c0_i32 = arith.constant 0 : i32
    %c0_i32_0 = arith.constant 0 : i32
    %c0_i32_1 = arith.constant 0 : i32
    return %arg0, %c0_i32, %c0_i32_0 : i32, i32, i32
  }
  func.func @transform_1(%arg0: i32) -> (i32, i32, i32) {
    %c0_i32 = arith.constant 0 : i32
    %c0_i32_0 = arith.constant 0 : i32
    %c0_i32_1 = arith.constant 0 : i32
    return %arg0, %c0_i32, %c0_i32_0 : i32, i32, i32
  }
  func.func @transform_2(%arg0: i32) -> (i32, i32, i32) {
    %c0_i32 = arith.constant 0 : i32
    %c0_i32_0 = arith.constant 0 : i32
    %c0_i32_1 = arith.constant 0 : i32
    return %arg0, %c0_i32, %c0_i32_0 : i32, i32, i32
  }
  func.func @transform_3(%arg0: i32) -> (i32, i32) {
    %c0_i32 = arith.constant 0 : i32
    %c0_i32_0 = arith.constant 0 : i32
    %c0_i32_1 = arith.constant 0 : i32
    return %c0_i32, %c0_i32_0 : i32, i32
  }
  func.func @transform_4(%arg0: i32) -> (i32, i32) {
    %c0_i32 = arith.constant 0 : i32
    %c0_i32_0 = arith.constant 0 : i32
    %c0_i32_1 = arith.constant 0 : i32
    return %c0_i32, %c0_i32_0 : i32, i32
  }
  func.func @transform_5(%arg0: i32) -> (i32, i32) {
    %c0_i32 = arith.constant 0 : i32
    %c0_i32_0 = arith.constant 0 : i32
    %c0_i32_1 = arith.constant 0 : i32
    return %c0_i32, %c0_i32_0 : i32, i32
  }
  func.func @transform_6(%arg0: i32) -> (i32, i32) {
    %c0_i32 = arith.constant 0 : i32
    %c0_i32_0 = arith.constant 0 : i32
    %c0_i32_1 = arith.constant 0 : i32
    return %c0_i32, %c0_i32_0 : i32, i32
  }
  func.func @transform_7(%arg0: i32) -> (i32, i32) {
    %c0_i32 = arith.constant 0 : i32
    %c0_i32_0 = arith.constant 0 : i32
    %c0_i32_1 = arith.constant 0 : i32
    return %c0_i32, %c0_i32_0 : i32, i32
  }
  func.func @transform_8(%arg0: i32) -> (i32, i32) {
    %c0_i32 = arith.constant 0 : i32
    %c0_i32_0 = arith.constant 0 : i32
    %c0_i32_1 = arith.constant 0 : i32
    return %c0_i32, %c0_i32_0 : i32, i32
  }
  func.func @transform_9(%arg0: i32) -> (i32, i32) {
    %c0_i32 = arith.constant 0 : i32
    %c0_i32_0 = arith.constant 0 : i32
    %c0_i32_1 = arith.constant 0 : i32
    return %c0_i32, %c0_i32_0 : i32, i32
  }
  func.func @transform_10(%arg0: i32) -> (i32, i32) {
    %c0_i32 = arith.constant 0 : i32
    %c0_i32_0 = arith.constant 0 : i32
    %c0_i32_1 = arith.constant 0 : i32
    return %c0_i32, %c0_i32_0 : i32, i32
  }
  func.func @transform_11(%arg0: i32) -> (i32, i32) {
    %c0_i32 = arith.constant 0 : i32
    %c0_i32_0 = arith.constant 0 : i32
    %c0_i32_1 = arith.constant 0 : i32
    return %c0_i32, %c0_i32_0 : i32, i32
  }
  func.func @transform_12(%arg0: i32) -> (i32, i32) {
    %c0_i32 = arith.constant 0 : i32
    %c0_i32_0 = arith.constant 0 : i32
    %c0_i32_1 = arith.constant 0 : i32
    return %c0_i32, %c0_i32_0 : i32, i32
  }
  func.func @transform_13(%arg0: i32) -> (i32, i32) {
    %c0_i32 = arith.constant 0 : i32
    %c0_i32_0 = arith.constant 0 : i32
    %c0_i32_1 = arith.constant 0 : i32
    return %c0_i32, %c0_i32_0 : i32, i32
  }
  func.func @transform_14(%arg0: i32) -> (i32, i32) {
    %c0_i32 = arith.constant 0 : i32
    %c0_i32_0 = arith.constant 0 : i32
    %c0_i32_1 = arith.constant 0 : i32
    return %c0_i32, %c0_i32_0 : i32, i32
  }
  func.func @transform_15(%arg0: i32) -> (i32, i32) {
    %c0_i32 = arith.constant 0 : i32
    %c0_i32_0 = arith.constant 0 : i32
    %c0_i32_1 = arith.constant 0 : i32
    return %c0_i32, %c0_i32_0 : i32, i32
  }
  func.func @transform_16(%arg0: i32) -> (i32, i32) {
    %c0_i32 = arith.constant 0 : i32
    %c0_i32_0 = arith.constant 0 : i32
    %c0_i32_1 = arith.constant 0 : i32
    return %c0_i32, %c0_i32_0 : i32, i32
  }
  func.func @transform_17(%arg0: i32) -> (i32, i32) {
    %c0_i32 = arith.constant 0 : i32
    %c0_i32_0 = arith.constant 0 : i32
    %c0_i32_1 = arith.constant 0 : i32
    return %c0_i32, %c0_i32_0 : i32, i32
  }
  func.func @transform_18(%arg0: i32) -> (i32, i32) {
    %c0_i32 = arith.constant 0 : i32
    %c0_i32_0 = arith.constant 0 : i32
    %c0_i32_1 = arith.constant 0 : i32
    return %c0_i32, %c0_i32_0 : i32, i32
  }
  func.func @transform_19(%arg0: i32) -> (i32, i32) {
    %c0_i32 = arith.constant 0 : i32
    %c0_i32_0 = arith.constant 0 : i32
    %c0_i32_1 = arith.constant 0 : i32
    return %c0_i32, %c0_i32_0 : i32, i32
  }
  func.func @transform_20(%arg0: i32) -> (i32, i32) {
    %c0_i32 = arith.constant 0 : i32
    %c0_i32_0 = arith.constant 0 : i32
    %c0_i32_1 = arith.constant 0 : i32
    return %c0_i32, %c0_i32_0 : i32, i32
  }
  func.func @transform_21(%arg0: i32) -> (i32, i32) {
    %c0_i32 = arith.constant 0 : i32
    %c0_i32_0 = arith.constant 0 : i32
    %c0_i32_1 = arith.constant 0 : i32
    return %c0_i32, %c0_i32_0 : i32, i32
  }
  func.func @transform_22(%arg0: i32) -> (i32, i32) {
    %c0_i32 = arith.constant 0 : i32
    %c0_i32_0 = arith.constant 0 : i32
    %c0_i32_1 = arith.constant 0 : i32
    return %c0_i32, %c0_i32_0 : i32, i32
  }
  func.func @transform_23(%arg0: i32) -> (i32, i32) {
    %c0_i32 = arith.constant 0 : i32
    %c0_i32_0 = arith.constant 0 : i32
    %c0_i32_1 = arith.constant 0 : i32
    return %c0_i32, %c0_i32_0 : i32, i32
  }
  func.func @transform_24(%arg0: i32) -> (i32, i32) {
    %c0_i32 = arith.constant 0 : i32
    %c0_i32_0 = arith.constant 0 : i32
    %c0_i32_1 = arith.constant 0 : i32
    return %c0_i32, %c0_i32_0 : i32, i32
  }
  func.func @transform_25(%arg0: i32) -> (i32, i32) {
    %c0_i32 = arith.constant 0 : i32
    %c0_i32_0 = arith.constant 0 : i32
    %c0_i32_1 = arith.constant 0 : i32
    return %c0_i32, %c0_i32_0 : i32, i32
  }
  func.func @transform_26(%arg0: i32) -> (i32, i32) {
    %c0_i32 = arith.constant 0 : i32
    %c0_i32_0 = arith.constant 0 : i32
    %c0_i32_1 = arith.constant 0 : i32
    return %c0_i32, %c0_i32_0 : i32, i32
  }
  func.func @transform_27(%arg0: i32) -> (i32, i32) {
    %c0_i32 = arith.constant 0 : i32
    %c0_i32_0 = arith.constant 0 : i32
    %c0_i32_1 = arith.constant 0 : i32
    return %c0_i32, %c0_i32_0 : i32, i32
  }
  func.func @transform_28(%arg0: i32) -> (i32, i32) {
    %c0_i32 = arith.constant 0 : i32
    %c0_i32_0 = arith.constant 0 : i32
    %c0_i32_1 = arith.constant 0 : i32
    return %c0_i32, %c0_i32_0 : i32, i32
  }
  func.func @transform_29(%arg0: i32) -> (i32, i32) {
    %c0_i32 = arith.constant 0 : i32
    %c0_i32_0 = arith.constant 0 : i32
    %c0_i32_1 = arith.constant 0 : i32
    return %c0_i32, %c0_i32_0 : i32, i32
  }
  func.func @transform_30(%arg0: i32) -> (i32, i32) {
    %c0_i32 = arith.constant 0 : i32
    %c0_i32_0 = arith.constant 0 : i32
    %c0_i32_1 = arith.constant 0 : i32
    return %c0_i32, %c0_i32_0 : i32, i32
  }
  func.func @transform_31(%arg0: i32) -> (i32, i32, i32) {
    %c0_i32 = arith.constant 0 : i32
    %c0_i32_0 = arith.constant 0 : i32
    %c0_i32_1 = arith.constant 0 : i32
    return %arg0, %c0_i32, %c0_i32_0 : i32, i32, i32
  }
  func.func @transform_32(%arg0: i32) -> (i32, i32, i32) {
    %c0_i32 = arith.constant 0 : i32
    %c0_i32_0 = arith.constant 0 : i32
    %c0_i32_1 = arith.constant 0 : i32
    return %arg0, %c0_i32, %c0_i32_0 : i32, i32, i32
  }
}

module attributes {stable_mosaic.version = 11 : i64} {
  func.func @_convnext_kernel(%arg0: i32, %arg1: i32, %arg2: memref<1x16x64xbf16, #tpu.memory_space<vmem>>, %arg3: memref<1x16x32xbf16, #tpu.memory_space<vmem>>, %arg4: memref<1x1x8x64xbf16, #tpu.memory_space<vmem>>, %arg5: memref<1x1x8x32xbf16, #tpu.memory_space<vmem>>, %arg6: memref<7x64xf32, #tpu.memory_space<vmem>>, %arg7: memref<7x32xf32, #tpu.memory_space<vmem>>, %arg8: memref<1x64xf32, #tpu.memory_space<vmem>>, %arg9: memref<1x32xf32, #tpu.memory_space<vmem>>, %arg10: memref<1x1x64xf32, #tpu.memory_space<vmem>>, %arg11: memref<1x1x32xf32, #tpu.memory_space<vmem>>, %arg12: memref<1x1x64xf32, #tpu.memory_space<vmem>>, %arg13: memref<1x1x32xf32, #tpu.memory_space<vmem>>, %arg14: memref<64x128xbf16, #tpu.memory_space<vmem>>, %arg15: memref<32x128xbf16, #tpu.memory_space<vmem>>, %arg16: memref<1x128xf32, #tpu.memory_space<vmem>>, %arg17: memref<128x128xbf16, #tpu.memory_space<vmem>>, %arg18: memref<1x128xf32, #tpu.memory_space<vmem>>, %arg19: memref<64x128xbf16, #tpu.memory_space<vmem>>, %arg20: memref<32x128xbf16, #tpu.memory_space<vmem>>, %arg21: memref<1x128xf32, #tpu.memory_space<vmem>>, %arg22: memref<1x16x128xbf16, #tpu.memory_space<vmem>>) attributes {dimension_semantics = [#tpu.dimension_semantics<parallel>, #tpu.dimension_semantics<parallel>], iteration_bounds = array<i64: 2, 3>, scalar_prefetch = 0 : i64, scratch_operands = 0 : i64, tpu.core_type = #tpu.core_type<tc>, window_params = [{transform_indices = @transform_0, window_bounds = array<i64: 1, 16, 64>}, {transform_indices = @transform_1, window_bounds = array<i64: 1, 16, 32>}, {transform_indices = @transform_2, window_bounds = array<i64: 1, 1, 8, 64>}, {transform_indices = @transform_3, window_bounds = array<i64: 1, 1, 8, 32>}, {pipeline_mode = #tpu.pipeline_mode<synchronous>, transform_indices = @transform_4, window_bounds = array<i64: 7, 64>}, {pipeline_mode = #tpu.pipeline_mode<synchronous>, transform_indices = @transform_5, window_bounds = array<i64: 7, 32>}, {pipeline_mode = #tpu.pipeline_mode<synchronous>, transform_indices = @transform_6, window_bounds = array<i64: 1, 64>}, {pipeline_mode = #tpu.pipeline_mode<synchronous>, transform_indices = @transform_7, window_bounds = array<i64: 1, 32>}, {transform_indices = @transform_8, window_bounds = array<i64: 1, 1, 64>}, {transform_indices = @transform_9, window_bounds = array<i64: 1, 1, 32>}, {transform_indices = @transform_10, window_bounds = array<i64: 1, 1, 64>}, {transform_indices = @transform_11, window_bounds = array<i64: 1, 1, 32>}, {pipeline_mode = #tpu.pipeline_mode<synchronous>, transform_indices = @transform_12, window_bounds = array<i64: 64, 128>}, {pipeline_mode = #tpu.pipeline_mode<synchronous>, transform_indices = @transform_13, window_bounds = array<i64: 32, 128>}, {pipeline_mode = #tpu.pipeline_mode<synchronous>, transform_indices = @transform_14, window_bounds = array<i64: 1, 128>}, {pipeline_mode = #tpu.pipeline_mode<synchronous>, transform_indices = @transform_15, window_bounds = array<i64: 128, 128>}, {pipeline_mode = #tpu.pipeline_mode<synchronous>, transform_indices = @transform_16, window_bounds = array<i64: 1, 128>}, {pipeline_mode = #tpu.pipeline_mode<synchronous>, transform_indices = @transform_17, window_bounds = array<i64: 64, 128>}, {pipeline_mode = #tpu.pipeline_mode<synchronous>, transform_indices = @transform_18, window_bounds = array<i64: 32, 128>}, {pipeline_mode = #tpu.pipeline_mode<synchronous>, transform_indices = @transform_19, window_bounds = array<i64: 1, 128>}, {transform_indices = @transform_20, window_bounds = array<i64: 1, 16, 128>}]} {
    %c0 = arith.constant 0 : index
    %c0_0 = arith.constant 0 : index
    %c0_1 = arith.constant 0 : index
    %0 = vector.load %arg2[%c0, %c0_0, %c0_1] : memref<1x16x64xbf16, #tpu.memory_space<vmem>>, vector<1x16x64xbf16>
    %1 = vector.shape_cast %0 : vector<1x16x64xbf16> to vector<16x64xbf16>
    %2 = arith.extf %1 : vector<16x64xbf16> to vector<16x64xf32>
    %c0_2 = arith.constant 0 : index
    %c0_3 = arith.constant 0 : index
    %c0_4 = arith.constant 0 : index
    %c0_5 = arith.constant 0 : index
    %3 = vector.load %arg4[%c0_2, %c0_3, %c0_4, %c0_5] : memref<1x1x8x64xbf16, #tpu.memory_space<vmem>>, vector<1x1x8x64xbf16>
    %4 = vector.shape_cast %3 : vector<1x1x8x64xbf16> to vector<8x64xbf16>
    %5 = arith.extf %4 : vector<8x64xbf16> to vector<8x64xf32>
    %6 = vector.extract_strided_slice %5 {offsets = [0, 0], sizes = [3, 64], strides = [1, 1]} : vector<8x64xf32> to vector<3x64xf32>
    %7 = vector.extract_strided_slice %5 {offsets = [3, 0], sizes = [3, 64], strides = [1, 1]} : vector<8x64xf32> to vector<3x64xf32>
    %8 = tpu.concatenate %6, %2, %7 in 0 : vector<3x64xf32>, vector<16x64xf32>, vector<3x64xf32> -> vector<22x64xf32>
    %c0_6 = arith.constant 0 : index
    %c0_7 = arith.constant 0 : index
    %9 = vector.load %arg6[%c0_6, %c0_7] : memref<7x64xf32, #tpu.memory_space<vmem>>, vector<7x64xf32>
    %10 = vector.extract_strided_slice %8 {offsets = [0, 0], sizes = [16, 64], strides = [1, 1]} : vector<22x64xf32> to vector<16x64xf32>
    %11 = vector.extract_strided_slice %9 {offsets = [0, 0], sizes = [1, 64], strides = [1, 1]} : vector<7x64xf32> to vector<1x64xf32>
    %12 = vector.broadcast %11 : vector<1x64xf32> to vector<16x64xf32>
    %13 = arith.mulf %10, %12 : vector<16x64xf32>
    %14 = vector.extract_strided_slice %8 {offsets = [1, 0], sizes = [16, 64], strides = [1, 1]} : vector<22x64xf32> to vector<16x64xf32>
    %15 = vector.extract_strided_slice %9 {offsets = [1, 0], sizes = [1, 64], strides = [1, 1]} : vector<7x64xf32> to vector<1x64xf32>
    %16 = vector.broadcast %15 : vector<1x64xf32> to vector<16x64xf32>
    %17 = arith.mulf %14, %16 : vector<16x64xf32>
    %18 = arith.addf %13, %17 : vector<16x64xf32>
    %19 = vector.extract_strided_slice %8 {offsets = [2, 0], sizes = [16, 64], strides = [1, 1]} : vector<22x64xf32> to vector<16x64xf32>
    %20 = vector.extract_strided_slice %9 {offsets = [2, 0], sizes = [1, 64], strides = [1, 1]} : vector<7x64xf32> to vector<1x64xf32>
    %21 = vector.broadcast %20 : vector<1x64xf32> to vector<16x64xf32>
    %22 = arith.mulf %19, %21 : vector<16x64xf32>
    %23 = arith.addf %18, %22 : vector<16x64xf32>
    %24 = vector.extract_strided_slice %8 {offsets = [3, 0], sizes = [16, 64], strides = [1, 1]} : vector<22x64xf32> to vector<16x64xf32>
    %25 = vector.extract_strided_slice %9 {offsets = [3, 0], sizes = [1, 64], strides = [1, 1]} : vector<7x64xf32> to vector<1x64xf32>
    %26 = vector.broadcast %25 : vector<1x64xf32> to vector<16x64xf32>
    %27 = arith.mulf %24, %26 : vector<16x64xf32>
    %28 = arith.addf %23, %27 : vector<16x64xf32>
    %29 = vector.extract_strided_slice %8 {offsets = [4, 0], sizes = [16, 64], strides = [1, 1]} : vector<22x64xf32> to vector<16x64xf32>
    %30 = vector.extract_strided_slice %9 {offsets = [4, 0], sizes = [1, 64], strides = [1, 1]} : vector<7x64xf32> to vector<1x64xf32>
    %31 = vector.broadcast %30 : vector<1x64xf32> to vector<16x64xf32>
    %32 = arith.mulf %29, %31 : vector<16x64xf32>
    %33 = arith.addf %28, %32 : vector<16x64xf32>
    %34 = vector.extract_strided_slice %8 {offsets = [5, 0], sizes = [16, 64], strides = [1, 1]} : vector<22x64xf32> to vector<16x64xf32>
    %35 = vector.extract_strided_slice %9 {offsets = [5, 0], sizes = [1, 64], strides = [1, 1]} : vector<7x64xf32> to vector<1x64xf32>
    %36 = vector.broadcast %35 : vector<1x64xf32> to vector<16x64xf32>
    %37 = arith.mulf %34, %36 : vector<16x64xf32>
    %38 = arith.addf %33, %37 : vector<16x64xf32>
    %39 = vector.extract_strided_slice %8 {offsets = [6, 0], sizes = [16, 64], strides = [1, 1]} : vector<22x64xf32> to vector<16x64xf32>
    %40 = vector.extract_strided_slice %9 {offsets = [6, 0], sizes = [1, 64], strides = [1, 1]} : vector<7x64xf32> to vector<1x64xf32>
    %41 = vector.broadcast %40 : vector<1x64xf32> to vector<16x64xf32>
    %42 = arith.mulf %39, %41 : vector<16x64xf32>
    %43 = arith.addf %38, %42 : vector<16x64xf32>
    %c0_8 = arith.constant 0 : index
    %c0_9 = arith.constant 0 : index
    %44 = vector.load %arg8[%c0_8, %c0_9] : memref<1x64xf32, #tpu.memory_space<vmem>>, vector<1x64xf32>
    %45 = vector.broadcast %44 : vector<1x64xf32> to vector<16x64xf32>
    %46 = arith.addf %43, %45 : vector<16x64xf32>
    %cst = arith.constant dense<0.000000e+00> : vector<16xf32>
    %47 = vector.multi_reduction <add>, %46, %cst [1] : vector<16x64xf32> to vector<16xf32>
    %48 = vector.shape_cast %47 : vector<16xf32> to vector<16x1xf32>
    %c0_10 = arith.constant 0 : index
    %c0_11 = arith.constant 0 : index
    %c0_12 = arith.constant 0 : index
    %49 = vector.load %arg3[%c0_10, %c0_11, %c0_12] : memref<1x16x32xbf16, #tpu.memory_space<vmem>>, vector<1x16x32xbf16>
    %50 = vector.shape_cast %49 : vector<1x16x32xbf16> to vector<16x32xbf16>
    %51 = arith.extf %50 : vector<16x32xbf16> to vector<16x32xf32>
    %c0_13 = arith.constant 0 : index
    %c0_14 = arith.constant 0 : index
    %c0_15 = arith.constant 0 : index
    %c0_16 = arith.constant 0 : index
    %52 = vector.load %arg5[%c0_13, %c0_14, %c0_15, %c0_16] : memref<1x1x8x32xbf16, #tpu.memory_space<vmem>>, vector<1x1x8x32xbf16>
    %53 = vector.shape_cast %52 : vector<1x1x8x32xbf16> to vector<8x32xbf16>
    %54 = arith.extf %53 : vector<8x32xbf16> to vector<8x32xf32>
    %55 = vector.extract_strided_slice %54 {offsets = [0, 0], sizes = [3, 32], strides = [1, 1]} : vector<8x32xf32> to vector<3x32xf32>
    %56 = vector.extract_strided_slice %54 {offsets = [3, 0], sizes = [3, 32], strides = [1, 1]} : vector<8x32xf32> to vector<3x32xf32>
    %57 = tpu.concatenate %55, %51, %56 in 0 : vector<3x32xf32>, vector<16x32xf32>, vector<3x32xf32> -> vector<22x32xf32>
    %c0_17 = arith.constant 0 : index
    %c0_18 = arith.constant 0 : index
    %58 = vector.load %arg7[%c0_17, %c0_18] : memref<7x32xf32, #tpu.memory_space<vmem>>, vector<7x32xf32>
    %59 = vector.extract_strided_slice %57 {offsets = [0, 0], sizes = [16, 32], strides = [1, 1]} : vector<22x32xf32> to vector<16x32xf32>
    %60 = vector.extract_strided_slice %58 {offsets = [0, 0], sizes = [1, 32], strides = [1, 1]} : vector<7x32xf32> to vector<1x32xf32>
    %61 = vector.broadcast %60 : vector<1x32xf32> to vector<16x32xf32>
    %62 = arith.mulf %59, %61 : vector<16x32xf32>
    %63 = vector.extract_strided_slice %57 {offsets = [1, 0], sizes = [16, 32], strides = [1, 1]} : vector<22x32xf32> to vector<16x32xf32>
    %64 = vector.extract_strided_slice %58 {offsets = [1, 0], sizes = [1, 32], strides = [1, 1]} : vector<7x32xf32> to vector<1x32xf32>
    %65 = vector.broadcast %64 : vector<1x32xf32> to vector<16x32xf32>
    %66 = arith.mulf %63, %65 : vector<16x32xf32>
    %67 = arith.addf %62, %66 : vector<16x32xf32>
    %68 = vector.extract_strided_slice %57 {offsets = [2, 0], sizes = [16, 32], strides = [1, 1]} : vector<22x32xf32> to vector<16x32xf32>
    %69 = vector.extract_strided_slice %58 {offsets = [2, 0], sizes = [1, 32], strides = [1, 1]} : vector<7x32xf32> to vector<1x32xf32>
    %70 = vector.broadcast %69 : vector<1x32xf32> to vector<16x32xf32>
    %71 = arith.mulf %68, %70 : vector<16x32xf32>
    %72 = arith.addf %67, %71 : vector<16x32xf32>
    %73 = vector.extract_strided_slice %57 {offsets = [3, 0], sizes = [16, 32], strides = [1, 1]} : vector<22x32xf32> to vector<16x32xf32>
    %74 = vector.extract_strided_slice %58 {offsets = [3, 0], sizes = [1, 32], strides = [1, 1]} : vector<7x32xf32> to vector<1x32xf32>
    %75 = vector.broadcast %74 : vector<1x32xf32> to vector<16x32xf32>
    %76 = arith.mulf %73, %75 : vector<16x32xf32>
    %77 = arith.addf %72, %76 : vector<16x32xf32>
    %78 = vector.extract_strided_slice %57 {offsets = [4, 0], sizes = [16, 32], strides = [1, 1]} : vector<22x32xf32> to vector<16x32xf32>
    %79 = vector.extract_strided_slice %58 {offsets = [4, 0], sizes = [1, 32], strides = [1, 1]} : vector<7x32xf32> to vector<1x32xf32>
    %80 = vector.broadcast %79 : vector<1x32xf32> to vector<16x32xf32>
    %81 = arith.mulf %78, %80 : vector<16x32xf32>
    %82 = arith.addf %77, %81 : vector<16x32xf32>
    %83 = vector.extract_strided_slice %57 {offsets = [5, 0], sizes = [16, 32], strides = [1, 1]} : vector<22x32xf32> to vector<16x32xf32>
    %84 = vector.extract_strided_slice %58 {offsets = [5, 0], sizes = [1, 32], strides = [1, 1]} : vector<7x32xf32> to vector<1x32xf32>
    %85 = vector.broadcast %84 : vector<1x32xf32> to vector<16x32xf32>
    %86 = arith.mulf %83, %85 : vector<16x32xf32>
    %87 = arith.addf %82, %86 : vector<16x32xf32>
    %88 = vector.extract_strided_slice %57 {offsets = [6, 0], sizes = [16, 32], strides = [1, 1]} : vector<22x32xf32> to vector<16x32xf32>
    %89 = vector.extract_strided_slice %58 {offsets = [6, 0], sizes = [1, 32], strides = [1, 1]} : vector<7x32xf32> to vector<1x32xf32>
    %90 = vector.broadcast %89 : vector<1x32xf32> to vector<16x32xf32>
    %91 = arith.mulf %88, %90 : vector<16x32xf32>
    %92 = arith.addf %87, %91 : vector<16x32xf32>
    %c0_19 = arith.constant 0 : index
    %c0_20 = arith.constant 0 : index
    %93 = vector.load %arg9[%c0_19, %c0_20] : memref<1x32xf32, #tpu.memory_space<vmem>>, vector<1x32xf32>
    %94 = vector.broadcast %93 : vector<1x32xf32> to vector<16x32xf32>
    %95 = arith.addf %92, %94 : vector<16x32xf32>
    %cst_21 = arith.constant dense<0.000000e+00> : vector<16xf32>
    %96 = vector.multi_reduction <add>, %95, %cst_21 [1] : vector<16x32xf32> to vector<16xf32>
    %97 = vector.shape_cast %96 : vector<16xf32> to vector<16x1xf32>
    %98 = arith.addf %48, %97 : vector<16x1xf32>
    %cst_22 = arith.constant 9.600000e+01 : f32
    %99 = vector.broadcast %cst_22 : f32 to vector<16x1xf32>
    %100 = arith.divf %98, %99 : vector<16x1xf32>
    %101 = vector.broadcast %100 : vector<16x1xf32> to vector<16x64xf32>
    %102 = arith.subf %46, %101 : vector<16x64xf32>
    %103 = arith.mulf %102, %102 : vector<16x64xf32>
    %cst_23 = arith.constant dense<0.000000e+00> : vector<16xf32>
    %104 = vector.multi_reduction <add>, %103, %cst_23 [1] : vector<16x64xf32> to vector<16xf32>
    %105 = vector.shape_cast %104 : vector<16xf32> to vector<16x1xf32>
    %106 = vector.broadcast %100 : vector<16x1xf32> to vector<16x32xf32>
    %107 = arith.subf %95, %106 : vector<16x32xf32>
    %108 = arith.mulf %107, %107 : vector<16x32xf32>
    %cst_24 = arith.constant dense<0.000000e+00> : vector<16xf32>
    %109 = vector.multi_reduction <add>, %108, %cst_24 [1] : vector<16x32xf32> to vector<16xf32>
    %110 = vector.shape_cast %109 : vector<16xf32> to vector<16x1xf32>
    %111 = arith.addf %105, %110 : vector<16x1xf32>
    %cst_25 = arith.constant 9.600000e+01 : f32
    %112 = vector.broadcast %cst_25 : f32 to vector<16x1xf32>
    %113 = arith.divf %111, %112 : vector<16x1xf32>
    %cst_26 = arith.constant 9.99999997E-7 : f32
    %114 = vector.broadcast %cst_26 : f32 to vector<16x1xf32>
    %115 = arith.addf %113, %114 : vector<16x1xf32>
    %116 = math.rsqrt %115 : vector<16x1xf32>
    %117 = vector.broadcast %116 : vector<16x1xf32> to vector<16x64xf32>
    %118 = arith.mulf %102, %117 : vector<16x64xf32>
    %c0_27 = arith.constant 0 : index
    %c0_28 = arith.constant 0 : index
    %c0_29 = arith.constant 0 : index
    %119 = vector.load %arg10[%c0_27, %c0_28, %c0_29] : memref<1x1x64xf32, #tpu.memory_space<vmem>>, vector<1x1x64xf32>
    %120 = vector.shape_cast %119 : vector<1x1x64xf32> to vector<1x64xf32>
    %121 = vector.broadcast %120 : vector<1x64xf32> to vector<16x64xf32>
    %122 = arith.mulf %118, %121 : vector<16x64xf32>
    %c0_30 = arith.constant 0 : index
    %c0_31 = arith.constant 0 : index
    %c0_32 = arith.constant 0 : index
    %123 = vector.load %arg12[%c0_30, %c0_31, %c0_32] : memref<1x1x64xf32, #tpu.memory_space<vmem>>, vector<1x1x64xf32>
    %124 = vector.shape_cast %123 : vector<1x1x64xf32> to vector<1x64xf32>
    %125 = vector.broadcast %124 : vector<1x64xf32> to vector<16x64xf32>
    %126 = arith.addf %122, %125 : vector<16x64xf32>
    %127 = arith.truncf %126 : vector<16x64xf32> to vector<16x64xbf16>
    %c0_33 = arith.constant 0 : index
    %c0_34 = arith.constant 0 : index
    %128 = vector.load %arg14[%c0_33, %c0_34] : memref<64x128xbf16, #tpu.memory_space<vmem>>, vector<64x128xbf16>
    %cst_35 = arith.constant dense<0.000000e+00> : vector<16x128xf32>
    %129 = tpu.matmul %127, %128, %cst_35 {dimension_numbers = #tpu.dot_dimension_numbers<[1], [0], [0], [1], [0, 0, 1, 1], [], []>} : vector<16x64xbf16>, vector<64x128xbf16>, vector<16x128xf32> -> vector<16x128xf32>
    %130 = vector.broadcast %116 : vector<16x1xf32> to vector<16x32xf32>
    %131 = arith.mulf %107, %130 : vector<16x32xf32>
    %c0_36 = arith.constant 0 : index
    %c0_37 = arith.constant 0 : index
    %c0_38 = arith.constant 0 : index
    %132 = vector.load %arg11[%c0_36, %c0_37, %c0_38] : memref<1x1x32xf32, #tpu.memory_space<vmem>>, vector<1x1x32xf32>
    %133 = vector.shape_cast %132 : vector<1x1x32xf32> to vector<1x32xf32>
    %134 = vector.broadcast %133 : vector<1x32xf32> to vector<16x32xf32>
    %135 = arith.mulf %131, %134 : vector<16x32xf32>
    %c0_39 = arith.constant 0 : index
    %c0_40 = arith.constant 0 : index
    %c0_41 = arith.constant 0 : index
    %136 = vector.load %arg13[%c0_39, %c0_40, %c0_41] : memref<1x1x32xf32, #tpu.memory_space<vmem>>, vector<1x1x32xf32>
    %137 = vector.shape_cast %136 : vector<1x1x32xf32> to vector<1x32xf32>
    %138 = vector.broadcast %137 : vector<1x32xf32> to vector<16x32xf32>
    %139 = arith.addf %135, %138 : vector<16x32xf32>
    %140 = arith.truncf %139 : vector<16x32xf32> to vector<16x32xbf16>
    %c0_42 = arith.constant 0 : index
    %c0_43 = arith.constant 0 : index
    %141 = vector.load %arg15[%c0_42, %c0_43] : memref<32x128xbf16, #tpu.memory_space<vmem>>, vector<32x128xbf16>
    %cst_44 = arith.constant dense<0.000000e+00> : vector<16x128xf32>
    %142 = tpu.matmul %140, %141, %cst_44 {dimension_numbers = #tpu.dot_dimension_numbers<[1], [0], [0], [1], [0, 0, 1, 1], [], []>} : vector<16x32xbf16>, vector<32x128xbf16>, vector<16x128xf32> -> vector<16x128xf32>
    %143 = arith.addf %129, %142 : vector<16x128xf32>
    %c0_45 = arith.constant 0 : index
    %c0_46 = arith.constant 0 : index
    %144 = vector.load %arg16[%c0_45, %c0_46] : memref<1x128xf32, #tpu.memory_space<vmem>>, vector<1x128xf32>
    %145 = vector.broadcast %144 : vector<1x128xf32> to vector<16x128xf32>
    %146 = arith.addf %143, %145 : vector<16x128xf32>
    %cst_47 = arith.constant 5.000000e-01 : f32
    %147 = vector.broadcast %cst_47 : f32 to vector<16x128xf32>
    %148 = arith.mulf %147, %146 : vector<16x128xf32>
    %cst_48 = arith.constant 4.471500e-02 : f32
    %149 = vector.broadcast %cst_48 : f32 to vector<16x128xf32>
    %150 = arith.mulf %149, %146 : vector<16x128xf32>
    %151 = arith.mulf %150, %146 : vector<16x128xf32>
    %152 = arith.mulf %151, %146 : vector<16x128xf32>
    %153 = arith.addf %146, %152 : vector<16x128xf32>
    %cst_49 = arith.constant 0.797884583 : f32
    %154 = vector.broadcast %cst_49 : f32 to vector<16x128xf32>
    %155 = arith.mulf %154, %153 : vector<16x128xf32>
    %156 = math.tanh %155 : vector<16x128xf32>
    %cst_50 = arith.constant 1.000000e+00 : f32
    %157 = vector.broadcast %cst_50 : f32 to vector<16x128xf32>
    %158 = arith.addf %157, %156 : vector<16x128xf32>
    %159 = arith.mulf %148, %158 : vector<16x128xf32>
    %160 = arith.truncf %159 : vector<16x128xf32> to vector<16x128xbf16>
    %c0_51 = arith.constant 0 : index
    %c0_52 = arith.constant 0 : index
    %161 = vector.load %arg17[%c0_51, %c0_52] : memref<128x128xbf16, #tpu.memory_space<vmem>>, vector<128x128xbf16>
    %cst_53 = arith.constant dense<0.000000e+00> : vector<16x128xf32>
    %162 = tpu.matmul %160, %161, %cst_53 {dimension_numbers = #tpu.dot_dimension_numbers<[1], [0], [0], [1], [0, 0, 1, 1], [], []>} : vector<16x128xbf16>, vector<128x128xbf16>, vector<16x128xf32> -> vector<16x128xf32>
    %c0_54 = arith.constant 0 : index
    %c0_55 = arith.constant 0 : index
    %163 = vector.load %arg18[%c0_54, %c0_55] : memref<1x128xf32, #tpu.memory_space<vmem>>, vector<1x128xf32>
    %164 = vector.broadcast %163 : vector<1x128xf32> to vector<16x128xf32>
    %165 = arith.addf %162, %164 : vector<16x128xf32>
    %c0_56 = arith.constant 0 : index
    %c0_57 = arith.constant 0 : index
    %c0_58 = arith.constant 0 : index
    %166 = vector.load %arg2[%c0_56, %c0_57, %c0_58] : memref<1x16x64xbf16, #tpu.memory_space<vmem>>, vector<1x16x64xbf16>
    %167 = vector.shape_cast %166 : vector<1x16x64xbf16> to vector<16x64xbf16>
    %c0_59 = arith.constant 0 : index
    %c0_60 = arith.constant 0 : index
    %168 = vector.load %arg19[%c0_59, %c0_60] : memref<64x128xbf16, #tpu.memory_space<vmem>>, vector<64x128xbf16>
    %cst_61 = arith.constant dense<0.000000e+00> : vector<16x128xf32>
    %169 = tpu.matmul %167, %168, %cst_61 {dimension_numbers = #tpu.dot_dimension_numbers<[1], [0], [0], [1], [0, 0, 1, 1], [], []>} : vector<16x64xbf16>, vector<64x128xbf16>, vector<16x128xf32> -> vector<16x128xf32>
    %c0_62 = arith.constant 0 : index
    %c0_63 = arith.constant 0 : index
    %c0_64 = arith.constant 0 : index
    %170 = vector.load %arg3[%c0_62, %c0_63, %c0_64] : memref<1x16x32xbf16, #tpu.memory_space<vmem>>, vector<1x16x32xbf16>
    %171 = vector.shape_cast %170 : vector<1x16x32xbf16> to vector<16x32xbf16>
    %c0_65 = arith.constant 0 : index
    %c0_66 = arith.constant 0 : index
    %172 = vector.load %arg20[%c0_65, %c0_66] : memref<32x128xbf16, #tpu.memory_space<vmem>>, vector<32x128xbf16>
    %cst_67 = arith.constant dense<0.000000e+00> : vector<16x128xf32>
    %173 = tpu.matmul %171, %172, %cst_67 {dimension_numbers = #tpu.dot_dimension_numbers<[1], [0], [0], [1], [0, 0, 1, 1], [], []>} : vector<16x32xbf16>, vector<32x128xbf16>, vector<16x128xf32> -> vector<16x128xf32>
    %174 = arith.addf %169, %173 : vector<16x128xf32>
    %175 = arith.addf %165, %174 : vector<16x128xf32>
    %c0_68 = arith.constant 0 : index
    %c0_69 = arith.constant 0 : index
    %176 = vector.load %arg21[%c0_68, %c0_69] : memref<1x128xf32, #tpu.memory_space<vmem>>, vector<1x128xf32>
    %177 = vector.broadcast %176 : vector<1x128xf32> to vector<16x128xf32>
    %178 = arith.addf %175, %177 : vector<16x128xf32>
    %179 = tpu.iota {dimensions = array<i32: 0>} : vector<16x1xi32>
    %c16_i32 = arith.constant 16 : i32
    %180 = arith.muli %arg1, %c16_i32 : i32
    %181 = vector.broadcast %180 : i32 to vector<16x1xi32>
    %182 = arith.addi %179, %181 : vector<16x1xi32>
    %c40_i32 = arith.constant 40 : i32
    %183 = vector.broadcast %c40_i32 : i32 to vector<16x1xi32>
    %184 = arith.cmpi slt, %182, %183 : vector<16x1xi32>
    %cst_70 = arith.constant 0.000000e+00 : f32
    %185 = vector.shape_cast %184 : vector<16x1xi1> to vector<16x1xi1>
    %186 = vector.broadcast %185 : vector<16x1xi1> to vector<16x128xi1>
    %187 = vector.broadcast %cst_70 : f32 to vector<16x128xf32>
    %188 = arith.select %186, %178, %187 : vector<16x128xi1>, vector<16x128xf32>
    %189 = arith.truncf %188 : vector<16x128xf32> to vector<16x128xbf16>
    %c0_71 = arith.constant 0 : index
    %c0_72 = arith.constant 0 : index
    %c0_73 = arith.constant 0 : index
    %190 = vector.load %arg22[%c0_71, %c0_72, %c0_73] : memref<1x16x128xbf16, #tpu.memory_space<vmem>>, vector<1x16x128xbf16>
    %191 = vector.shape_cast %190 : vector<1x16x128xbf16> to vector<16x128xbf16>
    %192 = vector.shape_cast %189 : vector<16x128xbf16> to vector<1x16x128xbf16>
    tpu.vector_store %arg22[%c0_71, %c0_72, %c0_73], %192 {strides = array<i32>} : memref<1x16x128xbf16, #tpu.memory_space<vmem>>, vector<1x16x128xbf16>,
    return
  }
  func.func @transform_0(%arg0: i32, %arg1: i32) -> (i32, i32, i32) {
    %c0_i32 = arith.constant 0 : i32
    %c0_i32_0 = arith.constant 0 : i32
    return %arg0, %arg1, %c0_i32 : i32, i32, i32
  }
  func.func @transform_1(%arg0: i32, %arg1: i32) -> (i32, i32, i32) {
    %c0_i32 = arith.constant 0 : i32
    %c0_i32_0 = arith.constant 0 : i32
    return %arg0, %arg1, %c0_i32 : i32, i32, i32
  }
  func.func @transform_2(%arg0: i32, %arg1: i32) -> (i32, i32, i32, i32) {
    %c0_i32 = arith.constant 0 : i32
    %c0_i32_0 = arith.constant 0 : i32
    %c0_i32_1 = arith.constant 0 : i32
    return %arg0, %arg1, %c0_i32, %c0_i32_0 : i32, i32, i32, i32
  }
  func.func @transform_3(%arg0: i32, %arg1: i32) -> (i32, i32, i32, i32) {
    %c0_i32 = arith.constant 0 : i32
    %c0_i32_0 = arith.constant 0 : i32
    %c0_i32_1 = arith.constant 0 : i32
    return %arg0, %arg1, %c0_i32, %c0_i32_0 : i32, i32, i32, i32
  }
  func.func @transform_4(%arg0: i32, %arg1: i32) -> (i32, i32) {
    %c0_i32 = arith.constant 0 : i32
    %c0_i32_0 = arith.constant 0 : i32
    %c0_i32_1 = arith.constant 0 : i32
    return %c0_i32, %c0_i32_0 : i32, i32
  }
  func.func @transform_5(%arg0: i32, %arg1: i32) -> (i32, i32) {
    %c0_i32 = arith.constant 0 : i32
    %c0_i32_0 = arith.constant 0 : i32
    %c0_i32_1 = arith.constant 0 : i32
    return %c0_i32, %c0_i32_0 : i32, i32
  }
  func.func @transform_6(%arg0: i32, %arg1: i32) -> (i32, i32) {
    %c0_i32 = arith.constant 0 : i32
    %c0_i32_0 = arith.constant 0 : i32
    %c0_i32_1 = arith.constant 0 : i32
    return %c0_i32, %c0_i32_0 : i32, i32
  }
  func.func @transform_7(%arg0: i32, %arg1: i32) -> (i32, i32) {
    %c0_i32 = arith.constant 0 : i32
    %c0_i32_0 = arith.constant 0 : i32
    %c0_i32_1 = arith.constant 0 : i32
    return %c0_i32, %c0_i32_0 : i32, i32
  }
  func.func @transform_8(%arg0: i32, %arg1: i32) -> (i32, i32, i32) {
    %c0_i32 = arith.constant 0 : i32
    %c0_i32_0 = arith.constant 0 : i32
    %c0_i32_1 = arith.constant 0 : i32
    return %arg0, %c0_i32, %c0_i32_0 : i32, i32, i32
  }
  func.func @transform_9(%arg0: i32, %arg1: i32) -> (i32, i32, i32) {
    %c0_i32 = arith.constant 0 : i32
    %c0_i32_0 = arith.constant 0 : i32
    %c0_i32_1 = arith.constant 0 : i32
    return %arg0, %c0_i32, %c0_i32_0 : i32, i32, i32
  }
  func.func @transform_10(%arg0: i32, %arg1: i32) -> (i32, i32, i32) {
    %c0_i32 = arith.constant 0 : i32
    %c0_i32_0 = arith.constant 0 : i32
    %c0_i32_1 = arith.constant 0 : i32
    return %arg0, %c0_i32, %c0_i32_0 : i32, i32, i32
  }
  func.func @transform_11(%arg0: i32, %arg1: i32) -> (i32, i32, i32) {
    %c0_i32 = arith.constant 0 : i32
    %c0_i32_0 = arith.constant 0 : i32
    %c0_i32_1 = arith.constant 0 : i32
    return %arg0, %c0_i32, %c0_i32_0 : i32, i32, i32
  }
  func.func @transform_12(%arg0: i32, %arg1: i32) -> (i32, i32) {
    %c0_i32 = arith.constant 0 : i32
    %c0_i32_0 = arith.constant 0 : i32
    %c0_i32_1 = arith.constant 0 : i32
    return %c0_i32, %c0_i32_0 : i32, i32
  }
  func.func @transform_13(%arg0: i32, %arg1: i32) -> (i32, i32) {
    %c0_i32 = arith.constant 0 : i32
    %c0_i32_0 = arith.constant 0 : i32
    %c0_i32_1 = arith.constant 0 : i32
    return %c0_i32, %c0_i32_0 : i32, i32
  }
  func.func @transform_14(%arg0: i32, %arg1: i32) -> (i32, i32) {
    %c0_i32 = arith.constant 0 : i32
    %c0_i32_0 = arith.constant 0 : i32
    %c0_i32_1 = arith.constant 0 : i32
    return %c0_i32, %c0_i32_0 : i32, i32
  }
  func.func @transform_15(%arg0: i32, %arg1: i32) -> (i32, i32) {
    %c0_i32 = arith.constant 0 : i32
    %c0_i32_0 = arith.constant 0 : i32
    %c0_i32_1 = arith.constant 0 : i32
    return %c0_i32, %c0_i32_0 : i32, i32
  }
  func.func @transform_16(%arg0: i32, %arg1: i32) -> (i32, i32) {
    %c0_i32 = arith.constant 0 : i32
    %c0_i32_0 = arith.constant 0 : i32
    %c0_i32_1 = arith.constant 0 : i32
    return %c0_i32, %c0_i32_0 : i32, i32
  }
  func.func @transform_17(%arg0: i32, %arg1: i32) -> (i32, i32) {
    %c0_i32 = arith.constant 0 : i32
    %c0_i32_0 = arith.constant 0 : i32
    %c0_i32_1 = arith.constant 0 : i32
    return %c0_i32, %c0_i32_0 : i32, i32
  }
  func.func @transform_18(%arg0: i32, %arg1: i32) -> (i32, i32) {
    %c0_i32 = arith.constant 0 : i32
    %c0_i32_0 = arith.constant 0 : i32
    %c0_i32_1 = arith.constant 0 : i32
    return %c0_i32, %c0_i32_0 : i32, i32
  }
  func.func @transform_19(%arg0: i32, %arg1: i32) -> (i32, i32) {
    %c0_i32 = arith.constant 0 : i32
    %c0_i32_0 = arith.constant 0 : i32
    %c0_i32_1 = arith.constant 0 : i32
    return %c0_i32, %c0_i32_0 : i32, i32
  }
  func.func @transform_20(%arg0: i32, %arg1: i32) -> (i32, i32, i32) {
    %c0_i32 = arith.constant 0 : i32
    %c0_i32_0 = arith.constant 0 : i32
    return %arg0, %arg1, %c0_i32 : i32, i32, i32
  }
}

module attributes {stable_mosaic.version = 11 : i64} {
  func.func @_convnext_kernel(%arg0: i32, %arg1: i32, %arg2: memref<1x16x128xbf16, #tpu.memory_space<vmem>>, %arg3: memref<1x1x8x128xbf16, #tpu.memory_space<vmem>>, %arg4: memref<7x128xf32, #tpu.memory_space<vmem>>, %arg5: memref<1x128xf32, #tpu.memory_space<vmem>>, %arg6: memref<1x1x128xf32, #tpu.memory_space<vmem>>, %arg7: memref<1x1x128xf32, #tpu.memory_space<vmem>>, %arg8: memref<128x128xbf16, #tpu.memory_space<vmem>>, %arg9: memref<1x128xf32, #tpu.memory_space<vmem>>, %arg10: memref<128x128xbf16, #tpu.memory_space<vmem>>, %arg11: memref<1x128xf32, #tpu.memory_space<vmem>>, %arg12: memref<1x16x128xbf16, #tpu.memory_space<vmem>>) attributes {dimension_semantics = [#tpu.dimension_semantics<parallel>, #tpu.dimension_semantics<parallel>], iteration_bounds = array<i64: 2, 3>, scalar_prefetch = 0 : i64, scratch_operands = 0 : i64, tpu.core_type = #tpu.core_type<tc>, window_params = [{transform_indices = @transform_0, window_bounds = array<i64: 1, 16, 128>}, {transform_indices = @transform_1, window_bounds = array<i64: 1, 1, 8, 128>}, {pipeline_mode = #tpu.pipeline_mode<synchronous>, transform_indices = @transform_2, window_bounds = array<i64: 7, 128>}, {pipeline_mode = #tpu.pipeline_mode<synchronous>, transform_indices = @transform_3, window_bounds = array<i64: 1, 128>}, {transform_indices = @transform_4, window_bounds = array<i64: 1, 1, 128>}, {transform_indices = @transform_5, window_bounds = array<i64: 1, 1, 128>}, {pipeline_mode = #tpu.pipeline_mode<synchronous>, transform_indices = @transform_6, window_bounds = array<i64: 128, 128>}, {pipeline_mode = #tpu.pipeline_mode<synchronous>, transform_indices = @transform_7, window_bounds = array<i64: 1, 128>}, {pipeline_mode = #tpu.pipeline_mode<synchronous>, transform_indices = @transform_8, window_bounds = array<i64: 128, 128>}, {pipeline_mode = #tpu.pipeline_mode<synchronous>, transform_indices = @transform_9, window_bounds = array<i64: 1, 128>}, {transform_indices = @transform_10, window_bounds = array<i64: 1, 16, 128>}]} {
    %c0 = arith.constant 0 : index
    %c0_0 = arith.constant 0 : index
    %c0_1 = arith.constant 0 : index
    %0 = vector.load %arg2[%c0, %c0_0, %c0_1] : memref<1x16x128xbf16, #tpu.memory_space<vmem>>, vector<1x16x128xbf16>
    %1 = vector.shape_cast %0 : vector<1x16x128xbf16> to vector<16x128xbf16>
    %2 = arith.extf %1 : vector<16x128xbf16> to vector<16x128xf32>
    %c0_2 = arith.constant 0 : index
    %c0_3 = arith.constant 0 : index
    %c0_4 = arith.constant 0 : index
    %c0_5 = arith.constant 0 : index
    %3 = vector.load %arg3[%c0_2, %c0_3, %c0_4, %c0_5] : memref<1x1x8x128xbf16, #tpu.memory_space<vmem>>, vector<1x1x8x128xbf16>
    %4 = vector.shape_cast %3 : vector<1x1x8x128xbf16> to vector<8x128xbf16>
    %5 = arith.extf %4 : vector<8x128xbf16> to vector<8x128xf32>
    %6 = vector.extract_strided_slice %5 {offsets = [0, 0], sizes = [3, 128], strides = [1, 1]} : vector<8x128xf32> to vector<3x128xf32>
    %7 = vector.extract_strided_slice %5 {offsets = [3, 0], sizes = [3, 128], strides = [1, 1]} : vector<8x128xf32> to vector<3x128xf32>
    %8 = tpu.concatenate %6, %2, %7 in 0 : vector<3x128xf32>, vector<16x128xf32>, vector<3x128xf32> -> vector<22x128xf32>
    %c0_6 = arith.constant 0 : index
    %c0_7 = arith.constant 0 : index
    %9 = vector.load %arg4[%c0_6, %c0_7] : memref<7x128xf32, #tpu.memory_space<vmem>>, vector<7x128xf32>
    %10 = vector.extract_strided_slice %8 {offsets = [0, 0], sizes = [16, 128], strides = [1, 1]} : vector<22x128xf32> to vector<16x128xf32>
    %11 = vector.extract_strided_slice %9 {offsets = [0, 0], sizes = [1, 128], strides = [1, 1]} : vector<7x128xf32> to vector<1x128xf32>
    %12 = vector.broadcast %11 : vector<1x128xf32> to vector<16x128xf32>
    %13 = arith.mulf %10, %12 : vector<16x128xf32>
    %14 = vector.extract_strided_slice %8 {offsets = [1, 0], sizes = [16, 128], strides = [1, 1]} : vector<22x128xf32> to vector<16x128xf32>
    %15 = vector.extract_strided_slice %9 {offsets = [1, 0], sizes = [1, 128], strides = [1, 1]} : vector<7x128xf32> to vector<1x128xf32>
    %16 = vector.broadcast %15 : vector<1x128xf32> to vector<16x128xf32>
    %17 = arith.mulf %14, %16 : vector<16x128xf32>
    %18 = arith.addf %13, %17 : vector<16x128xf32>
    %19 = vector.extract_strided_slice %8 {offsets = [2, 0], sizes = [16, 128], strides = [1, 1]} : vector<22x128xf32> to vector<16x128xf32>
    %20 = vector.extract_strided_slice %9 {offsets = [2, 0], sizes = [1, 128], strides = [1, 1]} : vector<7x128xf32> to vector<1x128xf32>
    %21 = vector.broadcast %20 : vector<1x128xf32> to vector<16x128xf32>
    %22 = arith.mulf %19, %21 : vector<16x128xf32>
    %23 = arith.addf %18, %22 : vector<16x128xf32>
    %24 = vector.extract_strided_slice %8 {offsets = [3, 0], sizes = [16, 128], strides = [1, 1]} : vector<22x128xf32> to vector<16x128xf32>
    %25 = vector.extract_strided_slice %9 {offsets = [3, 0], sizes = [1, 128], strides = [1, 1]} : vector<7x128xf32> to vector<1x128xf32>
    %26 = vector.broadcast %25 : vector<1x128xf32> to vector<16x128xf32>
    %27 = arith.mulf %24, %26 : vector<16x128xf32>
    %28 = arith.addf %23, %27 : vector<16x128xf32>
    %29 = vector.extract_strided_slice %8 {offsets = [4, 0], sizes = [16, 128], strides = [1, 1]} : vector<22x128xf32> to vector<16x128xf32>
    %30 = vector.extract_strided_slice %9 {offsets = [4, 0], sizes = [1, 128], strides = [1, 1]} : vector<7x128xf32> to vector<1x128xf32>
    %31 = vector.broadcast %30 : vector<1x128xf32> to vector<16x128xf32>
    %32 = arith.mulf %29, %31 : vector<16x128xf32>
    %33 = arith.addf %28, %32 : vector<16x128xf32>
    %34 = vector.extract_strided_slice %8 {offsets = [5, 0], sizes = [16, 128], strides = [1, 1]} : vector<22x128xf32> to vector<16x128xf32>
    %35 = vector.extract_strided_slice %9 {offsets = [5, 0], sizes = [1, 128], strides = [1, 1]} : vector<7x128xf32> to vector<1x128xf32>
    %36 = vector.broadcast %35 : vector<1x128xf32> to vector<16x128xf32>
    %37 = arith.mulf %34, %36 : vector<16x128xf32>
    %38 = arith.addf %33, %37 : vector<16x128xf32>
    %39 = vector.extract_strided_slice %8 {offsets = [6, 0], sizes = [16, 128], strides = [1, 1]} : vector<22x128xf32> to vector<16x128xf32>
    %40 = vector.extract_strided_slice %9 {offsets = [6, 0], sizes = [1, 128], strides = [1, 1]} : vector<7x128xf32> to vector<1x128xf32>
    %41 = vector.broadcast %40 : vector<1x128xf32> to vector<16x128xf32>
    %42 = arith.mulf %39, %41 : vector<16x128xf32>
    %43 = arith.addf %38, %42 : vector<16x128xf32>
    %c0_8 = arith.constant 0 : index
    %c0_9 = arith.constant 0 : index
    %44 = vector.load %arg5[%c0_8, %c0_9] : memref<1x128xf32, #tpu.memory_space<vmem>>, vector<1x128xf32>
    %45 = vector.broadcast %44 : vector<1x128xf32> to vector<16x128xf32>
    %46 = arith.addf %43, %45 : vector<16x128xf32>
    %cst = arith.constant dense<0.000000e+00> : vector<16xf32>
    %47 = vector.multi_reduction <add>, %46, %cst [1] : vector<16x128xf32> to vector<16xf32>
    %48 = vector.shape_cast %47 : vector<16xf32> to vector<16x1xf32>
    %cst_10 = arith.constant 1.280000e+02 : f32
    %49 = vector.broadcast %cst_10 : f32 to vector<16x1xf32>
    %50 = arith.divf %48, %49 : vector<16x1xf32>
    %51 = vector.broadcast %50 : vector<16x1xf32> to vector<16x128xf32>
    %52 = arith.subf %46, %51 : vector<16x128xf32>
    %53 = arith.mulf %52, %52 : vector<16x128xf32>
    %cst_11 = arith.constant dense<0.000000e+00> : vector<16xf32>
    %54 = vector.multi_reduction <add>, %53, %cst_11 [1] : vector<16x128xf32> to vector<16xf32>
    %55 = vector.shape_cast %54 : vector<16xf32> to vector<16x1xf32>
    %cst_12 = arith.constant 1.280000e+02 : f32
    %56 = vector.broadcast %cst_12 : f32 to vector<16x1xf32>
    %57 = arith.divf %55, %56 : vector<16x1xf32>
    %cst_13 = arith.constant 9.99999997E-7 : f32
    %58 = vector.broadcast %cst_13 : f32 to vector<16x1xf32>
    %59 = arith.addf %57, %58 : vector<16x1xf32>
    %60 = math.rsqrt %59 : vector<16x1xf32>
    %61 = vector.broadcast %60 : vector<16x1xf32> to vector<16x128xf32>
    %62 = arith.mulf %52, %61 : vector<16x128xf32>
    %c0_14 = arith.constant 0 : index
    %c0_15 = arith.constant 0 : index
    %c0_16 = arith.constant 0 : index
    %63 = vector.load %arg6[%c0_14, %c0_15, %c0_16] : memref<1x1x128xf32, #tpu.memory_space<vmem>>, vector<1x1x128xf32>
    %64 = vector.shape_cast %63 : vector<1x1x128xf32> to vector<1x128xf32>
    %65 = vector.broadcast %64 : vector<1x128xf32> to vector<16x128xf32>
    %66 = arith.mulf %62, %65 : vector<16x128xf32>
    %c0_17 = arith.constant 0 : index
    %c0_18 = arith.constant 0 : index
    %c0_19 = arith.constant 0 : index
    %67 = vector.load %arg7[%c0_17, %c0_18, %c0_19] : memref<1x1x128xf32, #tpu.memory_space<vmem>>, vector<1x1x128xf32>
    %68 = vector.shape_cast %67 : vector<1x1x128xf32> to vector<1x128xf32>
    %69 = vector.broadcast %68 : vector<1x128xf32> to vector<16x128xf32>
    %70 = arith.addf %66, %69 : vector<16x128xf32>
    %71 = arith.truncf %70 : vector<16x128xf32> to vector<16x128xbf16>
    %c0_20 = arith.constant 0 : index
    %c0_21 = arith.constant 0 : index
    %72 = vector.load %arg8[%c0_20, %c0_21] : memref<128x128xbf16, #tpu.memory_space<vmem>>, vector<128x128xbf16>
    %cst_22 = arith.constant dense<0.000000e+00> : vector<16x128xf32>
    %73 = tpu.matmul %71, %72, %cst_22 {dimension_numbers = #tpu.dot_dimension_numbers<[1], [0], [0], [1], [0, 0, 1, 1], [], []>} : vector<16x128xbf16>, vector<128x128xbf16>, vector<16x128xf32> -> vector<16x128xf32>
    %c0_23 = arith.constant 0 : index
    %c0_24 = arith.constant 0 : index
    %74 = vector.load %arg9[%c0_23, %c0_24] : memref<1x128xf32, #tpu.memory_space<vmem>>, vector<1x128xf32>
    %75 = vector.broadcast %74 : vector<1x128xf32> to vector<16x128xf32>
    %76 = arith.addf %73, %75 : vector<16x128xf32>
    %cst_25 = arith.constant 5.000000e-01 : f32
    %77 = vector.broadcast %cst_25 : f32 to vector<16x128xf32>
    %78 = arith.mulf %77, %76 : vector<16x128xf32>
    %cst_26 = arith.constant 4.471500e-02 : f32
    %79 = vector.broadcast %cst_26 : f32 to vector<16x128xf32>
    %80 = arith.mulf %79, %76 : vector<16x128xf32>
    %81 = arith.mulf %80, %76 : vector<16x128xf32>
    %82 = arith.mulf %81, %76 : vector<16x128xf32>
    %83 = arith.addf %76, %82 : vector<16x128xf32>
    %cst_27 = arith.constant 0.797884583 : f32
    %84 = vector.broadcast %cst_27 : f32 to vector<16x128xf32>
    %85 = arith.mulf %84, %83 : vector<16x128xf32>
    %86 = math.tanh %85 : vector<16x128xf32>
    %cst_28 = arith.constant 1.000000e+00 : f32
    %87 = vector.broadcast %cst_28 : f32 to vector<16x128xf32>
    %88 = arith.addf %87, %86 : vector<16x128xf32>
    %89 = arith.mulf %78, %88 : vector<16x128xf32>
    %90 = arith.truncf %89 : vector<16x128xf32> to vector<16x128xbf16>
    %c0_29 = arith.constant 0 : index
    %c0_30 = arith.constant 0 : index
    %91 = vector.load %arg10[%c0_29, %c0_30] : memref<128x128xbf16, #tpu.memory_space<vmem>>, vector<128x128xbf16>
    %cst_31 = arith.constant dense<0.000000e+00> : vector<16x128xf32>
    %92 = tpu.matmul %90, %91, %cst_31 {dimension_numbers = #tpu.dot_dimension_numbers<[1], [0], [0], [1], [0, 0, 1, 1], [], []>} : vector<16x128xbf16>, vector<128x128xbf16>, vector<16x128xf32> -> vector<16x128xf32>
    %c0_32 = arith.constant 0 : index
    %c0_33 = arith.constant 0 : index
    %93 = vector.load %arg11[%c0_32, %c0_33] : memref<1x128xf32, #tpu.memory_space<vmem>>, vector<1x128xf32>
    %94 = vector.broadcast %93 : vector<1x128xf32> to vector<16x128xf32>
    %95 = arith.addf %92, %94 : vector<16x128xf32>
    %96 = arith.addf %95, %2 : vector<16x128xf32>
    %97 = tpu.iota {dimensions = array<i32: 0>} : vector<16x1xi32>
    %c16_i32 = arith.constant 16 : i32
    %98 = arith.muli %arg1, %c16_i32 : i32
    %99 = vector.broadcast %98 : i32 to vector<16x1xi32>
    %100 = arith.addi %97, %99 : vector<16x1xi32>
    %c40_i32 = arith.constant 40 : i32
    %101 = vector.broadcast %c40_i32 : i32 to vector<16x1xi32>
    %102 = arith.cmpi slt, %100, %101 : vector<16x1xi32>
    %cst_34 = arith.constant 0.000000e+00 : f32
    %103 = vector.shape_cast %102 : vector<16x1xi1> to vector<16x1xi1>
    %104 = vector.broadcast %103 : vector<16x1xi1> to vector<16x128xi1>
    %105 = vector.broadcast %cst_34 : f32 to vector<16x128xf32>
    %106 = arith.select %104, %96, %105 : vector<16x128xi1>, vector<16x128xf32>
    %107 = arith.truncf %106 : vector<16x128xf32> to vector<16x128xbf16>
    %c0_35 = arith.constant 0 : index
    %c0_36 = arith.constant 0 : index
    %c0_37 = arith.constant 0 : index
    %108 = vector.load %arg12[%c0_35, %c0_36, %c0_37] : memref<1x16x128xbf16, #tpu.memory_space<vmem>>, vector<1x16x128xbf16>
    %109 = vector.shape_cast %108 : vector<1x16x128xbf16> to vector<16x128xbf16>
    %110 = vector.shape_cast %107 : vector<16x128xbf16> to vector<1x16x128xbf16>
    tpu.vector_store %arg12[%c0_35, %c0_36, %c0_37], %110 {strides = array<i32>} : memref<1x16x128xbf16, #tpu.memory_space<vmem>>, vector<1x16x128xbf16>,
    return
  }
  func.func @transform_0(%arg0: i32, %arg1: i32) -> (i32, i32, i32) {
    %c0_i32 = arith.constant 0 : i32
    %c0_i32_0 = arith.constant 0 : i32
    return %arg0, %arg1, %c0_i32 : i32, i32, i32
  }
  func.func @transform_1(%arg0: i32, %arg1: i32) -> (i32, i32, i32, i32) {
    %c0_i32 = arith.constant 0 : i32
    %c0_i32_0 = arith.constant 0 : i32
    %c0_i32_1 = arith.constant 0 : i32
    return %arg0, %arg1, %c0_i32, %c0_i32_0 : i32, i32, i32, i32
  }
  func.func @transform_2(%arg0: i32, %arg1: i32) -> (i32, i32) {
    %c0_i32 = arith.constant 0 : i32
    %c0_i32_0 = arith.constant 0 : i32
    %c0_i32_1 = arith.constant 0 : i32
    return %c0_i32, %c0_i32_0 : i32, i32
  }
  func.func @transform_3(%arg0: i32, %arg1: i32) -> (i32, i32) {
    %c0_i32 = arith.constant 0 : i32
    %c0_i32_0 = arith.constant 0 : i32
    %c0_i32_1 = arith.constant 0 : i32
    return %c0_i32, %c0_i32_0 : i32, i32
  }
  func.func @transform_4(%arg0: i32, %arg1: i32) -> (i32, i32, i32) {
    %c0_i32 = arith.constant 0 : i32
    %c0_i32_0 = arith.constant 0 : i32
    %c0_i32_1 = arith.constant 0 : i32
    return %arg0, %c0_i32, %c0_i32_0 : i32, i32, i32
  }
  func.func @transform_5(%arg0: i32, %arg1: i32) -> (i32, i32, i32) {
    %c0_i32 = arith.constant 0 : i32
    %c0_i32_0 = arith.constant 0 : i32
    %c0_i32_1 = arith.constant 0 : i32
    return %arg0, %c0_i32, %c0_i32_0 : i32, i32, i32
  }
  func.func @transform_6(%arg0: i32, %arg1: i32) -> (i32, i32) {
    %c0_i32 = arith.constant 0 : i32
    %c0_i32_0 = arith.constant 0 : i32
    %c0_i32_1 = arith.constant 0 : i32
    return %c0_i32, %c0_i32_0 : i32, i32
  }
  func.func @transform_7(%arg0: i32, %arg1: i32) -> (i32, i32) {
    %c0_i32 = arith.constant 0 : i32
    %c0_i32_0 = arith.constant 0 : i32
    %c0_i32_1 = arith.constant 0 : i32
    return %c0_i32, %c0_i32_0 : i32, i32
  }
  func.func @transform_8(%arg0: i32, %arg1: i32) -> (i32, i32) {
    %c0_i32 = arith.constant 0 : i32
    %c0_i32_0 = arith.constant 0 : i32
    %c0_i32_1 = arith.constant 0 : i32
    return %c0_i32, %c0_i32_0 : i32, i32
  }
  func.func @transform_9(%arg0: i32, %arg1: i32) -> (i32, i32) {
    %c0_i32 = arith.constant 0 : i32
    %c0_i32_0 = arith.constant 0 : i32
    %c0_i32_1 = arith.constant 0 : i32
    return %c0_i32, %c0_i32_0 : i32, i32
  }
  func.func @transform_10(%arg0: i32, %arg1: i32) -> (i32, i32, i32) {
    %c0_i32 = arith.constant 0 : i32
    %c0_i32_0 = arith.constant 0 : i32
    return %arg0, %arg1, %c0_i32 : i32, i32, i32
  }
}

module attributes {stable_mosaic.version = 11 : i64} {
  func.func @_convnext_kernel(%arg0: i32, %arg1: i32, %arg2: memref<1x16x128xbf16, #tpu.memory_space<vmem>>, %arg3: memref<1x16x48xbf16, #tpu.memory_space<vmem>>, %arg4: memref<1x1x8x128xbf16, #tpu.memory_space<vmem>>, %arg5: memref<1x1x8x48xbf16, #tpu.memory_space<vmem>>, %arg6: memref<7x128xf32, #tpu.memory_space<vmem>>, %arg7: memref<7x48xf32, #tpu.memory_space<vmem>>, %arg8: memref<1x128xf32, #tpu.memory_space<vmem>>, %arg9: memref<1x48xf32, #tpu.memory_space<vmem>>, %arg10: memref<1x1x128xf32, #tpu.memory_space<vmem>>, %arg11: memref<1x1x48xf32, #tpu.memory_space<vmem>>, %arg12: memref<1x1x128xf32, #tpu.memory_space<vmem>>, %arg13: memref<1x1x48xf32, #tpu.memory_space<vmem>>, %arg14: memref<128x128xbf16, #tpu.memory_space<vmem>>, %arg15: memref<48x128xbf16, #tpu.memory_space<vmem>>, %arg16: memref<1x128xf32, #tpu.memory_space<vmem>>, %arg17: memref<128x128xbf16, #tpu.memory_space<vmem>>, %arg18: memref<1x128xf32, #tpu.memory_space<vmem>>, %arg19: memref<128x128xbf16, #tpu.memory_space<vmem>>, %arg20: memref<48x128xbf16, #tpu.memory_space<vmem>>, %arg21: memref<1x128xf32, #tpu.memory_space<vmem>>, %arg22: memref<1x16x128xbf16, #tpu.memory_space<vmem>>) attributes {dimension_semantics = [#tpu.dimension_semantics<parallel>, #tpu.dimension_semantics<parallel>], iteration_bounds = array<i64: 2, 3>, scalar_prefetch = 0 : i64, scratch_operands = 0 : i64, tpu.core_type = #tpu.core_type<tc>, window_params = [{transform_indices = @transform_0, window_bounds = array<i64: 1, 16, 128>}, {transform_indices = @transform_1, window_bounds = array<i64: 1, 16, 48>}, {transform_indices = @transform_2, window_bounds = array<i64: 1, 1, 8, 128>}, {transform_indices = @transform_3, window_bounds = array<i64: 1, 1, 8, 48>}, {pipeline_mode = #tpu.pipeline_mode<synchronous>, transform_indices = @transform_4, window_bounds = array<i64: 7, 128>}, {pipeline_mode = #tpu.pipeline_mode<synchronous>, transform_indices = @transform_5, window_bounds = array<i64: 7, 48>}, {pipeline_mode = #tpu.pipeline_mode<synchronous>, transform_indices = @transform_6, window_bounds = array<i64: 1, 128>}, {pipeline_mode = #tpu.pipeline_mode<synchronous>, transform_indices = @transform_7, window_bounds = array<i64: 1, 48>}, {transform_indices = @transform_8, window_bounds = array<i64: 1, 1, 128>}, {transform_indices = @transform_9, window_bounds = array<i64: 1, 1, 48>}, {transform_indices = @transform_10, window_bounds = array<i64: 1, 1, 128>}, {transform_indices = @transform_11, window_bounds = array<i64: 1, 1, 48>}, {pipeline_mode = #tpu.pipeline_mode<synchronous>, transform_indices = @transform_12, window_bounds = array<i64: 128, 128>}, {pipeline_mode = #tpu.pipeline_mode<synchronous>, transform_indices = @transform_13, window_bounds = array<i64: 48, 128>}, {pipeline_mode = #tpu.pipeline_mode<synchronous>, transform_indices = @transform_14, window_bounds = array<i64: 1, 128>}, {pipeline_mode = #tpu.pipeline_mode<synchronous>, transform_indices = @transform_15, window_bounds = array<i64: 128, 128>}, {pipeline_mode = #tpu.pipeline_mode<synchronous>, transform_indices = @transform_16, window_bounds = array<i64: 1, 128>}, {pipeline_mode = #tpu.pipeline_mode<synchronous>, transform_indices = @transform_17, window_bounds = array<i64: 128, 128>}, {pipeline_mode = #tpu.pipeline_mode<synchronous>, transform_indices = @transform_18, window_bounds = array<i64: 48, 128>}, {pipeline_mode = #tpu.pipeline_mode<synchronous>, transform_indices = @transform_19, window_bounds = array<i64: 1, 128>}, {transform_indices = @transform_20, window_bounds = array<i64: 1, 16, 128>}]} {
    %c0 = arith.constant 0 : index
    %c0_0 = arith.constant 0 : index
    %c0_1 = arith.constant 0 : index
    %0 = vector.load %arg2[%c0, %c0_0, %c0_1] : memref<1x16x128xbf16, #tpu.memory_space<vmem>>, vector<1x16x128xbf16>
    %1 = vector.shape_cast %0 : vector<1x16x128xbf16> to vector<16x128xbf16>
    %2 = arith.extf %1 : vector<16x128xbf16> to vector<16x128xf32>
    %c0_2 = arith.constant 0 : index
    %c0_3 = arith.constant 0 : index
    %c0_4 = arith.constant 0 : index
    %c0_5 = arith.constant 0 : index
    %3 = vector.load %arg4[%c0_2, %c0_3, %c0_4, %c0_5] : memref<1x1x8x128xbf16, #tpu.memory_space<vmem>>, vector<1x1x8x128xbf16>
    %4 = vector.shape_cast %3 : vector<1x1x8x128xbf16> to vector<8x128xbf16>
    %5 = arith.extf %4 : vector<8x128xbf16> to vector<8x128xf32>
    %6 = vector.extract_strided_slice %5 {offsets = [0, 0], sizes = [3, 128], strides = [1, 1]} : vector<8x128xf32> to vector<3x128xf32>
    %7 = vector.extract_strided_slice %5 {offsets = [3, 0], sizes = [3, 128], strides = [1, 1]} : vector<8x128xf32> to vector<3x128xf32>
    %8 = tpu.concatenate %6, %2, %7 in 0 : vector<3x128xf32>, vector<16x128xf32>, vector<3x128xf32> -> vector<22x128xf32>
    %c0_6 = arith.constant 0 : index
    %c0_7 = arith.constant 0 : index
    %9 = vector.load %arg6[%c0_6, %c0_7] : memref<7x128xf32, #tpu.memory_space<vmem>>, vector<7x128xf32>
    %10 = vector.extract_strided_slice %8 {offsets = [0, 0], sizes = [16, 128], strides = [1, 1]} : vector<22x128xf32> to vector<16x128xf32>
    %11 = vector.extract_strided_slice %9 {offsets = [0, 0], sizes = [1, 128], strides = [1, 1]} : vector<7x128xf32> to vector<1x128xf32>
    %12 = vector.broadcast %11 : vector<1x128xf32> to vector<16x128xf32>
    %13 = arith.mulf %10, %12 : vector<16x128xf32>
    %14 = vector.extract_strided_slice %8 {offsets = [1, 0], sizes = [16, 128], strides = [1, 1]} : vector<22x128xf32> to vector<16x128xf32>
    %15 = vector.extract_strided_slice %9 {offsets = [1, 0], sizes = [1, 128], strides = [1, 1]} : vector<7x128xf32> to vector<1x128xf32>
    %16 = vector.broadcast %15 : vector<1x128xf32> to vector<16x128xf32>
    %17 = arith.mulf %14, %16 : vector<16x128xf32>
    %18 = arith.addf %13, %17 : vector<16x128xf32>
    %19 = vector.extract_strided_slice %8 {offsets = [2, 0], sizes = [16, 128], strides = [1, 1]} : vector<22x128xf32> to vector<16x128xf32>
    %20 = vector.extract_strided_slice %9 {offsets = [2, 0], sizes = [1, 128], strides = [1, 1]} : vector<7x128xf32> to vector<1x128xf32>
    %21 = vector.broadcast %20 : vector<1x128xf32> to vector<16x128xf32>
    %22 = arith.mulf %19, %21 : vector<16x128xf32>
    %23 = arith.addf %18, %22 : vector<16x128xf32>
    %24 = vector.extract_strided_slice %8 {offsets = [3, 0], sizes = [16, 128], strides = [1, 1]} : vector<22x128xf32> to vector<16x128xf32>
    %25 = vector.extract_strided_slice %9 {offsets = [3, 0], sizes = [1, 128], strides = [1, 1]} : vector<7x128xf32> to vector<1x128xf32>
    %26 = vector.broadcast %25 : vector<1x128xf32> to vector<16x128xf32>
    %27 = arith.mulf %24, %26 : vector<16x128xf32>
    %28 = arith.addf %23, %27 : vector<16x128xf32>
    %29 = vector.extract_strided_slice %8 {offsets = [4, 0], sizes = [16, 128], strides = [1, 1]} : vector<22x128xf32> to vector<16x128xf32>
    %30 = vector.extract_strided_slice %9 {offsets = [4, 0], sizes = [1, 128], strides = [1, 1]} : vector<7x128xf32> to vector<1x128xf32>
    %31 = vector.broadcast %30 : vector<1x128xf32> to vector<16x128xf32>
    %32 = arith.mulf %29, %31 : vector<16x128xf32>
    %33 = arith.addf %28, %32 : vector<16x128xf32>
    %34 = vector.extract_strided_slice %8 {offsets = [5, 0], sizes = [16, 128], strides = [1, 1]} : vector<22x128xf32> to vector<16x128xf32>
    %35 = vector.extract_strided_slice %9 {offsets = [5, 0], sizes = [1, 128], strides = [1, 1]} : vector<7x128xf32> to vector<1x128xf32>
    %36 = vector.broadcast %35 : vector<1x128xf32> to vector<16x128xf32>
    %37 = arith.mulf %34, %36 : vector<16x128xf32>
    %38 = arith.addf %33, %37 : vector<16x128xf32>
    %39 = vector.extract_strided_slice %8 {offsets = [6, 0], sizes = [16, 128], strides = [1, 1]} : vector<22x128xf32> to vector<16x128xf32>
    %40 = vector.extract_strided_slice %9 {offsets = [6, 0], sizes = [1, 128], strides = [1, 1]} : vector<7x128xf32> to vector<1x128xf32>
    %41 = vector.broadcast %40 : vector<1x128xf32> to vector<16x128xf32>
    %42 = arith.mulf %39, %41 : vector<16x128xf32>
    %43 = arith.addf %38, %42 : vector<16x128xf32>
    %c0_8 = arith.constant 0 : index
    %c0_9 = arith.constant 0 : index
    %44 = vector.load %arg8[%c0_8, %c0_9] : memref<1x128xf32, #tpu.memory_space<vmem>>, vector<1x128xf32>
    %45 = vector.broadcast %44 : vector<1x128xf32> to vector<16x128xf32>
    %46 = arith.addf %43, %45 : vector<16x128xf32>
    %cst = arith.constant dense<0.000000e+00> : vector<16xf32>
    %47 = vector.multi_reduction <add>, %46, %cst [1] : vector<16x128xf32> to vector<16xf32>
    %48 = vector.shape_cast %47 : vector<16xf32> to vector<16x1xf32>
    %c0_10 = arith.constant 0 : index
    %c0_11 = arith.constant 0 : index
    %c0_12 = arith.constant 0 : index
    %49 = vector.load %arg3[%c0_10, %c0_11, %c0_12] : memref<1x16x48xbf16, #tpu.memory_space<vmem>>, vector<1x16x48xbf16>
    %50 = vector.shape_cast %49 : vector<1x16x48xbf16> to vector<16x48xbf16>
    %51 = arith.extf %50 : vector<16x48xbf16> to vector<16x48xf32>
    %c0_13 = arith.constant 0 : index
    %c0_14 = arith.constant 0 : index
    %c0_15 = arith.constant 0 : index
    %c0_16 = arith.constant 0 : index
    %52 = vector.load %arg5[%c0_13, %c0_14, %c0_15, %c0_16] : memref<1x1x8x48xbf16, #tpu.memory_space<vmem>>, vector<1x1x8x48xbf16>
    %53 = vector.shape_cast %52 : vector<1x1x8x48xbf16> to vector<8x48xbf16>
    %54 = arith.extf %53 : vector<8x48xbf16> to vector<8x48xf32>
    %55 = vector.extract_strided_slice %54 {offsets = [0, 0], sizes = [3, 48], strides = [1, 1]} : vector<8x48xf32> to vector<3x48xf32>
    %56 = vector.extract_strided_slice %54 {offsets = [3, 0], sizes = [3, 48], strides = [1, 1]} : vector<8x48xf32> to vector<3x48xf32>
    %57 = tpu.concatenate %55, %51, %56 in 0 : vector<3x48xf32>, vector<16x48xf32>, vector<3x48xf32> -> vector<22x48xf32>
    %c0_17 = arith.constant 0 : index
    %c0_18 = arith.constant 0 : index
    %58 = vector.load %arg7[%c0_17, %c0_18] : memref<7x48xf32, #tpu.memory_space<vmem>>, vector<7x48xf32>
    %59 = vector.extract_strided_slice %57 {offsets = [0, 0], sizes = [16, 48], strides = [1, 1]} : vector<22x48xf32> to vector<16x48xf32>
    %60 = vector.extract_strided_slice %58 {offsets = [0, 0], sizes = [1, 48], strides = [1, 1]} : vector<7x48xf32> to vector<1x48xf32>
    %61 = vector.broadcast %60 : vector<1x48xf32> to vector<16x48xf32>
    %62 = arith.mulf %59, %61 : vector<16x48xf32>
    %63 = vector.extract_strided_slice %57 {offsets = [1, 0], sizes = [16, 48], strides = [1, 1]} : vector<22x48xf32> to vector<16x48xf32>
    %64 = vector.extract_strided_slice %58 {offsets = [1, 0], sizes = [1, 48], strides = [1, 1]} : vector<7x48xf32> to vector<1x48xf32>
    %65 = vector.broadcast %64 : vector<1x48xf32> to vector<16x48xf32>
    %66 = arith.mulf %63, %65 : vector<16x48xf32>
    %67 = arith.addf %62, %66 : vector<16x48xf32>
    %68 = vector.extract_strided_slice %57 {offsets = [2, 0], sizes = [16, 48], strides = [1, 1]} : vector<22x48xf32> to vector<16x48xf32>
    %69 = vector.extract_strided_slice %58 {offsets = [2, 0], sizes = [1, 48], strides = [1, 1]} : vector<7x48xf32> to vector<1x48xf32>
    %70 = vector.broadcast %69 : vector<1x48xf32> to vector<16x48xf32>
    %71 = arith.mulf %68, %70 : vector<16x48xf32>
    %72 = arith.addf %67, %71 : vector<16x48xf32>
    %73 = vector.extract_strided_slice %57 {offsets = [3, 0], sizes = [16, 48], strides = [1, 1]} : vector<22x48xf32> to vector<16x48xf32>
    %74 = vector.extract_strided_slice %58 {offsets = [3, 0], sizes = [1, 48], strides = [1, 1]} : vector<7x48xf32> to vector<1x48xf32>
    %75 = vector.broadcast %74 : vector<1x48xf32> to vector<16x48xf32>
    %76 = arith.mulf %73, %75 : vector<16x48xf32>
    %77 = arith.addf %72, %76 : vector<16x48xf32>
    %78 = vector.extract_strided_slice %57 {offsets = [4, 0], sizes = [16, 48], strides = [1, 1]} : vector<22x48xf32> to vector<16x48xf32>
    %79 = vector.extract_strided_slice %58 {offsets = [4, 0], sizes = [1, 48], strides = [1, 1]} : vector<7x48xf32> to vector<1x48xf32>
    %80 = vector.broadcast %79 : vector<1x48xf32> to vector<16x48xf32>
    %81 = arith.mulf %78, %80 : vector<16x48xf32>
    %82 = arith.addf %77, %81 : vector<16x48xf32>
    %83 = vector.extract_strided_slice %57 {offsets = [5, 0], sizes = [16, 48], strides = [1, 1]} : vector<22x48xf32> to vector<16x48xf32>
    %84 = vector.extract_strided_slice %58 {offsets = [5, 0], sizes = [1, 48], strides = [1, 1]} : vector<7x48xf32> to vector<1x48xf32>
    %85 = vector.broadcast %84 : vector<1x48xf32> to vector<16x48xf32>
    %86 = arith.mulf %83, %85 : vector<16x48xf32>
    %87 = arith.addf %82, %86 : vector<16x48xf32>
    %88 = vector.extract_strided_slice %57 {offsets = [6, 0], sizes = [16, 48], strides = [1, 1]} : vector<22x48xf32> to vector<16x48xf32>
    %89 = vector.extract_strided_slice %58 {offsets = [6, 0], sizes = [1, 48], strides = [1, 1]} : vector<7x48xf32> to vector<1x48xf32>
    %90 = vector.broadcast %89 : vector<1x48xf32> to vector<16x48xf32>
    %91 = arith.mulf %88, %90 : vector<16x48xf32>
    %92 = arith.addf %87, %91 : vector<16x48xf32>
    %c0_19 = arith.constant 0 : index
    %c0_20 = arith.constant 0 : index
    %93 = vector.load %arg9[%c0_19, %c0_20] : memref<1x48xf32, #tpu.memory_space<vmem>>, vector<1x48xf32>
    %94 = vector.broadcast %93 : vector<1x48xf32> to vector<16x48xf32>
    %95 = arith.addf %92, %94 : vector<16x48xf32>
    %cst_21 = arith.constant dense<0.000000e+00> : vector<16xf32>
    %96 = vector.multi_reduction <add>, %95, %cst_21 [1] : vector<16x48xf32> to vector<16xf32>
    %97 = vector.shape_cast %96 : vector<16xf32> to vector<16x1xf32>
    %98 = arith.addf %48, %97 : vector<16x1xf32>
    %cst_22 = arith.constant 1.760000e+02 : f32
    %99 = vector.broadcast %cst_22 : f32 to vector<16x1xf32>
    %100 = arith.divf %98, %99 : vector<16x1xf32>
    %101 = vector.broadcast %100 : vector<16x1xf32> to vector<16x128xf32>
    %102 = arith.subf %46, %101 : vector<16x128xf32>
    %103 = arith.mulf %102, %102 : vector<16x128xf32>
    %cst_23 = arith.constant dense<0.000000e+00> : vector<16xf32>
    %104 = vector.multi_reduction <add>, %103, %cst_23 [1] : vector<16x128xf32> to vector<16xf32>
    %105 = vector.shape_cast %104 : vector<16xf32> to vector<16x1xf32>
    %106 = vector.broadcast %100 : vector<16x1xf32> to vector<16x48xf32>
    %107 = arith.subf %95, %106 : vector<16x48xf32>
    %108 = arith.mulf %107, %107 : vector<16x48xf32>
    %cst_24 = arith.constant dense<0.000000e+00> : vector<16xf32>
    %109 = vector.multi_reduction <add>, %108, %cst_24 [1] : vector<16x48xf32> to vector<16xf32>
    %110 = vector.shape_cast %109 : vector<16xf32> to vector<16x1xf32>
    %111 = arith.addf %105, %110 : vector<16x1xf32>
    %cst_25 = arith.constant 1.760000e+02 : f32
    %112 = vector.broadcast %cst_25 : f32 to vector<16x1xf32>
    %113 = arith.divf %111, %112 : vector<16x1xf32>
    %cst_26 = arith.constant 9.99999997E-7 : f32
    %114 = vector.broadcast %cst_26 : f32 to vector<16x1xf32>
    %115 = arith.addf %113, %114 : vector<16x1xf32>
    %116 = math.rsqrt %115 : vector<16x1xf32>
    %117 = vector.broadcast %116 : vector<16x1xf32> to vector<16x128xf32>
    %118 = arith.mulf %102, %117 : vector<16x128xf32>
    %c0_27 = arith.constant 0 : index
    %c0_28 = arith.constant 0 : index
    %c0_29 = arith.constant 0 : index
    %119 = vector.load %arg10[%c0_27, %c0_28, %c0_29] : memref<1x1x128xf32, #tpu.memory_space<vmem>>, vector<1x1x128xf32>
    %120 = vector.shape_cast %119 : vector<1x1x128xf32> to vector<1x128xf32>
    %121 = vector.broadcast %120 : vector<1x128xf32> to vector<16x128xf32>
    %122 = arith.mulf %118, %121 : vector<16x128xf32>
    %c0_30 = arith.constant 0 : index
    %c0_31 = arith.constant 0 : index
    %c0_32 = arith.constant 0 : index
    %123 = vector.load %arg12[%c0_30, %c0_31, %c0_32] : memref<1x1x128xf32, #tpu.memory_space<vmem>>, vector<1x1x128xf32>
    %124 = vector.shape_cast %123 : vector<1x1x128xf32> to vector<1x128xf32>
    %125 = vector.broadcast %124 : vector<1x128xf32> to vector<16x128xf32>
    %126 = arith.addf %122, %125 : vector<16x128xf32>
    %127 = arith.truncf %126 : vector<16x128xf32> to vector<16x128xbf16>
    %c0_33 = arith.constant 0 : index
    %c0_34 = arith.constant 0 : index
    %128 = vector.load %arg14[%c0_33, %c0_34] : memref<128x128xbf16, #tpu.memory_space<vmem>>, vector<128x128xbf16>
    %cst_35 = arith.constant dense<0.000000e+00> : vector<16x128xf32>
    %129 = tpu.matmul %127, %128, %cst_35 {dimension_numbers = #tpu.dot_dimension_numbers<[1], [0], [0], [1], [0, 0, 1, 1], [], []>} : vector<16x128xbf16>, vector<128x128xbf16>, vector<16x128xf32> -> vector<16x128xf32>
    %130 = vector.broadcast %116 : vector<16x1xf32> to vector<16x48xf32>
    %131 = arith.mulf %107, %130 : vector<16x48xf32>
    %c0_36 = arith.constant 0 : index
    %c0_37 = arith.constant 0 : index
    %c0_38 = arith.constant 0 : index
    %132 = vector.load %arg11[%c0_36, %c0_37, %c0_38] : memref<1x1x48xf32, #tpu.memory_space<vmem>>, vector<1x1x48xf32>
    %133 = vector.shape_cast %132 : vector<1x1x48xf32> to vector<1x48xf32>
    %134 = vector.broadcast %133 : vector<1x48xf32> to vector<16x48xf32>
    %135 = arith.mulf %131, %134 : vector<16x48xf32>
    %c0_39 = arith.constant 0 : index
    %c0_40 = arith.constant 0 : index
    %c0_41 = arith.constant 0 : index
    %136 = vector.load %arg13[%c0_39, %c0_40, %c0_41] : memref<1x1x48xf32, #tpu.memory_space<vmem>>, vector<1x1x48xf32>
    %137 = vector.shape_cast %136 : vector<1x1x48xf32> to vector<1x48xf32>
    %138 = vector.broadcast %137 : vector<1x48xf32> to vector<16x48xf32>
    %139 = arith.addf %135, %138 : vector<16x48xf32>
    %140 = arith.truncf %139 : vector<16x48xf32> to vector<16x48xbf16>
    %c0_42 = arith.constant 0 : index
    %c0_43 = arith.constant 0 : index
    %141 = vector.load %arg15[%c0_42, %c0_43] : memref<48x128xbf16, #tpu.memory_space<vmem>>, vector<48x128xbf16>
    %cst_44 = arith.constant dense<0.000000e+00> : vector<16x128xf32>
    %142 = tpu.matmul %140, %141, %cst_44 {dimension_numbers = #tpu.dot_dimension_numbers<[1], [0], [0], [1], [0, 0, 1, 1], [], []>} : vector<16x48xbf16>, vector<48x128xbf16>, vector<16x128xf32> -> vector<16x128xf32>
    %143 = arith.addf %129, %142 : vector<16x128xf32>
    %c0_45 = arith.constant 0 : index
    %c0_46 = arith.constant 0 : index
    %144 = vector.load %arg16[%c0_45, %c0_46] : memref<1x128xf32, #tpu.memory_space<vmem>>, vector<1x128xf32>
    %145 = vector.broadcast %144 : vector<1x128xf32> to vector<16x128xf32>
    %146 = arith.addf %143, %145 : vector<16x128xf32>
    %cst_47 = arith.constant 5.000000e-01 : f32
    %147 = vector.broadcast %cst_47 : f32 to vector<16x128xf32>
    %148 = arith.mulf %147, %146 : vector<16x128xf32>
    %cst_48 = arith.constant 4.471500e-02 : f32
    %149 = vector.broadcast %cst_48 : f32 to vector<16x128xf32>
    %150 = arith.mulf %149, %146 : vector<16x128xf32>
    %151 = arith.mulf %150, %146 : vector<16x128xf32>
    %152 = arith.mulf %151, %146 : vector<16x128xf32>
    %153 = arith.addf %146, %152 : vector<16x128xf32>
    %cst_49 = arith.constant 0.797884583 : f32
    %154 = vector.broadcast %cst_49 : f32 to vector<16x128xf32>
    %155 = arith.mulf %154, %153 : vector<16x128xf32>
    %156 = math.tanh %155 : vector<16x128xf32>
    %cst_50 = arith.constant 1.000000e+00 : f32
    %157 = vector.broadcast %cst_50 : f32 to vector<16x128xf32>
    %158 = arith.addf %157, %156 : vector<16x128xf32>
    %159 = arith.mulf %148, %158 : vector<16x128xf32>
    %160 = arith.truncf %159 : vector<16x128xf32> to vector<16x128xbf16>
    %c0_51 = arith.constant 0 : index
    %c0_52 = arith.constant 0 : index
    %161 = vector.load %arg17[%c0_51, %c0_52] : memref<128x128xbf16, #tpu.memory_space<vmem>>, vector<128x128xbf16>
    %cst_53 = arith.constant dense<0.000000e+00> : vector<16x128xf32>
    %162 = tpu.matmul %160, %161, %cst_53 {dimension_numbers = #tpu.dot_dimension_numbers<[1], [0], [0], [1], [0, 0, 1, 1], [], []>} : vector<16x128xbf16>, vector<128x128xbf16>, vector<16x128xf32> -> vector<16x128xf32>
    %c0_54 = arith.constant 0 : index
    %c0_55 = arith.constant 0 : index
    %163 = vector.load %arg18[%c0_54, %c0_55] : memref<1x128xf32, #tpu.memory_space<vmem>>, vector<1x128xf32>
    %164 = vector.broadcast %163 : vector<1x128xf32> to vector<16x128xf32>
    %165 = arith.addf %162, %164 : vector<16x128xf32>
    %c0_56 = arith.constant 0 : index
    %c0_57 = arith.constant 0 : index
    %c0_58 = arith.constant 0 : index
    %166 = vector.load %arg2[%c0_56, %c0_57, %c0_58] : memref<1x16x128xbf16, #tpu.memory_space<vmem>>, vector<1x16x128xbf16>
    %167 = vector.shape_cast %166 : vector<1x16x128xbf16> to vector<16x128xbf16>
    %c0_59 = arith.constant 0 : index
    %c0_60 = arith.constant 0 : index
    %168 = vector.load %arg19[%c0_59, %c0_60] : memref<128x128xbf16, #tpu.memory_space<vmem>>, vector<128x128xbf16>
    %cst_61 = arith.constant dense<0.000000e+00> : vector<16x128xf32>
    %169 = tpu.matmul %167, %168, %cst_61 {dimension_numbers = #tpu.dot_dimension_numbers<[1], [0], [0], [1], [0, 0, 1, 1], [], []>} : vector<16x128xbf16>, vector<128x128xbf16>, vector<16x128xf32> -> vector<16x128xf32>
    %c0_62 = arith.constant 0 : index
    %c0_63 = arith.constant 0 : index
    %c0_64 = arith.constant 0 : index
    %170 = vector.load %arg3[%c0_62, %c0_63, %c0_64] : memref<1x16x48xbf16, #tpu.memory_space<vmem>>, vector<1x16x48xbf16>
    %171 = vector.shape_cast %170 : vector<1x16x48xbf16> to vector<16x48xbf16>
    %c0_65 = arith.constant 0 : index
    %c0_66 = arith.constant 0 : index
    %172 = vector.load %arg20[%c0_65, %c0_66] : memref<48x128xbf16, #tpu.memory_space<vmem>>, vector<48x128xbf16>
    %cst_67 = arith.constant dense<0.000000e+00> : vector<16x128xf32>
    %173 = tpu.matmul %171, %172, %cst_67 {dimension_numbers = #tpu.dot_dimension_numbers<[1], [0], [0], [1], [0, 0, 1, 1], [], []>} : vector<16x48xbf16>, vector<48x128xbf16>, vector<16x128xf32> -> vector<16x128xf32>
    %174 = arith.addf %169, %173 : vector<16x128xf32>
    %175 = arith.addf %165, %174 : vector<16x128xf32>
    %c0_68 = arith.constant 0 : index
    %c0_69 = arith.constant 0 : index
    %176 = vector.load %arg21[%c0_68, %c0_69] : memref<1x128xf32, #tpu.memory_space<vmem>>, vector<1x128xf32>
    %177 = vector.broadcast %176 : vector<1x128xf32> to vector<16x128xf32>
    %178 = arith.addf %175, %177 : vector<16x128xf32>
    %179 = tpu.iota {dimensions = array<i32: 0>} : vector<16x1xi32>
    %c16_i32 = arith.constant 16 : i32
    %180 = arith.muli %arg1, %c16_i32 : i32
    %181 = vector.broadcast %180 : i32 to vector<16x1xi32>
    %182 = arith.addi %179, %181 : vector<16x1xi32>
    %c40_i32 = arith.constant 40 : i32
    %183 = vector.broadcast %c40_i32 : i32 to vector<16x1xi32>
    %184 = arith.cmpi slt, %182, %183 : vector<16x1xi32>
    %cst_70 = arith.constant 0.000000e+00 : f32
    %185 = vector.shape_cast %184 : vector<16x1xi1> to vector<16x1xi1>
    %186 = vector.broadcast %185 : vector<16x1xi1> to vector<16x128xi1>
    %187 = vector.broadcast %cst_70 : f32 to vector<16x128xf32>
    %188 = arith.select %186, %178, %187 : vector<16x128xi1>, vector<16x128xf32>
    %189 = arith.truncf %188 : vector<16x128xf32> to vector<16x128xbf16>
    %c0_71 = arith.constant 0 : index
    %c0_72 = arith.constant 0 : index
    %c0_73 = arith.constant 0 : index
    %190 = vector.load %arg22[%c0_71, %c0_72, %c0_73] : memref<1x16x128xbf16, #tpu.memory_space<vmem>>, vector<1x16x128xbf16>
    %191 = vector.shape_cast %190 : vector<1x16x128xbf16> to vector<16x128xbf16>
    %192 = vector.shape_cast %189 : vector<16x128xbf16> to vector<1x16x128xbf16>
    tpu.vector_store %arg22[%c0_71, %c0_72, %c0_73], %192 {strides = array<i32>} : memref<1x16x128xbf16, #tpu.memory_space<vmem>>, vector<1x16x128xbf16>,
    return
  }
  func.func @transform_0(%arg0: i32, %arg1: i32) -> (i32, i32, i32) {
    %c0_i32 = arith.constant 0 : i32
    %c0_i32_0 = arith.constant 0 : i32
    return %arg0, %arg1, %c0_i32 : i32, i32, i32
  }
  func.func @transform_1(%arg0: i32, %arg1: i32) -> (i32, i32, i32) {
    %c0_i32 = arith.constant 0 : i32
    %c0_i32_0 = arith.constant 0 : i32
    return %arg0, %arg1, %c0_i32 : i32, i32, i32
  }
  func.func @transform_2(%arg0: i32, %arg1: i32) -> (i32, i32, i32, i32) {
    %c0_i32 = arith.constant 0 : i32
    %c0_i32_0 = arith.constant 0 : i32
    %c0_i32_1 = arith.constant 0 : i32
    return %arg0, %arg1, %c0_i32, %c0_i32_0 : i32, i32, i32, i32
  }
  func.func @transform_3(%arg0: i32, %arg1: i32) -> (i32, i32, i32, i32) {
    %c0_i32 = arith.constant 0 : i32
    %c0_i32_0 = arith.constant 0 : i32
    %c0_i32_1 = arith.constant 0 : i32
    return %arg0, %arg1, %c0_i32, %c0_i32_0 : i32, i32, i32, i32
  }
  func.func @transform_4(%arg0: i32, %arg1: i32) -> (i32, i32) {
    %c0_i32 = arith.constant 0 : i32
    %c0_i32_0 = arith.constant 0 : i32
    %c0_i32_1 = arith.constant 0 : i32
    return %c0_i32, %c0_i32_0 : i32, i32
  }
  func.func @transform_5(%arg0: i32, %arg1: i32) -> (i32, i32) {
    %c0_i32 = arith.constant 0 : i32
    %c0_i32_0 = arith.constant 0 : i32
    %c0_i32_1 = arith.constant 0 : i32
    return %c0_i32, %c0_i32_0 : i32, i32
  }
  func.func @transform_6(%arg0: i32, %arg1: i32) -> (i32, i32) {
    %c0_i32 = arith.constant 0 : i32
    %c0_i32_0 = arith.constant 0 : i32
    %c0_i32_1 = arith.constant 0 : i32
    return %c0_i32, %c0_i32_0 : i32, i32
  }
  func.func @transform_7(%arg0: i32, %arg1: i32) -> (i32, i32) {
    %c0_i32 = arith.constant 0 : i32
    %c0_i32_0 = arith.constant 0 : i32
    %c0_i32_1 = arith.constant 0 : i32
    return %c0_i32, %c0_i32_0 : i32, i32
  }
  func.func @transform_8(%arg0: i32, %arg1: i32) -> (i32, i32, i32) {
    %c0_i32 = arith.constant 0 : i32
    %c0_i32_0 = arith.constant 0 : i32
    %c0_i32_1 = arith.constant 0 : i32
    return %arg0, %c0_i32, %c0_i32_0 : i32, i32, i32
  }
  func.func @transform_9(%arg0: i32, %arg1: i32) -> (i32, i32, i32) {
    %c0_i32 = arith.constant 0 : i32
    %c0_i32_0 = arith.constant 0 : i32
    %c0_i32_1 = arith.constant 0 : i32
    return %arg0, %c0_i32, %c0_i32_0 : i32, i32, i32
  }
  func.func @transform_10(%arg0: i32, %arg1: i32) -> (i32, i32, i32) {
    %c0_i32 = arith.constant 0 : i32
    %c0_i32_0 = arith.constant 0 : i32
    %c0_i32_1 = arith.constant 0 : i32
    return %arg0, %c0_i32, %c0_i32_0 : i32, i32, i32
  }
  func.func @transform_11(%arg0: i32, %arg1: i32) -> (i32, i32, i32) {
    %c0_i32 = arith.constant 0 : i32
    %c0_i32_0 = arith.constant 0 : i32
    %c0_i32_1 = arith.constant 0 : i32
    return %arg0, %c0_i32, %c0_i32_0 : i32, i32, i32
  }
  func.func @transform_12(%arg0: i32, %arg1: i32) -> (i32, i32) {
    %c0_i32 = arith.constant 0 : i32
    %c0_i32_0 = arith.constant 0 : i32
    %c0_i32_1 = arith.constant 0 : i32
    return %c0_i32, %c0_i32_0 : i32, i32
  }
  func.func @transform_13(%arg0: i32, %arg1: i32) -> (i32, i32) {
    %c0_i32 = arith.constant 0 : i32
    %c0_i32_0 = arith.constant 0 : i32
    %c0_i32_1 = arith.constant 0 : i32
    return %c0_i32, %c0_i32_0 : i32, i32
  }
  func.func @transform_14(%arg0: i32, %arg1: i32) -> (i32, i32) {
    %c0_i32 = arith.constant 0 : i32
    %c0_i32_0 = arith.constant 0 : i32
    %c0_i32_1 = arith.constant 0 : i32
    return %c0_i32, %c0_i32_0 : i32, i32
  }
  func.func @transform_15(%arg0: i32, %arg1: i32) -> (i32, i32) {
    %c0_i32 = arith.constant 0 : i32
    %c0_i32_0 = arith.constant 0 : i32
    %c0_i32_1 = arith.constant 0 : i32
    return %c0_i32, %c0_i32_0 : i32, i32
  }
  func.func @transform_16(%arg0: i32, %arg1: i32) -> (i32, i32) {
    %c0_i32 = arith.constant 0 : i32
    %c0_i32_0 = arith.constant 0 : i32
    %c0_i32_1 = arith.constant 0 : i32
    return %c0_i32, %c0_i32_0 : i32, i32
  }
  func.func @transform_17(%arg0: i32, %arg1: i32) -> (i32, i32) {
    %c0_i32 = arith.constant 0 : i32
    %c0_i32_0 = arith.constant 0 : i32
    %c0_i32_1 = arith.constant 0 : i32
    return %c0_i32, %c0_i32_0 : i32, i32
  }
  func.func @transform_18(%arg0: i32, %arg1: i32) -> (i32, i32) {
    %c0_i32 = arith.constant 0 : i32
    %c0_i32_0 = arith.constant 0 : i32
    %c0_i32_1 = arith.constant 0 : i32
    return %c0_i32, %c0_i32_0 : i32, i32
  }
  func.func @transform_19(%arg0: i32, %arg1: i32) -> (i32, i32) {
    %c0_i32 = arith.constant 0 : i32
    %c0_i32_0 = arith.constant 0 : i32
    %c0_i32_1 = arith.constant 0 : i32
    return %c0_i32, %c0_i32_0 : i32, i32
  }
  func.func @transform_20(%arg0: i32, %arg1: i32) -> (i32, i32, i32) {
    %c0_i32 = arith.constant 0 : i32
    %c0_i32_0 = arith.constant 0 : i32
    return %arg0, %arg1, %c0_i32 : i32, i32, i32
  }
}

module attributes {stable_mosaic.version = 11 : i64} {
  func.func @_convnext_kernel(%arg0: i32, %arg1: i32, %arg2: memref<1x16x128xbf16, #tpu.memory_space<vmem>>, %arg3: memref<1x16x48xbf16, #tpu.memory_space<vmem>>, %arg4: memref<1x1x8x128xbf16, #tpu.memory_space<vmem>>, %arg5: memref<1x1x8x48xbf16, #tpu.memory_space<vmem>>, %arg6: memref<7x128xf32, #tpu.memory_space<vmem>>, %arg7: memref<7x48xf32, #tpu.memory_space<vmem>>, %arg8: memref<1x128xf32, #tpu.memory_space<vmem>>, %arg9: memref<1x48xf32, #tpu.memory_space<vmem>>, %arg10: memref<1x1x128xf32, #tpu.memory_space<vmem>>, %arg11: memref<1x1x48xf32, #tpu.memory_space<vmem>>, %arg12: memref<1x1x128xf32, #tpu.memory_space<vmem>>, %arg13: memref<1x1x48xf32, #tpu.memory_space<vmem>>, %arg14: memref<128x128xbf16, #tpu.memory_space<vmem>>, %arg15: memref<48x128xbf16, #tpu.memory_space<vmem>>, %arg16: memref<1x128xf32, #tpu.memory_space<vmem>>, %arg17: memref<128x64xbf16, #tpu.memory_space<vmem>>, %arg18: memref<1x64xf32, #tpu.memory_space<vmem>>, %arg19: memref<128x64xbf16, #tpu.memory_space<vmem>>, %arg20: memref<48x64xbf16, #tpu.memory_space<vmem>>, %arg21: memref<1x64xf32, #tpu.memory_space<vmem>>, %arg22: memref<1x16x64xbf16, #tpu.memory_space<vmem>>) attributes {dimension_semantics = [#tpu.dimension_semantics<parallel>, #tpu.dimension_semantics<parallel>], iteration_bounds = array<i64: 2, 3>, scalar_prefetch = 0 : i64, scratch_operands = 0 : i64, tpu.core_type = #tpu.core_type<tc>, window_params = [{transform_indices = @transform_0, window_bounds = array<i64: 1, 16, 128>}, {transform_indices = @transform_1, window_bounds = array<i64: 1, 16, 48>}, {transform_indices = @transform_2, window_bounds = array<i64: 1, 1, 8, 128>}, {transform_indices = @transform_3, window_bounds = array<i64: 1, 1, 8, 48>}, {pipeline_mode = #tpu.pipeline_mode<synchronous>, transform_indices = @transform_4, window_bounds = array<i64: 7, 128>}, {pipeline_mode = #tpu.pipeline_mode<synchronous>, transform_indices = @transform_5, window_bounds = array<i64: 7, 48>}, {pipeline_mode = #tpu.pipeline_mode<synchronous>, transform_indices = @transform_6, window_bounds = array<i64: 1, 128>}, {pipeline_mode = #tpu.pipeline_mode<synchronous>, transform_indices = @transform_7, window_bounds = array<i64: 1, 48>}, {transform_indices = @transform_8, window_bounds = array<i64: 1, 1, 128>}, {transform_indices = @transform_9, window_bounds = array<i64: 1, 1, 48>}, {transform_indices = @transform_10, window_bounds = array<i64: 1, 1, 128>}, {transform_indices = @transform_11, window_bounds = array<i64: 1, 1, 48>}, {pipeline_mode = #tpu.pipeline_mode<synchronous>, transform_indices = @transform_12, window_bounds = array<i64: 128, 128>}, {pipeline_mode = #tpu.pipeline_mode<synchronous>, transform_indices = @transform_13, window_bounds = array<i64: 48, 128>}, {pipeline_mode = #tpu.pipeline_mode<synchronous>, transform_indices = @transform_14, window_bounds = array<i64: 1, 128>}, {pipeline_mode = #tpu.pipeline_mode<synchronous>, transform_indices = @transform_15, window_bounds = array<i64: 128, 64>}, {pipeline_mode = #tpu.pipeline_mode<synchronous>, transform_indices = @transform_16, window_bounds = array<i64: 1, 64>}, {pipeline_mode = #tpu.pipeline_mode<synchronous>, transform_indices = @transform_17, window_bounds = array<i64: 128, 64>}, {pipeline_mode = #tpu.pipeline_mode<synchronous>, transform_indices = @transform_18, window_bounds = array<i64: 48, 64>}, {pipeline_mode = #tpu.pipeline_mode<synchronous>, transform_indices = @transform_19, window_bounds = array<i64: 1, 64>}, {transform_indices = @transform_20, window_bounds = array<i64: 1, 16, 64>}]} {
    %c0 = arith.constant 0 : index
    %c0_0 = arith.constant 0 : index
    %c0_1 = arith.constant 0 : index
    %0 = vector.load %arg2[%c0, %c0_0, %c0_1] : memref<1x16x128xbf16, #tpu.memory_space<vmem>>, vector<1x16x128xbf16>
    %1 = vector.shape_cast %0 : vector<1x16x128xbf16> to vector<16x128xbf16>
    %2 = arith.extf %1 : vector<16x128xbf16> to vector<16x128xf32>
    %c0_2 = arith.constant 0 : index
    %c0_3 = arith.constant 0 : index
    %c0_4 = arith.constant 0 : index
    %c0_5 = arith.constant 0 : index
    %3 = vector.load %arg4[%c0_2, %c0_3, %c0_4, %c0_5] : memref<1x1x8x128xbf16, #tpu.memory_space<vmem>>, vector<1x1x8x128xbf16>
    %4 = vector.shape_cast %3 : vector<1x1x8x128xbf16> to vector<8x128xbf16>
    %5 = arith.extf %4 : vector<8x128xbf16> to vector<8x128xf32>
    %6 = vector.extract_strided_slice %5 {offsets = [0, 0], sizes = [3, 128], strides = [1, 1]} : vector<8x128xf32> to vector<3x128xf32>
    %7 = vector.extract_strided_slice %5 {offsets = [3, 0], sizes = [3, 128], strides = [1, 1]} : vector<8x128xf32> to vector<3x128xf32>
    %8 = tpu.concatenate %6, %2, %7 in 0 : vector<3x128xf32>, vector<16x128xf32>, vector<3x128xf32> -> vector<22x128xf32>
    %c0_6 = arith.constant 0 : index
    %c0_7 = arith.constant 0 : index
    %9 = vector.load %arg6[%c0_6, %c0_7] : memref<7x128xf32, #tpu.memory_space<vmem>>, vector<7x128xf32>
    %10 = vector.extract_strided_slice %8 {offsets = [0, 0], sizes = [16, 128], strides = [1, 1]} : vector<22x128xf32> to vector<16x128xf32>
    %11 = vector.extract_strided_slice %9 {offsets = [0, 0], sizes = [1, 128], strides = [1, 1]} : vector<7x128xf32> to vector<1x128xf32>
    %12 = vector.broadcast %11 : vector<1x128xf32> to vector<16x128xf32>
    %13 = arith.mulf %10, %12 : vector<16x128xf32>
    %14 = vector.extract_strided_slice %8 {offsets = [1, 0], sizes = [16, 128], strides = [1, 1]} : vector<22x128xf32> to vector<16x128xf32>
    %15 = vector.extract_strided_slice %9 {offsets = [1, 0], sizes = [1, 128], strides = [1, 1]} : vector<7x128xf32> to vector<1x128xf32>
    %16 = vector.broadcast %15 : vector<1x128xf32> to vector<16x128xf32>
    %17 = arith.mulf %14, %16 : vector<16x128xf32>
    %18 = arith.addf %13, %17 : vector<16x128xf32>
    %19 = vector.extract_strided_slice %8 {offsets = [2, 0], sizes = [16, 128], strides = [1, 1]} : vector<22x128xf32> to vector<16x128xf32>
    %20 = vector.extract_strided_slice %9 {offsets = [2, 0], sizes = [1, 128], strides = [1, 1]} : vector<7x128xf32> to vector<1x128xf32>
    %21 = vector.broadcast %20 : vector<1x128xf32> to vector<16x128xf32>
    %22 = arith.mulf %19, %21 : vector<16x128xf32>
    %23 = arith.addf %18, %22 : vector<16x128xf32>
    %24 = vector.extract_strided_slice %8 {offsets = [3, 0], sizes = [16, 128], strides = [1, 1]} : vector<22x128xf32> to vector<16x128xf32>
    %25 = vector.extract_strided_slice %9 {offsets = [3, 0], sizes = [1, 128], strides = [1, 1]} : vector<7x128xf32> to vector<1x128xf32>
    %26 = vector.broadcast %25 : vector<1x128xf32> to vector<16x128xf32>
    %27 = arith.mulf %24, %26 : vector<16x128xf32>
    %28 = arith.addf %23, %27 : vector<16x128xf32>
    %29 = vector.extract_strided_slice %8 {offsets = [4, 0], sizes = [16, 128], strides = [1, 1]} : vector<22x128xf32> to vector<16x128xf32>
    %30 = vector.extract_strided_slice %9 {offsets = [4, 0], sizes = [1, 128], strides = [1, 1]} : vector<7x128xf32> to vector<1x128xf32>
    %31 = vector.broadcast %30 : vector<1x128xf32> to vector<16x128xf32>
    %32 = arith.mulf %29, %31 : vector<16x128xf32>
    %33 = arith.addf %28, %32 : vector<16x128xf32>
    %34 = vector.extract_strided_slice %8 {offsets = [5, 0], sizes = [16, 128], strides = [1, 1]} : vector<22x128xf32> to vector<16x128xf32>
    %35 = vector.extract_strided_slice %9 {offsets = [5, 0], sizes = [1, 128], strides = [1, 1]} : vector<7x128xf32> to vector<1x128xf32>
    %36 = vector.broadcast %35 : vector<1x128xf32> to vector<16x128xf32>
    %37 = arith.mulf %34, %36 : vector<16x128xf32>
    %38 = arith.addf %33, %37 : vector<16x128xf32>
    %39 = vector.extract_strided_slice %8 {offsets = [6, 0], sizes = [16, 128], strides = [1, 1]} : vector<22x128xf32> to vector<16x128xf32>
    %40 = vector.extract_strided_slice %9 {offsets = [6, 0], sizes = [1, 128], strides = [1, 1]} : vector<7x128xf32> to vector<1x128xf32>
    %41 = vector.broadcast %40 : vector<1x128xf32> to vector<16x128xf32>
    %42 = arith.mulf %39, %41 : vector<16x128xf32>
    %43 = arith.addf %38, %42 : vector<16x128xf32>
    %c0_8 = arith.constant 0 : index
    %c0_9 = arith.constant 0 : index
    %44 = vector.load %arg8[%c0_8, %c0_9] : memref<1x128xf32, #tpu.memory_space<vmem>>, vector<1x128xf32>
    %45 = vector.broadcast %44 : vector<1x128xf32> to vector<16x128xf32>
    %46 = arith.addf %43, %45 : vector<16x128xf32>
    %cst = arith.constant dense<0.000000e+00> : vector<16xf32>
    %47 = vector.multi_reduction <add>, %46, %cst [1] : vector<16x128xf32> to vector<16xf32>
    %48 = vector.shape_cast %47 : vector<16xf32> to vector<16x1xf32>
    %c0_10 = arith.constant 0 : index
    %c0_11 = arith.constant 0 : index
    %c0_12 = arith.constant 0 : index
    %49 = vector.load %arg3[%c0_10, %c0_11, %c0_12] : memref<1x16x48xbf16, #tpu.memory_space<vmem>>, vector<1x16x48xbf16>
    %50 = vector.shape_cast %49 : vector<1x16x48xbf16> to vector<16x48xbf16>
    %51 = arith.extf %50 : vector<16x48xbf16> to vector<16x48xf32>
    %c0_13 = arith.constant 0 : index
    %c0_14 = arith.constant 0 : index
    %c0_15 = arith.constant 0 : index
    %c0_16 = arith.constant 0 : index
    %52 = vector.load %arg5[%c0_13, %c0_14, %c0_15, %c0_16] : memref<1x1x8x48xbf16, #tpu.memory_space<vmem>>, vector<1x1x8x48xbf16>
    %53 = vector.shape_cast %52 : vector<1x1x8x48xbf16> to vector<8x48xbf16>
    %54 = arith.extf %53 : vector<8x48xbf16> to vector<8x48xf32>
    %55 = vector.extract_strided_slice %54 {offsets = [0, 0], sizes = [3, 48], strides = [1, 1]} : vector<8x48xf32> to vector<3x48xf32>
    %56 = vector.extract_strided_slice %54 {offsets = [3, 0], sizes = [3, 48], strides = [1, 1]} : vector<8x48xf32> to vector<3x48xf32>
    %57 = tpu.concatenate %55, %51, %56 in 0 : vector<3x48xf32>, vector<16x48xf32>, vector<3x48xf32> -> vector<22x48xf32>
    %c0_17 = arith.constant 0 : index
    %c0_18 = arith.constant 0 : index
    %58 = vector.load %arg7[%c0_17, %c0_18] : memref<7x48xf32, #tpu.memory_space<vmem>>, vector<7x48xf32>
    %59 = vector.extract_strided_slice %57 {offsets = [0, 0], sizes = [16, 48], strides = [1, 1]} : vector<22x48xf32> to vector<16x48xf32>
    %60 = vector.extract_strided_slice %58 {offsets = [0, 0], sizes = [1, 48], strides = [1, 1]} : vector<7x48xf32> to vector<1x48xf32>
    %61 = vector.broadcast %60 : vector<1x48xf32> to vector<16x48xf32>
    %62 = arith.mulf %59, %61 : vector<16x48xf32>
    %63 = vector.extract_strided_slice %57 {offsets = [1, 0], sizes = [16, 48], strides = [1, 1]} : vector<22x48xf32> to vector<16x48xf32>
    %64 = vector.extract_strided_slice %58 {offsets = [1, 0], sizes = [1, 48], strides = [1, 1]} : vector<7x48xf32> to vector<1x48xf32>
    %65 = vector.broadcast %64 : vector<1x48xf32> to vector<16x48xf32>
    %66 = arith.mulf %63, %65 : vector<16x48xf32>
    %67 = arith.addf %62, %66 : vector<16x48xf32>
    %68 = vector.extract_strided_slice %57 {offsets = [2, 0], sizes = [16, 48], strides = [1, 1]} : vector<22x48xf32> to vector<16x48xf32>
    %69 = vector.extract_strided_slice %58 {offsets = [2, 0], sizes = [1, 48], strides = [1, 1]} : vector<7x48xf32> to vector<1x48xf32>
    %70 = vector.broadcast %69 : vector<1x48xf32> to vector<16x48xf32>
    %71 = arith.mulf %68, %70 : vector<16x48xf32>
    %72 = arith.addf %67, %71 : vector<16x48xf32>
    %73 = vector.extract_strided_slice %57 {offsets = [3, 0], sizes = [16, 48], strides = [1, 1]} : vector<22x48xf32> to vector<16x48xf32>
    %74 = vector.extract_strided_slice %58 {offsets = [3, 0], sizes = [1, 48], strides = [1, 1]} : vector<7x48xf32> to vector<1x48xf32>
    %75 = vector.broadcast %74 : vector<1x48xf32> to vector<16x48xf32>
    %76 = arith.mulf %73, %75 : vector<16x48xf32>
    %77 = arith.addf %72, %76 : vector<16x48xf32>
    %78 = vector.extract_strided_slice %57 {offsets = [4, 0], sizes = [16, 48], strides = [1, 1]} : vector<22x48xf32> to vector<16x48xf32>
    %79 = vector.extract_strided_slice %58 {offsets = [4, 0], sizes = [1, 48], strides = [1, 1]} : vector<7x48xf32> to vector<1x48xf32>
    %80 = vector.broadcast %79 : vector<1x48xf32> to vector<16x48xf32>
    %81 = arith.mulf %78, %80 : vector<16x48xf32>
    %82 = arith.addf %77, %81 : vector<16x48xf32>
    %83 = vector.extract_strided_slice %57 {offsets = [5, 0], sizes = [16, 48], strides = [1, 1]} : vector<22x48xf32> to vector<16x48xf32>
    %84 = vector.extract_strided_slice %58 {offsets = [5, 0], sizes = [1, 48], strides = [1, 1]} : vector<7x48xf32> to vector<1x48xf32>
    %85 = vector.broadcast %84 : vector<1x48xf32> to vector<16x48xf32>
    %86 = arith.mulf %83, %85 : vector<16x48xf32>
    %87 = arith.addf %82, %86 : vector<16x48xf32>
    %88 = vector.extract_strided_slice %57 {offsets = [6, 0], sizes = [16, 48], strides = [1, 1]} : vector<22x48xf32> to vector<16x48xf32>
    %89 = vector.extract_strided_slice %58 {offsets = [6, 0], sizes = [1, 48], strides = [1, 1]} : vector<7x48xf32> to vector<1x48xf32>
    %90 = vector.broadcast %89 : vector<1x48xf32> to vector<16x48xf32>
    %91 = arith.mulf %88, %90 : vector<16x48xf32>
    %92 = arith.addf %87, %91 : vector<16x48xf32>
    %c0_19 = arith.constant 0 : index
    %c0_20 = arith.constant 0 : index
    %93 = vector.load %arg9[%c0_19, %c0_20] : memref<1x48xf32, #tpu.memory_space<vmem>>, vector<1x48xf32>
    %94 = vector.broadcast %93 : vector<1x48xf32> to vector<16x48xf32>
    %95 = arith.addf %92, %94 : vector<16x48xf32>
    %cst_21 = arith.constant dense<0.000000e+00> : vector<16xf32>
    %96 = vector.multi_reduction <add>, %95, %cst_21 [1] : vector<16x48xf32> to vector<16xf32>
    %97 = vector.shape_cast %96 : vector<16xf32> to vector<16x1xf32>
    %98 = arith.addf %48, %97 : vector<16x1xf32>
    %cst_22 = arith.constant 1.760000e+02 : f32
    %99 = vector.broadcast %cst_22 : f32 to vector<16x1xf32>
    %100 = arith.divf %98, %99 : vector<16x1xf32>
    %101 = vector.broadcast %100 : vector<16x1xf32> to vector<16x128xf32>
    %102 = arith.subf %46, %101 : vector<16x128xf32>
    %103 = arith.mulf %102, %102 : vector<16x128xf32>
    %cst_23 = arith.constant dense<0.000000e+00> : vector<16xf32>
    %104 = vector.multi_reduction <add>, %103, %cst_23 [1] : vector<16x128xf32> to vector<16xf32>
    %105 = vector.shape_cast %104 : vector<16xf32> to vector<16x1xf32>
    %106 = vector.broadcast %100 : vector<16x1xf32> to vector<16x48xf32>
    %107 = arith.subf %95, %106 : vector<16x48xf32>
    %108 = arith.mulf %107, %107 : vector<16x48xf32>
    %cst_24 = arith.constant dense<0.000000e+00> : vector<16xf32>
    %109 = vector.multi_reduction <add>, %108, %cst_24 [1] : vector<16x48xf32> to vector<16xf32>
    %110 = vector.shape_cast %109 : vector<16xf32> to vector<16x1xf32>
    %111 = arith.addf %105, %110 : vector<16x1xf32>
    %cst_25 = arith.constant 1.760000e+02 : f32
    %112 = vector.broadcast %cst_25 : f32 to vector<16x1xf32>
    %113 = arith.divf %111, %112 : vector<16x1xf32>
    %cst_26 = arith.constant 9.99999997E-7 : f32
    %114 = vector.broadcast %cst_26 : f32 to vector<16x1xf32>
    %115 = arith.addf %113, %114 : vector<16x1xf32>
    %116 = math.rsqrt %115 : vector<16x1xf32>
    %117 = vector.broadcast %116 : vector<16x1xf32> to vector<16x128xf32>
    %118 = arith.mulf %102, %117 : vector<16x128xf32>
    %c0_27 = arith.constant 0 : index
    %c0_28 = arith.constant 0 : index
    %c0_29 = arith.constant 0 : index
    %119 = vector.load %arg10[%c0_27, %c0_28, %c0_29] : memref<1x1x128xf32, #tpu.memory_space<vmem>>, vector<1x1x128xf32>
    %120 = vector.shape_cast %119 : vector<1x1x128xf32> to vector<1x128xf32>
    %121 = vector.broadcast %120 : vector<1x128xf32> to vector<16x128xf32>
    %122 = arith.mulf %118, %121 : vector<16x128xf32>
    %c0_30 = arith.constant 0 : index
    %c0_31 = arith.constant 0 : index
    %c0_32 = arith.constant 0 : index
    %123 = vector.load %arg12[%c0_30, %c0_31, %c0_32] : memref<1x1x128xf32, #tpu.memory_space<vmem>>, vector<1x1x128xf32>
    %124 = vector.shape_cast %123 : vector<1x1x128xf32> to vector<1x128xf32>
    %125 = vector.broadcast %124 : vector<1x128xf32> to vector<16x128xf32>
    %126 = arith.addf %122, %125 : vector<16x128xf32>
    %127 = arith.truncf %126 : vector<16x128xf32> to vector<16x128xbf16>
    %c0_33 = arith.constant 0 : index
    %c0_34 = arith.constant 0 : index
    %128 = vector.load %arg14[%c0_33, %c0_34] : memref<128x128xbf16, #tpu.memory_space<vmem>>, vector<128x128xbf16>
    %cst_35 = arith.constant dense<0.000000e+00> : vector<16x128xf32>
    %129 = tpu.matmul %127, %128, %cst_35 {dimension_numbers = #tpu.dot_dimension_numbers<[1], [0], [0], [1], [0, 0, 1, 1], [], []>} : vector<16x128xbf16>, vector<128x128xbf16>, vector<16x128xf32> -> vector<16x128xf32>
    %130 = vector.broadcast %116 : vector<16x1xf32> to vector<16x48xf32>
    %131 = arith.mulf %107, %130 : vector<16x48xf32>
    %c0_36 = arith.constant 0 : index
    %c0_37 = arith.constant 0 : index
    %c0_38 = arith.constant 0 : index
    %132 = vector.load %arg11[%c0_36, %c0_37, %c0_38] : memref<1x1x48xf32, #tpu.memory_space<vmem>>, vector<1x1x48xf32>
    %133 = vector.shape_cast %132 : vector<1x1x48xf32> to vector<1x48xf32>
    %134 = vector.broadcast %133 : vector<1x48xf32> to vector<16x48xf32>
    %135 = arith.mulf %131, %134 : vector<16x48xf32>
    %c0_39 = arith.constant 0 : index
    %c0_40 = arith.constant 0 : index
    %c0_41 = arith.constant 0 : index
    %136 = vector.load %arg13[%c0_39, %c0_40, %c0_41] : memref<1x1x48xf32, #tpu.memory_space<vmem>>, vector<1x1x48xf32>
    %137 = vector.shape_cast %136 : vector<1x1x48xf32> to vector<1x48xf32>
    %138 = vector.broadcast %137 : vector<1x48xf32> to vector<16x48xf32>
    %139 = arith.addf %135, %138 : vector<16x48xf32>
    %140 = arith.truncf %139 : vector<16x48xf32> to vector<16x48xbf16>
    %c0_42 = arith.constant 0 : index
    %c0_43 = arith.constant 0 : index
    %141 = vector.load %arg15[%c0_42, %c0_43] : memref<48x128xbf16, #tpu.memory_space<vmem>>, vector<48x128xbf16>
    %cst_44 = arith.constant dense<0.000000e+00> : vector<16x128xf32>
    %142 = tpu.matmul %140, %141, %cst_44 {dimension_numbers = #tpu.dot_dimension_numbers<[1], [0], [0], [1], [0, 0, 1, 1], [], []>} : vector<16x48xbf16>, vector<48x128xbf16>, vector<16x128xf32> -> vector<16x128xf32>
    %143 = arith.addf %129, %142 : vector<16x128xf32>
    %c0_45 = arith.constant 0 : index
    %c0_46 = arith.constant 0 : index
    %144 = vector.load %arg16[%c0_45, %c0_46] : memref<1x128xf32, #tpu.memory_space<vmem>>, vector<1x128xf32>
    %145 = vector.broadcast %144 : vector<1x128xf32> to vector<16x128xf32>
    %146 = arith.addf %143, %145 : vector<16x128xf32>
    %cst_47 = arith.constant 5.000000e-01 : f32
    %147 = vector.broadcast %cst_47 : f32 to vector<16x128xf32>
    %148 = arith.mulf %147, %146 : vector<16x128xf32>
    %cst_48 = arith.constant 4.471500e-02 : f32
    %149 = vector.broadcast %cst_48 : f32 to vector<16x128xf32>
    %150 = arith.mulf %149, %146 : vector<16x128xf32>
    %151 = arith.mulf %150, %146 : vector<16x128xf32>
    %152 = arith.mulf %151, %146 : vector<16x128xf32>
    %153 = arith.addf %146, %152 : vector<16x128xf32>
    %cst_49 = arith.constant 0.797884583 : f32
    %154 = vector.broadcast %cst_49 : f32 to vector<16x128xf32>
    %155 = arith.mulf %154, %153 : vector<16x128xf32>
    %156 = math.tanh %155 : vector<16x128xf32>
    %cst_50 = arith.constant 1.000000e+00 : f32
    %157 = vector.broadcast %cst_50 : f32 to vector<16x128xf32>
    %158 = arith.addf %157, %156 : vector<16x128xf32>
    %159 = arith.mulf %148, %158 : vector<16x128xf32>
    %160 = arith.truncf %159 : vector<16x128xf32> to vector<16x128xbf16>
    %c0_51 = arith.constant 0 : index
    %c0_52 = arith.constant 0 : index
    %161 = vector.load %arg17[%c0_51, %c0_52] : memref<128x64xbf16, #tpu.memory_space<vmem>>, vector<128x64xbf16>
    %cst_53 = arith.constant dense<0.000000e+00> : vector<16x64xf32>
    %162 = tpu.matmul %160, %161, %cst_53 {dimension_numbers = #tpu.dot_dimension_numbers<[1], [0], [0], [1], [0, 0, 1, 1], [], []>} : vector<16x128xbf16>, vector<128x64xbf16>, vector<16x64xf32> -> vector<16x64xf32>
    %c0_54 = arith.constant 0 : index
    %c0_55 = arith.constant 0 : index
    %163 = vector.load %arg18[%c0_54, %c0_55] : memref<1x64xf32, #tpu.memory_space<vmem>>, vector<1x64xf32>
    %164 = vector.broadcast %163 : vector<1x64xf32> to vector<16x64xf32>
    %165 = arith.addf %162, %164 : vector<16x64xf32>
    %c0_56 = arith.constant 0 : index
    %c0_57 = arith.constant 0 : index
    %c0_58 = arith.constant 0 : index
    %166 = vector.load %arg2[%c0_56, %c0_57, %c0_58] : memref<1x16x128xbf16, #tpu.memory_space<vmem>>, vector<1x16x128xbf16>
    %167 = vector.shape_cast %166 : vector<1x16x128xbf16> to vector<16x128xbf16>
    %c0_59 = arith.constant 0 : index
    %c0_60 = arith.constant 0 : index
    %168 = vector.load %arg19[%c0_59, %c0_60] : memref<128x64xbf16, #tpu.memory_space<vmem>>, vector<128x64xbf16>
    %cst_61 = arith.constant dense<0.000000e+00> : vector<16x64xf32>
    %169 = tpu.matmul %167, %168, %cst_61 {dimension_numbers = #tpu.dot_dimension_numbers<[1], [0], [0], [1], [0, 0, 1, 1], [], []>} : vector<16x128xbf16>, vector<128x64xbf16>, vector<16x64xf32> -> vector<16x64xf32>
    %c0_62 = arith.constant 0 : index
    %c0_63 = arith.constant 0 : index
    %c0_64 = arith.constant 0 : index
    %170 = vector.load %arg3[%c0_62, %c0_63, %c0_64] : memref<1x16x48xbf16, #tpu.memory_space<vmem>>, vector<1x16x48xbf16>
    %171 = vector.shape_cast %170 : vector<1x16x48xbf16> to vector<16x48xbf16>
    %c0_65 = arith.constant 0 : index
    %c0_66 = arith.constant 0 : index
    %172 = vector.load %arg20[%c0_65, %c0_66] : memref<48x64xbf16, #tpu.memory_space<vmem>>, vector<48x64xbf16>
    %cst_67 = arith.constant dense<0.000000e+00> : vector<16x64xf32>
    %173 = tpu.matmul %171, %172, %cst_67 {dimension_numbers = #tpu.dot_dimension_numbers<[1], [0], [0], [1], [0, 0, 1, 1], [], []>} : vector<16x48xbf16>, vector<48x64xbf16>, vector<16x64xf32> -> vector<16x64xf32>
    %174 = arith.addf %169, %173 : vector<16x64xf32>
    %175 = arith.addf %165, %174 : vector<16x64xf32>
    %c0_68 = arith.constant 0 : index
    %c0_69 = arith.constant 0 : index
    %176 = vector.load %arg21[%c0_68, %c0_69] : memref<1x64xf32, #tpu.memory_space<vmem>>, vector<1x64xf32>
    %177 = vector.broadcast %176 : vector<1x64xf32> to vector<16x64xf32>
    %178 = arith.addf %175, %177 : vector<16x64xf32>
    %179 = tpu.iota {dimensions = array<i32: 0>} : vector<16x1xi32>
    %c16_i32 = arith.constant 16 : i32
    %180 = arith.muli %arg1, %c16_i32 : i32
    %181 = vector.broadcast %180 : i32 to vector<16x1xi32>
    %182 = arith.addi %179, %181 : vector<16x1xi32>
    %c40_i32 = arith.constant 40 : i32
    %183 = vector.broadcast %c40_i32 : i32 to vector<16x1xi32>
    %184 = arith.cmpi slt, %182, %183 : vector<16x1xi32>
    %cst_70 = arith.constant 0.000000e+00 : f32
    %185 = vector.shape_cast %184 : vector<16x1xi1> to vector<16x1xi1>
    %186 = vector.broadcast %185 : vector<16x1xi1> to vector<16x64xi1>
    %187 = vector.broadcast %cst_70 : f32 to vector<16x64xf32>
    %188 = arith.select %186, %178, %187 : vector<16x64xi1>, vector<16x64xf32>
    %189 = arith.truncf %188 : vector<16x64xf32> to vector<16x64xbf16>
    %c0_71 = arith.constant 0 : index
    %c0_72 = arith.constant 0 : index
    %c0_73 = arith.constant 0 : index
    %190 = vector.load %arg22[%c0_71, %c0_72, %c0_73] : memref<1x16x64xbf16, #tpu.memory_space<vmem>>, vector<1x16x64xbf16>
    %191 = vector.shape_cast %190 : vector<1x16x64xbf16> to vector<16x64xbf16>
    %192 = vector.shape_cast %189 : vector<16x64xbf16> to vector<1x16x64xbf16>
    tpu.vector_store %arg22[%c0_71, %c0_72, %c0_73], %192 {strides = array<i32>} : memref<1x16x64xbf16, #tpu.memory_space<vmem>>, vector<1x16x64xbf16>,
    return
  }
  func.func @transform_0(%arg0: i32, %arg1: i32) -> (i32, i32, i32) {
    %c0_i32 = arith.constant 0 : i32
    %c0_i32_0 = arith.constant 0 : i32
    return %arg0, %arg1, %c0_i32 : i32, i32, i32
  }
  func.func @transform_1(%arg0: i32, %arg1: i32) -> (i32, i32, i32) {
    %c0_i32 = arith.constant 0 : i32
    %c0_i32_0 = arith.constant 0 : i32
    return %arg0, %arg1, %c0_i32 : i32, i32, i32
  }
  func.func @transform_2(%arg0: i32, %arg1: i32) -> (i32, i32, i32, i32) {
    %c0_i32 = arith.constant 0 : i32
    %c0_i32_0 = arith.constant 0 : i32
    %c0_i32_1 = arith.constant 0 : i32
    return %arg0, %arg1, %c0_i32, %c0_i32_0 : i32, i32, i32, i32
  }
  func.func @transform_3(%arg0: i32, %arg1: i32) -> (i32, i32, i32, i32) {
    %c0_i32 = arith.constant 0 : i32
    %c0_i32_0 = arith.constant 0 : i32
    %c0_i32_1 = arith.constant 0 : i32
    return %arg0, %arg1, %c0_i32, %c0_i32_0 : i32, i32, i32, i32
  }
  func.func @transform_4(%arg0: i32, %arg1: i32) -> (i32, i32) {
    %c0_i32 = arith.constant 0 : i32
    %c0_i32_0 = arith.constant 0 : i32
    %c0_i32_1 = arith.constant 0 : i32
    return %c0_i32, %c0_i32_0 : i32, i32
  }
  func.func @transform_5(%arg0: i32, %arg1: i32) -> (i32, i32) {
    %c0_i32 = arith.constant 0 : i32
    %c0_i32_0 = arith.constant 0 : i32
    %c0_i32_1 = arith.constant 0 : i32
    return %c0_i32, %c0_i32_0 : i32, i32
  }
  func.func @transform_6(%arg0: i32, %arg1: i32) -> (i32, i32) {
    %c0_i32 = arith.constant 0 : i32
    %c0_i32_0 = arith.constant 0 : i32
    %c0_i32_1 = arith.constant 0 : i32
    return %c0_i32, %c0_i32_0 : i32, i32
  }
  func.func @transform_7(%arg0: i32, %arg1: i32) -> (i32, i32) {
    %c0_i32 = arith.constant 0 : i32
    %c0_i32_0 = arith.constant 0 : i32
    %c0_i32_1 = arith.constant 0 : i32
    return %c0_i32, %c0_i32_0 : i32, i32
  }
  func.func @transform_8(%arg0: i32, %arg1: i32) -> (i32, i32, i32) {
    %c0_i32 = arith.constant 0 : i32
    %c0_i32_0 = arith.constant 0 : i32
    %c0_i32_1 = arith.constant 0 : i32
    return %arg0, %c0_i32, %c0_i32_0 : i32, i32, i32
  }
  func.func @transform_9(%arg0: i32, %arg1: i32) -> (i32, i32, i32) {
    %c0_i32 = arith.constant 0 : i32
    %c0_i32_0 = arith.constant 0 : i32
    %c0_i32_1 = arith.constant 0 : i32
    return %arg0, %c0_i32, %c0_i32_0 : i32, i32, i32
  }
  func.func @transform_10(%arg0: i32, %arg1: i32) -> (i32, i32, i32) {
    %c0_i32 = arith.constant 0 : i32
    %c0_i32_0 = arith.constant 0 : i32
    %c0_i32_1 = arith.constant 0 : i32
    return %arg0, %c0_i32, %c0_i32_0 : i32, i32, i32
  }
  func.func @transform_11(%arg0: i32, %arg1: i32) -> (i32, i32, i32) {
    %c0_i32 = arith.constant 0 : i32
    %c0_i32_0 = arith.constant 0 : i32
    %c0_i32_1 = arith.constant 0 : i32
    return %arg0, %c0_i32, %c0_i32_0 : i32, i32, i32
  }
  func.func @transform_12(%arg0: i32, %arg1: i32) -> (i32, i32) {
    %c0_i32 = arith.constant 0 : i32
    %c0_i32_0 = arith.constant 0 : i32
    %c0_i32_1 = arith.constant 0 : i32
    return %c0_i32, %c0_i32_0 : i32, i32
  }
  func.func @transform_13(%arg0: i32, %arg1: i32) -> (i32, i32) {
    %c0_i32 = arith.constant 0 : i32
    %c0_i32_0 = arith.constant 0 : i32
    %c0_i32_1 = arith.constant 0 : i32
    return %c0_i32, %c0_i32_0 : i32, i32
  }
  func.func @transform_14(%arg0: i32, %arg1: i32) -> (i32, i32) {
    %c0_i32 = arith.constant 0 : i32
    %c0_i32_0 = arith.constant 0 : i32
    %c0_i32_1 = arith.constant 0 : i32
    return %c0_i32, %c0_i32_0 : i32, i32
  }
  func.func @transform_15(%arg0: i32, %arg1: i32) -> (i32, i32) {
    %c0_i32 = arith.constant 0 : i32
    %c0_i32_0 = arith.constant 0 : i32
    %c0_i32_1 = arith.constant 0 : i32
    return %c0_i32, %c0_i32_0 : i32, i32
  }
  func.func @transform_16(%arg0: i32, %arg1: i32) -> (i32, i32) {
    %c0_i32 = arith.constant 0 : i32
    %c0_i32_0 = arith.constant 0 : i32
    %c0_i32_1 = arith.constant 0 : i32
    return %c0_i32, %c0_i32_0 : i32, i32
  }
  func.func @transform_17(%arg0: i32, %arg1: i32) -> (i32, i32) {
    %c0_i32 = arith.constant 0 : i32
    %c0_i32_0 = arith.constant 0 : i32
    %c0_i32_1 = arith.constant 0 : i32
    return %c0_i32, %c0_i32_0 : i32, i32
  }
  func.func @transform_18(%arg0: i32, %arg1: i32) -> (i32, i32) {
    %c0_i32 = arith.constant 0 : i32
    %c0_i32_0 = arith.constant 0 : i32
    %c0_i32_1 = arith.constant 0 : i32
    return %c0_i32, %c0_i32_0 : i32, i32
  }
  func.func @transform_19(%arg0: i32, %arg1: i32) -> (i32, i32) {
    %c0_i32 = arith.constant 0 : i32
    %c0_i32_0 = arith.constant 0 : i32
    %c0_i32_1 = arith.constant 0 : i32
    return %c0_i32, %c0_i32_0 : i32, i32
  }
  func.func @transform_20(%arg0: i32, %arg1: i32) -> (i32, i32, i32) {
    %c0_i32 = arith.constant 0 : i32
    %c0_i32_0 = arith.constant 0 : i32
    return %arg0, %arg1, %c0_i32 : i32, i32, i32
  }
}

module attributes {stable_mosaic.version = 11 : i64} {
  func.func @_convnext_kernel(%arg0: i32, %arg1: i32, %arg2: memref<1x16x64xbf16, #tpu.memory_space<vmem>>, %arg3: memref<1x1x8x64xbf16, #tpu.memory_space<vmem>>, %arg4: memref<7x64xf32, #tpu.memory_space<vmem>>, %arg5: memref<1x64xf32, #tpu.memory_space<vmem>>, %arg6: memref<1x1x64xf32, #tpu.memory_space<vmem>>, %arg7: memref<1x1x64xf32, #tpu.memory_space<vmem>>, %arg8: memref<64x128xbf16, #tpu.memory_space<vmem>>, %arg9: memref<1x128xf32, #tpu.memory_space<vmem>>, %arg10: memref<128x64xbf16, #tpu.memory_space<vmem>>, %arg11: memref<1x64xf32, #tpu.memory_space<vmem>>, %arg12: memref<1x16x64xbf16, #tpu.memory_space<vmem>>) attributes {dimension_semantics = [#tpu.dimension_semantics<parallel>, #tpu.dimension_semantics<parallel>], iteration_bounds = array<i64: 2, 3>, scalar_prefetch = 0 : i64, scratch_operands = 0 : i64, tpu.core_type = #tpu.core_type<tc>, window_params = [{transform_indices = @transform_0, window_bounds = array<i64: 1, 16, 64>}, {transform_indices = @transform_1, window_bounds = array<i64: 1, 1, 8, 64>}, {pipeline_mode = #tpu.pipeline_mode<synchronous>, transform_indices = @transform_2, window_bounds = array<i64: 7, 64>}, {pipeline_mode = #tpu.pipeline_mode<synchronous>, transform_indices = @transform_3, window_bounds = array<i64: 1, 64>}, {transform_indices = @transform_4, window_bounds = array<i64: 1, 1, 64>}, {transform_indices = @transform_5, window_bounds = array<i64: 1, 1, 64>}, {pipeline_mode = #tpu.pipeline_mode<synchronous>, transform_indices = @transform_6, window_bounds = array<i64: 64, 128>}, {pipeline_mode = #tpu.pipeline_mode<synchronous>, transform_indices = @transform_7, window_bounds = array<i64: 1, 128>}, {pipeline_mode = #tpu.pipeline_mode<synchronous>, transform_indices = @transform_8, window_bounds = array<i64: 128, 64>}, {pipeline_mode = #tpu.pipeline_mode<synchronous>, transform_indices = @transform_9, window_bounds = array<i64: 1, 64>}, {transform_indices = @transform_10, window_bounds = array<i64: 1, 16, 64>}]} {
    %c0 = arith.constant 0 : index
    %c0_0 = arith.constant 0 : index
    %c0_1 = arith.constant 0 : index
    %0 = vector.load %arg2[%c0, %c0_0, %c0_1] : memref<1x16x64xbf16, #tpu.memory_space<vmem>>, vector<1x16x64xbf16>
    %1 = vector.shape_cast %0 : vector<1x16x64xbf16> to vector<16x64xbf16>
    %2 = arith.extf %1 : vector<16x64xbf16> to vector<16x64xf32>
    %c0_2 = arith.constant 0 : index
    %c0_3 = arith.constant 0 : index
    %c0_4 = arith.constant 0 : index
    %c0_5 = arith.constant 0 : index
    %3 = vector.load %arg3[%c0_2, %c0_3, %c0_4, %c0_5] : memref<1x1x8x64xbf16, #tpu.memory_space<vmem>>, vector<1x1x8x64xbf16>
    %4 = vector.shape_cast %3 : vector<1x1x8x64xbf16> to vector<8x64xbf16>
    %5 = arith.extf %4 : vector<8x64xbf16> to vector<8x64xf32>
    %6 = vector.extract_strided_slice %5 {offsets = [0, 0], sizes = [3, 64], strides = [1, 1]} : vector<8x64xf32> to vector<3x64xf32>
    %7 = vector.extract_strided_slice %5 {offsets = [3, 0], sizes = [3, 64], strides = [1, 1]} : vector<8x64xf32> to vector<3x64xf32>
    %8 = tpu.concatenate %6, %2, %7 in 0 : vector<3x64xf32>, vector<16x64xf32>, vector<3x64xf32> -> vector<22x64xf32>
    %c0_6 = arith.constant 0 : index
    %c0_7 = arith.constant 0 : index
    %9 = vector.load %arg4[%c0_6, %c0_7] : memref<7x64xf32, #tpu.memory_space<vmem>>, vector<7x64xf32>
    %10 = vector.extract_strided_slice %8 {offsets = [0, 0], sizes = [16, 64], strides = [1, 1]} : vector<22x64xf32> to vector<16x64xf32>
    %11 = vector.extract_strided_slice %9 {offsets = [0, 0], sizes = [1, 64], strides = [1, 1]} : vector<7x64xf32> to vector<1x64xf32>
    %12 = vector.broadcast %11 : vector<1x64xf32> to vector<16x64xf32>
    %13 = arith.mulf %10, %12 : vector<16x64xf32>
    %14 = vector.extract_strided_slice %8 {offsets = [1, 0], sizes = [16, 64], strides = [1, 1]} : vector<22x64xf32> to vector<16x64xf32>
    %15 = vector.extract_strided_slice %9 {offsets = [1, 0], sizes = [1, 64], strides = [1, 1]} : vector<7x64xf32> to vector<1x64xf32>
    %16 = vector.broadcast %15 : vector<1x64xf32> to vector<16x64xf32>
    %17 = arith.mulf %14, %16 : vector<16x64xf32>
    %18 = arith.addf %13, %17 : vector<16x64xf32>
    %19 = vector.extract_strided_slice %8 {offsets = [2, 0], sizes = [16, 64], strides = [1, 1]} : vector<22x64xf32> to vector<16x64xf32>
    %20 = vector.extract_strided_slice %9 {offsets = [2, 0], sizes = [1, 64], strides = [1, 1]} : vector<7x64xf32> to vector<1x64xf32>
    %21 = vector.broadcast %20 : vector<1x64xf32> to vector<16x64xf32>
    %22 = arith.mulf %19, %21 : vector<16x64xf32>
    %23 = arith.addf %18, %22 : vector<16x64xf32>
    %24 = vector.extract_strided_slice %8 {offsets = [3, 0], sizes = [16, 64], strides = [1, 1]} : vector<22x64xf32> to vector<16x64xf32>
    %25 = vector.extract_strided_slice %9 {offsets = [3, 0], sizes = [1, 64], strides = [1, 1]} : vector<7x64xf32> to vector<1x64xf32>
    %26 = vector.broadcast %25 : vector<1x64xf32> to vector<16x64xf32>
    %27 = arith.mulf %24, %26 : vector<16x64xf32>
    %28 = arith.addf %23, %27 : vector<16x64xf32>
    %29 = vector.extract_strided_slice %8 {offsets = [4, 0], sizes = [16, 64], strides = [1, 1]} : vector<22x64xf32> to vector<16x64xf32>
    %30 = vector.extract_strided_slice %9 {offsets = [4, 0], sizes = [1, 64], strides = [1, 1]} : vector<7x64xf32> to vector<1x64xf32>
    %31 = vector.broadcast %30 : vector<1x64xf32> to vector<16x64xf32>
    %32 = arith.mulf %29, %31 : vector<16x64xf32>
    %33 = arith.addf %28, %32 : vector<16x64xf32>
    %34 = vector.extract_strided_slice %8 {offsets = [5, 0], sizes = [16, 64], strides = [1, 1]} : vector<22x64xf32> to vector<16x64xf32>
    %35 = vector.extract_strided_slice %9 {offsets = [5, 0], sizes = [1, 64], strides = [1, 1]} : vector<7x64xf32> to vector<1x64xf32>
    %36 = vector.broadcast %35 : vector<1x64xf32> to vector<16x64xf32>
    %37 = arith.mulf %34, %36 : vector<16x64xf32>
    %38 = arith.addf %33, %37 : vector<16x64xf32>
    %39 = vector.extract_strided_slice %8 {offsets = [6, 0], sizes = [16, 64], strides = [1, 1]} : vector<22x64xf32> to vector<16x64xf32>
    %40 = vector.extract_strided_slice %9 {offsets = [6, 0], sizes = [1, 64], strides = [1, 1]} : vector<7x64xf32> to vector<1x64xf32>
    %41 = vector.broadcast %40 : vector<1x64xf32> to vector<16x64xf32>
    %42 = arith.mulf %39, %41 : vector<16x64xf32>
    %43 = arith.addf %38, %42 : vector<16x64xf32>
    %c0_8 = arith.constant 0 : index
    %c0_9 = arith.constant 0 : index
    %44 = vector.load %arg5[%c0_8, %c0_9] : memref<1x64xf32, #tpu.memory_space<vmem>>, vector<1x64xf32>
    %45 = vector.broadcast %44 : vector<1x64xf32> to vector<16x64xf32>
    %46 = arith.addf %43, %45 : vector<16x64xf32>
    %cst = arith.constant dense<0.000000e+00> : vector<16xf32>
    %47 = vector.multi_reduction <add>, %46, %cst [1] : vector<16x64xf32> to vector<16xf32>
    %48 = vector.shape_cast %47 : vector<16xf32> to vector<16x1xf32>
    %cst_10 = arith.constant 6.400000e+01 : f32
    %49 = vector.broadcast %cst_10 : f32 to vector<16x1xf32>
    %50 = arith.divf %48, %49 : vector<16x1xf32>
    %51 = vector.broadcast %50 : vector<16x1xf32> to vector<16x64xf32>
    %52 = arith.subf %46, %51 : vector<16x64xf32>
    %53 = arith.mulf %52, %52 : vector<16x64xf32>
    %cst_11 = arith.constant dense<0.000000e+00> : vector<16xf32>
    %54 = vector.multi_reduction <add>, %53, %cst_11 [1] : vector<16x64xf32> to vector<16xf32>
    %55 = vector.shape_cast %54 : vector<16xf32> to vector<16x1xf32>
    %cst_12 = arith.constant 6.400000e+01 : f32
    %56 = vector.broadcast %cst_12 : f32 to vector<16x1xf32>
    %57 = arith.divf %55, %56 : vector<16x1xf32>
    %cst_13 = arith.constant 9.99999997E-7 : f32
    %58 = vector.broadcast %cst_13 : f32 to vector<16x1xf32>
    %59 = arith.addf %57, %58 : vector<16x1xf32>
    %60 = math.rsqrt %59 : vector<16x1xf32>
    %61 = vector.broadcast %60 : vector<16x1xf32> to vector<16x64xf32>
    %62 = arith.mulf %52, %61 : vector<16x64xf32>
    %c0_14 = arith.constant 0 : index
    %c0_15 = arith.constant 0 : index
    %c0_16 = arith.constant 0 : index
    %63 = vector.load %arg6[%c0_14, %c0_15, %c0_16] : memref<1x1x64xf32, #tpu.memory_space<vmem>>, vector<1x1x64xf32>
    %64 = vector.shape_cast %63 : vector<1x1x64xf32> to vector<1x64xf32>
    %65 = vector.broadcast %64 : vector<1x64xf32> to vector<16x64xf32>
    %66 = arith.mulf %62, %65 : vector<16x64xf32>
    %c0_17 = arith.constant 0 : index
    %c0_18 = arith.constant 0 : index
    %c0_19 = arith.constant 0 : index
    %67 = vector.load %arg7[%c0_17, %c0_18, %c0_19] : memref<1x1x64xf32, #tpu.memory_space<vmem>>, vector<1x1x64xf32>
    %68 = vector.shape_cast %67 : vector<1x1x64xf32> to vector<1x64xf32>
    %69 = vector.broadcast %68 : vector<1x64xf32> to vector<16x64xf32>
    %70 = arith.addf %66, %69 : vector<16x64xf32>
    %71 = arith.truncf %70 : vector<16x64xf32> to vector<16x64xbf16>
    %c0_20 = arith.constant 0 : index
    %c0_21 = arith.constant 0 : index
    %72 = vector.load %arg8[%c0_20, %c0_21] : memref<64x128xbf16, #tpu.memory_space<vmem>>, vector<64x128xbf16>
    %cst_22 = arith.constant dense<0.000000e+00> : vector<16x128xf32>
    %73 = tpu.matmul %71, %72, %cst_22 {dimension_numbers = #tpu.dot_dimension_numbers<[1], [0], [0], [1], [0, 0, 1, 1], [], []>} : vector<16x64xbf16>, vector<64x128xbf16>, vector<16x128xf32> -> vector<16x128xf32>
    %c0_23 = arith.constant 0 : index
    %c0_24 = arith.constant 0 : index
    %74 = vector.load %arg9[%c0_23, %c0_24] : memref<1x128xf32, #tpu.memory_space<vmem>>, vector<1x128xf32>
    %75 = vector.broadcast %74 : vector<1x128xf32> to vector<16x128xf32>
    %76 = arith.addf %73, %75 : vector<16x128xf32>
    %cst_25 = arith.constant 5.000000e-01 : f32
    %77 = vector.broadcast %cst_25 : f32 to vector<16x128xf32>
    %78 = arith.mulf %77, %76 : vector<16x128xf32>
    %cst_26 = arith.constant 4.471500e-02 : f32
    %79 = vector.broadcast %cst_26 : f32 to vector<16x128xf32>
    %80 = arith.mulf %79, %76 : vector<16x128xf32>
    %81 = arith.mulf %80, %76 : vector<16x128xf32>
    %82 = arith.mulf %81, %76 : vector<16x128xf32>
    %83 = arith.addf %76, %82 : vector<16x128xf32>
    %cst_27 = arith.constant 0.797884583 : f32
    %84 = vector.broadcast %cst_27 : f32 to vector<16x128xf32>
    %85 = arith.mulf %84, %83 : vector<16x128xf32>
    %86 = math.tanh %85 : vector<16x128xf32>
    %cst_28 = arith.constant 1.000000e+00 : f32
    %87 = vector.broadcast %cst_28 : f32 to vector<16x128xf32>
    %88 = arith.addf %87, %86 : vector<16x128xf32>
    %89 = arith.mulf %78, %88 : vector<16x128xf32>
    %90 = arith.truncf %89 : vector<16x128xf32> to vector<16x128xbf16>
    %c0_29 = arith.constant 0 : index
    %c0_30 = arith.constant 0 : index
    %91 = vector.load %arg10[%c0_29, %c0_30] : memref<128x64xbf16, #tpu.memory_space<vmem>>, vector<128x64xbf16>
    %cst_31 = arith.constant dense<0.000000e+00> : vector<16x64xf32>
    %92 = tpu.matmul %90, %91, %cst_31 {dimension_numbers = #tpu.dot_dimension_numbers<[1], [0], [0], [1], [0, 0, 1, 1], [], []>} : vector<16x128xbf16>, vector<128x64xbf16>, vector<16x64xf32> -> vector<16x64xf32>
    %c0_32 = arith.constant 0 : index
    %c0_33 = arith.constant 0 : index
    %93 = vector.load %arg11[%c0_32, %c0_33] : memref<1x64xf32, #tpu.memory_space<vmem>>, vector<1x64xf32>
    %94 = vector.broadcast %93 : vector<1x64xf32> to vector<16x64xf32>
    %95 = arith.addf %92, %94 : vector<16x64xf32>
    %96 = arith.addf %95, %2 : vector<16x64xf32>
    %97 = tpu.iota {dimensions = array<i32: 0>} : vector<16x1xi32>
    %c16_i32 = arith.constant 16 : i32
    %98 = arith.muli %arg1, %c16_i32 : i32
    %99 = vector.broadcast %98 : i32 to vector<16x1xi32>
    %100 = arith.addi %97, %99 : vector<16x1xi32>
    %c40_i32 = arith.constant 40 : i32
    %101 = vector.broadcast %c40_i32 : i32 to vector<16x1xi32>
    %102 = arith.cmpi slt, %100, %101 : vector<16x1xi32>
    %cst_34 = arith.constant 0.000000e+00 : f32
    %103 = vector.shape_cast %102 : vector<16x1xi1> to vector<16x1xi1>
    %104 = vector.broadcast %103 : vector<16x1xi1> to vector<16x64xi1>
    %105 = vector.broadcast %cst_34 : f32 to vector<16x64xf32>
    %106 = arith.select %104, %96, %105 : vector<16x64xi1>, vector<16x64xf32>
    %107 = arith.truncf %106 : vector<16x64xf32> to vector<16x64xbf16>
    %c0_35 = arith.constant 0 : index
    %c0_36 = arith.constant 0 : index
    %c0_37 = arith.constant 0 : index
    %108 = vector.load %arg12[%c0_35, %c0_36, %c0_37] : memref<1x16x64xbf16, #tpu.memory_space<vmem>>, vector<1x16x64xbf16>
    %109 = vector.shape_cast %108 : vector<1x16x64xbf16> to vector<16x64xbf16>
    %110 = vector.shape_cast %107 : vector<16x64xbf16> to vector<1x16x64xbf16>
    tpu.vector_store %arg12[%c0_35, %c0_36, %c0_37], %110 {strides = array<i32>} : memref<1x16x64xbf16, #tpu.memory_space<vmem>>, vector<1x16x64xbf16>,
    return
  }
  func.func @transform_0(%arg0: i32, %arg1: i32) -> (i32, i32, i32) {
    %c0_i32 = arith.constant 0 : i32
    %c0_i32_0 = arith.constant 0 : i32
    return %arg0, %arg1, %c0_i32 : i32, i32, i32
  }
  func.func @transform_1(%arg0: i32, %arg1: i32) -> (i32, i32, i32, i32) {
    %c0_i32 = arith.constant 0 : i32
    %c0_i32_0 = arith.constant 0 : i32
    %c0_i32_1 = arith.constant 0 : i32
    return %arg0, %arg1, %c0_i32, %c0_i32_0 : i32, i32, i32, i32
  }
  func.func @transform_2(%arg0: i32, %arg1: i32) -> (i32, i32) {
    %c0_i32 = arith.constant 0 : i32
    %c0_i32_0 = arith.constant 0 : i32
    %c0_i32_1 = arith.constant 0 : i32
    return %c0_i32, %c0_i32_0 : i32, i32
  }
  func.func @transform_3(%arg0: i32, %arg1: i32) -> (i32, i32) {
    %c0_i32 = arith.constant 0 : i32
    %c0_i32_0 = arith.constant 0 : i32
    %c0_i32_1 = arith.constant 0 : i32
    return %c0_i32, %c0_i32_0 : i32, i32
  }
  func.func @transform_4(%arg0: i32, %arg1: i32) -> (i32, i32, i32) {
    %c0_i32 = arith.constant 0 : i32
    %c0_i32_0 = arith.constant 0 : i32
    %c0_i32_1 = arith.constant 0 : i32
    return %arg0, %c0_i32, %c0_i32_0 : i32, i32, i32
  }
  func.func @transform_5(%arg0: i32, %arg1: i32) -> (i32, i32, i32) {
    %c0_i32 = arith.constant 0 : i32
    %c0_i32_0 = arith.constant 0 : i32
    %c0_i32_1 = arith.constant 0 : i32
    return %arg0, %c0_i32, %c0_i32_0 : i32, i32, i32
  }
  func.func @transform_6(%arg0: i32, %arg1: i32) -> (i32, i32) {
    %c0_i32 = arith.constant 0 : i32
    %c0_i32_0 = arith.constant 0 : i32
    %c0_i32_1 = arith.constant 0 : i32
    return %c0_i32, %c0_i32_0 : i32, i32
  }
  func.func @transform_7(%arg0: i32, %arg1: i32) -> (i32, i32) {
    %c0_i32 = arith.constant 0 : i32
    %c0_i32_0 = arith.constant 0 : i32
    %c0_i32_1 = arith.constant 0 : i32
    return %c0_i32, %c0_i32_0 : i32, i32
  }
  func.func @transform_8(%arg0: i32, %arg1: i32) -> (i32, i32) {
    %c0_i32 = arith.constant 0 : i32
    %c0_i32_0 = arith.constant 0 : i32
    %c0_i32_1 = arith.constant 0 : i32
    return %c0_i32, %c0_i32_0 : i32, i32
  }
  func.func @transform_9(%arg0: i32, %arg1: i32) -> (i32, i32) {
    %c0_i32 = arith.constant 0 : i32
    %c0_i32_0 = arith.constant 0 : i32
    %c0_i32_1 = arith.constant 0 : i32
    return %c0_i32, %c0_i32_0 : i32, i32
  }
  func.func @transform_10(%arg0: i32, %arg1: i32) -> (i32, i32, i32) {
    %c0_i32 = arith.constant 0 : i32
    %c0_i32_0 = arith.constant 0 : i32
    return %arg0, %arg1, %c0_i32 : i32, i32, i32
  }
}

module attributes {stable_mosaic.version = 11 : i64} {
  func.func @_pw_out_kernel(%arg0: i32, %arg1: i32, %arg2: memref<1x16x64xbf16, #tpu.memory_space<vmem>>, %arg3: memref<64x64xbf16, #tpu.memory_space<vmem>>, %arg4: memref<1x64xf32, #tpu.memory_space<vmem>>, %arg5: memref<1x16x64xf32, #tpu.memory_space<vmem>>) attributes {dimension_semantics = [#tpu.dimension_semantics<parallel>, #tpu.dimension_semantics<parallel>], iteration_bounds = array<i64: 2, 3>, scalar_prefetch = 0 : i64, scratch_operands = 0 : i64, tpu.core_type = #tpu.core_type<tc>, window_params = [{transform_indices = @transform_0, window_bounds = array<i64: 1, 16, 64>}, {pipeline_mode = #tpu.pipeline_mode<synchronous>, transform_indices = @transform_1, window_bounds = array<i64: 64, 64>}, {pipeline_mode = #tpu.pipeline_mode<synchronous>, transform_indices = @transform_2, window_bounds = array<i64: 1, 64>}, {transform_indices = @transform_3, window_bounds = array<i64: 1, 16, 64>}]} {
    %c0 = arith.constant 0 : index
    %c0_0 = arith.constant 0 : index
    %c0_1 = arith.constant 0 : index
    %0 = vector.load %arg2[%c0, %c0_0, %c0_1] : memref<1x16x64xbf16, #tpu.memory_space<vmem>>, vector<1x16x64xbf16>
    %1 = vector.shape_cast %0 : vector<1x16x64xbf16> to vector<16x64xbf16>
    %c0_2 = arith.constant 0 : index
    %c0_3 = arith.constant 0 : index
    %2 = vector.load %arg3[%c0_2, %c0_3] : memref<64x64xbf16, #tpu.memory_space<vmem>>, vector<64x64xbf16>
    %cst = arith.constant dense<0.000000e+00> : vector<16x64xf32>
    %3 = tpu.matmul %1, %2, %cst {dimension_numbers = #tpu.dot_dimension_numbers<[1], [0], [0], [1], [0, 0, 1, 1], [], []>} : vector<16x64xbf16>, vector<64x64xbf16>, vector<16x64xf32> -> vector<16x64xf32>
    %c0_4 = arith.constant 0 : index
    %c0_5 = arith.constant 0 : index
    %4 = vector.load %arg4[%c0_4, %c0_5] : memref<1x64xf32, #tpu.memory_space<vmem>>, vector<1x64xf32>
    %5 = vector.broadcast %4 : vector<1x64xf32> to vector<16x64xf32>
    %6 = arith.addf %3, %5 : vector<16x64xf32>
    %c0_6 = arith.constant 0 : index
    %c0_7 = arith.constant 0 : index
    %c0_8 = arith.constant 0 : index
    %7 = vector.load %arg5[%c0_6, %c0_7, %c0_8] : memref<1x16x64xf32, #tpu.memory_space<vmem>>, vector<1x16x64xf32>
    %8 = vector.shape_cast %7 : vector<1x16x64xf32> to vector<16x64xf32>
    %9 = vector.shape_cast %6 : vector<16x64xf32> to vector<1x16x64xf32>
    tpu.vector_store %arg5[%c0_6, %c0_7, %c0_8], %9 {strides = array<i32>} : memref<1x16x64xf32, #tpu.memory_space<vmem>>, vector<1x16x64xf32>,
    return
  }
  func.func @transform_0(%arg0: i32, %arg1: i32) -> (i32, i32, i32) {
    %c0_i32 = arith.constant 0 : i32
    %c0_i32_0 = arith.constant 0 : i32
    return %arg0, %arg1, %c0_i32 : i32, i32, i32
  }
  func.func @transform_1(%arg0: i32, %arg1: i32) -> (i32, i32) {
    %c0_i32 = arith.constant 0 : i32
    %c0_i32_0 = arith.constant 0 : i32
    %c0_i32_1 = arith.constant 0 : i32
    return %c0_i32, %c0_i32_0 : i32, i32
  }
  func.func @transform_2(%arg0: i32, %arg1: i32) -> (i32, i32) {
    %c0_i32 = arith.constant 0 : i32
    %c0_i32_0 = arith.constant 0 : i32
    %c0_i32_1 = arith.constant 0 : i32
    return %c0_i32, %c0_i32_0 : i32, i32
  }
  func.func @transform_3(%arg0: i32, %arg1: i32) -> (i32, i32, i32) {
    %c0_i32 = arith.constant 0 : i32
    %c0_i32_0 = arith.constant 0 : i32
    return %arg0, %arg1, %c0_i32 : i32, i32, i32
  }
}

</mosaic_0001>

<bundles_post_ra>
// kernel: mel_decoder_forward.11
= control target key start
LH: loop header
LB: loop body
LE: loop exit
PB: predicated region body
PF: predicated region fallthrough
CT: control target
= control target key end

     0   :  { %s1319_s13 = smov 0   ;;  %s1321_s14 = smov 0   ;;  %s1514_s0 = inlined_call_operand.vmem [shape: bf16[2,48,128], index: 0, kind: input, shape index: {}]   ;;  %s1515_s1 = inlined_call_operand.vmem [shape: bf16[2,3,8,128], index: 1, kind: input, shape index: {}]   ;;  %s1516_s2 = inlined_call_operand.vmem [shape: f32[7,128], index: 2, kind: input, shape index: {}]   ;;  %s1517_s3 = inlined_call_operand.vmem [shape: f32[1,128], index: 3, kind: input, shape index: {}]   ;;  %s1518_s4 = inlined_call_operand.vmem [shape: f32[2,1,128], index: 4, kind: input, shape index: {}]   ;;  %s1519_s5 = inlined_call_operand.vmem [shape: f32[2,1,128], index: 5, kind: input, shape index: {}]   ;;  %s1520_s6 = inlined_call_operand.vmem [shape: bf16[128,128], index: 6, kind: input, shape index: {}]   ;;  %s1521_s7 = inlined_call_operand.vmem [shape: f32[1,128], index: 7, kind: input, shape index: {}]   ;;  %s1522_s8 = inlined_call_operand.vmem [shape: bf16[128,128], index: 8, kind: input, shape index: {}]   ;;  %s1523_s9 = inlined_call_operand.vmem [shape: f32[1,128], index: 9, kind: input, shape index: {}]   ;;  %s1524_s10 = inlined_call_operand.vmem [shape: bf16[2,48,128], index: 10, kind: output, shape index: {}]  }
   0x1   :  { %s1323_s15 = smov 0   ;;  %s1325_s16 = smov 0  }
   0x2   :  { %s1327_s17 = smov 0  }
   0x3 LB: > { %s29_s18 = sadd.s32 1, %s1252_s15  ;;  %s32_s19 = sadd.s32 1, %s1256_s16  ;;  %s1260_s17 = sphi %s1327_s17, %s20_s17   ;;  %s1256_s16 = sphi %s1325_s16, %s1528_s16   ;;  %s1252_s15 = sphi %s1323_s15, %s1527_s15   ;;  %s1248_s14 = sphi %s1321_s14, %s1526_s14   ;;  %s1244_s13 = sphi %s1319_s13, %s1525_s13  }
   0x4   : > { %p30_p0 = scmp.ge.s32.totalorder %s29_s18, 3  ;;  %p1053_p1 = scmp.ge.s32.totalorder %s1260_s17, 1 }
   0x5   : > { %p364_p2 = scmp.lt.s32.totalorder %s1260_s17, 7 }
   0x6   : > { %s1530_s18 = smov (%p30_p0, %s29_s18), 0  ;;  %s1532_s19 = smov (!%p30_p0, %s32_s19), %s1256_s16 }
   0x7   : > { %p365_p3 = pnand %p1053_p1, %p364_p2  ;;  %p34_p4 = scmp.ge.s32.totalorder %s1532_s19, 2 }
   0x8   : > { %s1054_s20 = sshll.u32 (!%p365_p3), %s1244_s13, 1  ;;  %p425_p5 = scmp.lt.s32.totalorder (!%p365_p3), %s1248_s14, 1 }
   0x9   : > { %s1534_s19 = smov (%p34_p4, %s1532_s19), 0  ;;  %368 = sbr.rel (%p365_p3) target bundleno = 794 (0x31a), region = 60 }
   0xa   : > { %p427_p6 = scmp.lt.s32.totalorder (!%p365_p3), %s1054_s20, 5  ;;  %p436_p7 = scmp.lt.s32.totalorder (!%p365_p3), %s1244_s13, 2 }
   0xe   : > { %v477_v0 = vlaneseq  ;;  %s1536_s14 = smov (!%p425_p5, %s1248_s14), 1  ;;  %s1538_s20 = smov (!%p427_p6, %s1054_s20), 5  ;;  %vm467_vm0 = vcmask 1042432   ;;  %v476_v7 = vld [vmem:[%s1516_s2] sm:$0x7f]  ;;  %vm493_vm1 = vcmask 1046528  }
   0xf   : > { %s1154_s21 = smul.u32 6, %s1536_s14  ;;  %vm513_vm2 = vcmask 1045504   ;;  %vm533_vm3 = vcmask 1044480   ;;  %vm553_vm4 = vcmask 1043456   ;;  %vm592_vm5 = vcmask 1041408  }
  0x10   : > { %v1355_v1 = vshrl.u32 %v477_v0, 7  ;;  %s437_s22 = scalar_select %p436_p7, %s1244_s13, 2  ;;  %vm1263_vm6 = vmmov 0  }
  0x11   : > { %s1364_s23 = sadd.s32 %s1154_s21, %s1538_s20  ;;  %s1155_s24 = smul.u32 3, %s1536_s14 }
  0x12   : > { %v479_v2 = vsub.s32 0, %v1355_v1  ;;  %v485_v3 = vsub.s32 1, %v1355_v1  ;;  %v505_v4 = vsub.s32 2, %v1355_v1  ;;  %v525_v5 = vsub.s32 3, %v1355_v1  ;;  %s1055_s27 = sshll.u32 %s1364_s23, 2  ;;  %s444_s21 = scalar_lea.vmem %s1518_s4, %s1536_s14 }
  0x13   : > { %v545_v6 = vsub.s32 4, %v1355_v1  ;;  %v565_v8 = vsub.s32 5, %v1355_v1  ;;  %v584_v9 = vsub.s32 6, %v1355_v1  ;;  %s432_s30 = scalar_lea.vmem %s1514_s0, %s1055_s27  ;;  %s439_s11 = sadd.s32 %s1155_s24, %s437_s22 }
  0x14   : > { %s1056_s12 = sshll.u32 %s439_s11, 2  ;;  %v1378_v10 = vld [vmem:[%s432_s30] sm:$0xff]   ;;  %v480_v14 = vrot.slane %v476_v7, %v479_v2  ;;  %v486_v15 = vrot.slane %v476_v7, %v485_v3  ;;  %v506_v16 = vrot.slane %v476_v7, %v505_v4  ;;  %v526_v17 = vrot.slane %v476_v7, %v525_v5  ;;  %s447_s24 = scalar_lea.vmem %s1519_s5, %s1536_s14 }
  0x15   : > { %s441_s25 = scalar_lea.vmem %s1515_s1, %s1056_s12  ;;  %v1089_v11 = vunpack.c.l.bf16 %v1378_v10  ;;  %v1090_v12 = vunpack.c.h.bf16 %v1378_v10  ;;  %v546_v21 = vrot.slane %v476_v7, %v545_v6  ;;  %v566_v22 = vrot.slane %v476_v7, %v565_v8  ;;  %s1080_s12 = sshll.u32 %s1244_s13, 4 }
  0x16   : > { %v463_v13 = vld [vmem:[%s441_s25] sm:$0xf]  ;;  %v585_v25 = vrot.slane %v476_v7, %v584_v9  ;;  %s456_s22 = scalar_lea.vmem %s1524_s10, %s1055_s27 }
  0x17   : > { %v464_v18 = vunpack.c.l.bf16 %v463_v13  ;;  %v468_v19 = vrot.slane %v1089_v11, 5  ;;  %v469_v20 = vrot.slane %v1090_v12, 5 }
  0x19   : > { %v470_v23 = vsel %vm467_vm0, %v468_v19, %v469_v20  ;;  %v474_v24 = vsel %vm467_vm0, %v464_v18, %v468_v19  ;;  %v475_v26 = vsel %vm467_vm0, %v469_v20, %v464_v18  ;;  %v1059_v19 = vld [vmem:[%s1517_s3] ss:$0 sm:$0xff] }
  0x1a   : > { %v481_v27 = vmul.f32 %v480_v14, %v474_v24  ;;  %v487_v28 = vmul.f32 %v486_v15, %v474_v24  ;;  %v488_v29 = vmul.f32 %v486_v15, %v470_v23  ;;  %v507_v30 = vmul.f32 %v506_v16, %v474_v24 }
  0x1b   : > { %v508_v31 = vmul.f32 %v506_v16, %v470_v23  ;;  %v527_v32 = vmul.f32 %v526_v17, %v474_v24  ;;  %v528_v33 = vmul.f32 %v526_v17, %v470_v23  ;;  %v547_v34 = vmul.f32 %v546_v21, %v474_v24 }
  0x1c   : > { %v494_v35 = vrot.slane %v487_v28, 1  ;;  %v495_v36 = vrot.slane %v488_v29, 1  ;;  %v514_v37 = vrot.slane %v507_v30, 2  ;;  %v548_v38 = vmul.f32 %v546_v21, %v470_v23 }
  0x1d   : > { %v515_v39 = vrot.slane %v508_v31, 2  ;;  %v534_v40 = vrot.slane %v527_v32, 3  ;;  %v535_v41 = vrot.slane %v528_v33, 3  ;;  %v554_v42 = vrot.slane %v547_v34, 4  ;;  %v1198_v32 = vld [vmem:[%s1520_s6 + $0x38] sm:$0xff]  }
  0x1e   : > { %v496_v43 = vsel %vm493_vm1, %v494_v35, %v495_v36  ;;  %v555_v44 = vrot.slane %v548_v38, 4  ;;  %v567_v45 = vmul.f32 %v566_v22, %v474_v24  ;;  %v568_v46 = vmul.f32 %v566_v22, %v470_v23 }
  0x1f   : > { %v501_v47 = vadd.f32 %v496_v43, %v481_v27  ;;  %v516_v48 = vsel %vm513_vm2, %v514_v37, %v515_v39  ;;  %v586_v49 = vmul.f32 %v585_v25, %v474_v24  ;;  %v536_v50 = vsel %vm533_vm3, %v534_v40, %v535_v41  ;;  %v1200_v43 = vld [vmem:[%s1520_s6 + $0x28] sm:$0xff]  }
  0x20   : > { %v573_v51 = vrot.slane %v567_v45, 5  ;;  %v574_v52 = vrot.slane %v568_v46, 5  ;;  %v587_v53 = vmul.f32 %v585_v25, %v470_v23  ;;  %v556_v55 = vsel %vm553_vm4, %v554_v42, %v555_v44  ;;  %v1199_v42 = vld [vmem:[%s1520_s6 + $0x30] sm:$0xff]   ;;  %v1202_v45 = vld [vmem:[%s1520_s6 + $0x18] sm:$0xff]  }
  0x21   : > { %v521_v54 = vadd.f32 %v516_v48, %v501_v47  ;;  %v593_v56 = vrot.slane %v586_v49, 6  ;;  %v489_v57 = vmul.f32 %v486_v15, %v475_v26  ;;  %v482_v59 = vmul.f32 %v480_v14, %v470_v23  ;;  %v1203_v46 = vld [vmem:[%s1520_s6 + $0x10] sm:$0xff]   ;;  %v1204_v47 = vld [vmem:[%s1520_s6 + $0x8] sm:$0xff]   ;;  %v1205_v48 = vld [vmem:[%s1520_s6] sm:$0xff]  }
  0x22   : > { %v594_v58 = vrot.slane %v587_v53, 6  ;;  %v509_v60 = vmul.f32 %v506_v16, %v475_v26  ;;  %v529_v61 = vmul.f32 %v526_v17, %v475_v26  ;;  %v549_v0 = vmul.f32 %v546_v21, %v475_v26 }
  0x23   : > { %v541_v62 = vadd.f32 %v536_v50, %v521_v54  ;;  %v497_v63 = vrot.slane %v489_v57, 1  ;;  %v569_v2 = vmul.f32 %v566_v22, %v475_v26  ;;  %v575_v3 = vsel %vm467_vm0, %v573_v51, %v574_v52  ;;  %v1060_v57 = vld [vmem:[%s444_s21] ss:$0 sm:$0xff] }
  0x24   : > { %v517_v4 = vrot.slane %v509_v60, 2  ;;  %v537_v5 = vrot.slane %v529_v61, 3  ;;  %v557_v8 = vrot.slane %v549_v0, 4  ;;  %v588_v9 = vmul.f32 %v585_v25, %v475_v26  ;;  %v1061_v61 = vld [vmem:[%s447_s24] ss:$0 sm:$0xff] }
  0x25   : > { %v561_v6 = vadd.f32 %v556_v55, %v541_v62  ;;  %v498_v7 = vsel %vm493_vm1, %v495_v36, %v497_v63  ;;  %v595_v13 = vsel %vm592_vm5, %v593_v56, %v594_v58  ;;  %v576_v18 = vrot.slane %v569_v2, 5 }
  0x26   : > { %v502_v15 = vadd.f32 %v498_v7, %v482_v59  ;;  %v518_v14 = vsel %vm513_vm2, %v515_v39, %v517_v4  ;;  %v538_v17 = vsel %vm533_vm3, %v535_v41, %v537_v5  ;;  %v558_v22 = vsel %vm553_vm4, %v555_v44, %v557_v8  ;;  %v1201_v44 = vld [vmem:[%s1520_s6 + $0x20] sm:$0xff]   ;;  %v1207_v4 = vld [vmem:[%s1522_s8 + $0x30] sm:$0xff]   ;;  %v1208_v5 = vld [vmem:[%s1522_s8 + $0x28] sm:$0xff]  }
  0x27   : > { %v580_v16 = vadd.f32 %v575_v3, %v561_v6  ;;  %v596_v23 = vrot.slane %v588_v9, 6  ;;  %v577_v26 = vsel %vm467_vm0, %v574_v52, %v576_v18  ;;  %v1262_v33 = vmov 0.0   ;;  %v1206_v3 = vld [vmem:[%s1522_s8 + $0x38] sm:$0xff]   ;;  %v1209_v6 = vld [vmem:[%s1522_s8 + $0x20] sm:$0xff]   ;;  %v1211_v8 = vld [vmem:[%s1522_s8 + $0x10] sm:$0xff]  }
  0x28   : > { %v522_v20 = vadd.f32 %v518_v14, %v502_v15  ;;  %1114 = vmatprep.subr.bf16.mxu0 %v1262_v33  ;;  %1134 = vmatprep.subr.bf16.mxu1 %v1262_v33  ;;  %v1210_v7 = vld [vmem:[%s1522_s8 + $0x18] sm:$0xff]   ;;  %v1212_v9 = vld [vmem:[%s1522_s8 + $0x8] sm:$0xff]   ;;  %v1062_v15 = vld [vmem:[%s1521_s7] ss:$0 sm:$0xff] }
  0x29   : > { %v600_v21 = vadd.f32 %v595_v13, %v580_v16  ;;  %v597_v28 = vsel %vm592_vm5, %v594_v58, %v596_v23  ;;  %1115 = vmatpush3.bf16.msra.mxu0 %v1198_v32  ;;  %1130 = vmatprep.mubr.msk.bf16.mxu0 %vm1263_vm6, %v1262_v33  ;;  %v1213_v13 = vld [vmem:[%s1522_s8] sm:$0xff]  }
  0x2a   : > { %v542_v24 = vadd.f32 %v538_v17, %v522_v20  ;;  %1116 = vmatprep.subr.bf16.mxu0 %v1262_v33  ;;  %1150 = vmatprep.mubr.msk.bf16.mxu1 %vm1263_vm6, %v1262_v33 }
  0x2b   : > { %v609_v25 = vadd.f32 %v1059_v19, %v600_v21  ;;  %1135 = vmatpush3.bf16.msra.mxu1 %v1206_v3 }
  0x2c   : > { %v562_v27 = vadd.f32 %v558_v22, %v542_v24  ;;  %1136 = vmatprep.subr.bf16.mxu1 %v1262_v33 }
  0x2d   : > { %611 = vadd.xlane.f32.xlu0 %v609_v25  ;;  %1117 = vmatpush3.bf16.msra.mxu0 %v1199_v42  ;;  %v902_v42 = vstv %s1080_s12 }
  0x2e   : > { %v581_v29 = vadd.f32 %v577_v26, %v562_v27  ;;  %1118 = vmatprep.subr.bf16.mxu0 %v1262_v33 }
  0x2f   : > { %1137 = vmatpush3.bf16.msra.mxu1 %v1207_v4 }
  0x30   : > { %v601_v30 = vadd.f32 %v597_v28, %v581_v29  ;;  %1138 = vmatprep.subr.bf16.mxu1 %v1262_v33 }
  0x31   : > { %1119 = vmatpush3.bf16.msra.mxu0 %v1200_v43 }
  0x32   : > { %v610_v31 = vadd.f32 %v1059_v19, %v601_v30  ;;  %1120 = vmatprep.subr.bf16.mxu0 %v1262_v33 }
  0x33   : > { %1139 = vmatpush3.bf16.msra.mxu1 %v1208_v5 }
  0x34   : > { %613 = vadd.xlane.f32.xlu0 %v610_v31  ;;  %1140 = vmatprep.subr.bf16.mxu1 %v1262_v33 }
  0x35   : > { %1121 = vmatpush3.bf16.msra.mxu0 %v1201_v44 }
  0x36   : > { %1122 = vmatprep.subr.bf16.mxu0 %v1262_v33 }
  0x37   : > { %1141 = vmatpush3.bf16.msra.mxu1 %v1209_v6 }
  0x38   : > { %1142 = vmatprep.subr.bf16.mxu1 %v1262_v33 }
  0x39   : > { %1123 = vmatpush3.bf16.msra.mxu0 %v1202_v45  ;;  %v903_v45 = vadd.s32 %v902_v42, %v1355_v1 }
  0x3a   : > { %1124 = vmatprep.subr.bf16.mxu0 %v1262_v33 }
  0x3b   : > { %1143 = vmatpush3.bf16.msra.mxu1 %v1210_v7  ;;  %vm905_vm7 = vcmp.lt.s32.totalorder %v903_v45, 40 }
  0x3c   : > { %1144 = vmatprep.subr.bf16.mxu1 %v1262_v33 }
  0x3d   : > { %1125 = vmatpush3.bf16.msra.mxu0 %v1203_v46 }
  0x3e   : > { %1126 = vmatprep.subr.bf16.mxu0 %v1262_v33 }
  0x3f   : > { %1145 = vmatpush3.bf16.msra.mxu1 %v1211_v8 }
  0x40   : > { %1146 = vmatprep.subr.bf16.mxu1 %v1262_v33 }
  0x41   : > { %1127 = vmatpush3.bf16.msra.mxu0 %v1204_v47 }
  0x42   : > { %1128 = vmatprep.subr.bf16.mxu0 %v1262_v33 }
  0x43   : > { %1147 = vmatpush3.bf16.msra.mxu1 %v1212_v9 }
  0x44   : > { %1148 = vmatprep.subr.bf16.mxu1 %v1262_v33 }
  0x45   : > { %1129 = vmatpush3.bf16.msra.mxu0 %v1205_v48 }
  0x47   : > { %1149 = vmatpush3.bf16.msra.mxu1 %v1213_v13 }
  0xb6   : > { %v612_v34 = vpop.xlane.xlu0 %611 }
  0xb7   : > { %v616_v35 = vmul.f32 0.0078125, %v612_v34 }
  0xb9   : > { %v618_v36 = vsub.f32 %v609_v25, %v616_v35 }
  0xbb   : > { %v620_v37 = vmul.f32 %v618_v36, %v618_v36 }
  0xbd   : > { %v614_v38 = vpop.xlane.xlu0 %613  ;;  %622 = vadd.xlane.f32.xlu1 %v620_v37 }
  0xbe   : > { %v617_v39 = vmul.f32 0.0078125, %v614_v38 }
  0xc0   : > { %v619_v40 = vsub.f32 %v610_v31, %v617_v39 }
  0xc2   : > { %v621_v41 = vmul.f32 %v619_v40, %v619_v40 }
  0xc4   : > { %624 = vadd.xlane.f32.xlu1 %v621_v41  ;;  %v900_v41 = vadd.s32 8, %v1355_v1 }
  0xc6   : > { %v904_v47 = vadd.s32 %v902_v42, %v900_v41 }
  0xc8   : > { %vm906_vm8 = vcmp.lt.s32.totalorder %v904_v47, 40 }
 0x146   : > { %v623_v49 = vpop.xlane.xlu1 %622 }
 0x147   : > { %v626_v50 = vmul.f32 0.0078125, %v623_v49 }
 0x149   : > { %v628_v51 = vadd.f32 1e-06, %v626_v50 }
 0x14b   : > { %1214 = vrsqrt.f32 %v628_v51 }
 0x14d   : > { %v625_v52 = vpop.xlane.xlu1 %624 }
 0x14e   : > { %v627_v53 = vmul.f32 0.0078125, %v625_v52 }
 0x150   : > { %v629_v54 = vadd.f32 1e-06, %v627_v53 }
 0x152   : > { %1216 = vrsqrt.f32 %v629_v54 }
 0x158   : > { %v1215_v55 = vpop.eup %1214 }
 0x159   : > { %v632_v56 = vmul.f32 %v1215_v55, %v618_v36 }
 0x15b   : > { %v641_v60 = vmul.f32 %v1060_v57, %v632_v56 }
 0x15d   : > { %v650_v63 = vadd.f32 %v1061_v61, %v641_v60 }
 0x15f   : > { %v1217_v58 = vpop.eup %1216 }
 0x160   : > { %v633_v59 = vmul.f32 %v1217_v58, %v619_v40  ;;  %v1071_v40 = vld [vmem:[%s1523_s9] ss:$0 sm:$0xff] }
 0x162   : > { %v642_v62 = vmul.f32 %v1060_v57, %v633_v59 }
 0x164   : > { %v651_v0 = vadd.f32 %v1061_v61, %v642_v62 }
 0x166   : > { %v652_v2 = vpack.c.bf16 %v651_v0, %v650_v63 }
 0x168   : > { %1131 = vmatmul.mubr.bf16.vlgmr.msra.gmra.mxu0 %v652_v2 }
 0x228   : > { %v758_v14 = vpop.f32.mrf.mxu0 }
 0x229   : > { %v759_v16 = vadd.f32 %v1062_v15, %v758_v14 }
 0x22a   : > { %v1132_v17 = vpop.f32.mrf.mxu0 }
 0x22b   : > { %v767_v18 = vmul.f32 0.044715, %v759_v16  ;;  %v765_v34 = vmul.f32 0.5, %v759_v16 }
 0x22c   : > { %v761_v19 = vpop.f32.mrf.mxu0 }
 0x22d   : > { %v769_v20 = vmul.f32 %v767_v18, %v759_v16  ;;  %v762_v21 = vadd.f32 %v1062_v15, %v761_v19 }
 0x22e   : > { %v1133_v22 = vpop.f32.mrf.mxu0 }
 0x22f   : > { %v771_v23 = vmul.f32 %v769_v20, %v759_v16  ;;  %v768_v24 = vmul.f32 0.044715, %v762_v21  ;;  %v766_v35 = vmul.f32 0.5, %v762_v21 }
 0x231   : > { %v770_v25 = vmul.f32 %v768_v24, %v762_v21  ;;  %v773_v26 = vadd.f32 %v771_v23, %v759_v16 }
 0x233   : > { %v772_v27 = vmul.f32 %v770_v25, %v762_v21  ;;  %v775_v28 = vmul.f32 0.7978846, %v773_v26 }
 0x235   : > { %v774_v29 = vadd.f32 %v772_v27, %v762_v21  ;;  %1218 = vtanh.f32 %v775_v28 }
 0x237   : > { %v776_v30 = vmul.f32 0.7978846, %v774_v29 }
 0x239   : > { %1220 = vtanh.f32 %v776_v30 }
 0x242   : > { %v1219_v31 = vpop.eup %1218 }
 0x243   : > { %v779_v32 = vadd.f32 1.0, %v1219_v31 }
 0x245   : > { %v781_v37 = vmul.f32 %v779_v32, %v765_v34 }
 0x246   : > { %v1221_v33 = vpop.eup %1220 }
 0x247   : > { %v780_v36 = vadd.f32 1.0, %v1221_v33 }
 0x249   : > { %v782_v38 = vmul.f32 %v780_v36, %v766_v35 }
 0x24b   : > { %v783_v39 = vpack.c.bf16 %v782_v38, %v781_v37 }
 0x24d   : > { %1151 = vmatmul.mubr.bf16.vlgmr.msra.gmra.mxu1 %v783_v39 }
 0x30d   : > { %v889_v43 = vpop.f32.mrf.mxu1 }
 0x30e   : > { %v890_v44 = vadd.f32 %v1071_v40, %v889_v43 }
 0x30f   : > { %v1152_v46 = vpop.f32.mrf.mxu1 }
 0x310   : > { %v896_v49 = vadd.f32 %v1089_v11, %v890_v44 }
 0x311   : > { %v892_v48 = vpop.f32.mrf.mxu1 }
 0x312   : > { %v893_v50 = vadd.f32 %v1071_v40, %v892_v48  ;;  %v911_v53 = vsel %vm905_vm7, %v896_v49, 0.0 }
 0x313   : > { %v1153_v51 = vpop.f32.mrf.mxu1 }
 0x314   : > { %v897_v52 = vadd.f32 %v1090_v12, %v893_v50 }
 0x316   : > { %v912_v1 = vsel %vm906_vm8, %v897_v52, 0.0 }
 0x317   : > { %v1094_v54 = vpack.c.bf16 %v912_v1, %v911_v53 }
 0x319   : > { %1095 = vst [vmem:[%s456_s22] sm:$0xff] %v1094_v54  }
 0x31a PF: > { %s20_s17 = sadd.s32 1, %s1260_s17   ;;  %s1525_s13 = smov %s1252_s15 }
 0x31b   : > { %p17_p8 = scmp.ge.s32.totalorder %s20_s17, 8   ;;  %s1526_s14 = smov %s1256_s16 }
 0x31c   : > { %s1527_s15 = smov %s1530_s18  ;;  %s1528_s16 = smov %s1534_s19 }
 0x31d   :  { %19 = sbr.rel (!%p17_p8) target bundleno = 3 (0x3), region = 99 }

// kernel: mel_decoder_forward.10
= control target key start
LH: loop header
LB: loop body
LE: loop exit
PB: predicated region body
PF: predicated region fallthrough
CT: control target
= control target key end

     0   :  { %s2219_s22 = smov 0   ;;  %s2221_s23 = smov 0   ;;  %s2675_s0 = inlined_call_operand.vmem [shape: bf16[2,48,64], index: 0, kind: input, shape index: {}]   ;;  %s2676_s1 = inlined_call_operand.vmem [shape: bf16[2,48,32], index: 1, kind: input, shape index: {}]   ;;  %s2677_s2 = inlined_call_operand.vmem [shape: bf16[2,3,8,64], index: 2, kind: input, shape index: {}]   ;;  %s2678_s3 = inlined_call_operand.vmem [shape: bf16[2,3,8,32], index: 3, kind: input, shape index: {}]   ;;  %s2679_s4 = inlined_call_operand.vmem [shape: f32[7,64], index: 4, kind: input, shape index: {}]   ;;  %s2680_s5 = inlined_call_operand.vmem [shape: f32[7,32], index: 5, kind: input, shape index: {}]   ;;  %s2681_s6 = inlined_call_operand.vmem [shape: f32[1,64], index: 6, kind: input, shape index: {}]   ;;  %s2682_s7 = inlined_call_operand.vmem [shape: f32[1,32], index: 7, kind: input, shape index: {}]   ;;  %s2683_s8 = inlined_call_operand.vmem [shape: f32[2,1,64], index: 8, kind: input, shape index: {}]   ;;  %s2684_s9 = inlined_call_operand.vmem [shape: f32[2,1,32], index: 9, kind: input, shape index: {}]   ;;  %s2685_s10 = inlined_call_operand.vmem [shape: f32[2,1,64], index: 10, kind: input, shape index: {}]   ;;  %s2686_s11 = inlined_call_operand.vmem [shape: f32[2,1,32], index: 11, kind: input, shape index: {}]   ;;  %s2687_s12 = inlined_call_operand.vmem [shape: bf16[64,128], index: 12, kind: input, shape index: {}]   ;;  %s2688_s13 = inlined_call_operand.vmem [shape: bf16[32,128], index: 13, kind: input, shape index: {}]   ;;  %s2689_s14 = inlined_call_operand.vmem [shape: f32[1,128], index: 14, kind: input, shape index: {}]   ;;  %s2690_s15 = inlined_call_operand.vmem [shape: bf16[128,128], index: 15, kind: input, shape index: {}]   ;;  %s2691_s16 = inlined_call_operand.vmem [shape: f32[1,128], index: 16, kind: input, shape index: {}]   ;;  %s2692_s17 = inlined_call_operand.vmem [shape: bf16[64,128], index: 17, kind: input, shape index: {}]   ;;  %s2693_s18 = inlined_call_operand.vmem [shape: bf16[32,128], index: 18, kind: input, shape index: {}]   ;;  %s2694_s19 = inlined_call_operand.vmem [shape: f32[1,128], index: 19, kind: input, shape index: {}]   ;;  %s2695_s20 = inlined_call_operand.vmem [shape: bf16[2,48,128], index: 20, kind: output, shape index: {}]  }
   0x1   :  { %2699 = sst [smem:[#allocation7_spill]] %s2675_s0  ;;  %s2223_s24 = smov 0  }
   0x2   :  { %2700 = sst [smem:[#allocation8_spill]] %s2676_s1  ;;  %s2217_s1 = smov 0  }
   0x3   :  { %2701 = sst [smem:[#allocation9_spill]] %s2677_s2  ;;  %s2225_s2 = smov 0  }
   0x4   :  { %2702 = sst [smem:[#allocation10_spill]] %s2678_s3 }
   0x5   :  { %2703 = sst [smem:[#allocation11_spill]] %s2679_s4 }
   0x6   :  { %2704 = sst [smem:[#allocation12_spill]] %s2680_s5 }
   0x7 LB: > { %2705 = sst [smem:[#allocation2_spill]] %s2100_s23  ;;  %s39_s25 = sadd.s32 1, %s2100_s23  ;;  %s2108_s2 = sphi %s2225_s2, %s30_s2   ;;  %s2104_s24 = sphi %s2223_s24, %s2720_s24   ;;  %s2100_s23 = sphi %s2221_s23, %s2719_s23   ;;  %s2096_s22 = sphi %s2219_s22, %s2718_s22   ;;  %s2092_s1 = sphi %s2217_s1, %s2717_s1  }
   0x8   : > { %2706 = sst [smem:[#allocation3_spill]] %s2104_s24  ;;  %s42_s3 = sadd.s32 1, %s2104_s24 }
   0x9   : > { %2707 = sst [smem:[#allocation4_spill]] %s2108_s2  ;;  %p40_p0 = scmp.ge.s32.totalorder %s39_s25, 3 }
   0xa   : > { %p1853_p1 = scmp.ge.s32.totalorder %s2108_s2, 1  ;;  %p662_p2 = scmp.lt.s32.totalorder %s2108_s2, 7 }
   0xb   : > { %s2722_s25 = smov (%p40_p0, %s39_s25), 0  ;;  %s2724_s3 = smov (!%p40_p0, %s42_s3), %s2104_s24 }
   0xc   : > { %2708 = sst [smem:[#allocation5_spill]] %s2722_s25  ;;  %p663_p3 = pnand %p1853_p1, %p662_p2 }
   0xd   : > { %p44_p4 = scmp.ge.s32.totalorder %s2724_s3, 2  ;;  %s1854_s26 = sshll.u32 (!%p663_p3), %s2092_s1, 1 }
   0xe   : > { %666 = sbr.rel (%p663_p3) target bundleno = 834 (0x342), region = 100  ;;  %p766_p5 = scmp.lt.s32.totalorder (!%p663_p3), %s2096_s22, 1 }
   0xf   : > { %s2726_s3 = smov (%p44_p4, %s2724_s3), 0  ;;  %p768_p6 = scmp.lt.s32.totalorder (!%p663_p3), %s1854_s26, 5 }
  0x10   : > { %2709 = sst [smem:[#allocation6_spill]] %s2726_s3  ;;  %p787_p7 = scmp.lt.s32.totalorder (!%p663_p3), %s2092_s1, 2 }
  0x11   : > { %s2710_s5 = sld [smem:[#allocation12_spill]] (!%p663_p3) }
  0x12   : > { %s2711_s21 = sld [smem:[#allocation11_spill]] (!%p663_p3) }
  0x13   : > { %v842_v0 = vlaneseq  ;;  %s2728_s22 = smov (!%p766_p5, %s2096_s22), 1  ;;  %s2730_s26 = smov (!%p768_p6, %s1854_s26), 5  ;;  %vm832_vm0 = vcmask 1042432   ;;  %vm858_vm1 = vcmask 1046528   ;;  %vm878_vm2 = vcmask 1045504  }
  0x14   : > { %s1994_s4 = smul.u32 6, %s2728_s22  ;;  %s2712_s24 = sld [smem:[#allocation8_spill]]  ;;  %vm898_vm3 = vcmask 1044480   ;;  %vm918_vm4 = vcmask 1043456   ;;  %vm957_vm5 = vcmask 1041408   ;;  %vm1129_vm6 = vcmask 261120  }
  0x15   : > { %v2253_v1 = vshrl.u32 %v842_v0, 7  ;;  %s788_s29 = scalar_select %p787_p7, %s2092_s1, 2  ;;  %vm976_vm7 = vcmask 523264   ;;  %vm2111_vm8 = vmmov 0  }
  0x16   : > { %s771_s27 = sadd.s32 %s1994_s4, %s2730_s26  ;;  %s1995_s28 = smul.u32 3, %s2728_s22 }
  0x17   : > { %v999_v2 = vld [vmem:[%s2710_s5] sm:$0x7f]  ;;  %v844_v3 = vsub.s32 0, %v2253_v1  ;;  %v850_v4 = vsub.s32 1, %v2253_v1  ;;  %v870_v5 = vsub.s32 2, %v2253_v1  ;;  %v890_v6 = vsub.s32 3, %v2253_v1  ;;  %s806_s4 = scalar_lea.vmem %s2684_s9, %s2728_s22 }
  0x18   : > { %v910_v7 = vsub.s32 4, %v2253_v1  ;;  %v930_v8 = vsub.s32 5, %v2253_v1  ;;  %v949_v9 = vsub.s32 6, %v2253_v1  ;;  %v841_v10 = vld [vmem:[%s2711_s21] sm:$0x7f]  ;;  %s2271_s5 = sshll.u32 %s771_s27, 2  ;;  %s790_s2 = sadd.s32 %s1995_s28, %s788_s29 }
  0x19   : > { %v2277_v11 = vrot.slane %v999_v2, %v844_v3  ;;  %v2279_v12 = vrot.slane %v999_v2, %v850_v4  ;;  %v2281_v13 = vrot.slane %v999_v2, %v870_v5  ;;  %s1858_s30 = sshll.u32 %s790_s2, 2  ;;  %v2285_v15 = vrot.slane %v999_v2, %v890_v6  ;;  %s2713_s3 = sld [smem:[#allocation7_spill]] }
  0x1a   : > { %s783_s23 = scalar_lea.vmem %s2712_s24, %s2271_s5  ;;  %v2287_v16 = vrot.slane %v999_v2, %v910_v7  ;;  %v2289_v17 = vrot.slane %v999_v2, %v930_v8  ;;  %v2291_v18 = vrot.slane %v999_v2, %v949_v9  ;;  %s2714_s0 = sld [smem:[#allocation10_spill]]  ;;  %v2307_v22 = vrot.slane %v841_v10, %v844_v3 }
  0x1b   : > { %v2283_v14 = vld [vmem:[%s783_s23] sm:$0xff]   ;;  %s2715_s27 = sld [smem:[#allocation9_spill]]  ;;  %v2309_v23 = vrot.slane %v841_v10, %v850_v4  ;;  %v2315_v28 = vrot.slane %v841_v10, %v870_v5  ;;  %v2317_v29 = vrot.slane %v841_v10, %v890_v6  ;;  %v2319_v33 = vrot.slane %v841_v10, %v910_v7  ;;  %s809_s24 = scalar_lea.vmem %s2685_s10, %s2728_s22 }
  0x1c   : > { %v985_v19 = vunpack.c.l.bf16 %v2283_v14  ;;  %v986_v20 = vunpack.c.h.bf16 %v2283_v14  ;;  %v2323_v36 = vrot.slane %v841_v10, %v930_v8  ;;  %v2325_v37 = vrot.slane %v841_v10, %v949_v9  ;;  %s821_s23 = scalar_lea.vmem %s2695_s20, %s2271_s5 }
  0x1e   : > { %v991_v31 = vrot.slane %v985_v19, 5  ;;  %v992_v32 = vrot.slane %v986_v20, 5 }
  0x1f   : > { %s773_s26 = scalar_lea.vmem %s2713_s3, %s2271_s5 }
  0x20   : > { %s800_s2 = scalar_lea.vmem %s2714_s0, %s1858_s30  ;;  %v2305_v21 = vld [vmem:[%s773_s26] sm:$0xff]   ;;  %v2328_v38 = vsel %vm832_vm0, %v991_v31, %v992_v32 }
  0x21   : > { %s792_s28 = scalar_lea.vmem %s2715_s27, %s1858_s30  ;;  %v987_v24 = vld [vmem:[%s800_s2] sm:$0xf]  ;;  %v826_v25 = vunpack.c.l.bf16 %v2305_v21  ;;  %v827_v26 = vunpack.c.h.bf16 %v2305_v21  ;;  %v2339_v44 = vmul.f32 %v2279_v12, %v2328_v38  ;;  %v2344_v46 = vmul.f32 %v2281_v13, %v2328_v38  ;;  %s803_s2 = scalar_lea.vmem %s2683_s8, %s2728_s22 }
  0x22   : > { %v2313_v27 = vld [vmem:[%s792_s28] sm:$0xf]  ;;  %v988_v30 = vunpack.c.l.bf16 %v987_v24  ;;  %v2349_v48 = vmul.f32 %v2285_v15, %v2328_v38  ;;  %v2355_v53 = vmul.f32 %v2287_v16, %v2328_v38  ;;  %v2366_v61 = vmul.f32 %v2289_v17, %v2328_v38  ;;  %s812_s27 = scalar_lea.vmem %s2686_s11, %s2728_s22 }
  0x23   : > { %v833_v34 = vrot.slane %v826_v25, 5  ;;  %v2321_v35 = vrot.slane %v827_v26, 5  ;;  %v829_v40 = vunpack.c.l.bf16 %v2313_v27  ;;  %v1017_v51 = vrot.slane %v2339_v44, 1  ;;  %v1862_v44 = vld [vmem:[%s2681_s6] ss:$0 sm:$0xff] }
  0x24   : > { %v997_v39 = vsel %vm832_vm0, %v988_v30, %v991_v31  ;;  %v2333_v41 = vsel %vm832_vm0, %v992_v32, %v988_v30  ;;  %v1036_v54 = vrot.slane %v2344_v46, 2  ;;  %v1055_v56 = vrot.slane %v2349_v48, 3 }
  0x25   : > { %v1004_v42 = vmul.f32 %v2277_v11, %v997_v39  ;;  %v1010_v43 = vmul.f32 %v2279_v12, %v997_v39  ;;  %v1029_v45 = vmul.f32 %v2281_v13, %v997_v39  ;;  %v1048_v47 = vmul.f32 %v2285_v15, %v997_v39 }
  0x26   : > { %v1067_v49 = vmul.f32 %v2287_v16, %v997_v39  ;;  %v1074_v59 = vrot.slane %v2355_v53, 4  ;;  %v1086_v60 = vmul.f32 %v2289_v17, %v997_v39  ;;  %v1105_v2 = vmul.f32 %v2291_v18, %v997_v39 }
  0x27   : > { %v1016_v50 = vrot.slane %v1010_v43, 1  ;;  %v1035_v52 = vrot.slane %v1029_v45, 2  ;;  %v1054_v55 = vrot.slane %v1048_v47, 3  ;;  %v1093_v5 = vrot.slane %v2366_v61, 5 }
  0x28   : > { %v1073_v57 = vrot.slane %v1067_v49, 4  ;;  %v1092_v4 = vrot.slane %v1086_v60, 5  ;;  %v2381_v6 = vmul.f32 %v2291_v18, %v2328_v38  ;;  %v1111_v8 = vrot.slane %v1105_v2, 6  ;;  %v2431_v2 = vld [vmem:[%s2682_s7] ss:$0 sm:$0xff] }
  0x29   : > { %v1018_v58 = vsel %vm858_vm1, %v1016_v50, %v1017_v51  ;;  %v1037_v63 = vsel %vm878_vm2, %v1035_v52, %v1036_v54  ;;  %v1056_v0 = vsel %vm898_vm3, %v1054_v55, %v1055_v56  ;;  %v2385_v9 = vsel %vm832_vm0, %v833_v34, %v2321_v35 }
  0x2a   : > { %v1023_v62 = vadd.f32 %v1018_v58, %v1004_v42  ;;  %v1075_v3 = vsel %vm918_vm4, %v1073_v57, %v1074_v59  ;;  %v839_v10 = vsel %vm832_vm0, %v829_v40, %v833_v34  ;;  %v1094_v19 = vsel %vm832_vm0, %v1092_v4, %v1093_v5 }
  0x2b   : > { %v1112_v20 = vrot.slane %v2381_v6, 6  ;;  %v846_v24 = vmul.f32 %v2307_v22, %v839_v10  ;;  %v852_v25 = vmul.f32 %v2309_v23, %v839_v10  ;;  %v2398_v30 = vmul.f32 %v2309_v23, %v2385_v9 }
  0x2c   : > { %v1042_v7 = vadd.f32 %v1037_v63, %v1023_v62  ;;  %v872_v31 = vmul.f32 %v2315_v28, %v839_v10  ;;  %v2403_v32 = vmul.f32 %v2315_v28, %v2385_v9  ;;  %v892_v42 = vmul.f32 %v2317_v29, %v839_v10 }
  0x2d   : > { %v1113_v34 = vsel %vm957_vm5, %v1111_v8, %v1112_v20  ;;  %v859_v39 = vrot.slane %v852_v25, 1  ;;  %v2411_v43 = vmul.f32 %v2317_v29, %v2385_v9  ;;  %v860_v47 = vrot.slane %v2398_v30, 1 }
  0x2e   : > { %v1061_v26 = vadd.f32 %v1056_v0, %v1042_v7  ;;  %v879_v49 = vrot.slane %v872_v31, 2  ;;  %v880_v50 = vrot.slane %v2403_v32, 2  ;;  %v899_v52 = vrot.slane %v892_v42, 3 }
  0x2f   : > { %v900_v55 = vrot.slane %v2411_v43, 3  ;;  %v912_v57 = vmul.f32 %v2319_v33, %v839_v10  ;;  %v2419_v58 = vmul.f32 %v2319_v33, %v2385_v9  ;;  %v861_v62 = vsel %vm858_vm1, %v859_v39, %v860_v47 }
  0x30   : > { %v1080_v45 = vadd.f32 %v1075_v3, %v1061_v26  ;;  %v881_v63 = vsel %vm878_vm2, %v879_v49, %v880_v50  ;;  %v932_v0 = vmul.f32 %v2323_v36, %v839_v10  ;;  %v866_v3 = vadd.f32 %v861_v62, %v846_v24 }
  0x31   : > { %v901_v4 = vsel %vm898_vm3, %v899_v52, %v900_v55  ;;  %v919_v7 = vrot.slane %v912_v57, 4  ;;  %v920_v8 = vrot.slane %v2419_v58, 4  ;;  %v2439_v25 = vmul.f32 %v2323_v36, %v2385_v9 }
  0x32   : > { %v1099_v60 = vadd.f32 %v1094_v19, %v1080_v45  ;;  %v938_v26 = vrot.slane %v932_v0, 5  ;;  %v951_v31 = vmul.f32 %v2325_v37, %v839_v10  ;;  %v886_v39 = vadd.f32 %v881_v63, %v866_v3 }
  0x33   : > { %v921_v24 = vsel %vm918_vm4, %v919_v7, %v920_v8  ;;  %v2447_v42 = vmul.f32 %v2325_v37, %v2385_v9  ;;  %v1005_v45 = vmul.f32 %v2277_v11, %v2328_v38  ;;  %v939_v49 = vrot.slane %v2439_v25, 5 }
  0x34   : > { %v1118_v19 = vadd.f32 %v1113_v34, %v1099_v60  ;;  %v958_v52 = vrot.slane %v951_v31, 6  ;;  %v1012_v10 = vmul.f32 %v2279_v12, %v2333_v41  ;;  %v906_v57 = vadd.f32 %v901_v4, %v886_v39 }
  0x35   : > { %v959_v60 = vrot.slane %v2447_v42, 6  ;;  %v1031_v62 = vmul.f32 %v2281_v13, %v2333_v41  ;;  %v1050_v63 = vmul.f32 %v2285_v15, %v2333_v41  ;;  %v940_v38 = vsel %vm832_vm0, %v938_v26, %v939_v49 }
  0x36   : > { %v2452_v34 = vadd.f32 %v2431_v2, %v1118_v19  ;;  %v1019_v0 = vrot.slane %v1012_v10, 1  ;;  %v1069_v12 = vmul.f32 %v2287_v16, %v2333_v41  ;;  %v926_v3 = vadd.f32 %v921_v24, %v906_v57 }
  0x37   : > { %v960_v4 = vsel %vm957_vm5, %v958_v52, %v959_v60  ;;  %v1038_v7 = vrot.slane %v1031_v62, 2  ;;  %v1057_v13 = vrot.slane %v1050_v63, 3  ;;  %v1088_v31 = vmul.f32 %v2289_v17, %v2333_v41 }
  0x38   : > { %v1130_v11 = vsel %vm1129_vm6, %v2452_v34, 0.0  ;;  %v1020_v15 = vsel %vm858_vm1, %v1017_v51, %v1019_v0  ;;  %v1076_v19 = vrot.slane %v1069_v12, 4  ;;  %v1107_v26 = vmul.f32 %v2291_v18, %v2333_v41 }
  0x39   : > { %1131 = vadd.xlane.f32.xlu1 %v1130_v11  ;;  %v945_v39 = vadd.f32 %v940_v38, %v926_v3  ;;  %v1024_v16 = vadd.f32 %v1020_v15, %v1005_v45  ;;  %v1039_v24 = vsel %vm878_vm2, %v1036_v54, %v1038_v7  ;;  %v1058_v51 = vsel %vm898_vm3, %v1055_v56, %v1057_v13 }
  0x3a   : > { %v1077_v17 = vsel %vm918_vm4, %v1074_v59, %v1076_v19  ;;  %v1095_v18 = vrot.slane %v1088_v31, 5  ;;  %v840_v41 = vsel %vm832_vm0, %v2321_v35, %v829_v40  ;;  %v1114_v42 = vrot.slane %v1107_v26, 6 }
  0x3b   : > { %v965_v46 = vadd.f32 %v960_v4, %v945_v39  ;;  %v1043_v54 = vadd.f32 %v1039_v24, %v1024_v16  ;;  %v854_v45 = vmul.f32 %v2309_v23, %v840_v41  ;;  %v847_v53 = vmul.f32 %v2307_v22, %v2385_v9 }
  0x3c   : > { %v1096_v48 = vsel %vm832_vm0, %v1093_v5, %v1095_v18  ;;  %v874_v56 = vmul.f32 %v2315_v28, %v840_v41  ;;  %v894_v59 = vmul.f32 %v2317_v29, %v840_v41  ;;  %v914_v35 = vmul.f32 %v2319_v33, %v840_v41 }
  0x3d   : > { %v974_v27 = vadd.f32 %v1862_v44, %v965_v46  ;;  %v1062_v52 = vadd.f32 %v1058_v51, %v1043_v54  ;;  %v862_v10 = vrot.slane %v854_v45, 1  ;;  %v934_v23 = vmul.f32 %v2323_v36, %v840_v41  ;;  %v2040_v46 = vld [vmem:[%s2688_s13 + $0x8] sm:$0xff]   ;;  %v2042_v45 = vld [vmem:[%s2688_s13] sm:$0xff]  }
  0x3e   : > { %v882_v40 = vrot.slane %v874_v56, 2  ;;  %v902_v57 = vrot.slane %v894_v59, 3  ;;  %v953_v61 = vmul.f32 %v2325_v37, %v840_v41  ;;  %v922_v28 = vrot.slane %v914_v35, 4  ;;  %v2038_v41 = vld [vmem:[%s2687_s12 + $0x18] sm:$0xff]  }
  0x3f   : > { %v977_v5 = vsel %vm976_vm7, %v974_v27, 0.0  ;;  %v1081_v62 = vadd.f32 %v1077_v17, %v1062_v52  ;;  %v863_v22 = vsel %vm858_vm1, %v860_v47, %v862_v10  ;;  %v1115_v29 = vsel %vm957_vm5, %v1112_v20, %v1114_v42  ;;  %v2039_v42 = vld [vmem:[%s2687_s12 + $0x10] sm:$0xff]  }
  0x40   : > { %978 = vadd.xlane.f32.xlu0 %v977_v5  ;;  %v867_v33 = vadd.f32 %v863_v22, %v847_v53  ;;  %v883_v36 = vsel %vm878_vm2, %v880_v50, %v882_v40  ;;  %v903_v37 = vsel %vm898_vm3, %v900_v55, %v902_v57  ;;  %v941_v63 = vrot.slane %v934_v23, 5  ;;  %v2043_v53 = vld [vmem:[%s2687_s12] sm:$0xff]  }
  0x41   : > { %v1100_v9 = vadd.f32 %v1096_v48, %v1081_v62  ;;  %v923_v47 = vsel %vm918_vm4, %v920_v8, %v922_v28  ;;  %v961_v6 = vrot.slane %v953_v61, 6  ;;  %v2110_v54 = vmov 0.0   ;;  %v2041_v48 = vld [vmem:[%s2687_s12 + $0x8] sm:$0xff]   ;;  %v1866_v28 = vld [vmem:[%s806_s4] ss:$0 sm:$0xff]  ;;  %s1897_s4 = sshll.u32 %s2092_s1, 4 }
  0x42   : > { %v887_v30 = vadd.f32 %v883_v36, %v867_v33  ;;  %v942_v32 = vsel %vm832_vm0, %v939_v49, %v941_v63  ;;  %1942 = vmatprep.subr.bf16.mxu1 %v2110_v54  ;;  %1934 = vmatprep.subr.bf16.mxu0 %v2110_v54 }
  0x43   : > { %v1119_v11 = vadd.f32 %v1115_v29, %v1100_v9  ;;  %v962_v55 = vsel %vm957_vm5, %v959_v60, %v961_v6  ;;  %1943 = vmatpush3.bf16.msra.mxu1 %v2038_v41  ;;  %1935 = vmatpush3.bf16.msra.mxu0 %v2040_v46  ;;  %v1864_v29 = vld [vmem:[%s803_s2] ss:$0 sm:$0xff] }
  0x44   : > { %v907_v38 = vadd.f32 %v903_v37, %v887_v30  ;;  %1944 = vmatprep.subr.bf16.mxu1 %v2110_v54  ;;  %1936 = vmatprep.subr.bf16.mxu0 %v2110_v54  ;;  %v1867_v30 = vld [vmem:[%s812_s27] ss:$0 sm:$0xff] }
  0x45   : > { %v1128_v20 = vadd.f32 %v2431_v2, %v1119_v11  ;;  %1938 = vmatprep.mubr.msk.bf16.mxu0 %vm2111_vm8, %v2110_v54  ;;  %1950 = vmatprep.mubr.msk.bf16.mxu1 %vm2111_vm8, %v2110_v54  ;;  %v1865_v11 = vld [vmem:[%s809_s24] ss:$0 sm:$0xff] }
  0x46   : > { %v927_v50 = vadd.f32 %v923_v47, %v907_v38 }
  0x47   : > { %v1133_v43 = vsel %vm1129_vm6, %v1128_v20, 0.0  ;;  %1945 = vmatpush3.bf16.msra.mxu1 %v2039_v42  ;;  %1937 = vmatpush3.bf16.msra.mxu0 %v2042_v45 }
  0x48   : > { %1134 = vadd.xlane.f32.xlu1 %v1133_v43  ;;  %v946_v0 = vadd.f32 %v942_v32, %v927_v50  ;;  %1946 = vmatprep.subr.bf16.mxu1 %v2110_v54  ;;  %v2044_v43 = vld [vmem:[%s2693_s18 + $0x8] sm:$0xff]  }
  0x49   : > { %1954 = vmatprep.subr.bf16.mxu0 %v2110_v54 }
  0x4a   : > { %v966_v12 = vadd.f32 %v962_v55, %v946_v0 }
  0x4b   : > { %1947 = vmatpush3.bf16.msra.mxu1 %v2041_v48 }
  0x4c   : > { %v975_v3 = vadd.f32 %v1862_v44, %v966_v12  ;;  %1948 = vmatprep.subr.bf16.mxu1 %v2110_v54  ;;  %v2045_v12 = vld [vmem:[%s2693_s18] sm:$0xff]  }
  0x4e   : > { %v980_v58 = vsel %vm976_vm7, %v975_v3, 0.0 }
  0x4f   : > { %981 = vadd.xlane.f32.xlu0 %v980_v58  ;;  %1949 = vmatpush3.bf16.msra.mxu1 %v2043_v53  ;;  %v2048_v58 = vld [vmem:[%s2690_s15 + $0x38] sm:$0xff]  }
  0x50   : > { %1974 = vmatprep.subr.bf16.mxu1 %v2110_v54 }
  0xc2   : > { %v1132_v8 = vpop.xlane.xlu1 %1131 }
  0xc9   : > { %v979_v4 = vpop.xlane.xlu0 %978 }
  0xca   : > { %v1136_v7 = vadd.f32 %v1132_v8, %v979_v4  ;;  %v2049_v8 = vld [vmem:[%s2692_s17 + $0x10] sm:$0xff]   ;;  %v2051_v4 = vld [vmem:[%s2692_s17 + $0x8] sm:$0xff]  }
  0xcc   : > { %v1139_v2 = vmul.f32 0.010416667, %v1136_v7  ;;  %v2052_v7 = vld [vmem:[%s2690_s15 + $0x28] sm:$0xff]  }
  0xce   : > { %v1141_v13 = vsub.f32 %v974_v27, %v1139_v2  ;;  %v1151_v25 = vsub.f32 %v2452_v34, %v1139_v2  ;;  %v2053_v2 = vld [vmem:[%s2692_s17] sm:$0xff]  }
  0xd0   : > { %v1143_v49 = vmul.f32 %v1141_v13, %v1141_v13  ;;  %v1153_v19 = vmul.f32 %v1151_v25, %v1151_v25 }
  0xd1   : > { %v1135_v60 = vpop.xlane.xlu1 %1134 }
  0xd2   : > { %v1145_v15 = vsel %vm976_vm7, %v1143_v49, 0.0  ;;  %v1155_v31 = vsel %vm1129_vm6, %v1153_v19, 0.0  ;;  %v2057_v49 = vld [vmem:[%s2690_s15 + $0x10] sm:$0xff]  }
  0xd3   : > { %1146 = vadd.xlane.f32.xlu0 %v1145_v15  ;;  %v2058_v15 = vld [vmem:[%s2690_s15 + $0x8] sm:$0xff]  }
  0xd7   : > { %1156 = vadd.xlane.f32.xlu0 %v1155_v31  ;;  %v1876_v31 = vld [vmem:[%s2689_s14] ss:$0 sm:$0xff] }
  0xd8   : > { %v982_v26 = vpop.xlane.xlu0 %981 }
  0xd9   : > { %v1137_v39 = vadd.f32 %v1135_v60, %v982_v26 }
  0xdb   : > { %v1140_v16 = vmul.f32 0.010416667, %v1137_v39 }
  0xdd   : > { %v1142_v24 = vsub.f32 %v975_v3, %v1140_v16  ;;  %v1152_v44 = vsub.f32 %v1128_v20, %v1140_v16  ;;  %v2047_v3 = vld [vmem:[%s2692_s17 + $0x18] sm:$0xff]  }
  0xdf   : > { %v1144_v51 = vmul.f32 %v1142_v24, %v1142_v24  ;;  %v1154_v18 = vmul.f32 %v1152_v44, %v1152_v44 }
  0xe1   : > { %v1148_v17 = vsel %vm976_vm7, %v1144_v51, 0.0  ;;  %v1158_v34 = vsel %vm1129_vm6, %v1154_v18, 0.0 }
  0xe2   : > { %1149 = vadd.xlane.f32.xlu1 %v1148_v17 }
  0xe6   : > { %1159 = vadd.xlane.f32.xlu1 %v1158_v34 }
 0x15c   : > { %v1147_v56 = vpop.xlane.xlu0 %1146 }
 0x160   : > { %v1157_v59 = vpop.xlane.xlu0 %1156 }
 0x161   : > { %v1161_v27 = vadd.f32 %v1157_v59, %v1147_v56 }
 0x163   : > { %v1163_v52 = vmul.f32 0.010416667, %v1161_v27 }
 0x165   : > { %v1165_v35 = vadd.f32 1e-06, %v1163_v52 }
 0x167   : > { %2062 = vrsqrt.f32 %v1165_v35 }
 0x16b   : > { %v1150_v10 = vpop.xlane.xlu1 %1149 }
 0x16f   : > { %v1160_v40 = vpop.xlane.xlu1 %1159 }
 0x170   : > { %v1162_v57 = vadd.f32 %v1160_v40, %v1150_v10 }
 0x172   : > { %v1164_v23 = vmul.f32 0.010416667, %v1162_v57 }
 0x174   : > { %v1166_v61 = vadd.f32 1e-06, %v1164_v23  ;;  %v2063_v5 = vpop.eup %2062 }
 0x175   : > { %v1198_v62 = vmul.f32 %v2063_v5, %v1151_v25  ;;  %v1169_v22 = vmul.f32 %v2063_v5, %v1141_v13  ;;  %v2054_v13 = vld [vmem:[%s2690_s15 + $0x20] sm:$0xff]   ;;  %v2056_v25 = vld [vmem:[%s2690_s15 + $0x18] sm:$0xff]  }
 0x176   : > { %2064 = vrsqrt.f32 %v1166_v61 }
 0x177   : > { %v1207_v9 = vmul.f32 %v1866_v28, %v1198_v62  ;;  %v1178_v63 = vmul.f32 %v1864_v29, %v1169_v22 }
 0x179   : > { %v1216_v38 = vadd.f32 %v1867_v30, %v1207_v9  ;;  %v1187_v32 = vadd.f32 %v1865_v11, %v1178_v63 }
 0x183   : > { %v2065_v33 = vpop.eup %2064 }
 0x184   : > { %v1199_v36 = vmul.f32 %v2065_v33, %v1152_v44  ;;  %v1170_v37 = vmul.f32 %v2065_v33, %v1142_v24 }
 0x186   : > { %v1208_v47 = vmul.f32 %v1866_v28, %v1199_v36  ;;  %v1179_v6 = vmul.f32 %v1864_v29, %v1170_v37 }
 0x188   : > { %v1217_v20 = vadd.f32 %v1867_v30, %v1208_v47  ;;  %v1188_v50 = vadd.f32 %v1865_v11, %v1179_v6  ;;  %v1877_v6 = vld [vmem:[%s2691_s16] ss:$0 sm:$0xff] }
 0x18a   : > { %v1218_v55 = vpack.c.bf16 %v1217_v20, %v1216_v38  ;;  %v1189_v0 = vpack.c.bf16 %v1188_v50, %v1187_v32  ;;  %v1646_v20 = vadd.s32 8, %v2253_v1  ;;  %v1648_v50 = vstv %s1897_s4 }
 0x18c   : > { %1939 = vmatmul.mubr.msk.bf16.vlgmr.msra.gmra.mxu0 %vm1129_vm6, %v1218_v55  ;;  %1951 = vmatmul.mubr.msk.bf16.vlgmr.msra.gmra.mxu1 %vm976_vm7, %v1189_v0  ;;  %v1896_v0 = vld [vmem:[%s2694_s19] ss:$0 sm:$0xff] }
 0x18d   : > { %1975 = vmatpush3.bf16.msra.mxu1 %v2044_v43  ;;  %1978 = vmatprep.mubr.msk.bf16.mxu1 %vm2111_vm8, %v2110_v54 }
 0x18e   : > { %1976 = vmatprep.subr.bf16.mxu1 %v2110_v54  ;;  %1970 = vmatprep.mubr.msk.bf16.mxu0 %vm2111_vm8, %v2110_v54 }
 0x18f   : > { %1955 = vmatpush3.bf16.msra.mxu0 %v2048_v58  ;;  %v1650_v58 = vadd.s32 %v1648_v50, %v1646_v20 }
 0x190   : > { %1956 = vmatprep.subr.bf16.mxu0 %v2110_v54 }
 0x191   : > { %1977 = vmatpush3.bf16.msra.mxu1 %v2045_v12  ;;  %v1649_v12 = vadd.s32 %v1648_v50, %v2253_v1  ;;  %vm1652_vm10 = vcmp.lt.s32.totalorder %v1650_v58, 40 }
 0x192   : > { %1982 = vmatprep.subr.bf16.mxu1 %v2110_v54 }
 0x193   : > { %vm1651_vm9 = vcmp.lt.s32.totalorder %v1649_v12, 40 }
 0x194   : > { %1979 = vmatmul.mubr.msk.bf16.vlgmr.msra.gmra.mxu1 %vm1129_vm6, %v2283_v14  ;;  %v2050_v14 = vld [vmem:[%s2690_s15 + $0x30] sm:$0xff]  }
 0x195   : > { %1983 = vmatpush3.bf16.msra.mxu1 %v2047_v3  ;;  %1990 = vmatprep.mubr.msk.bf16.mxu1 %vm2111_vm8, %v2110_v54 }
 0x196   : > { %1984 = vmatprep.subr.bf16.mxu1 %v2110_v54  ;;  %1957 = vmatpush3.bf16.msra.mxu0 %v2050_v14 }
 0x197   : > { %1958 = vmatprep.subr.bf16.mxu0 %v2110_v54 }
 0x199   : > { %1985 = vmatpush3.bf16.msra.mxu1 %v2049_v8 }
 0x19a   : > { %1986 = vmatprep.subr.bf16.mxu1 %v2110_v54  ;;  %1959 = vmatpush3.bf16.msra.mxu0 %v2052_v7 }
 0x19b   : > { %1960 = vmatprep.subr.bf16.mxu0 %v2110_v54 }
 0x19d   : > { %1987 = vmatpush3.bf16.msra.mxu1 %v2051_v4 }
 0x19e   : > { %1988 = vmatprep.subr.bf16.mxu1 %v2110_v54  ;;  %1961 = vmatpush3.bf16.msra.mxu0 %v2054_v13 }
 0x19f   : > { %1962 = vmatprep.subr.bf16.mxu0 %v2110_v54 }
 0x1a1   : > { %1989 = vmatpush3.bf16.msra.mxu1 %v2053_v2 }
 0x1a2   : > { %1963 = vmatpush3.bf16.msra.mxu0 %v2056_v25 }
 0x1a3   : > { %1964 = vmatprep.subr.bf16.mxu0 %v2110_v54 }
 0x1a4   : > { %1991 = vmatmul.mubr.msk.bf16.vlgmr.msra.gmra.mxu1 %vm976_vm7, %v2305_v21  ;;  %v2059_v21 = vld [vmem:[%s2690_s15] sm:$0xff]  }
 0x1a6   : > { %1965 = vmatpush3.bf16.msra.mxu0 %v2057_v49 }
 0x1a7   : > { %1966 = vmatprep.subr.bf16.mxu0 %v2110_v54 }
 0x1aa   : > { %1967 = vmatpush3.bf16.msra.mxu0 %v2058_v15 }
 0x1ab   : > { %1968 = vmatprep.subr.bf16.mxu0 %v2110_v54 }
 0x1ae   : > { %1969 = vmatpush3.bf16.msra.mxu0 %v2059_v21 }
 0x24c   : > { %v1272_v19 = vpop.f32.mrf.mxu0  ;;  %v1340_v60 = vpop.f32.mrf.mxu1 }
 0x24d   : > { %v1341_v26 = vadd.f32 %v1340_v60, %v1272_v19 }
 0x24e   : > { %v1940_v39 = vpop.f32.mrf.mxu0  ;;  %v1952_v16 = vpop.f32.mrf.mxu1 }
 0x24f   : > { %v1354_v24 = vadd.f32 %v1876_v31, %v1341_v26 }
 0x250   : > { %v1275_v44 = vpop.f32.mrf.mxu0  ;;  %v1343_v51 = vpop.f32.mrf.mxu1 }
 0x251   : > { %v1358_v17 = vmul.f32 0.044715, %v1354_v24  ;;  %v1344_v18 = vadd.f32 %v1343_v51, %v1275_v44  ;;  %v1356_v57 = vmul.f32 0.5, %v1354_v24 }
 0x252   : > { %v1941_v34 = vpop.f32.mrf.mxu0  ;;  %v1953_v41 = vpop.f32.mrf.mxu1 }
 0x253   : > { %v1360_v46 = vmul.f32 %v1358_v17, %v1354_v24  ;;  %v1355_v42 = vadd.f32 %v1876_v31, %v1344_v18 }
 0x254   : > { %v1553_v28 = vpop.f32.mrf.mxu1 }
 0x255   : > { %v1362_v54 = vmul.f32 %v1360_v46, %v1354_v24  ;;  %v1359_v45 = vmul.f32 0.044715, %v1355_v42  ;;  %v1357_v23 = vmul.f32 0.5, %v1355_v42 }
 0x256   : > { %v1980_v29 = vpop.f32.mrf.mxu1 }
 0x257   : > { %v1364_v48 = vadd.f32 %v1362_v54, %v1354_v24  ;;  %v1361_v53 = vmul.f32 %v1359_v45, %v1355_v42 }
 0x258   : > { %v1556_v33 = vpop.f32.mrf.mxu1 }
 0x259   : > { %v1363_v56 = vmul.f32 %v1361_v53, %v1355_v42  ;;  %v1366_v59 = vmul.f32 0.7978846, %v1364_v48 }
 0x25a   : > { %v1981_v36 = vpop.f32.mrf.mxu1 }
 0x25b   : > { %v1365_v27 = vadd.f32 %v1363_v56, %v1355_v42  ;;  %2066 = vtanh.f32 %v1366_v59 }
 0x25d   : > { %v1367_v52 = vmul.f32 0.7978846, %v1365_v27 }
 0x25f   : > { %2068 = vtanh.f32 %v1367_v52 }
 0x264   : > { %v1626_v9 = vpop.f32.mrf.mxu1 }
 0x265   : > { %v1627_v37 = vadd.f32 %v1626_v9, %v1553_v28 }
 0x266   : > { %v1992_v63 = vpop.f32.mrf.mxu1 }
 0x268   : > { %v2067_v10 = vpop.eup %2066  ;;  %v1629_v30 = vpop.f32.mrf.mxu1 }
 0x269   : > { %v1370_v35 = vadd.f32 1.0, %v2067_v10  ;;  %v1630_v11 = vadd.f32 %v1629_v30, %v1556_v33 }
 0x26a   : > { %v1993_v47 = vpop.f32.mrf.mxu1 }
 0x26b   : > { %v1372_v5 = vmul.f32 %v1370_v35, %v1356_v57 }
 0x26c   : > { %v2069_v40 = vpop.eup %2068 }
 0x26d   : > { %v1371_v61 = vadd.f32 1.0, %v2069_v40 }
 0x26f   : > { %v1373_v62 = vmul.f32 %v1371_v61, %v1357_v23 }
 0x271   : > { %v1374_v22 = vpack.c.bf16 %v1373_v62, %v1372_v5 }
 0x273   : > { %1971 = vmatmul.mubr.bf16.vlgmr.msra.gmra.mxu0 %v1374_v22 }
 0x333   : > { %v1480_v38 = vpop.f32.mrf.mxu0 }
 0x334   : > { %v1481_v32 = vadd.f32 %v1877_v6, %v1480_v38 }
 0x335   : > { %v1972_v43 = vpop.f32.mrf.mxu0 }
 0x336   : > { %v1633_v55 = vadd.f32 %v1627_v37, %v1481_v32 }
 0x337   : > { %v1483_v3 = vpop.f32.mrf.mxu0 }
 0x338   : > { %v1484_v8 = vadd.f32 %v1877_v6, %v1483_v3  ;;  %v1642_v4 = vadd.f32 %v1896_v0, %v1633_v55 }
 0x339   : > { %v1973_v14 = vpop.f32.mrf.mxu0 }
 0x33a   : > { %v1634_v7 = vadd.f32 %v1630_v11, %v1484_v8  ;;  %v1657_v13 = vsel %vm1651_vm9, %v1642_v4, 0.0 }
 0x33c   : > { %v1643_v2 = vadd.f32 %v1896_v0, %v1634_v7 }
 0x33e   : > { %v1658_v25 = vsel %vm1652_vm10, %v1643_v2, 0.0 }
 0x33f   : > { %v1907_v49 = vpack.c.bf16 %v1658_v25, %v1657_v13 }
 0x341   : > { %1908 = vst [vmem:[%s821_s23] sm:$0xff] %v1907_v49  }
 0x342 PF: > { %s2716_s21 = sld [smem:[#allocation4_spill]] }
 0x343   : > { %s2717_s1 = sld [smem:[#allocation2_spill]] }
 0x344   : > { %s2718_s22 = sld [smem:[#allocation3_spill]] }
 0x345   : > { %s2719_s23 = sld [smem:[#allocation5_spill]] }
 0x346   : > { %s2720_s24 = sld [smem:[#allocation6_spill]] }
 0x348   : > { %s30_s2 = sadd.s32 1, %s2716_s21  }
 0x349   : > { %p27_p8 = scmp.ge.s32.totalorder %s30_s2, 8  }
 0x34b   :  { %29 = sbr.rel (!%p27_p8) target bundleno = 7 (0x7), region = 151 }

// kernel: mel_decoder_forward.9
= control target key start
LH: loop header
LB: loop body
LE: loop exit
PB: predicated region body
PF: predicated region fallthrough
CT: control target
= control target key end

     0   :  { %s3230_s6 = smov 1   ;;  %s3231_s10 = smov 2   ;;  %s4247_s0 = inlined_call_operand.smem [shape: u32[33], index: -1, kind: input, shape index: {}] }
   0x1   :  { %s3274_s5 = sld [smem:[%s4247_s0]]   ;;  %s3232_s14 = smov 3  }
   0x2   :  { %s3279_s9 = sld [smem:[%s4247_s0 + %s3230_s6]]   ;;  %s3233_s18 = smov 4  }
   0x3   :  { %s3284_s13 = sld [smem:[%s4247_s0 + %s3231_s10]]   ;;  %s3234_s22 = smov 5  }
   0x4   :  { %s3289_s17 = sld [smem:[%s4247_s0 + %s3232_s14]]   ;;  %s3235_s26 = smov 6  }
   0x5   :  { %s3294_s21 = sld [smem:[%s4247_s0 + %s3233_s18]]   ;;  %s3236_s30 = smov 7  }
   0x6   :  { %s3299_s25 = sld [smem:[%s4247_s0 + %s3234_s22]]   ;;  %s3237_s4 = smov 8  }
   0x7   :  { %s3304_s29 = sld [smem:[%s4247_s0 + %s3235_s26]]   ;;  %s3238_s10 = smov 9  }
   0x8   :  { %s3309_s3 = sld [smem:[%s4247_s0 + %s3236_s30]]   ;;  %s3239_s15 = smov 10  }
   0x9   :  { %s3314_s8 = sld [smem:[%s4247_s0 + %s3237_s4]]   ;;  %s3240_s20 = smov 11  }
   0xa   :  { %s3319_s14 = sld [smem:[%s4247_s0 + %s3238_s10]]   ;;  %s3241_s26 = smov 12  }
   0xb   :  { %s3324_s19 = sld [smem:[%s4247_s0 + %s3239_s15]]   ;;  %s3242_s1 = smov 13  }
   0xc   :  { %s3329_s24 = sld [smem:[%s4247_s0 + %s3240_s20]]   ;;  %s3243_s7 = smov 14  }
   0xd   :  { %s3334_s30 = sld [smem:[%s4247_s0 + %s3241_s26]]   ;;  %s3244_s15 = smov 15  }
   0xe   :  { %s3339_s6 = sld [smem:[%s4247_s0 + %s3242_s1]]   ;;  %s3245_s22 = smov 16  }
   0xf   :  { %s3344_s12 = sld [smem:[%s4247_s0 + %s3243_s7]]   ;;  %s3246_s28 = smov 17  }
  0x10   :  { %s3349_s20 = sld [smem:[%s4247_s0 + %s3244_s15]]   ;;  %s3247_s7 = smov 18  }
  0x11   :  { %4260 = sst [smem:[#allocation2_spill]] %s3324_s19  ;;  %s3248_s15 = smov 19  }
  0x12   :  { %4261 = sst [smem:[#allocation3_spill]] %s3329_s24 }
  0x13   :  { %4262 = sst [smem:[#allocation4_spill]] %s3334_s30 }
  0x14   :  { %4263 = sst [smem:[#allocation5_spill]] %s3339_s6 }
  0x15   :  { %4264 = sst [smem:[#allocation6_spill]] %s3344_s12 }
  0x16   :  { %s3354_s27 = sld [smem:[%s4247_s0 + %s3245_s22]]   ;;  %s3249_s22 = smov 20  }
  0x17   :  { %s3359_s4 = sld [smem:[%s4247_s0 + %s3246_s28]]   ;;  %s3250_s28 = smov 21  }
  0x18   :  { %s3364_s12 = sld [smem:[%s4247_s0 + %s3247_s7]]   ;;  %s3251_s7 = smov 22  }
  0x19   :  { %s3369_s6 = sld [smem:[%s4247_s0 + %s3248_s15]]   ;;  %s3252_s15 = smov 23  }
  0x1a   :  { %s3374_s30 = sld [smem:[%s4247_s0 + %s3249_s22]]   ;;  %s3253_s22 = smov 24  }
  0x1b   :  { %s3379_s19 = sld [smem:[%s4247_s0 + %s3250_s28]]   ;;  %s3254_s28 = smov 25  }
  0x1c   :  { %s3384_s24 = sld [smem:[%s4247_s0 + %s3251_s7]]   ;;  %s3255_s7 = smov 26  }
  0x1f   :  { %4265 = sst [smem:[#allocation7_spill]] %s3369_s6 }
  0x20   :  { %4266 = sst [smem:[#allocation8_spill]] %s3374_s30 }
  0x21   :  { %4267 = sst [smem:[#allocation9_spill]] %s3379_s19 }
  0x22   :  { %4268 = sst [smem:[#allocation10_spill]] %s3384_s24 }
  0x23   :  { %s3389_s6 = sld [smem:[%s4247_s0 + %s3252_s15]]   ;;  %s3256_s15 = smov 27  }
  0x24   :  { %s3394_s30 = sld [smem:[%s4247_s0 + %s3253_s22]]   ;;  %s3257_s22 = smov 28  }
  0x25   :  { %s3399_s19 = sld [smem:[%s4247_s0 + %s3254_s28]]   ;;  %s3258_s28 = smov 29  }
  0x26   :  { %s3404_s24 = sld [smem:[%s4247_s0 + %s3255_s7]]   ;;  %s3259_s7 = smov 30  }
  0x29   :  { %4269 = sst [smem:[#allocation11_spill]] %s3389_s6 }
  0x2a   :  { %4270 = sst [smem:[#allocation12_spill]] %s3394_s30 }
  0x2b   :  { %4271 = sst [smem:[#allocation13_spill]] %s3399_s19 }
  0x2c   :  { %4272 = sst [smem:[#allocation14_spill]] %s3404_s24 }
  0x2d   :  { %s3409_s6 = sld [smem:[%s4247_s0 + %s3256_s15]]   ;;  %s3260_s15 = smov 31  }
  0x2e   :  { %s3414_s30 = sld [smem:[%s4247_s0 + %s3257_s22]]   ;;  %s3261_s22 = smov 32  }
  0x2f   :  { %s3419_s19 = sld [smem:[%s4247_s0 + %s3258_s28]]   ;;  %s3436_s28 = smov 0  }
  0x30   :  { %s3424_s24 = sld [smem:[%s4247_s0 + %s3259_s7]]  }
  0x33   :  { %4273 = sst [smem:[#allocation15_spill]] %s3409_s6 }
  0x34   :  { %4274 = sst [smem:[#allocation16_spill]] %s3414_s30 }
  0x35   :  { %s3429_s6 = sld [smem:[%s4247_s0 + %s3260_s15]]  }
  0x36   :  { %s3434_s30 = sld [smem:[%s4247_s0 + %s3261_s22]]  }
  0x37 LB: > { %s2907_s1 = sadd.s32 4294967295, %s3228_s28   ;;  %p2911_p0 = scmp.ge.s32.totalorder %s3228_s28, 1  ;;  %s3228_s28 = sphi %s3436_s28, %s76_s28  }
  0x38   : > { %p918_p1 = scmp.lt.s32.totalorder %s3228_s28, 3 }
  0x3a   : > { %p919_p2 = pnand %p2911_p0, %p918_p1 }
  0x3c   : > { %922 = sbr.rel (%p919_p2) target bundleno = 1344 (0x540), region = 144 }
  0x41   : > { %p1015_p3 = scmp.lt.s32.totalorder %s2907_s1, 1  ;;  %v3262_v0 = vmov 0   ;;  %v1119_v11 = vlaneseq  ;;  %v2917_v13 = vld [vmem:[%s3289_s17] ss:$0 sm:$0xff]  ;;  %vm1100_vm0 = vcmask 1042432   ;;  %vm1144_vm1 = vcmask 1046528  }
  0x42   : > { %3142 = vset.pattern.permute.xlu1 %v3262_v0  ;;  %3141 = vset.pattern.permute.xlu0 %v3262_v0  ;;  %v1118_v15 = vld [vmem:[%s3299_s25] sm:$0x7f]  ;;  %vm1182_vm2 = vcmask 1045504   ;;  %vm1220_vm3 = vcmask 1044480   ;;  %vm1258_vm4 = vcmask 1043456   ;;  %vm1333_vm5 = vcmask 1041408  }
  0x43   : > { %s4310_s1 = smov (!%p1015_p3, %s2907_s1), 1  ;;  %v1120_v12 = vshrl.u32 %v1119_v11, 7  ;;  %v2918_v19 = vld [vmem:[%s3294_s21] ss:$0 sm:$0xff]  ;;  %vm1367_vm6 = vcmask 130048   ;;  %vm3264_vm7 = vmmov 0  }
  0x44   : > { %s3095_s0 = smul.u32 40, %s4310_s1  ;;  %v1833_v25 = vld [vmem:[%s3359_s4] sm:$0x7f]  ;;  %s4287_s15 = sld [smem:[#allocation9_spill]]  ;;  %vm1612_vm8 = vcmask 261120   ;;  %vm2520_vm9 = vcmask 523264  }
  0x45   : > { %s3445_s7 = smul.u32 20, %s4310_s1  ;;  %v1130_v14 = vsub.s32 1, %v1120_v12  ;;  %v1168_v16 = vsub.s32 2, %v1120_v12  ;;  %v1206_v17 = vsub.s32 3, %v1120_v12  ;;  %v1121_v18 = vsub.s32 0, %v1120_v12  ;;  %s4288_s16 = sld [smem:[#allocation7_spill]] }
  0x46   : > { %s1019_s2 = scalar_lea.vmem %s3274_s5, %s3095_s0  ;;  %s1024_s10 = scalar_lea.vmem %s3279_s9, %s3095_s0  ;;  %v1244_v22 = vsub.s32 4, %v1120_v12  ;;  %v1282_v23 = vsub.s32 5, %v1120_v12  ;;  %v1319_v28 = vsub.s32 6, %v1120_v12  ;;  %v2935_v44 = vld [vmem:[%s3349_s20] ss:$0 sm:$0xff]  ;;  %vm2705_vm10 = vcmask 257024  }
  0x47   : > { %v1043_v1 = vld [vmem:[%s1019_s2 + $0x10] sm:$0xff]  ;;  %v1041_v2 = vld [vmem:[%s1019_s2] sm:$0xff]  ;;  %v1044_v3 = vld [vmem:[%s1019_s2 + $0x18] sm:$0xff]  ;;  %s3450_s11 = scalar_lea.vmem %s3284_s13, %s3445_s7  ;;  %v3456_v27 = vrot.slane %v1118_v15, %v1130_v14  ;;  %v3460_v30 = vrot.slane %v1118_v15, %v1168_v16  ;;  %v3462_v31 = vrot.slane %v1118_v15, %v1206_v17  ;;  %v3464_v32 = vrot.slane %v1118_v15, %v1121_v18  ;;  %s4289_s18 = sld [smem:[#allocation8_spill]] }
  0x48   : > { %1059 = vperm.xlu1 %3142, %v1043_v1   ;;  %1049 = vperm.xlu0 %3141, %v1041_v2   ;;  %v1042_v4 = vld [vmem:[%s1019_s2 + $0x8] sm:$0xff]  ;;  %v1757_v5 = vld [vmem:[%s1024_s10] sm:$0xff]  ;;  %v1759_v7 = vld [vmem:[%s1024_s10 + $0x10] sm:$0xff]  ;;  %v3466_v35 = vrot.slane %v1833_v25, %v1130_v14  ;;  %v3468_v36 = vrot.slane %v1833_v25, %v1168_v16  ;;  %v3470_v37 = vrot.slane %v1118_v15, %v1244_v22  ;;  %s4290_s22 = sld [smem:[#allocation3_spill]]  ;;  %vm2757_vm11 = vcmask 388096  }
  0x49   : > { %v1045_v6 = vld [vmem:[%s1019_s2 + $0x20] sm:$0xff]  ;;  %v1758_v8 = vld [vmem:[%s1024_s10 + $0x8] sm:$0xff]  ;;  %v1760_v10 = vld [vmem:[%s1024_s10 + $0x18] sm:$0xff]  ;;  %v3472_v38 = vrot.slane %v1118_v15, %v1282_v23  ;;  %v3475_v42 = vrot.slane %v1833_v25, %v1206_v17  ;;  %v3480_v45 = vrot.slane %v1118_v15, %v1319_v28  ;;  %v3482_v46 = vrot.slane %v1833_v25, %v1121_v18  ;;  %s4291_s23 = sld [smem:[#allocation15_spill]] }
  0x4a   : > { %v1761_v9 = vld [vmem:[%s1024_s10 + $0x20] sm:$0xff]  ;;  %v3491_v50 = vrot.slane %v1833_v25, %v1244_v22  ;;  %v3500_v57 = vrot.slane %v1833_v25, %v1282_v23  ;;  %v3503_v61 = vrot.slane %v1833_v25, %v1319_v28  ;;  %s4292_s26 = sld [smem:[#allocation2_spill]] }
  0x4b   : > { %v2936_v52 = vld [vmem:[%s3354_s27] ss:$0 sm:$0xff]  ;;  %s4293_s1 = sld [smem:[#allocation10_spill]] }
  0x4c   : > { %1064 = vperm.xlu1 %3142, %v1044_v3   ;;  %1054 = vperm.xlu0 %3141, %v1042_v4   ;;  %s4294_s0 = sld [smem:[#allocation11_spill]] }
  0x4d   : > { %s4295_s2 = sld [smem:[#allocation4_spill]] }
  0x4e   : > { %s4298_s10 = sld [smem:[#allocation12_spill]] }
  0x50   : > { %1765 = vperm.xlu1 %3142, %v1757_v5   ;;  %1069 = vperm.xlu0 %3141, %v1045_v6  }
  0x54   : > { %1775 = vperm.xlu1 %3142, %v1759_v7   ;;  %1770 = vperm.xlu0 %3141, %v1758_v8  }
  0x58   : > { %1785 = vperm.xlu1 %3142, %v1761_v9   ;;  %1780 = vperm.xlu0 %3141, %v1760_v10  }
  0xc3   : > { %v1060_v20 = vpop.permute.xlu1 %1059  ;;  %v1050_v21 = vpop.permute.xlu0 %1049 }
  0xc4   : > { %v1078_v24 = vmul.f32 %v2917_v13, %v1050_v21  ;;  %v1080_v26 = vmul.f32 %v2917_v13, %v1060_v20 }
  0xc6   : > { %v3458_v29 = vadd.f32 %v2918_v19, %v1078_v24  ;;  %v3477_v43 = vadd.f32 %v2918_v19, %v1080_v26 }
  0xc7   : > { %v1065_v33 = vpop.permute.xlu1 %1064  ;;  %v1055_v34 = vpop.permute.xlu0 %1054 }
  0xc8   : > { %v1101_v39 = vrot.slane %v3458_v29, 5  ;;  %v1081_v40 = vmul.f32 %v2917_v13, %v1065_v33  ;;  %v1079_v41 = vmul.f32 %v2917_v13, %v1055_v34  ;;  %v1104_v62 = vrot.slane %v3477_v43, 5 }
  0xca   : > { %v3485_v47 = vsel %vm1100_vm0, 0.0, %v1101_v39  ;;  %v3487_v48 = vadd.f32 %v2918_v19, %v1081_v40  ;;  %v3489_v49 = vadd.f32 %v2918_v19, %v1079_v41 }
  0xcb   : > { %v1132_v51 = vmul.f32 %v3456_v27, %v3485_v47  ;;  %v1766_v53 = vpop.permute.xlu1 %1765  ;;  %v1070_v54 = vpop.permute.xlu0 %1069  ;;  %v1170_v55 = vmul.f32 %v3460_v30, %v3485_v47  ;;  %v1208_v56 = vmul.f32 %v3462_v31, %v3485_v47  ;;  %v1123_v1 = vmul.f32 %v3464_v32, %v3485_v47 }
  0xcc   : > { %4275 = vst [vmem:[#allocation17_spill] sm:$0xff] %v3487_v48  ;;  %v1102_v58 = vrot.slane %v3489_v49, 5  ;;  %v1794_v59 = vmul.f32 %v2935_v44, %v1766_v53  ;;  %v1082_v60 = vmul.f32 %v2917_v13, %v1070_v54  ;;  %v1106_v0 = vrot.slane %v3487_v48, 5 }
  0xcd   : > { %v1145_v63 = vrot.slane %v1132_v51, 1  ;;  %v1183_v4 = vrot.slane %v1170_v55, 2  ;;  %v1221_v5 = vrot.slane %v1208_v56, 3  ;;  %v1246_v11 = vmul.f32 %v3470_v37, %v3485_v47 }
  0xce   : > { %v3510_v2 = vsel %vm1100_vm0, %v1101_v39, %v1102_v58  ;;  %v3512_v3 = vadd.f32 %v2936_v52, %v1794_v59  ;;  %v3514_v6 = vadd.f32 %v2918_v19, %v1082_v60  ;;  %v3532_v16 = vsel %vm1100_vm0, %v1104_v62, %v1106_v0 }
  0xcf   : > { %v1776_v7 = vpop.permute.xlu1 %1775  ;;  %v1771_v8 = vpop.permute.xlu0 %1770  ;;  %v3518_v9 = vmul.f32 %v3456_v27, %v3510_v2  ;;  %v3522_v10 = vmul.f32 %v3460_v30, %v3510_v2  ;;  %v3529_v15 = vmul.f32 %v3462_v31, %v3510_v2  ;;  %v3535_v17 = vsel %vm1100_vm0, %v1102_v58, %v1104_v62 }
  0xd0   : > { %4276 = vst [vmem:[#allocation18_spill] sm:$0xff] %v3512_v3  ;;  %4277 = vst [vmem:[#allocation19_spill] sm:$0xff] %v3514_v6  ;;  %v1816_v12 = vrot.slane %v3512_v3, 5  ;;  %v1796_v13 = vmul.f32 %v2935_v44, %v1776_v7  ;;  %v1795_v14 = vmul.f32 %v2935_v44, %v1771_v8  ;;  %v1108_v18 = vrot.slane %v3514_v6, 5 }
  0xd1   : > { %v1146_v19 = vrot.slane %v3518_v9, 1  ;;  %v3548_v23 = vmul.f32 %v3470_v37, %v3510_v2  ;;  %v4252_v34 = vrot.slane %v3522_v10, 2  ;;  %v4251_v41 = vrot.slane %v3529_v15, 3 }
  0xd2   : > { %v3540_v20 = vsel %vm1100_vm0, 0.0, %v1816_v12  ;;  %v3542_v21 = vadd.f32 %v2936_v52, %v1796_v13  ;;  %v3544_v22 = vadd.f32 %v2936_v52, %v1795_v14  ;;  %v3555_v25 = vsel %vm1100_vm0, %v1108_v18, 0.0 }
  0xd3   : > { %v3552_v24 = vmul.f32 %v3466_v35, %v3540_v20  ;;  %v1786_v26 = vpop.permute.xlu1 %1785  ;;  %v1781_v28 = vpop.permute.xlu0 %1780  ;;  %v1147_v33 = vsel %vm1144_vm1, %v1145_v63, %v1146_v19  ;;  %v3562_v39 = vsel %vm1100_vm0, %v1106_v0, %v1108_v18  ;;  %v3566_v40 = vmul.f32 %v3456_v27, %v3555_v25 }
  0xd4   : > { %4278 = vst [vmem:[#allocation20_spill] sm:$0xff] %v3542_v21  ;;  %4279 = vst [vmem:[#allocation21_spill] sm:$0xff] %v3544_v22  ;;  %v1259_v51 = vrot.slane %v1246_v11, 4  ;;  %v3571_v53 = vmul.f32 %v3460_v30, %v3555_v25  ;;  %v3575_v54 = vmul.f32 %v3462_v31, %v3555_v25  ;;  %v1798_v55 = vmul.f32 %v2935_v44, %v1786_v26 }
  0xd5   : > { %v1797_v56 = vmul.f32 %v2935_v44, %v1781_v28  ;;  %v1819_v59 = vrot.slane %v3542_v21, 5  ;;  %v1817_v60 = vrot.slane %v3544_v22, 5  ;;  %v1161_v62 = vadd.f32 %v1147_v33, %v1123_v1 }
  0xd6   : > { %v3581_v0 = vadd.f32 %v2936_v52, %v1798_v55  ;;  %v1185_v8 = vsel %vm1182_vm2, %v1183_v4, %v4252_v34  ;;  %v1223_v44 = vsel %vm1220_vm3, %v1221_v5, %v4251_v41  ;;  %v1260_v13 = vrot.slane %v3548_v23, 4 }
  0xd7   : > { %v3583_v7 = vadd.f32 %v2936_v52, %v1797_v56  ;;  %v1199_v11 = vadd.f32 %v1185_v8, %v1161_v62  ;;  %v1284_v1 = vmul.f32 %v3472_v38, %v3485_v47  ;;  %v1285_v52 = vmul.f32 %v3472_v38, %v3510_v2 }
  0xd8   : > { %4280 = vst [vmem:[#allocation22_spill] sm:$0xff] %v3581_v0  ;;  %v1823_v14 = vrot.slane %v3581_v0, 5  ;;  %v1321_v4 = vmul.f32 %v3480_v45, %v3485_v47  ;;  %v3602_v5 = vsel %vm1100_vm0, %v1816_v12, %v1817_v60  ;;  %v1322_v28 = vmul.f32 %v3480_v45, %v3510_v2 }
  0xd9   : > { %4281 = vst [vmem:[#allocation23_spill] sm:$0xff] %v3583_v7  ;;  %v1821_v18 = vrot.slane %v3583_v7, 5  ;;  %v1237_v23 = vadd.f32 %v1223_v44, %v1199_v11  ;;  %v1261_v55 = vsel %vm1258_vm4, %v1259_v51, %v1260_v13  ;;  %v1296_v56 = vrot.slane %v1284_v1, 5 }
  0xda   : > { %v3607_v33 = vsel %vm1100_vm0, %v1823_v14, 0.0  ;;  %v1297_v62 = vrot.slane %v1285_v52, 5  ;;  %v3611_v47 = vsel %vm1100_vm0, %v1817_v60, %v1819_v59  ;;  %v1334_v51 = vrot.slane %v1321_v4, 6  ;;  %v3634_v52 = vld [vmem:[%s3304_s29] ss:$0 sm:$0xff] }
  0xdb   : > { %v3614_v8 = vsel %vm1100_vm0, %v1819_v59, %v1821_v18  ;;  %v3617_v12 = vsel %vm1100_vm0, %v1821_v18, %v1823_v14  ;;  %v1275_v11 = vadd.f32 %v1261_v55, %v1237_v23  ;;  %v3621_v44 = vmul.f32 %v3466_v35, %v3607_v33 }
  0xdc   : > { %v1298_v58 = vsel %vm1100_vm0, %v1296_v56, %v1297_v62  ;;  %v1335_v26 = vrot.slane %v1322_v28, 6  ;;  %v3626_v1 = vmul.f32 %v3468_v36, %v3607_v33  ;;  %v1124_v59 = vmul.f32 %v3464_v32, %v3510_v2 }
  0xdd   : > { %v1312_v60 = vadd.f32 %v1298_v58, %v1275_v11  ;;  %v1134_v14 = vmul.f32 %v3456_v27, %v3535_v17  ;;  %v1172_v23 = vmul.f32 %v3460_v30, %v3535_v17  ;;  %v1210_v4 = vmul.f32 %v3462_v31, %v3535_v17 }
  0xde   : > { %v1336_v18 = vsel %vm1333_vm5, %v1334_v51, %v1335_v26  ;;  %v1248_v28 = vmul.f32 %v3470_v37, %v3535_v17  ;;  %v1286_v2 = vmul.f32 %v3472_v38, %v3535_v17  ;;  %v1323_v56 = vmul.f32 %v3480_v45, %v3535_v17 }
  0xdf   : > { %v1350_v58 = vadd.f32 %v1336_v18, %v1312_v60  ;;  %v1148_v55 = vrot.slane %v1134_v14, 1  ;;  %v1186_v11 = vrot.slane %v1172_v23, 2  ;;  %v1224_v51 = vrot.slane %v1210_v4, 3 }
  0xe0   : > { %v1262_v63 = vrot.slane %v1248_v28, 4  ;;  %v1125_v41 = vmul.f32 %v3464_v32, %v3535_v17  ;;  %v1299_v14 = vrot.slane %v1286_v2, 5  ;;  %v1337_v18 = vrot.slane %v1323_v56, 6 }
  0xe1   : > { %v3649_v34 = vadd.f32 %v3634_v52, %v1350_v58  ;;  %v1149_v60 = vsel %vm1144_vm1, %v1146_v19, %v1148_v55  ;;  %v4282_v7 = vrot.slane %v3522_v10, 2  ;;  %v4283_v23 = vrot.slane %v3529_v15, 3 }
  0xe2   : > { %v1162_v0 = vadd.f32 %v1149_v60, %v1124_v59  ;;  %v1263_v17 = vsel %vm1258_vm4, %v1260_v13, %v1262_v63  ;;  %v1300_v9 = vsel %vm1100_vm0, %v1297_v62, %v1299_v14  ;;  %v1338_v19 = vsel %vm1333_vm5, %v1335_v26, %v1337_v18 }
  0xe3   : > { %v1187_v21 = vsel %vm1182_vm2, %v4282_v7, %v1186_v11  ;;  %v1225_v4 = vsel %vm1220_vm3, %v4283_v23, %v1224_v51  ;;  %v1368_v28 = vsel %vm1367_vm6, %v3649_v34, 0.0  ;;  %v1135_v59 = vmul.f32 %v3456_v27, %v3532_v16 }
  0xe4   : > { %1369 = vadd.xlane.f32.xlu0 %v1368_v28  ;;  %v1200_v10 = vadd.f32 %v1187_v21, %v1162_v0  ;;  %v1173_v7 = vmul.f32 %v3460_v30, %v3532_v16  ;;  %v3671_v15 = vmul.f32 %v3462_v31, %v3532_v16  ;;  %v3675_v13 = vmul.f32 %v3470_v37, %v3532_v16 }
  0xe5   : > { %v1150_v58 = vrot.slane %v1135_v59, 1  ;;  %v3679_v26 = vmul.f32 %v3472_v38, %v3532_v16  ;;  %v3683_v62 = vmul.f32 %v3480_v45, %v3532_v16  ;;  %v1127_v21 = vmul.f32 %v3464_v32, %v3562_v39 }
  0xe6   : > { %v1238_v0 = vadd.f32 %v1225_v4, %v1200_v10  ;;  %v1188_v2 = vrot.slane %v1173_v7, 2  ;;  %v1226_v56 = vrot.slane %v3671_v15, 3  ;;  %v1264_v60 = vrot.slane %v3675_v13, 4 }
  0xe7   : > { %v1151_v23 = vsel %vm1144_vm1, %v1148_v55, %v1150_v58  ;;  %v1301_v28 = vrot.slane %v3679_v26, 5  ;;  %v1339_v59 = vrot.slane %v3683_v62, 6  ;;  %v1136_v3 = vmul.f32 %v3456_v27, %v3562_v39 }
  0xe8   : > { %v1276_v22 = vadd.f32 %v1263_v17, %v1238_v0  ;;  %v1163_v6 = vadd.f32 %v1151_v23, %v1125_v41  ;;  %v1189_v48 = vsel %vm1182_vm2, %v1186_v11, %v1188_v2  ;;  %v1227_v4 = vsel %vm1220_vm3, %v1224_v51, %v1226_v56 }
  0xe9   : > { %v1265_v10 = vsel %vm1258_vm4, %v1262_v63, %v1264_v60  ;;  %v1302_v7 = vsel %vm1100_vm0, %v1299_v14, %v1301_v28  ;;  %v1340_v15 = vsel %vm1333_vm5, %v1337_v18, %v1339_v59  ;;  %v1152_v55 = vrot.slane %v1136_v3, 1 }
  0xea   : > { %v1313_v13 = vadd.f32 %v1300_v9, %v1276_v22  ;;  %v1201_v26 = vadd.f32 %v1189_v48, %v1163_v6  ;;  %v1174_v62 = vmul.f32 %v3460_v30, %v3562_v39  ;;  %v1212_v27 = vmul.f32 %v3462_v31, %v3562_v39 }
  0xeb   : > { %v4284_v41 = vrot.slane %v3566_v40, 1  ;;  %v1230_v51 = vrot.slane %v3575_v54, 3  ;;  %v1250_v63 = vmul.f32 %v3470_v37, %v3562_v39  ;;  %v1251_v3 = vmul.f32 %v3470_v37, %v3555_v25 }
  0xec   : > { %v1351_v22 = vadd.f32 %v1338_v19, %v1313_v13  ;;  %v1239_v48 = vadd.f32 %v1227_v4, %v1201_v26  ;;  %v1190_v14 = vrot.slane %v1174_v62, 2  ;;  %v1228_v30 = vrot.slane %v1212_v27, 3 }
  0xed   : > { %v1155_v11 = vsel %vm1144_vm1, %v1152_v55, %v4284_v41  ;;  %v1266_v18 = vrot.slane %v1250_v63, 4  ;;  %v1268_v17 = vrot.slane %v1251_v3, 4  ;;  %v1288_v31 = vmul.f32 %v3472_v38, %v3562_v39 }
  0xee   : > { %v1165_v6 = vadd.f32 %v1155_v11, %v1127_v21  ;;  %v3714_v40 = vadd.f32 %v3634_v52, %v1351_v22  ;;  %v1277_v54 = vadd.f32 %v1265_v10, %v1239_v48  ;;  %v4285_v9 = vrot.slane %v3571_v53, 2 }
  0xef   : > { %v1289_v37 = vmul.f32 %v3472_v38, %v3555_v25  ;;  %v1231_v21 = vsel %vm1220_vm3, %v1228_v30, %v1230_v51  ;;  %v1269_v23 = vsel %vm1258_vm4, %v1266_v18, %v1268_v17  ;;  %v1303_v4 = vrot.slane %v1288_v31, 5 }
  0xf0   : > { %v1193_v0 = vsel %vm1182_vm2, %v1190_v14, %v4285_v9  ;;  %v1371_v13 = vsel %vm1367_vm6, %v3714_v40, 0.0  ;;  %v1314_v26 = vadd.f32 %v1302_v7, %v1277_v54  ;;  %v1325_v10 = vmul.f32 %v3480_v45, %v3562_v39 }
  0xf1   : > { %v1203_v19 = vadd.f32 %v1193_v0, %v1165_v6  ;;  %v1305_v62 = vrot.slane %v1289_v37, 5  ;;  %1372 = vadd.xlane.f32.xlu1 %v1371_v13  ;;  %v1326_v27 = vmul.f32 %v3480_v45, %v3555_v25  ;;  %v1126_v38 = vmul.f32 %v3464_v32, %v3532_v16 }
  0xf2   : > { %v1153_v41 = vsel %vm1144_vm1, %v1150_v58, %v1152_v55  ;;  %v1352_v11 = vadd.f32 %v1340_v15, %v1314_v26  ;;  %v1341_v63 = vrot.slane %v1325_v10, 6  ;;  %v1191_v7 = vsel %vm1182_vm2, %v1188_v2, %v1190_v14 }
  0xf3   : > { %v1241_v53 = vadd.f32 %v1231_v21, %v1203_v19  ;;  %v1306_v51 = vsel %vm1100_vm0, %v1303_v4, %v1305_v62  ;;  %v1343_v22 = vrot.slane %v1326_v27, 6  ;;  %v1164_v48 = vadd.f32 %v1153_v41, %v1126_v38 }
  0xf4   : > { %v1229_v39 = vsel %vm1220_vm3, %v1226_v56, %v1228_v30  ;;  %v3736_v6 = vadd.f32 %v3634_v52, %v1352_v11  ;;  %v1267_v45 = vsel %vm1258_vm4, %v1264_v60, %v1266_v18  ;;  %v1304_v32 = vsel %vm1100_vm0, %v1301_v28, %v1303_v4 }
  0xf5   : > { %v1279_v3 = vadd.f32 %v1269_v23, %v1241_v53  ;;  %v1342_v16 = vsel %vm1333_vm5, %v1339_v59, %v1341_v63  ;;  %v1344_v58 = vsel %vm1333_vm5, %v1341_v63, %v1343_v22  ;;  %v1202_v15 = vadd.f32 %v1191_v7, %v1164_v48 }
  0xf6   : > { %v1839_v2 = vmul.f32 %v3482_v46, %v3602_v5  ;;  %v1374_v55 = vsel %vm1367_vm6, %v3736_v6, 0.0  ;;  %v1848_v56 = vmul.f32 %v3466_v35, %v3602_v5  ;;  %v3750_v60 = vmul.f32 %v3466_v35, %v3611_v47 }
  0xf7   : > { %v1316_v25 = vadd.f32 %v1306_v51, %v1279_v3  ;;  %v1885_v28 = vmul.f32 %v3468_v36, %v3602_v5  ;;  %1375 = vadd.xlane.f32.xlu0 %v1374_v55  ;;  %v1240_v14 = vadd.f32 %v1229_v39, %v1202_v15  ;;  %v3756_v30 = vmul.f32 %v3468_v36, %v3611_v47 }
  0xf8   : > { %v1922_v18 = vmul.f32 %v3475_v42, %v3602_v5  ;;  %v1860_v17 = vrot.slane %v1848_v56, 1  ;;  %v1862_v31 = vrot.slane %v3750_v60, 1  ;;  %v3763_v9 = vmul.f32 %v3475_v42, %v3611_v47 }
  0xf9   : > { %v1354_v59 = vadd.f32 %v1344_v58, %v1316_v25  ;;  %v1897_v54 = vrot.slane %v1885_v28, 2  ;;  %v1278_v37 = vadd.f32 %v1267_v45, %v1240_v14  ;;  %v1899_v19 = vrot.slane %v3756_v30, 2 }
  0xfa   : > { %v1934_v21 = vrot.slane %v1922_v18, 3  ;;  %v1863_v23 = vsel %vm1144_vm1, %v1860_v17, %v1862_v31  ;;  %v1936_v4 = vrot.slane %v3763_v9, 3  ;;  %v1959_v13 = vmul.f32 %v3491_v50, %v3602_v5 }
  0xfb   : > { %v3766_v0 = vadd.f32 %v3634_v52, %v1354_v59  ;;  %v3777_v26 = vmul.f32 %v3491_v50, %v3611_v47  ;;  %v1315_v10 = vadd.f32 %v1304_v32, %v1278_v37  ;;  %v1876_v53 = vadd.f32 %v1863_v23, %v1839_v2 }
  0xfc   : > { %v1900_v27 = vsel %vm1182_vm2, %v1897_v54, %v1899_v19  ;;  %v1937_v38 = vsel %vm1220_vm3, %v1934_v21, %v1936_v4  ;;  %v1971_v41 = vrot.slane %v1959_v13, 4  ;;  %v1996_v51 = vmul.f32 %v3500_v57, %v3602_v5 }
  0xfd   : > { %v1380_v62 = vsel %vm1367_vm6, %v3766_v0, 0.0  ;;  %v1973_v11 = vrot.slane %v3777_v26, 4  ;;  %v1353_v63 = vadd.f32 %v1342_v16, %v1315_v10  ;;  %v1913_v7 = vadd.f32 %v1900_v27, %v1876_v53  ;;  %v3834_v27 = vld [vmem:[%s3364_s12] ss:$0 sm:$0xff] }
  0xfe   : > { %1381 = vadd.xlane.f32.xlu1 %v1380_v62  ;;  %v3792_v3 = vmul.f32 %v3500_v57, %v3611_v47  ;;  %v2033_v22 = vmul.f32 %v3503_v61, %v3602_v5  ;;  %v2008_v39 = vrot.slane %v1996_v51, 5  ;;  %v3801_v45 = vmul.f32 %v3503_v61, %v3611_v47 }
  0xff   : > { %v1974_v48 = vsel %vm1258_vm4, %v1971_v41, %v1973_v11  ;;  %v1838_v32 = vmul.f32 %v3482_v46, %v3540_v20  ;;  %v3806_v16 = vadd.f32 %v3634_v52, %v1353_v63  ;;  %v1950_v25 = vadd.f32 %v1937_v38, %v1913_v7 }
 0x100   : > { %v2010_v58 = vrot.slane %v3792_v3, 5  ;;  %v2045_v15 = vrot.slane %v2033_v22, 6  ;;  %v2047_v5 = vrot.slane %v3801_v45, 6  ;;  %v4286_v2 = vrot.slane %v3552_v24, 1 }
 0x101   : > { %v1884_v56 = vmul.f32 %v3468_v36, %v3540_v20  ;;  %v1921_v28 = vmul.f32 %v3475_v42, %v3540_v20  ;;  %v1377_v52 = vsel %vm1367_vm6, %v3806_v16, 0.0  ;;  %v1987_v59 = vadd.f32 %v1974_v48, %v1950_v25 }
 0x102   : > { %v1861_v55 = vsel %vm1144_vm1, %v4286_v2, %v1860_v17  ;;  %v2011_v14 = vsel %vm1100_vm0, %v2008_v39, %v2010_v58  ;;  %1378 = vadd.xlane.f32.xlu0 %v1377_v52  ;;  %v2048_v24 = vsel %vm1333_vm5, %v2045_v15, %v2047_v5  ;;  %v1958_v23 = vmul.f32 %v3491_v50, %v3540_v20 }
 0x103   : > { %v1875_v18 = vadd.f32 %v1861_v55, %v1838_v32  ;;  %v1896_v17 = vrot.slane %v1884_v56, 2  ;;  %v1933_v37 = vrot.slane %v1921_v28, 3  ;;  %v2024_v13 = vadd.f32 %v2011_v14, %v1987_v59 }
 0x104   : > { %v1995_v62 = vmul.f32 %v3500_v57, %v3540_v20  ;;  %v2032_v10 = vmul.f32 %v3503_v61, %v3540_v20  ;;  %v1841_v53 = vmul.f32 %v3482_v46, %v3614_v8  ;;  %v1970_v63 = vrot.slane %v1958_v23, 4 }
 0x105   : > { %v1898_v38 = vsel %vm1182_vm2, %v1896_v17, %v1897_v54  ;;  %v1935_v51 = vsel %vm1220_vm3, %v1933_v37, %v1934_v21  ;;  %v1850_v7 = vmul.f32 %v3466_v35, %v3614_v8  ;;  %v2061_v22 = vadd.f32 %v2048_v24, %v2024_v13 }
 0x106   : > { %v1912_v48 = vadd.f32 %v1898_v38, %v1875_v18  ;;  %v2007_v32 = vrot.slane %v1995_v62, 5  ;;  %v2044_v25 = vrot.slane %v2032_v10, 6  ;;  %v1972_v2 = vsel %vm1258_vm4, %v1970_v63, %v1971_v41 }
 0x107   : > { %v1851_v20 = vmul.f32 %v3466_v35, %v3617_v12  ;;  %v1864_v55 = vrot.slane %v1850_v7, 1  ;;  %v1887_v56 = vmul.f32 %v3468_v36, %v3614_v8  ;;  %v3846_v54 = vadd.f32 %v3834_v27, %v2061_v22 }
 0x108   : > { %v1949_v21 = vadd.f32 %v1935_v51, %v1912_v48  ;;  %v2009_v28 = vsel %vm1100_vm0, %v2007_v32, %v2008_v39  ;;  %v2046_v52 = vsel %vm1333_vm5, %v2044_v25, %v2045_v15  ;;  %v1888_v14 = vmul.f32 %v3468_v36, %v3617_v12 }
 0x109   : > { %v1866_v59 = vrot.slane %v1851_v20, 1  ;;  %v1901_v41 = vrot.slane %v1887_v56, 2  ;;  %v1924_v35 = vmul.f32 %v3475_v42, %v3614_v8  ;;  %v2080_v18 = vsel %vm1367_vm6, %v3846_v54, 0.0 }
 0x10a   : > { %v1986_v24 = vadd.f32 %v1972_v2, %v1949_v21  ;;  %v1925_v17 = vmul.f32 %v3475_v42, %v3617_v12  ;;  %v1961_v39 = vmul.f32 %v3491_v50, %v3614_v8  ;;  %2081 = vadd.xlane.f32.xlu1 %v2080_v18  ;;  %v1903_v37 = vrot.slane %v1888_v14, 2 }
 0x10b   : > { %v1867_v15 = vsel %vm1144_vm1, %v1864_v55, %v1866_v59  ;;  %v1938_v23 = vrot.slane %v1924_v35, 3  ;;  %v1962_v36 = vmul.f32 %v3491_v50, %v3617_v12  ;;  %v1998_v7 = vmul.f32 %v3500_v57, %v3614_v8 }
 0x10c   : > { %v2023_v13 = vadd.f32 %v2009_v28, %v1986_v24  ;;  %v1878_v62 = vadd.f32 %v1867_v15, %v1841_v53  ;;  %v1940_v10 = vrot.slane %v1925_v17, 3  ;;  %v1975_v38 = vrot.slane %v1961_v39, 4 }
 0x10d   : > { %v1904_v51 = vsel %vm1182_vm2, %v1901_v41, %v1903_v37  ;;  %v1977_v63 = vrot.slane %v1962_v36, 4  ;;  %v1999_v22 = vmul.f32 %v3500_v57, %v3617_v12  ;;  %v1926_v48 = vmul.f32 %v3475_v42, %v3607_v33 }
 0x10e   : > { %v2060_v32 = vadd.f32 %v2046_v52, %v2023_v13  ;;  %v1915_v25 = vadd.f32 %v1904_v51, %v1878_v62  ;;  %v2035_v2 = vmul.f32 %v3503_v61, %v3614_v8  ;;  %v1941_v53 = vsel %vm1220_vm3, %v1938_v23, %v1940_v10 }
 0x10f   : > { %v2012_v20 = vrot.slane %v1998_v7, 5  ;;  %v2014_v56 = vrot.slane %v1999_v22, 5  ;;  %v2036_v21 = vmul.f32 %v3503_v61, %v3617_v12  ;;  %v1868_v28 = vrot.slane %v3621_v44, 1 }
 0x110   : > { %v3877_v14 = vadd.f32 %v3834_v27, %v2060_v32  ;;  %v1952_v35 = vadd.f32 %v1941_v53, %v1915_v25  ;;  %v1840_v42 = vmul.f32 %v3482_v46, %v3611_v47  ;;  %v1978_v52 = vsel %vm1258_vm4, %v1975_v38, %v1977_v63 }
 0x111   : > { %v2049_v18 = vrot.slane %v2035_v2, 6  ;;  %v2051_v8 = vrot.slane %v2036_v21, 6  ;;  %v1865_v24 = vsel %vm1144_vm1, %v1862_v31, %v1864_v55  ;;  %v1905_v15 = vrot.slane %v3626_v1, 2 }
 0x112   : > { %v2077_v17 = vsel %vm1367_vm6, %v3877_v14, 0.0  ;;  %v1989_v39 = vadd.f32 %v1978_v52, %v1952_v35  ;;  %v1877_v44 = vadd.f32 %v1865_v24, %v1840_v42  ;;  %v2015_v36 = vsel %vm1100_vm0, %v2012_v20, %v2014_v56 }
 0x113   : > { %2078 = vadd.xlane.f32.xlu0 %v2077_v17  ;;  %v1902_v47 = vsel %vm1182_vm2, %v1899_v19, %v1901_v41  ;;  %v1939_v60 = vsel %vm1220_vm3, %v1936_v4, %v1938_v23  ;;  %v1842_v55 = vmul.f32 %v3482_v46, %v3617_v12  ;;  %v1869_v62 = vsel %vm1144_vm1, %v1866_v59, %v1868_v28 }
 0x114   : > { %v2026_v13 = vadd.f32 %v2015_v36, %v1989_v39  ;;  %v1914_v31 = vadd.f32 %v1902_v47, %v1877_v44  ;;  %v2052_v1 = vsel %vm1333_vm5, %v2049_v18, %v2051_v8  ;;  %v1942_v51 = vrot.slane %v1926_v48, 3 }
 0x115   : > { %v1963_v7 = vmul.f32 %v3491_v50, %v3607_v33  ;;  %v2000_v30 = vmul.f32 %v3500_v57, %v3607_v33  ;;  %v1879_v41 = vadd.f32 %v1869_v62, %v1842_v55  ;;  %v1976_v4 = vsel %vm1258_vm4, %v1973_v11, %v1975_v38 }
 0x116   : > { %v2063_v19 = vadd.f32 %v2052_v1, %v2026_v13  ;;  %v1951_v9 = vadd.f32 %v1939_v60, %v1914_v31  ;;  %v1906_v46 = vsel %vm1182_vm2, %v1903_v37, %v1905_v15  ;;  %v2037_v59 = vmul.f32 %v3503_v61, %v3607_v33 }
 0x117   : > { %v1979_v12 = vrot.slane %v1963_v7, 4  ;;  %v1916_v22 = vadd.f32 %v1906_v46, %v1879_v41  ;;  %v2013_v57 = vsel %vm1100_vm0, %v2010_v58, %v2012_v20  ;;  %v1943_v48 = vsel %vm1220_vm3, %v1940_v10, %v1942_v51 }
 0x118   : > { %v3910_v23 = vadd.f32 %v3834_v27, %v2063_v19  ;;  %v1988_v50 = vadd.f32 %v1976_v4, %v1951_v9  ;;  %v2016_v26 = vrot.slane %v2000_v30, 5  ;;  %v2050_v61 = vsel %vm1333_vm5, %v2047_v5, %v2049_v18 }
 0x119   : > { %v1953_v38 = vadd.f32 %v1943_v48, %v1916_v22  ;;  %v1980_v33 = vsel %vm1258_vm4, %v1977_v63, %v1979_v12  ;;  %v2053_v32 = vrot.slane %v2037_v59, 6 }
 0x11a   : > { %v2086_v11 = vsel %vm1367_vm6, %v3910_v23, 0.0  ;;  %v2025_v37 = vadd.f32 %v2013_v57, %v1988_v50  ;;  %v2017_v58 = vsel %vm1100_vm0, %v2014_v56, %v2016_v26 }
 0x11b   : > { %2087 = vadd.xlane.f32.xlu1 %v2086_v11  ;;  %v1990_v3 = vadd.f32 %v1980_v33, %v1953_v38  ;;  %v2054_v53 = vsel %vm1333_vm5, %v2051_v8, %v2053_v32  ;;  %v3163_v32 = vld [vmem:[%s3319_s14] sm:$0xff]  }
 0x11c   : > { %v2062_v25 = vadd.f32 %v2050_v61, %v2025_v37 }
 0x11d   : > { %v2027_v2 = vadd.f32 %v2017_v58, %v1990_v3 }
 0x11e   : > { %v2074_v10 = vadd.f32 %v3834_v27, %v2062_v25  ;;  %v3263_v25 = vmov 0.0  }
 0x11f   : > { %v2064_v21 = vadd.f32 %v2054_v53, %v2027_v2  ;;  %3013 = vmatprep.subr.bf16.mxu0 %v3263_v25  ;;  %3015 = vmatprep.mubr.msk.bf16.mxu0 %vm3264_vm7, %v3263_v25 }
 0x120   : > { %v2083_v20 = vsel %vm1367_vm6, %v2074_v10, 0.0  ;;  %3014 = vmatpush3.bf16.msra.mxu0 %v3163_v32  ;;  %3093 = vmatprep.subr.bf16.mxu1 %v3263_v25 }
 0x121   : > { %2084 = vadd.xlane.f32.xlu0 %v2083_v20  ;;  %v2076_v45 = vadd.f32 %v3834_v27, %v2064_v21  ;;  %3094 = vmatpush3.bf16.msra.mxu1 %v3163_v32 }
 0x122   : > { %3019 = vmatprep.mubr.msk.bf16.mxu1 %vm3264_vm7, %v3263_v25  ;;  %3043 = vmatprep.subr.bf16.mxu0 %v3263_v25 }
 0x123   : > { %v2089_v5 = vsel %vm1367_vm6, %v2076_v45, 0.0  ;;  %3027 = vmatprep.subr.bf16.mxu1 %v3263_v25 }
 0x125   : > { %2090 = vadd.xlane.f32.xlu0 %v2089_v5 }
 0x16d   : > { %v1370_v63 = vpop.xlane.xlu0 %1369 }
 0x16e   : > { %v1384_v28 = vmul.f32 0.0625, %v1370_v63 }
 0x170   : > { %v3929_v35 = vsub.f32 %v3649_v34, %v1384_v28 }
 0x172   : > { %v1394_v56 = vmul.f32 %v3929_v35, %v3929_v35 }
 0x174   : > { %v1399_v42 = vsel %vm1367_vm6, %v1394_v56, 0.0 }
 0x175   : > { %1400 = vadd.xlane.f32.xlu1 %v1399_v42 }
 0x17a   : > { %v1373_v52 = vpop.xlane.xlu1 %1372 }
 0x17b   : > { %v1385_v18 = vmul.f32 0.0625, %v1373_v52  ;;  %v2920_v52 = vld [vmem:[%s3309_s3] ss:$0 sm:$0xff] }
 0x17d   : > { %v3935_v8 = vsub.f32 %v3714_v40, %v1385_v18 }
 0x17f   : > { %v1395_v27 = vmul.f32 %v3935_v8, %v3935_v8 }
 0x180   : > { %v1376_v24 = vpop.xlane.xlu0 %1375 }
 0x181   : > { %v1386_v17 = vmul.f32 0.0625, %v1376_v24  ;;  %v1402_v39 = vsel %vm1367_vm6, %v1395_v27, 0.0 }
 0x182   : > { %1403 = vadd.xlane.f32.xlu0 %v1402_v39 }
 0x183   : > { %v3941_v34 = vsub.f32 %v3736_v6, %v1386_v17 }
 0x185   : > { %v1396_v15 = vmul.f32 %v3941_v34, %v3941_v34 }
 0x187   : > { %v1382_v44 = vpop.xlane.xlu1 %1381  ;;  %v1405_v47 = vsel %vm1367_vm6, %v1396_v15, 0.0 }
 0x188   : > { %v1388_v36 = vmul.f32 0.0625, %v1382_v44  ;;  %1406 = vadd.xlane.f32.xlu1 %v1405_v47  ;;  %v2921_v44 = vld [vmem:[%s3314_s8] ss:$0 sm:$0xff] }
 0x18a   : > { %v3947_v40 = vsub.f32 %v3766_v0, %v1388_v36 }
 0x18b   : > { %v1379_v13 = vpop.xlane.xlu0 %1378 }
 0x18c   : > { %v1398_v60 = vmul.f32 %v3947_v40, %v3947_v40  ;;  %v1387_v31 = vmul.f32 0.0625, %v1379_v13 }
 0x18e   : > { %v1411_v55 = vsel %vm1367_vm6, %v1398_v60, 0.0  ;;  %v3953_v6 = vsub.f32 %v3806_v16, %v1387_v31  ;;  %v3164_v31 = vld [vmem:[%s4287_s15] sm:$0xff]   ;;  %s4305_s15 = sld [smem:[#allocation13_spill]] }
 0x18f   : > { %1412 = vadd.xlane.f32.xlu1 %v1411_v55 }
 0x190   : > { %v1397_v62 = vmul.f32 %v3953_v6, %v3953_v6 }
 0x192   : > { %v1408_v1 = vsel %vm1367_vm6, %v1397_v62, 0.0 }
 0x193   : > { %v2082_v51 = vpop.xlane.xlu1 %2081  ;;  %1409 = vadd.xlane.f32.xlu0 %v1408_v1 }
 0x194   : > { %v2093_v0 = vmul.f32 0.0625, %v2082_v51 }
 0x196   : > { %v3959_v7 = vsub.f32 %v3846_v54, %v2093_v0 }
 0x198   : > { %v2103_v30 = vmul.f32 %v3959_v7, %v3959_v7 }
 0x19a   : > { %v2110_v19 = vsel %vm1367_vm6, %v2103_v30, 0.0 }
 0x19b   : > { %2111 = vadd.xlane.f32.xlu1 %v2110_v19 }
 0x19c   : > { %v2079_v9 = vpop.xlane.xlu0 %2078 }
 0x19d   : > { %v2092_v16 = vmul.f32 0.0625, %v2079_v9 }
 0x19f   : > { %v3965_v41 = vsub.f32 %v3877_v14, %v2092_v16 }
 0x1a1   : > { %v2102_v4 = vmul.f32 %v3965_v41, %v3965_v41 }
 0x1a3   : > { %v2107_v46 = vsel %vm1367_vm6, %v2102_v4, 0.0 }
 0x1a4   : > { %v2088_v12 = vpop.xlane.xlu1 %2087  ;;  %2108 = vadd.xlane.f32.xlu0 %v2107_v46 }
 0x1a5   : > { %v2095_v54 = vmul.f32 0.0625, %v2088_v12 }
 0x1a7   : > { %v3971_v59 = vsub.f32 %v3910_v23, %v2095_v54 }
 0x1a9   : > { %v2105_v50 = vmul.f32 %v3971_v59, %v3971_v59 }
 0x1aa   : > { %v2085_v22 = vpop.xlane.xlu0 %2084 }
 0x1ab   : > { %v2094_v57 = vmul.f32 0.0625, %v2085_v22  ;;  %v2116_v14 = vsel %vm1367_vm6, %v2105_v50, 0.0 }
 0x1ac   : > { %2117 = vadd.xlane.f32.xlu1 %v2116_v14 }
 0x1ad   : > { %v3976_v48 = vsub.f32 %v2074_v10, %v2094_v57 }
 0x1ae   : > { %v2091_v26 = vpop.xlane.xlu0 %2090 }
 0x1af   : > { %v2096_v11 = vmul.f32 0.0625, %v2091_v26  ;;  %v2104_v37 = vmul.f32 %v3976_v48, %v3976_v48 }
 0x1b1   : > { %v3980_v38 = vsub.f32 %v2076_v45, %v2096_v11  ;;  %v2113_v23 = vsel %vm1367_vm6, %v2104_v37, 0.0 }
 0x1b2   : > { %2114 = vadd.xlane.f32.xlu0 %v2113_v23 }
 0x1b3   : > { %v2106_v61 = vmul.f32 %v3980_v38, %v3980_v38 }
 0x1b5   : > { %v2119_v33 = vsel %vm1367_vm6, %v2106_v61, 0.0 }
 0x1b6   : > { %2120 = vadd.xlane.f32.xlu0 %v2119_v33 }
 0x1fe   : > { %v1401_v3 = vpop.xlane.xlu1 %1400 }
 0x1ff   : > { %v1414_v58 = vmul.f32 0.0625, %v1401_v3 }
 0x201   : > { %v1419_v10 = vadd.f32 1e-06, %v1414_v58 }
 0x203   : > { %3176 = vrsqrt.f32 %v1419_v10 }
 0x20b   : > { %v1404_v2 = vpop.xlane.xlu0 %1403 }
 0x20c   : > { %v1415_v53 = vmul.f32 0.0625, %v1404_v2 }
 0x20e   : > { %v1420_v20 = vadd.f32 1e-06, %v1415_v53  ;;  %v2939_v53 = vld [vmem:[%s4289_s18] ss:$0 sm:$0xff]  ;;  %s3265_s18 = smov 16  }
 0x210   : > { %3178 = vrsqrt.f32 %v1420_v20  ;;  %v3177_v5 = vpop.eup %3176 }
 0x211   : > { %v1407_v21 = vpop.xlane.xlu1 %1406  ;;  %v1429_v42 = vmul.f32 %v3177_v5, %v3929_v35 }
 0x212   : > { %v1416_v45 = vmul.f32 0.0625, %v1407_v21 }
 0x213   : > { %v1441_v24 = vmul.f32 %v2920_v52, %v1429_v42 }
 0x214   : > { %v1421_v28 = vadd.f32 1e-06, %v1416_v45 }
 0x215   : > { %v1453_v60 = vadd.f32 %v2921_v44, %v1441_v24 }
 0x216   : > { %3180 = vrsqrt.f32 %v1421_v28 }
 0x218   : > { %v1413_v63 = vpop.xlane.xlu1 %1412 }
 0x219   : > { %v1418_v56 = vmul.f32 0.0625, %v1413_v63 }
 0x21b   : > { %v1423_v18 = vadd.f32 1e-06, %v1418_v56 }
 0x21c   : > { %v1410_v27 = vpop.xlane.xlu0 %1409 }
 0x21d   : > { %v3179_v17 = vpop.eup %3178  ;;  %v1417_v39 = vmul.f32 0.0625, %v1410_v27  ;;  %3182 = vrsqrt.f32 %v1423_v18 }
 0x21e   : > { %v1430_v15 = vmul.f32 %v3179_v17, %v3935_v8 }
 0x21f   : > { %v1422_v36 = vadd.f32 1e-06, %v1417_v39 }
 0x220   : > { %v1442_v47 = vmul.f32 %v2920_v52, %v1430_v15 }
 0x221   : > { %3184 = vrsqrt.f32 %v1422_v36 }
 0x222   : > { %v1454_v13 = vadd.f32 %v2921_v44, %v1442_v47 }
 0x223   : > { %v3181_v51 = vpop.eup %3180 }
 0x224   : > { %v2112_v55 = vpop.xlane.xlu1 %2111  ;;  %v1458_v35 = vpack.c.bf16 %v1454_v13, %v1453_v60  ;;  %v1431_v8 = vmul.f32 %v3181_v51, %v3941_v34  ;;  %v3169_v60 = vld [vmem:[%s4291_s23 + $0x18] sm:$0xff]   ;;  %v3170_v13 = vld [vmem:[%s4291_s23 + $0x10] sm:$0xff]  }
 0x225   : > { %v2123_v62 = vmul.f32 0.0625, %v2112_v55  ;;  %v3172_v55 = vld [vmem:[%s4291_s23] sm:$0xff]  }
 0x226   : > { %3016 = vmatmul.mubr.msk.bf16.vlgmr.msra.gmra.mxu0 %vm1367_vm6, %v1458_v35  ;;  %v1443_v46 = vmul.f32 %v2920_v52, %v1431_v8  ;;  %v2922_v35 = vld [vmem:[%s4292_s26] ss:$0 sm:$0xff]  ;;  %s4307_s26 = sld [smem:[#allocation5_spill]] }
 0x227   : > { %v2128_v1 = vadd.f32 1e-06, %v2123_v62  ;;  %3044 = vmatpush3.bf16.msra.mxu0 %v3164_v31  ;;  %3045 = vmatprep.mubr.msk.bf16.mxu0 %vm3264_vm7, %v3263_v25  ;;  %v3171_v31 = vld [vmem:[%s4291_s23 + $0x8] sm:$0xff]  }
 0x228   : > { %3073 = vmatprep.subr.bf16.mxu0 %v3263_v25  ;;  %v1455_v50 = vadd.f32 %v2921_v44, %v1443_v46 }
 0x229   : > { %3186 = vrsqrt.f32 %v2128_v1 }
 0x22a   : > { %v3183_v30 = vpop.eup %3182 }
 0x22b   : > { %v1433_v54 = vmul.f32 %v3183_v30, %v3947_v40  ;;  %v2938_v40 = vld [vmem:[%s4288_s16] ss:$0 sm:$0xff]  ;;  %s4306_s16 = sld [smem:[#allocation14_spill]] }
 0x22d   : > { %v2109_v0 = vpop.xlane.xlu0 %2108  ;;  %v1445_v11 = vmul.f32 %v2920_v52, %v1433_v54 }
 0x22e   : > { %v2122_v19 = vmul.f32 0.0625, %v2109_v0  ;;  %v3185_v9 = vpop.eup %3184 }
 0x22f   : > { %v1432_v4 = vmul.f32 %v3185_v9, %v3953_v6  ;;  %v1457_v23 = vadd.f32 %v2921_v44, %v1445_v11 }
 0x230   : > { %v2127_v16 = vadd.f32 1e-06, %v2122_v19 }
 0x231   : > { %v1444_v12 = vmul.f32 %v2920_v52, %v1432_v4  ;;  %v1460_v58 = vpack.c.bf16 %v1457_v23, %v1457_v23 }
 0x232   : > { %3188 = vrsqrt.f32 %v2127_v16 }
 0x233   : > { %v1456_v22 = vadd.f32 %v2921_v44, %v1444_v12 }
 0x235   : > { %v2118_v57 = vpop.xlane.xlu1 %2117  ;;  %v1459_v26 = vpack.c.bf16 %v1456_v22, %v1455_v50 }
 0x236   : > { %v2125_v14 = vmul.f32 0.0625, %v2118_v57  ;;  %v3187_v34 = vpop.eup %3186 }
 0x237   : > { %3020 = vmatmul.mubr.msk.bf16.vlgmr.msra.gmra.mxu1 %vm1367_vm6, %v1459_v26  ;;  %v2138_v6 = vmul.f32 %v3187_v34, %v3959_v7 }
 0x238   : > { %v2130_v37 = vadd.f32 1e-06, %v2125_v14  ;;  %3023 = vmatprep.mubr.msk.bf16.mxu1 %vm3264_vm7, %v3263_v25 }
 0x239   : > { %v2150_v3 = vmul.f32 %v2938_v40, %v2138_v6 }
 0x23a   : > { %3190 = vrsqrt.f32 %v2130_v37 }
 0x23b   : > { %v2115_v61 = vpop.xlane.xlu0 %2114  ;;  %v2162_v5 = vadd.f32 %v2939_v53, %v2150_v3 }
 0x23c   : > { %v2124_v33 = vmul.f32 0.0625, %v2115_v61 }
 0x23e   : > { %v2129_v32 = vadd.f32 1e-06, %v2124_v33 }
 0x23f   : > { %v3189_v10 = vpop.eup %3188  ;;  %v2121_v2 = vpop.xlane.xlu0 %2120  ;;  %3024 = vmatmul.mubr.msk.bf16.gmra.mxu1 %vm1367_vm6, %v1460_v58 }
 0x240   : > { %v2137_v20 = vmul.f32 %v3189_v10, %v3965_v41  ;;  %3192 = vrsqrt.f32 %v2129_v32  ;;  %v2126_v21 = vmul.f32 0.0625, %v2121_v2  ;;  %3031 = vmatprep.mubr.msk.bf16.mxu1 %vm3264_vm7, %v3263_v25 }
 0x242   : > { %v2131_v7 = vadd.f32 1e-06, %v2126_v21  ;;  %v2149_v45 = vmul.f32 %v2938_v40, %v2137_v20 }
 0x244   : > { %3194 = vrsqrt.f32 %v2131_v7  ;;  %v2161_v63 = vadd.f32 %v2939_v53, %v2149_v45 }
 0x246   : > { %v2166_v28 = vpack.c.bf16 %v2162_v5, %v2161_v63 }
 0x247   : > { %v3191_v56 = vpop.eup %3190 }
 0x248   : > { %3046 = vmatmul.mubr.msk.bf16.vlgmr.msra.gmra.mxu0 %vm1367_vm6, %v2166_v28  ;;  %v2140_v42 = vmul.f32 %v3191_v56, %v3971_v59 }
 0x249   : > { %3049 = vmatprep.mubr.msk.bf16.mxu0 %vm3264_vm7, %v3263_v25  ;;  %3074 = vmatpush3.bf16.msra.mxu0 %v3169_v60 }
 0x24a   : > { %v2152_v41 = vmul.f32 %v2938_v40, %v2140_v42  ;;  %3075 = vmatprep.subr.bf16.mxu0 %v3263_v25 }
 0x24c   : > { %v2164_v24 = vadd.f32 %v2939_v53, %v2152_v41 }
 0x24d   : > { %v3193_v52 = vpop.eup %3192  ;;  %3076 = vmatpush3.bf16.msra.mxu0 %v3170_v13 }
 0x24e   : > { %v2139_v18 = vmul.f32 %v3193_v52, %v3976_v48  ;;  %v3165_v48 = vld [vmem:[%s4290_s22 + $0x8] sm:$0xff]   ;;  %3077 = vmatprep.subr.bf16.mxu0 %v3263_v25 }
 0x24f   : > { %3028 = vmatpush3.bf16.msra.mxu1 %v3165_v48 }
 0x250   : > { %v2151_v27 = vmul.f32 %v2938_v40, %v2139_v18  ;;  %3029 = vmatprep.subr.bf16.mxu1 %v3263_v25  ;;  %v4058_v18 = vld [vmem:[%s4293_s1] ss:$0 sm:$0xff]  ;;  %s4308_s1 = sld [smem:[#allocation6_spill]] }
 0x251   : > { %v3195_v17 = vpop.eup %3194  ;;  %3078 = vmatpush3.bf16.msra.mxu0 %v3171_v31 }
 0x252   : > { %v2163_v39 = vadd.f32 %v2939_v53, %v2151_v27  ;;  %v2141_v44 = vmul.f32 %v3195_v17, %v3980_v38  ;;  %v3166_v38 = vld [vmem:[%s4290_s22] sm:$0xff]   ;;  %3079 = vmatprep.subr.bf16.mxu0 %v3263_v25 }
 0x253   : > { %3030 = vmatpush3.bf16.msra.mxu1 %v3166_v38 }
 0x254   : > { %v2167_v15 = vpack.c.bf16 %v2164_v24, %v2163_v39  ;;  %v2153_v36 = vmul.f32 %v2938_v40, %v2141_v44  ;;  %3057 = vmatprep.subr.bf16.mxu1 %v3263_v25 }
 0x255   : > { %3080 = vmatpush3.bf16.msra.mxu0 %v3172_v55 }
 0x256   : > { %3050 = vmatmul.mubr.msk.bf16.gmra.mxu0 %vm1367_vm6, %v2167_v15  ;;  %v2165_v59 = vadd.f32 %v2939_v53, %v2153_v36 }
 0x257   : > { %3053 = vmatprep.mubr.msk.bf16.mxu0 %vm3264_vm7, %v3263_v25 }
 0x258   : > { %v2168_v47 = vpack.c.bf16 %v2165_v59, %v2165_v59 }
 0x25e   : > { %3054 = vmatmul.mubr.msk.bf16.gmra.mxu0 %vm1367_vm6, %v2168_v47  ;;  %v3167_v47 = vld [vmem:[%s4294_s0 + $0x8] sm:$0xff]  }
 0x25f   : > { %3081 = vmatprep.mubr.msk.bf16.mxu0 %vm3264_vm7, %v3263_v25 }
 0x2e6   : > { %v1519_v62 = vpop.f32.mrf.mxu0 }
 0x2e7   : > { %v1520_v1 = vadd.f32 %v2922_v35, %v1519_v62  ;;  %v3168_v62 = vld [vmem:[%s4294_s0] sm:$0xff]  }
 0x2e8   : > { %v3017_v51 = vpop.f32.mrf.mxu0 }
 0x2e9   : > { %v1546_v8 = vmul.f32 0.044715, %v1520_v1  ;;  %v1541_v42 = vmul.f32 0.5, %v1520_v1 }
 0x2ea   : > { %v1522_v0 = vpop.f32.mrf.mxu0 }
 0x2eb   : > { %v1551_v30 = vmul.f32 %v1546_v8, %v1520_v1  ;;  %v1523_v19 = vadd.f32 %v2922_v35, %v1522_v0 }
 0x2ec   : > { %v3018_v9 = vpop.f32.mrf.mxu0 }
 0x2ed   : > { %v1556_v16 = vmul.f32 %v1551_v30, %v1520_v1  ;;  %v1547_v4 = vmul.f32 0.044715, %v1523_v19  ;;  %v1542_v41 = vmul.f32 0.5, %v1523_v19 }
 0x2ef   : > { %v1561_v46 = vadd.f32 %v1556_v16, %v1520_v1  ;;  %v1552_v12 = vmul.f32 %v1547_v4, %v1523_v19 }
 0x2f1   : > { %v1566_v54 = vmul.f32 0.7978846, %v1561_v46  ;;  %v1557_v50 = vmul.f32 %v1552_v12, %v1523_v19 }
 0x2f3   : > { %3196 = vtanh.f32 %v1566_v54  ;;  %v1562_v22 = vadd.f32 %v1557_v50, %v1523_v19 }
 0x2f5   : > { %v1567_v57 = vmul.f32 0.7978846, %v1562_v22 }
 0x2f7   : > { %3198 = vtanh.f32 %v1567_v57  ;;  %v1527_v14 = vpop.f32.mrf.mxu1 }
 0x2f8   : > { %v4041_v26 = vadd.f32 %v2922_v35, %v1527_v14 }
 0x2f9   : > { %v3021_v11 = vpop.f32.mrf.mxu1 }
 0x2fa   : > { %v1548_v34 = vmul.f32 0.044715, %v4041_v26  ;;  %v1543_v50 = vmul.f32 0.5, %v4041_v26 }
 0x2fb   : > { %v1530_v37 = vpop.f32.mrf.mxu1 }
 0x2fc   : > { %v1553_v6 = vmul.f32 %v1548_v34, %v4041_v26  ;;  %v4045_v23 = vadd.f32 %v2922_v35, %v1530_v37 }
 0x2fd   : > { %v3022_v61 = vpop.f32.mrf.mxu1 }
 0x2fe   : > { %v1558_v40 = vmul.f32 %v1553_v6, %v4041_v26  ;;  %v1549_v33 = vmul.f32 0.044715, %v4045_v23  ;;  %v1544_v14 = vmul.f32 0.5, %v4045_v23 }
 0x2ff   : > { %v1535_v32 = vpop.f32.mrf.mxu1 }
 0x300   : > { %v3197_v3 = vpop.eup %3196  ;;  %v1563_v58 = vadd.f32 %v1558_v40, %v4041_v26  ;;  %v1554_v10 = vmul.f32 %v1549_v33, %v4045_v23  ;;  %v4051_v2 = vadd.f32 %v2922_v35, %v1535_v32 }
 0x301   : > { %v3025_v53 = vpop.f32.mrf.mxu1  ;;  %v1576_v45 = vadd.f32 1.0, %v3197_v3 }
 0x302   : > { %v1568_v20 = vmul.f32 0.7978846, %v1563_v58  ;;  %v1559_v21 = vmul.f32 %v1554_v10, %v4045_v23  ;;  %v1550_v7 = vmul.f32 0.044715, %v4051_v2 }
 0x303   : > { %v1538_v5 = vpop.f32.mrf.mxu1  ;;  %v1581_v39 = vmul.f32 %v1576_v45, %v1541_v42 }
 0x304   : > { %v3199_v63 = vpop.eup %3198  ;;  %3200 = vtanh.f32 %v1568_v20  ;;  %v1564_v28 = vadd.f32 %v1559_v21, %v4045_v23  ;;  %v1555_v56 = vmul.f32 %v1550_v7, %v4051_v2  ;;  %v1545_v23 = vmul.f32 0.5, %v4051_v2 }
 0x305   : > { %v1577_v52 = vadd.f32 1.0, %v3199_v63  ;;  %v3026_v27 = vpop.f32.mrf.mxu1 }
 0x306   : > { %v1569_v24 = vmul.f32 0.7978846, %v1564_v28  ;;  %v1560_v17 = vmul.f32 %v1555_v56, %v4051_v2 }
 0x307   : > { %v1582_v44 = vmul.f32 %v1577_v52, %v1542_v41 }
 0x308   : > { %v2227_v15 = vpop.f32.mrf.mxu0  ;;  %3202 = vtanh.f32 %v1569_v24  ;;  %v1565_v59 = vadd.f32 %v1560_v17, %v4051_v2 }
 0x309   : > { %v4062_v36 = vadd.f32 %v4058_v18, %v2227_v15  ;;  %v1586_v48 = vpack.c.bf16 %v1582_v44, %v1581_v39 }
 0x30a   : > { %v3047_v38 = vpop.f32.mrf.mxu0  ;;  %v1570_v13 = vmul.f32 0.7978846, %v1565_v59 }
 0x30b   : > { %v2254_v60 = vmul.f32 0.044715, %v4062_v36  ;;  %3032 = vmatmul.mubr.msk.bf16.vlgmr.msra.gmra.mxu1 %vm1612_vm8, %v1586_v48 }
 0x30c   : > { %v2230_v31 = vpop.f32.mrf.mxu0  ;;  %3058 = vmatpush3.bf16.msra.mxu1 %v3167_v47  ;;  %3035 = vmatprep.mubr.msk.bf16.mxu1 %vm3264_vm7, %v3263_v25  ;;  %3204 = vtanh.f32 %v1570_v13 }
 0x30d   : > { %v2259_v55 = vmul.f32 %v2254_v60, %v4062_v36  ;;  %v4070_v35 = vadd.f32 %v4058_v18, %v2230_v31  ;;  %3059 = vmatprep.subr.bf16.mxu1 %v3263_v25 }
 0x30e   : > { %v3048_v1 = vpop.f32.mrf.mxu0 }
 0x30f   : > { %v2264_v51 = vmul.f32 %v2259_v55, %v4062_v36  ;;  %v2255_v8 = vmul.f32 0.044715, %v4070_v35  ;;  %v2250_v48 = vmul.f32 0.5, %v4070_v35 }
 0x310   : > { %3060 = vmatpush3.bf16.msra.mxu1 %v3168_v62 }
 0x311   : > { %v2269_v0 = vadd.f32 %v2264_v51, %v4062_v36  ;;  %v2260_v30 = vmul.f32 %v2255_v8, %v4070_v35  ;;  %v3201_v19 = vpop.eup %3200 }
 0x312   : > { %v1578_v46 = vadd.f32 1.0, %v3201_v19 }
 0x313   : > { %v2274_v9 = vmul.f32 0.7978846, %v2269_v0  ;;  %v2265_v16 = vmul.f32 %v2260_v30, %v4070_v35 }
 0x314   : > { %v1583_v6 = vmul.f32 %v1578_v46, %v1543_v50  ;;  %v3173_v50 = vld [vmem:[%s3450_s11] sm:$0xff]  }
 0x315   : > { %3206 = vtanh.f32 %v2274_v9  ;;  %v2270_v4 = vadd.f32 %v2265_v16, %v4070_v35  ;;  %v3203_v12 = vpop.eup %3202  ;;  %3082 = vmatmul.mubr.msk.bf16.vlgmr.msra.gmra.mxu0 %vm2520_vm9, %v3173_v50  ;;  %v4300_v50 = vld [vmem:[#allocation18_spill] sm:$0xff] }
 0x316   : > { %v2235_v54 = vpop.f32.mrf.mxu0  ;;  %v1579_v11 = vadd.f32 1.0, %v3203_v12  ;;  %3085 = vmatprep.mubr.msk.bf16.mxu0 %vm3264_vm7, %v3263_v25 }
 0x317   : > { %v2275_v22 = vmul.f32 0.7978846, %v2270_v4  ;;  %v2236_v57 = vadd.f32 %v4058_v18, %v2235_v54 }
 0x318   : > { %v3051_v34 = vpop.f32.mrf.mxu0  ;;  %v1584_v61 = vmul.f32 %v1579_v11, %v1544_v14  ;;  %v2927_v14 = vld [vmem:[%s4295_s2] ss:$0 sm:$0xff]  ;;  %s1034_s2 = scalar_lea.vmem %s3429_s6, %s3445_s7 }
 0x319   : > { %3208 = vtanh.f32 %v2275_v22  ;;  %v2256_v37 = vmul.f32 0.044715, %v2236_v57  ;;  %v3205_v40 = vpop.eup %3204  ;;  %v2251_v8 = vmul.f32 0.5, %v2236_v57  ;;  %v3174_v22 = vld [vmem:[%s3450_s11 + $0x8] sm:$0xff]  }
 0x31a   : > { %v2238_v33 = vpop.f32.mrf.mxu0  ;;  %v1587_v58 = vpack.c.bf16 %v1584_v61, %v1583_v6  ;;  %v1580_v10 = vadd.f32 1.0, %v3205_v40 }
 0x31b   : > { %v2261_v32 = vmul.f32 %v2256_v37, %v2236_v57  ;;  %v2239_v3 = vadd.f32 %v4058_v18, %v2238_v33 }
 0x31c   : > { %v3052_v53 = vpop.f32.mrf.mxu0  ;;  %3036 = vmatmul.mubr.msk.bf16.gmra.mxu1 %vm1612_vm8, %v1587_v58  ;;  %v1585_v63 = vmul.f32 %v1580_v10, %v1545_v23 }
 0x31d   : > { %v2266_v26 = vmul.f32 %v2261_v32, %v2236_v57  ;;  %v2257_v20 = vmul.f32 0.044715, %v2239_v3  ;;  %3039 = vmatprep.mubr.msk.bf16.mxu1 %vm3264_vm7, %v3263_v25  ;;  %v2252_v0 = vmul.f32 0.5, %v2239_v3  ;;  %3086 = vmatmul.mubr.msk.bf16.gmra.mxu0 %vm2520_vm9, %v3174_v22 }
 0x31e   : > { %v2243_v21 = vpop.f32.mrf.mxu0  ;;  %v1588_v39 = vpack.c.bf16 %v1585_v63, %v1585_v63  ;;  %3089 = vmatprep.mubr.msk.bf16.mxu0 %vm3264_vm7, %v3263_v25 }
 0x31f   : > { %v2271_v7 = vadd.f32 %v2266_v26, %v2236_v57  ;;  %v2262_v45 = vmul.f32 %v2257_v20, %v2239_v3  ;;  %v2244_v5 = vadd.f32 %v4058_v18, %v2243_v21  ;;  %v2249_v18 = vmul.f32 0.5, %v4062_v36  ;;  %v3175_v57 = vld [vmem:[%s3450_s11 + $0x10] ss:$0 sps:$4 sm:$0xff]   ;;  %s4304_s11 = sld [smem:[#allocation16_spill]] }
 0x320   : > { %v3055_v28 = vpop.f32.mrf.mxu0 }
 0x321   : > { %v2276_v56 = vmul.f32 0.7978846, %v2271_v7  ;;  %v2267_v42 = vmul.f32 %v2262_v45, %v2239_v3  ;;  %v2258_v41 = vmul.f32 0.044715, %v2244_v5  ;;  %v2253_v46 = vmul.f32 0.5, %v2244_v5 }
 0x322   : > { %v3207_v52 = vpop.eup %3206  ;;  %v2246_v27 = vpop.f32.mrf.mxu0 }
 0x323   : > { %3210 = vtanh.f32 %v2276_v56  ;;  %v2272_v24 = vadd.f32 %v2267_v42, %v2239_v3  ;;  %v2263_v17 = vmul.f32 %v2258_v41, %v2244_v5  ;;  %v2284_v44 = vadd.f32 1.0, %v3207_v52  ;;  %v4297_v52 = vld [vmem:[#allocation19_spill] sm:$0xff] }
 0x324   : > { %v3056_v2 = vpop.f32.mrf.mxu0  ;;  %3040 = vmatmul.mubr.msk.bf16.gmra.mxu1 %vm1612_vm8, %v1588_v39 }
 0x325   : > { %v2277_v15 = vmul.f32 0.7978846, %v2272_v24  ;;  %v2268_v59 = vmul.f32 %v2263_v17, %v2244_v5  ;;  %3061 = vmatprep.mubr.msk.bf16.mxu1 %vm3264_vm7, %v3263_v25  ;;  %v2289_v13 = vmul.f32 %v2284_v44, %v2249_v18  ;;  %3090 = vmatmul.mubr.msk.bf16.gmra.mxu0 %vm2520_vm9, %v3175_v57  ;;  %v4301_v57 = vld [vmem:[#allocation20_spill] sm:$0xff] }
 0x326   : > { %v3209_v47 = vpop.eup %3208 }
 0x327   : > { %v2285_v38 = vadd.f32 1.0, %v3209_v47  ;;  %3212 = vtanh.f32 %v2277_v15  ;;  %v2273_v60 = vadd.f32 %v2268_v59, %v2244_v5  ;;  %v4296_v5 = vld [vmem:[#allocation17_spill] sm:$0xff] }
 0x329   : > { %v2290_v31 = vmul.f32 %v2285_v38, %v2250_v48  ;;  %v2278_v55 = vmul.f32 0.7978846, %v2273_v60 }
 0x32b   : > { %v2294_v62 = vpack.c.bf16 %v2290_v31, %v2289_v13  ;;  %3214 = vtanh.f32 %v2278_v55  ;;  %v2945_v31 = vld [vmem:[%s4298_s10] ss:$0 sm:$0xff]  ;;  %s1039_s10 = scalar_lea.vmem %s3434_s30, %s3445_s7 }
 0x32d   : > { %3062 = vmatmul.mubr.msk.bf16.vlgmr.msra.gmra.mxu1 %vm1612_vm8, %v2294_v62 }
 0x32e   : > { %3065 = vmatprep.mubr.msk.bf16.mxu1 %vm3264_vm7, %v3263_v25 }
 0x330   : > { %v3211_v1 = vpop.eup %3210 }
 0x331   : > { %v2286_v36 = vadd.f32 1.0, %v3211_v1 }
 0x333   : > { %v2291_v30 = vmul.f32 %v2286_v36, %v2251_v8 }
 0x334   : > { %v3213_v51 = vpop.eup %3212 }
 0x335   : > { %v2287_v35 = vadd.f32 1.0, %v3213_v51 }
 0x337   : > { %v2292_v19 = vmul.f32 %v2287_v35, %v2252_v0 }
 0x338   : > { %v3215_v9 = vpop.eup %3214 }
 0x339   : > { %v2295_v16 = vpack.c.bf16 %v2292_v19, %v2291_v30  ;;  %v2288_v4 = vadd.f32 1.0, %v3215_v9  ;;  %v4299_v19 = vld [vmem:[#allocation21_spill] sm:$0xff] }
 0x33b   : > { %3066 = vmatmul.mubr.msk.bf16.gmra.mxu1 %vm1612_vm8, %v2295_v16  ;;  %v2293_v12 = vmul.f32 %v2288_v4, %v2253_v46 }
 0x33c   : > { %3069 = vmatprep.mubr.msk.bf16.mxu1 %vm3264_vm7, %v3263_v25 }
 0x33d   : > { %v2296_v54 = vpack.c.bf16 %v2293_v12, %v2293_v12 }
 0x343   : > { %3070 = vmatmul.mubr.msk.bf16.gmra.mxu1 %vm1612_vm8, %v2296_v54 }
 0x3cb   : > { %v1656_v11 = vpop.f32.mrf.mxu1 }
 0x3cc   : > { %v1657_v34 = vadd.f32 %v2927_v14, %v1656_v11 }
 0x3cd   : > { %v3033_v37 = vpop.f32.mrf.mxu1 }
 0x3ce   : > { %v1678_v61 = vadd.f32 %v1657_v34, %v3458_v29 }
 0x3cf   : > { %v1659_v6 = vpop.f32.mrf.mxu1 }
 0x3d0   : > { %v1660_v40 = vadd.f32 %v2927_v14, %v1659_v6  ;;  %v1685_v3 = vsel %vm1367_vm6, %v1678_v61, 0.0 }
 0x3d1   : > { %v3034_v33 = vpop.f32.mrf.mxu1 }
 0x3d2   : > { %v1679_v32 = vadd.f32 %v1660_v40, %v3489_v49 }
 0x3d4   : > { %v1686_v58 = vsel %vm1367_vm6, %v1679_v32, 0.0 }
 0x3d5   : > { %v1687_v10 = vadd.f32 %v1686_v58, %v1685_v3 }
 0x3dc   : > { %v1664_v53 = vpop.f32.mrf.mxu1 }
 0x3dd   : > { %v1665_v25 = vadd.f32 %v2927_v14, %v1664_v53 }
 0x3de   : > { %v3037_v26 = vpop.f32.mrf.mxu1 }
 0x3df   : > { %v1680_v20 = vadd.f32 %v1665_v25, %v3477_v43  ;;  %v4302_v26 = vld [vmem:[#allocation23_spill] sm:$0xff] }
 0x3e0   : > { %v1667_v23 = vpop.f32.mrf.mxu1 }
 0x3e1   : > { %v1688_v21 = vsel %vm1367_vm6, %v1680_v20, 0.0  ;;  %v1668_v7 = vadd.f32 %v2927_v14, %v1667_v23 }
 0x3e2   : > { %v1689_v45 = vadd.f32 %v1688_v21, %v1687_v10  ;;  %v3038_v29 = vpop.f32.mrf.mxu1 }
 0x3e3   : > { %v1681_v63 = vadd.f32 %v1668_v7, %v4296_v5 }
 0x3e4   : > { %v1672_v28 = vpop.f32.mrf.mxu1 }
 0x3e5   : > { %v1690_v49 = vsel %vm1367_vm6, %v1681_v63, 0.0  ;;  %v1673_v56 = vadd.f32 %v2927_v14, %v1672_v28 }
 0x3e6   : > { %v1691_v42 = vadd.f32 %v1690_v49, %v1689_v45  ;;  %v3041_v41 = vpop.f32.mrf.mxu1 }
 0x3e7   : > { %v1682_v27 = vadd.f32 %v1673_v56, %v4297_v52 }
 0x3e8   : > { %v1675_v24 = vpop.f32.mrf.mxu1 }
 0x3e9   : > { %v1692_v43 = vsel %vm1367_vm6, %v1682_v27, 0.0 }
 0x3ea   : > { %v1693_v17 = vadd.f32 %v1692_v43, %v1691_v42  ;;  %v3042_v39 = vpop.f32.mrf.mxu1  ;;  %v4303_v42 = vld [vmem:[#allocation22_spill] sm:$0xff] }
 0x3ec   : > { %v1694_v2 = vrot.slane %v1693_v17, 4 }
 0x3ed   : > { %v2363_v44 = vpop.f32.mrf.mxu1 }
 0x3ee   : > { %v1695_v15 = vadd.f32 %v1694_v2, %v1693_v17  ;;  %v2364_v1 = vadd.f32 %v2945_v31, %v2363_v44 }
 0x3ef   : > { %v3063_v59 = vpop.f32.mrf.mxu1 }
 0x3f0   : > { %v1696_v47 = vrot.slane %v1695_v15, 2  ;;  %v2385_v22 = vadd.f32 %v2364_v1, %v4300_v50 }
 0x3f1   : > { %v2366_v18 = vpop.f32.mrf.mxu1 }
 0x3f2   : > { %v1697_v48 = vadd.f32 %v1696_v47, %v1695_v15  ;;  %v2367_v55 = vadd.f32 %v2945_v31, %v2366_v18  ;;  %v2392_v53 = vsel %vm1367_vm6, %v2385_v22, 0.0 }
 0x3f3   : > { %v3064_v38 = vpop.f32.mrf.mxu1 }
 0x3f4   : > { %v1698_v60 = vrot.slane %v1697_v48, 1  ;;  %v2386_v9 = vadd.f32 %v2367_v55, %v4299_v19  ;;  %v2564_v55 = vpop.f32.mrf.mxu0 }
 0x3f6   : > { %v1699_v13 = vadd.f32 %v1698_v60, %v1697_v48  ;;  %v2393_v40 = vsel %vm1367_vm6, %v2386_v9, 0.0  ;;  %v4158_v60 = vld [vmem:[%s4304_s11] ss:$0 sm:$0xff]  ;;  %v3083_v19 = vpop.f32.mrf.mxu0 }
 0x3f7   : > { %v2394_v21 = vadd.f32 %v2393_v40, %v2392_v53  ;;  %v4161_v1 = vadd.f32 %v4158_v60, %v2564_v55 }
 0x3f8   : > { %v1701_v62 = vmul.f32 0.025, %v1699_v13 }
 0x3fa   : > { %v4122_v36 = vsub.f32 %v1678_v61, %v1701_v62  ;;  %v4124_v51 = vsub.f32 %v1679_v32, %v1701_v62  ;;  %v4126_v8 = vsub.f32 %v1680_v20, %v1701_v62  ;;  %v4128_v0 = vsub.f32 %v1681_v63, %v1701_v62 }
 0x3fb   : > { %v2371_v35 = vpop.f32.mrf.mxu1  ;;  %v4130_v30 = vsub.f32 %v1682_v27, %v1701_v62 }
 0x3fc   : > { %v2372_v16 = vadd.f32 %v2945_v31, %v2371_v35  ;;  %v1707_v4 = vmul.f32 %v4122_v36, %v4122_v36  ;;  %v1708_v46 = vmul.f32 %v4124_v51, %v4124_v51  ;;  %v1709_v12 = vmul.f32 %v4126_v8, %v4126_v8 }
 0x3fd   : > { %v3067_v54 = vpop.f32.mrf.mxu1  ;;  %v1710_v11 = vmul.f32 %v4128_v0, %v4128_v0  ;;  %v1711_v32 = vmul.f32 %v4130_v30, %v4130_v30 }
 0x3fe   : > { %v2387_v14 = vadd.f32 %v2372_v16, %v4301_v57  ;;  %v1712_v34 = vsel %vm1367_vm6, %v1707_v4, 0.0  ;;  %v1713_v37 = vsel %vm1367_vm6, %v1708_v46, 0.0  ;;  %v1715_v3 = vsel %vm1367_vm6, %v1709_v12, 0.0  ;;  %v2567_v46 = vpop.f32.mrf.mxu0 }
 0x3ff   : > { %v2374_v6 = vpop.f32.mrf.mxu1  ;;  %v1714_v61 = vadd.f32 %v1713_v37, %v1712_v34  ;;  %v1717_v23 = vsel %vm1367_vm6, %v1710_v11, 0.0  ;;  %v1719_v63 = vsel %vm1367_vm6, %v1711_v32, 0.0  ;;  %v2588_v12 = vsel %vm1367_vm6, %v4161_v1, 0.0 }
 0x400   : > { %v2375_v33 = vadd.f32 %v2945_v31, %v2374_v6  ;;  %v2395_v25 = vsel %vm1367_vm6, %v2387_v14, 0.0  ;;  %v4166_v54 = vadd.f32 %v4158_v60, %v2567_v46  ;;  %v3084_v37 = vpop.f32.mrf.mxu0 }
 0x401   : > { %v3068_v58 = vpop.f32.mrf.mxu1  ;;  %v1716_v10 = vadd.f32 %v1715_v3, %v1714_v61  ;;  %v2396_v28 = vadd.f32 %v2395_v25, %v2394_v21 }
 0x402   : > { %v2388_v20 = vadd.f32 %v2375_v33, %v4302_v26  ;;  %v2589_v6 = vsel %vm1367_vm6, %v4166_v54, 0.0 }
 0x403   : > { %v2379_v7 = vpop.f32.mrf.mxu1  ;;  %v1718_v45 = vadd.f32 %v1717_v23, %v1716_v10  ;;  %v2590_v3 = vadd.f32 %v2589_v6, %v2588_v12 }
 0x404   : > { %v2397_v29 = vsel %vm1367_vm6, %v2388_v20, 0.0  ;;  %v2380_v5 = vadd.f32 %v2945_v31, %v2379_v7 }
 0x405   : > { %v3071_v49 = vpop.f32.mrf.mxu1  ;;  %v1720_v56 = vadd.f32 %v1719_v63, %v1718_v45  ;;  %v2398_v52 = vadd.f32 %v2397_v29, %v2396_v28  ;;  %v2572_v45 = vpop.f32.mrf.mxu0 }
 0x406   : > { %v2389_v41 = vadd.f32 %v2380_v5, %v4303_v42  ;;  %v2573_v63 = vadd.f32 %v4158_v60, %v2572_v45 }
 0x407   : > { %v2382_v27 = vpop.f32.mrf.mxu1  ;;  %v1721_v24 = vrot.slane %v1720_v56, 4  ;;  %v3087_v49 = vpop.f32.mrf.mxu0 }
 0x408   : > { %v2399_v43 = vsel %vm1367_vm6, %v2389_v41, 0.0 }
 0x409   : > { %v2400_v17 = vadd.f32 %v2399_v43, %v2398_v52  ;;  %v3072_v39 = vpop.f32.mrf.mxu1  ;;  %v1722_v2 = vadd.f32 %v1721_v24, %v1720_v56  ;;  %v2575_v24 = vpop.f32.mrf.mxu0 }
 0x40b   : > { %v2401_v44 = vrot.slane %v2400_v17, 4  ;;  %v1723_v15 = vrot.slane %v1722_v2, 2 }
 0x40d   : > { %v2402_v59 = vadd.f32 %v2401_v44, %v2400_v17  ;;  %v1724_v47 = vadd.f32 %v1723_v15, %v1722_v2  ;;  %v3088_v17 = vpop.f32.mrf.mxu0 }
 0x40f   : > { %v2403_v18 = vrot.slane %v2402_v59, 2  ;;  %v1725_v48 = vrot.slane %v1724_v47, 1  ;;  %v2580_v6 = vpop.f32.mrf.mxu0 }
 0x411   : > { %v2404_v38 = vadd.f32 %v2403_v18, %v2402_v59  ;;  %v1726_v13 = vadd.f32 %v1725_v48, %v1724_v47  ;;  %v2951_v47 = vld [vmem:[%s4305_s15] ss:$0 sm:$0xff] }
 0x413   : > { %v2405_v31 = vrot.slane %v2404_v38, 1  ;;  %v1727_v62 = vmul.f32 0.025, %v1726_v13  ;;  %v2952_v13 = vld [vmem:[%s4306_s16] ss:$0 sm:$0xff] }
 0x415   : > { %v2406_v35 = vadd.f32 %v2405_v31, %v2404_v38  ;;  %v1728_v16 = vadd.f32 1e-05, %v1727_v62 }
 0x417   : > { %v2407_v4 = vmul.f32 0.025, %v2406_v35  ;;  %3216 = vrsqrt.f32 %v1728_v16 }
 0x419   : > { %v2408_v50 = vsub.f32 %v2385_v22, %v2407_v4  ;;  %v2409_v57 = vsub.f32 %v2386_v9, %v2407_v4  ;;  %v2410_v11 = vsub.f32 %v2387_v14, %v2407_v4  ;;  %v2411_v34 = vsub.f32 %v2388_v20, %v2407_v4 }
 0x41a   : > { %v2412_v61 = vsub.f32 %v2389_v41, %v2407_v4 }
 0x41b   : > { %v2413_v40 = vmul.f32 %v2408_v50, %v2408_v50  ;;  %v2414_v33 = vmul.f32 %v2409_v57, %v2409_v57  ;;  %v2415_v32 = vmul.f32 %v2410_v11, %v2410_v11  ;;  %v2416_v58 = vmul.f32 %v2411_v34, %v2411_v34 }
 0x41c   : > { %v2417_v26 = vmul.f32 %v2412_v61, %v2412_v61 }
 0x41d   : > { %v2418_v10 = vsel %vm1367_vm6, %v2413_v40, 0.0  ;;  %v2419_v53 = vsel %vm1367_vm6, %v2414_v33, 0.0  ;;  %v2421_v9 = vsel %vm1367_vm6, %v2415_v32, 0.0  ;;  %v2423_v14 = vsel %vm1367_vm6, %v2416_v58, 0.0 }
 0x41e   : > { %v2420_v25 = vadd.f32 %v2419_v53, %v2418_v10  ;;  %v2425_v23 = vsel %vm1367_vm6, %v2417_v26, 0.0  ;;  %v2581_v33 = vadd.f32 %v4158_v60, %v2580_v6 }
 0x420   : > { %v2422_v22 = vadd.f32 %v2421_v9, %v2420_v25 }
 0x422   : > { %v2424_v20 = vadd.f32 %v2423_v14, %v2422_v22 }
 0x424   : > { %v2426_v21 = vadd.f32 %v2425_v23, %v2424_v20  ;;  %v3217_v7 = vpop.eup %3216 }
 0x425   : > { %v4176_v29 = vmul.f32 %v3217_v7, %v4130_v30  ;;  %v4180_v28 = vmul.f32 %v3217_v7, %v4126_v8  ;;  %v4183_v56 = vmul.f32 %v3217_v7, %v4128_v0  ;;  %v4186_v42 = vmul.f32 %v3217_v7, %v4122_v36 }
 0x426   : > { %v2427_v5 = vrot.slane %v2426_v21, 4  ;;  %v4189_v41 = vmul.f32 %v3217_v7, %v4124_v51  ;;  %v2591_v30 = vsel %vm1367_vm6, %v2573_v63, 0.0  ;;  %v2576_v8 = vadd.f32 %v4158_v60, %v2575_v24 }
 0x427   : > { %v2592_v27 = vadd.f32 %v2591_v30, %v2590_v3 }
 0x428   : > { %v2428_v52 = vadd.f32 %v2427_v5, %v2426_v21  ;;  %v2593_v0 = vsel %vm1367_vm6, %v2576_v8, 0.0 }
 0x429   : > { %v2594_v2 = vadd.f32 %v2593_v0, %v2592_v27 }
 0x42a   : > { %v2429_v43 = vrot.slane %v2428_v52, 2 }
 0x42c   : > { %v2430_v39 = vadd.f32 %v2429_v43, %v2428_v52 }
 0x42e   : > { %v2431_v36 = vrot.slane %v2430_v39, 1 }
 0x430   : > { %v2432_v44 = vadd.f32 %v2431_v36, %v2430_v39 }
 0x432   : > { %v2433_v15 = vmul.f32 0.025, %v2432_v44 }
 0x434   : > { %v2434_v51 = vadd.f32 1e-05, %v2433_v15 }
 0x436   : > { %3218 = vrsqrt.f32 %v2434_v51 }
 0x443   : > { %v3219_v59 = vpop.eup %3218 }
 0x444   : > { %v2438_v18 = vmul.f32 %v3219_v59, %v2410_v11  ;;  %v2439_v48 = vmul.f32 %v3219_v59, %v2411_v34  ;;  %v2436_v38 = vmul.f32 %v3219_v59, %v2408_v50  ;;  %v2437_v31 = vmul.f32 %v3219_v59, %v2409_v57  ;;  %v3091_v11 = vpop.f32.mrf.mxu0 }
 0x445   : > { %v2440_v19 = vmul.f32 %v3219_v59, %v2412_v61  ;;  %v2595_v50 = vsel %vm1367_vm6, %v2581_v33, 0.0 }
 0x446   : > { %v2449_v55 = vmul.f32 %v2951_v47, %v2438_v18  ;;  %v2450_v62 = vmul.f32 %v2951_v47, %v2439_v48  ;;  %v2447_v35 = vmul.f32 %v2951_v47, %v2436_v38  ;;  %v2448_v16 = vmul.f32 %v2951_v47, %v2437_v31  ;;  %v2583_v34 = vpop.f32.mrf.mxu0 }
 0x447   : > { %v2451_v3 = vmul.f32 %v2951_v47, %v2440_v19  ;;  %v2596_v57 = vadd.f32 %v2595_v50, %v2594_v2 }
 0x448   : > { %v2460_v4 = vadd.f32 %v2952_v13, %v2449_v55  ;;  %v2461_v46 = vadd.f32 %v2952_v13, %v2450_v62  ;;  %v2458_v12 = vadd.f32 %v2952_v13, %v2447_v35  ;;  %v2459_v37 = vadd.f32 %v2952_v13, %v2448_v16  ;;  %v3092_v10 = vpop.f32.mrf.mxu0  ;;  %v2933_v62 = vld [vmem:[%s4307_s26] ss:$0 sm:$0xff] }
 0x449   : > { %v2462_v61 = vadd.f32 %v2952_v13, %v2451_v3  ;;  %v2597_v58 = vrot.slane %v2596_v57, 4  ;;  %v1743_v35 = vmul.f32 %v2933_v62, %v4180_v28  ;;  %v1744_v19 = vmul.f32 %v2933_v62, %v4183_v56  ;;  %v2934_v16 = vld [vmem:[%s4308_s1] ss:$0 sm:$0xff] }
 0x44a   : > { %v3148_v40 = vpack.i.bf16 %v2461_v46, %v2460_v4  ;;  %v3143_v32 = vpack.i.bf16 %v2459_v37, %v2458_v12  ;;  %v1741_v4 = vmul.f32 %v2933_v62, %v4186_v42  ;;  %v1745_v46 = vmul.f32 %v2933_v62, %v4176_v29 }
 0x44b   : > { %v2598_v53 = vadd.f32 %v2597_v58, %v2596_v57  ;;  %v1742_v12 = vmul.f32 %v2933_v62, %v4189_v41  ;;  %v1755_v3 = vadd.f32 %v2934_v16, %v1744_v19 }
 0x44c   : > { %3149 = vrot.lane.b32.xlu0 %v3148_v40, %s3265_s18  ;;  %3144 = vrot.lane.b32.xlu1 %v3143_v32, %s3265_s18  ;;  %v1754_v32 = vadd.f32 %v2934_v16, %v1743_v35  ;;  %v1752_v28 = vadd.f32 %v2934_v16, %v1741_v4  ;;  %v1756_v57 = vadd.f32 %v2934_v16, %v1745_v46 }
 0x44d   : > { %v2599_v25 = vrot.slane %v2598_v53, 2  ;;  %v1753_v42 = vadd.f32 %v2934_v16, %v1742_v12 }
 0x44f   : > { %v2600_v60 = vadd.f32 %v2599_v25, %v2598_v53 }
 0x450   : > { %2672 = vrot.lane.b32.xlu1 %v2462_v61, %s3265_s18 }
 0x451   : > { %v2601_v26 = vrot.slane %v2600_v60, 1 }
 0x453   : > { %v2602_v9 = vadd.f32 %v2601_v26, %v2600_v60 }
 0x455   : > { %v2603_v22 = vmul.f32 0.025, %v2602_v9 }
 0x457   : > { %v2604_v14 = vsub.f32 %v4161_v1, %v2603_v22  ;;  %v2605_v20 = vsub.f32 %v4166_v54, %v2603_v22  ;;  %v2606_v23 = vsub.f32 %v2573_v63, %v2603_v22  ;;  %v2607_v21 = vsub.f32 %v2576_v8, %v2603_v22 }
 0x458   : > { %v2608_v7 = vsub.f32 %v2581_v33, %v2603_v22 }
 0x459   : > { %v2609_v45 = vmul.f32 %v2604_v14, %v2604_v14  ;;  %v2610_v5 = vmul.f32 %v2605_v20, %v2605_v20  ;;  %v2611_v49 = vmul.f32 %v2606_v23, %v2606_v23  ;;  %v2612_v52 = vmul.f32 %v2607_v21, %v2607_v21 }
 0x45a   : > { %v2613_v30 = vmul.f32 %v2608_v7, %v2608_v7 }
 0x45b   : > { %v2614_v27 = vsel %vm1367_vm6, %v2609_v45, 0.0  ;;  %v2615_v24 = vsel %vm1367_vm6, %v2610_v5, 0.0  ;;  %v2617_v43 = vsel %vm1367_vm6, %v2611_v49, 0.0  ;;  %v2619_v39 = vsel %vm1367_vm6, %v2612_v52, 0.0  ;;  %v2965_v45 = vld [vmem:[%s3424_s24] ss:$0 sm:$0xff] }
 0x45c   : > { %v2616_v17 = vadd.f32 %v2615_v24, %v2614_v27  ;;  %v2621_v54 = vsel %vm1367_vm6, %v2613_v30, 0.0 }
 0x45e   : > { %v2618_v1 = vadd.f32 %v2617_v43, %v2616_v17 }
 0x460   : > { %v2620_v63 = vadd.f32 %v2619_v39, %v2618_v1 }
 0x462   : > { %v2622_v8 = vadd.f32 %v2621_v54, %v2620_v63 }
 0x464   : > { %v2623_v0 = vrot.slane %v2622_v8, 4 }
 0x466   : > { %v2624_v2 = vadd.f32 %v2623_v0, %v2622_v8 }
 0x468   : > { %v2625_v36 = vrot.slane %v2624_v2, 2 }
 0x46a   : > { %v2626_v44 = vadd.f32 %v2625_v36, %v2624_v2 }
 0x46c   : > { %v2627_v15 = vrot.slane %v2626_v44, 1 }
 0x46e   : > { %v2628_v51 = vadd.f32 %v2627_v15, %v2626_v44 }
 0x470   : > { %v2629_v59 = vmul.f32 0.025, %v2628_v51 }
 0x472   : > { %v2630_v47 = vadd.f32 1e-05, %v2629_v59 }
 0x474   : > { %3220 = vrsqrt.f32 %v2630_v47 }
 0x481   : > { %v3221_v18 = vpop.eup %3220 }
 0x482   : > { %v2636_v48 = vmul.f32 %v3221_v18, %v2608_v7  ;;  %v2632_v38 = vmul.f32 %v3221_v18, %v2604_v14  ;;  %v2633_v13 = vmul.f32 %v3221_v18, %v2605_v20  ;;  %v2634_v31 = vmul.f32 %v3221_v18, %v2606_v23  ;;  %v2964_v14 = vld [vmem:[%s3419_s19] ss:$0 sm:$0xff] }
 0x483   : > { %v2635_v55 = vmul.f32 %v3221_v18, %v2607_v21 }
 0x484   : > { %v2645_v20 = vmul.f32 %v2964_v14, %v2634_v31  ;;  %v2643_v21 = vmul.f32 %v2964_v14, %v2632_v38  ;;  %v2644_v7 = vmul.f32 %v2964_v14, %v2633_v13  ;;  %v2647_v5 = vmul.f32 %v2964_v14, %v2636_v48 }
 0x485   : > { %v2646_v23 = vmul.f32 %v2964_v14, %v2635_v55 }
 0x486   : > { %v2656_v27 = vadd.f32 %v2965_v45, %v2645_v20  ;;  %v2654_v17 = vadd.f32 %v2965_v45, %v2643_v21  ;;  %v2655_v39 = vadd.f32 %v2965_v45, %v2644_v7  ;;  %v2658_v15 = vadd.f32 %v2965_v45, %v2647_v5 }
 0x487   : > { %v2657_v24 = vadd.f32 %v2965_v45, %v2646_v23 }
 0x4be   : > { %v3150_v37 = vpop.permute.xlu0 %3149  ;;  %v3145_v33 = vpop.permute.xlu1 %3144 }
 0x4bf   : > { %v3152_v6 = vunpack.i.h.bf16 %v3150_v37  ;;  %v3151_v40 = vunpack.i.l.bf16 %v3150_v37  ;;  %v3147_v11 = vunpack.i.h.bf16 %v3145_v33  ;;  %v3146_v50 = vunpack.i.l.bf16 %v3145_v33 }
 0x4c1   : > { %v2681_v56 = vsel %vm1367_vm6, %v1754_v32, %v3151_v40  ;;  %v2682_v34 = vsel %vm1367_vm6, %v1755_v3, %v3152_v6  ;;  %v2679_v58 = vsel %vm1367_vm6, %v1752_v28, %v3146_v50  ;;  %v2680_v53 = vsel %vm1367_vm6, %v1753_v42, %v3147_v11 }
 0x4c2   : > { %v2981_v29 = vpack.c.bf16 %v2682_v34, %v2682_v34  ;;  %v3158_v61 = vpack.i.bf16 %v2682_v34, %v2681_v56  ;;  %v2980_v41 = vpack.c.bf16 %v2681_v56, %v2681_v56  ;;  %v2673_v10 = vpop.permute.xlu1 %2672  ;;  %v2978_v25 = vpack.c.bf16 %v2679_v58, %v2679_v58 }
 0x4c3   : > { %v2979_v60 = vpack.c.bf16 %v2680_v53, %v2680_v53  ;;  %v3153_v26 = vpack.i.bf16 %v2680_v53, %v2679_v58  ;;  %v2683_v9 = vsel %vm1367_vm6, %v1756_v57, %v2673_v10 }
 0x4c4   : > { %2709 = vst.msk [vmem:[%s1034_s2 + $0xc] sm:$0xf] %vm2705_vm10, %v2981_v29  ;;  %3159 = vrot.lane.b32.xlu0 %v3158_v61, %s3265_s18  ;;  %2708 = vst.msk [vmem:[%s1034_s2 + $0x8] sm:$0xf] %vm2705_vm10, %v2980_v41  ;;  %v2982_v22 = vpack.c.bf16 %v2683_v9, %v2683_v9 }
 0x4c5   : > { %2706 = vst.msk [vmem:[%s1034_s2] sm:$0xf] %vm2705_vm10, %v2978_v25  ;;  %2707 = vst.msk [vmem:[%s1034_s2 + $0x4] sm:$0xf] %vm2705_vm10, %v2979_v60  ;;  %3154 = vrot.lane.b32.xlu1 %v3153_v26, %s3265_s18 }
 0x4c6   : > { %2710 = vst.msk [vmem:[%s1034_s2 + $0x10] sm:$0xf] %vm2705_vm10, %v2982_v22 }
 0x4c9   : > { %2724 = vrot.lane.b32.xlu1 %v2683_v9, %s3265_s18 }
 0x536   : > { %v3160_v49 = vpop.permute.xlu0 %3159 }
 0x537   : > { %v3162_v52 = vunpack.i.h.bf16 %v3160_v49  ;;  %v3161_v30 = vunpack.i.l.bf16 %v3160_v49  ;;  %v3155_v43 = vpop.permute.xlu1 %3154 }
 0x538   : > { %v3157_v63 = vunpack.i.h.bf16 %v3155_v43  ;;  %v3156_v8 = vunpack.i.l.bf16 %v3155_v43 }
 0x539   : > { %v2733_v1 = vsel %vm1367_vm6, %v2656_v27, %v3161_v30  ;;  %v2734_v54 = vsel %vm1367_vm6, %v2657_v24, %v3162_v52 }
 0x53a   : > { %v2985_v0 = vpack.c.bf16 %v2733_v1, %v2733_v1  ;;  %v2986_v2 = vpack.c.bf16 %v2734_v54, %v2734_v54  ;;  %v2731_v36 = vsel %vm1367_vm6, %v2654_v17, %v3156_v8  ;;  %v2732_v44 = vsel %vm1367_vm6, %v2655_v39, %v3157_v63 }
 0x53b   : > { %v2983_v51 = vpack.c.bf16 %v2731_v36, %v2731_v36  ;;  %v2984_v59 = vpack.c.bf16 %v2732_v44, %v2732_v44  ;;  %v2725_v47 = vpop.permute.xlu1 %2724 }
 0x53c   : > { %2760 = vst.msk [vmem:[%s1039_s10 + $0x8] sm:$0xf] %vm2757_vm11, %v2985_v0  ;;  %2761 = vst.msk [vmem:[%s1039_s10 + $0xc] sm:$0xf] %vm2757_vm11, %v2986_v2  ;;  %v2735_v18 = vsel %vm1367_vm6, %v2658_v15, %v2725_v47 }
 0x53d   : > { %2758 = vst.msk [vmem:[%s1039_s10] sm:$0xf] %vm2757_vm11, %v2983_v51  ;;  %2759 = vst.msk [vmem:[%s1039_s10 + $0x4] sm:$0xf] %vm2757_vm11, %v2984_v59  ;;  %v2987_v48 = vpack.c.bf16 %v2735_v18, %v2735_v18 }
 0x53f   : > { %2762 = vst.msk [vmem:[%s1039_s10 + $0x10] sm:$0xf] %vm2757_vm11, %v2987_v48 }
 0x540 PF: > { %s76_s28 = sadd.s32 1, %s3228_s28  }
 0x541   : > { %p73_p4 = scmp.ge.s32.totalorder %s76_s28, 4  }
 0x543   :  { %75 = sbr.rel (!%p73_p4) target bundleno = 55 (0x37), region = 224 }

// kernel: mel_decoder_forward.12
= control target key start
LH: loop header
LB: loop body
LE: loop exit
PB: predicated region body
PF: predicated region fallthrough
CT: control target
= control target key end

     0   :  { %s2337_s22 = smov 0   ;;  %s2339_s23 = smov 0   ;;  %s2833_s0 = inlined_call_operand.vmem [shape: bf16[2,48,128], index: 0, kind: input, shape index: {}]   ;;  %s2834_s1 = inlined_call_operand.vmem [shape: bf16[2,48,48], index: 1, kind: input, shape index: {}]   ;;  %s2835_s2 = inlined_call_operand.vmem [shape: bf16[2,3,8,128], index: 2, kind: input, shape index: {}]   ;;  %s2836_s3 = inlined_call_operand.vmem [shape: bf16[2,3,8,48], index: 3, kind: input, shape index: {}]   ;;  %s2837_s4 = inlined_call_operand.vmem [shape: f32[7,128], index: 4, kind: input, shape index: {}]   ;;  %s2838_s5 = inlined_call_operand.vmem [shape: f32[7,48], index: 5, kind: input, shape index: {}]   ;;  %s2839_s6 = inlined_call_operand.vmem [shape: f32[1,128], index: 6, kind: input, shape index: {}]   ;;  %s2840_s7 = inlined_call_operand.vmem [shape: f32[1,48], index: 7, kind: input, shape index: {}]   ;;  %s2841_s8 = inlined_call_operand.vmem [shape: f32[2,1,128], index: 8, kind: input, shape index: {}]   ;;  %s2842_s9 = inlined_call_operand.vmem [shape: f32[2,1,48], index: 9, kind: input, shape index: {}]   ;;  %s2843_s10 = inlined_call_operand.vmem [shape: f32[2,1,128], index: 10, kind: input, shape index: {}]   ;;  %s2844_s11 = inlined_call_operand.vmem [shape: f32[2,1,48], index: 11, kind: input, shape index: {}]   ;;  %s2845_s12 = inlined_call_operand.vmem [shape: bf16[128,128], index: 12, kind: input, shape index: {}]   ;;  %s2846_s13 = inlined_call_operand.vmem [shape: bf16[48,128], index: 13, kind: input, shape index: {}]   ;;  %s2847_s14 = inlined_call_operand.vmem [shape: f32[1,128], index: 14, kind: input, shape index: {}]   ;;  %s2848_s15 = inlined_call_operand.vmem [shape: bf16[128,128], index: 15, kind: input, shape index: {}]   ;;  %s2849_s16 = inlined_call_operand.vmem [shape: f32[1,128], index: 16, kind: input, shape index: {}]   ;;  %s2850_s17 = inlined_call_operand.vmem [shape: bf16[128,128], index: 17, kind: input, shape index: {}]   ;;  %s2851_s18 = inlined_call_operand.vmem [shape: bf16[48,128], index: 18, kind: input, shape index: {}]   ;;  %s2852_s19 = inlined_call_operand.vmem [shape: f32[1,128], index: 19, kind: input, shape index: {}]   ;;  %s2853_s20 = inlined_call_operand.vmem [shape: bf16[2,48,128], index: 20, kind: output, shape index: {}]  }
   0x1   :  { %2857 = sst [smem:[#allocation7_spill]] %s2833_s0  ;;  %s2341_s24 = smov 0  }
   0x2   :  { %2858 = sst [smem:[#allocation8_spill]] %s2834_s1  ;;  %s2335_s1 = smov 0  }
   0x3   :  { %2859 = sst [smem:[#allocation9_spill]] %s2835_s2  ;;  %s2343_s2 = smov 0  }
   0x4   :  { %2860 = sst [smem:[#allocation10_spill]] %s2836_s3 }
   0x5   :  { %2861 = sst [smem:[#allocation11_spill]] %s2837_s4 }
   0x6   :  { %2862 = sst [smem:[#allocation12_spill]] %s2838_s5 }
   0x7 LB: > { %2863 = sst [smem:[#allocation2_spill]] %s2218_s23  ;;  %s39_s25 = sadd.s32 1, %s2218_s23  ;;  %s2226_s2 = sphi %s2343_s2, %s30_s2   ;;  %s2222_s24 = sphi %s2341_s24, %s2878_s24   ;;  %s2218_s23 = sphi %s2339_s23, %s2877_s23   ;;  %s2214_s22 = sphi %s2337_s22, %s2876_s22   ;;  %s2210_s1 = sphi %s2335_s1, %s2875_s1  }
   0x8   : > { %2864 = sst [smem:[#allocation3_spill]] %s2222_s24  ;;  %s42_s3 = sadd.s32 1, %s2222_s24 }
   0x9   : > { %2865 = sst [smem:[#allocation4_spill]] %s2226_s2  ;;  %p40_p0 = scmp.ge.s32.totalorder %s39_s25, 3 }
   0xa   : > { %p1923_p1 = scmp.ge.s32.totalorder %s2226_s2, 1  ;;  %p662_p2 = scmp.lt.s32.totalorder %s2226_s2, 7 }
   0xb   : > { %s2880_s25 = smov (%p40_p0, %s39_s25), 0  ;;  %s2882_s3 = smov (!%p40_p0, %s42_s3), %s2222_s24 }
   0xc   : > { %2866 = sst [smem:[#allocation5_spill]] %s2880_s25  ;;  %p663_p3 = pnand %p1923_p1, %p662_p2 }
   0xd   : > { %p44_p4 = scmp.ge.s32.totalorder %s2882_s3, 2  ;;  %s1924_s26 = sshll.u32 (!%p663_p3), %s2210_s1, 1 }
   0xe   : > { %666 = sbr.rel (%p663_p3) target bundleno = 896 (0x380), region = 100  ;;  %p766_p5 = scmp.lt.s32.totalorder (!%p663_p3), %s2214_s22, 1 }
   0xf   : > { %s2884_s3 = smov (%p44_p4, %s2882_s3), 0  ;;  %p768_p6 = scmp.lt.s32.totalorder (!%p663_p3), %s1924_s26, 5 }
  0x10   : > { %2867 = sst [smem:[#allocation6_spill]] %s2884_s3  ;;  %p787_p7 = scmp.lt.s32.totalorder (!%p663_p3), %s2210_s1, 2 }
  0x11   : > { %s2868_s5 = sld [smem:[#allocation12_spill]] (!%p663_p3) }
  0x12   : > { %s2869_s21 = sld [smem:[#allocation11_spill]] (!%p663_p3) }
  0x13   : > { %v842_v0 = vlaneseq  ;;  %s2886_s22 = smov (!%p766_p5, %s2214_s22), 1  ;;  %s2888_s26 = smov (!%p768_p6, %s1924_s26), 5  ;;  %vm832_vm0 = vcmask 1042432   ;;  %vm858_vm1 = vcmask 1046528   ;;  %vm878_vm2 = vcmask 1045504  }
  0x14   : > { %s2102_s4 = smul.u32 6, %s2886_s22  ;;  %s2870_s24 = sld [smem:[#allocation8_spill]]  ;;  %vm898_vm3 = vcmask 1044480   ;;  %vm918_vm4 = vcmask 1043456   ;;  %vm957_vm5 = vcmask 1041408   ;;  %vm1126_vm6 = vcmask 392192  }
  0x15   : > { %v2371_v1 = vshrl.u32 %v842_v0, 7  ;;  %s788_s29 = scalar_select %p787_p7, %s2210_s1, 2  ;;  %vm2229_vm7 = vmmov 0  }
  0x16   : > { %s771_s27 = sadd.s32 %s2102_s4, %s2888_s26  ;;  %s2103_s28 = smul.u32 3, %s2886_s22 }
  0x17   : > { %v996_v2 = vld [vmem:[%s2868_s5] sm:$0x7f]  ;;  %v844_v3 = vsub.s32 0, %v2371_v1  ;;  %v850_v4 = vsub.s32 1, %v2371_v1  ;;  %v870_v5 = vsub.s32 2, %v2371_v1  ;;  %v890_v6 = vsub.s32 3, %v2371_v1  ;;  %s812_s25 = scalar_lea.vmem %s2844_s11, %s2886_s22 }
  0x18   : > { %v910_v7 = vsub.s32 4, %v2371_v1  ;;  %v930_v8 = vsub.s32 5, %v2371_v1  ;;  %v949_v9 = vsub.s32 6, %v2371_v1  ;;  %v841_v10 = vld [vmem:[%s2869_s21] sm:$0x7f]  ;;  %s2389_s5 = sshll.u32 %s771_s27, 2  ;;  %s790_s2 = sadd.s32 %s2103_s28, %s788_s29 }
  0x19   : > { %v2395_v11 = vrot.slane %v996_v2, %v844_v3  ;;  %v2397_v12 = vrot.slane %v996_v2, %v850_v4  ;;  %v2399_v13 = vrot.slane %v996_v2, %v870_v5  ;;  %s1928_s30 = sshll.u32 %s790_s2, 2  ;;  %v2403_v15 = vrot.slane %v996_v2, %v890_v6  ;;  %s2871_s3 = sld [smem:[#allocation7_spill]] }
  0x1a   : > { %s783_s23 = scalar_lea.vmem %s2870_s24, %s2389_s5  ;;  %v2405_v16 = vrot.slane %v996_v2, %v910_v7  ;;  %v2407_v17 = vrot.slane %v996_v2, %v930_v8  ;;  %v2409_v18 = vrot.slane %v996_v2, %v949_v9  ;;  %s2872_s0 = sld [smem:[#allocation10_spill]]  ;;  %v2425_v22 = vrot.slane %v841_v10, %v844_v3 }
  0x1b   : > { %v2401_v14 = vld [vmem:[%s783_s23] sm:$0xff]   ;;  %s2873_s27 = sld [smem:[#allocation9_spill]]  ;;  %v2427_v23 = vrot.slane %v841_v10, %v850_v4  ;;  %v2433_v28 = vrot.slane %v841_v10, %v870_v5  ;;  %v2435_v29 = vrot.slane %v841_v10, %v890_v6  ;;  %v2437_v33 = vrot.slane %v841_v10, %v910_v7  ;;  %s809_s23 = scalar_lea.vmem %s2843_s10, %s2886_s22 }
  0x1c   : > { %v982_v19 = vunpack.c.l.bf16 %v2401_v14  ;;  %v983_v20 = vunpack.c.h.bf16 %v2401_v14  ;;  %v2441_v36 = vrot.slane %v841_v10, %v930_v8  ;;  %v2443_v37 = vrot.slane %v841_v10, %v949_v9 }
  0x1e   : > { %v988_v31 = vrot.slane %v982_v19, 5  ;;  %v989_v32 = vrot.slane %v983_v20, 5 }
  0x1f   : > { %s773_s26 = scalar_lea.vmem %s2871_s3, %s2389_s5 }
  0x20   : > { %s800_s2 = scalar_lea.vmem %s2872_s0, %s1928_s30  ;;  %v2423_v21 = vld [vmem:[%s773_s26] sm:$0xff]   ;;  %v2446_v38 = vsel %vm832_vm0, %v988_v31, %v989_v32  ;;  %s803_s26 = scalar_lea.vmem %s2841_s8, %s2886_s22 }
  0x21   : > { %s792_s28 = scalar_lea.vmem %s2873_s27, %s1928_s30  ;;  %v984_v24 = vld [vmem:[%s800_s2] sm:$0xf]  ;;  %v826_v25 = vunpack.c.l.bf16 %v2423_v21  ;;  %v827_v26 = vunpack.c.h.bf16 %v2423_v21  ;;  %v2457_v44 = vmul.f32 %v2397_v12, %v2446_v38  ;;  %v2462_v46 = vmul.f32 %v2399_v13, %v2446_v38 }
  0x22   : > { %v2431_v27 = vld [vmem:[%s792_s28] sm:$0xf]  ;;  %v985_v30 = vunpack.c.l.bf16 %v984_v24  ;;  %v2467_v48 = vmul.f32 %v2403_v15, %v2446_v38  ;;  %v2473_v53 = vmul.f32 %v2405_v16, %v2446_v38  ;;  %v2484_v61 = vmul.f32 %v2407_v17, %v2446_v38  ;;  %s806_s28 = scalar_lea.vmem %s2842_s9, %s2886_s22  ;;  %s1975_s22 = sshll.u32 %s2210_s1, 4 }
  0x23   : > { %v833_v34 = vrot.slane %v826_v25, 5  ;;  %v2439_v35 = vrot.slane %v827_v26, 5  ;;  %v829_v40 = vunpack.c.l.bf16 %v2431_v27  ;;  %v1014_v51 = vrot.slane %v2457_v44, 1 }
  0x24   : > { %v994_v39 = vsel %vm832_vm0, %v985_v30, %v988_v31  ;;  %v2451_v41 = vsel %vm832_vm0, %v989_v32, %v985_v30  ;;  %v1033_v54 = vrot.slane %v2462_v46, 2  ;;  %v1052_v56 = vrot.slane %v2467_v48, 3 }
  0x25   : > { %v1001_v42 = vmul.f32 %v2395_v11, %v994_v39  ;;  %v1007_v43 = vmul.f32 %v2397_v12, %v994_v39  ;;  %v1026_v45 = vmul.f32 %v2399_v13, %v994_v39  ;;  %v1045_v47 = vmul.f32 %v2403_v15, %v994_v39 }
  0x26   : > { %v1064_v49 = vmul.f32 %v2405_v16, %v994_v39  ;;  %v1071_v59 = vrot.slane %v2473_v53, 4  ;;  %v1083_v60 = vmul.f32 %v2407_v17, %v994_v39  ;;  %v1102_v2 = vmul.f32 %v2409_v18, %v994_v39 }
  0x27   : > { %v1013_v50 = vrot.slane %v1007_v43, 1  ;;  %v1032_v52 = vrot.slane %v1026_v45, 2  ;;  %v1051_v55 = vrot.slane %v1045_v47, 3  ;;  %v1090_v5 = vrot.slane %v2484_v61, 5 }
  0x28   : > { %v1070_v57 = vrot.slane %v1064_v49, 4  ;;  %v1089_v4 = vrot.slane %v1083_v60, 5  ;;  %v2499_v6 = vmul.f32 %v2409_v18, %v2446_v38  ;;  %v1108_v8 = vrot.slane %v1102_v2, 6 }
  0x29   : > { %v1015_v58 = vsel %vm858_vm1, %v1013_v50, %v1014_v51  ;;  %v1034_v63 = vsel %vm878_vm2, %v1032_v52, %v1033_v54  ;;  %v1053_v0 = vsel %vm898_vm3, %v1051_v55, %v1052_v56  ;;  %v2503_v9 = vsel %vm832_vm0, %v833_v34, %v2439_v35  ;;  %v2536_v52 = vld [vmem:[%s2840_s7] ss:$0 sm:$0xff] }
  0x2a   : > { %v1020_v62 = vadd.f32 %v1015_v58, %v1001_v42  ;;  %v1072_v3 = vsel %vm918_vm4, %v1070_v57, %v1071_v59  ;;  %v839_v10 = vsel %vm832_vm0, %v829_v40, %v833_v34  ;;  %v1091_v19 = vsel %vm832_vm0, %v1089_v4, %v1090_v5 }
  0x2b   : > { %v1109_v20 = vrot.slane %v2499_v6, 6  ;;  %v846_v24 = vmul.f32 %v2425_v22, %v839_v10  ;;  %v852_v25 = vmul.f32 %v2427_v23, %v839_v10  ;;  %v2516_v30 = vmul.f32 %v2427_v23, %v2503_v9 }
  0x2c   : > { %v1039_v7 = vadd.f32 %v1034_v63, %v1020_v62  ;;  %v872_v31 = vmul.f32 %v2433_v28, %v839_v10  ;;  %v2521_v32 = vmul.f32 %v2433_v28, %v2503_v9  ;;  %v892_v42 = vmul.f32 %v2435_v29, %v839_v10 }
  0x2d   : > { %v1110_v34 = vsel %vm957_vm5, %v1108_v8, %v1109_v20  ;;  %v859_v39 = vrot.slane %v852_v25, 1  ;;  %v2529_v43 = vmul.f32 %v2435_v29, %v2503_v9  ;;  %v860_v47 = vrot.slane %v2516_v30, 1 }
  0x2e   : > { %v1058_v26 = vadd.f32 %v1053_v0, %v1039_v7  ;;  %v879_v49 = vrot.slane %v872_v31, 2  ;;  %v880_v50 = vrot.slane %v2521_v32, 2  ;;  %v899_v55 = vrot.slane %v892_v42, 3 }
  0x2f   : > { %v900_v57 = vrot.slane %v2529_v43, 3  ;;  %v912_v58 = vmul.f32 %v2437_v33, %v839_v10  ;;  %v2542_v60 = vmul.f32 %v2437_v33, %v2503_v9  ;;  %v861_v63 = vsel %vm858_vm1, %v859_v39, %v860_v47 }
  0x30   : > { %v1077_v45 = vadd.f32 %v1072_v3, %v1058_v26  ;;  %v881_v0 = vsel %vm878_vm2, %v879_v49, %v880_v50  ;;  %v932_v2 = vmul.f32 %v2441_v36, %v839_v10  ;;  %v866_v3 = vadd.f32 %v861_v63, %v846_v24 }
  0x31   : > { %v901_v4 = vsel %vm898_vm3, %v899_v55, %v900_v57  ;;  %v919_v7 = vrot.slane %v912_v58, 4  ;;  %v920_v8 = vrot.slane %v2542_v60, 4  ;;  %v951_v31 = vmul.f32 %v2443_v37, %v839_v10 }
  0x32   : > { %v1096_v62 = vadd.f32 %v1091_v19, %v1077_v45  ;;  %v2557_v19 = vmul.f32 %v2441_v36, %v2503_v9  ;;  %v938_v26 = vrot.slane %v932_v2, 5  ;;  %v886_v39 = vadd.f32 %v881_v0, %v866_v3 }
  0x33   : > { %v921_v24 = vsel %vm918_vm4, %v919_v7, %v920_v8  ;;  %v2565_v42 = vmul.f32 %v2443_v37, %v2503_v9  ;;  %v1002_v45 = vmul.f32 %v2395_v11, %v2446_v38  ;;  %v958_v55 = vrot.slane %v951_v31, 6 }
  0x34   : > { %v1115_v25 = vadd.f32 %v1110_v34, %v1096_v62  ;;  %v939_v49 = vrot.slane %v2557_v19, 5  ;;  %v1009_v10 = vmul.f32 %v2397_v12, %v2451_v41  ;;  %v906_v58 = vadd.f32 %v901_v4, %v886_v39 }
  0x35   : > { %v959_v62 = vrot.slane %v2565_v42, 6  ;;  %v1028_v63 = vmul.f32 %v2399_v13, %v2451_v41  ;;  %v1047_v0 = vmul.f32 %v2403_v15, %v2451_v41  ;;  %v1066_v3 = vmul.f32 %v2405_v16, %v2451_v41 }
  0x36   : > { %v2570_v34 = vadd.f32 %v2536_v52, %v1115_v25  ;;  %v940_v38 = vsel %vm832_vm0, %v938_v26, %v939_v49  ;;  %v1016_v2 = vrot.slane %v1009_v10, 1  ;;  %v926_v12 = vadd.f32 %v921_v24, %v906_v58  ;;  %v1932_v24 = vld [vmem:[%s2839_s6] ss:$0 sm:$0xff] }
  0x37   : > { %v960_v4 = vsel %vm957_vm5, %v958_v55, %v959_v62  ;;  %v1035_v7 = vrot.slane %v1028_v63, 2  ;;  %v1054_v25 = vrot.slane %v1047_v0, 3  ;;  %v1073_v15 = vrot.slane %v1066_v3, 4 }
  0x38   : > { %v1127_v11 = vsel %vm1126_vm6, %v2570_v34, 0.0  ;;  %v1017_v13 = vsel %vm858_vm1, %v1014_v51, %v1016_v2  ;;  %v1085_v19 = vmul.f32 %v2407_v17, %v2451_v41  ;;  %v1104_v26 = vmul.f32 %v2409_v18, %v2451_v41 }
  0x39   : > { %1128 = vadd.xlane.f32.xlu1 %v1127_v11  ;;  %v945_v31 = vadd.f32 %v940_v38, %v926_v12  ;;  %v1021_v39 = vadd.f32 %v1017_v13, %v1002_v45  ;;  %v1036_v16 = vsel %vm878_vm2, %v1033_v54, %v1035_v7  ;;  %v1055_v44 = vsel %vm898_vm3, %v1052_v56, %v1054_v25 }
  0x3a   : > { %v1092_v51 = vrot.slane %v1085_v19, 5  ;;  %v840_v17 = vsel %vm832_vm0, %v2439_v35, %v829_v40  ;;  %v1074_v46 = vsel %vm918_vm4, %v1071_v59, %v1073_v15  ;;  %v1111_v42 = vrot.slane %v1104_v26, 6 }
  0x3b   : > { %v965_v18 = vadd.f32 %v960_v4, %v945_v31  ;;  %v1040_v41 = vadd.f32 %v1036_v16, %v1021_v39  ;;  %v854_v54 = vmul.f32 %v2427_v23, %v840_v17  ;;  %v847_v48 = vmul.f32 %v2425_v22, %v2503_v9 }
  0x3c   : > { %v874_v56 = vmul.f32 %v2433_v28, %v840_v17  ;;  %v894_v45 = vmul.f32 %v2435_v29, %v840_v17  ;;  %v914_v35 = vmul.f32 %v2437_v33, %v840_v17  ;;  %v1093_v40 = vsel %vm832_vm0, %v1090_v5, %v1092_v51  ;;  %v2147_v51 = vld [vmem:[%s2846_s13 + $0x8] sm:$0xff]  }
  0x3d   : > { %v974_v27 = vadd.f32 %v1932_v24, %v965_v18  ;;  %v1059_v55 = vadd.f32 %v1055_v44, %v1040_v41  ;;  %v862_v10 = vrot.slane %v854_v54, 1  ;;  %v934_v23 = vmul.f32 %v2441_v36, %v840_v17 }
  0x3e   : > { %v882_v53 = vrot.slane %v874_v56, 2  ;;  %v902_v59 = vrot.slane %v894_v45, 3  ;;  %v922_v28 = vrot.slane %v914_v35, 4  ;;  %v953_v29 = vmul.f32 %v2443_v37, %v840_v17  ;;  %v2148_v17 = vld [vmem:[%s2846_s13] sm:$0xff]  }
  0x3f   : > { %976 = vadd.xlane.f32.xlu0 %v974_v27  ;;  %v1078_v58 = vadd.f32 %v1074_v46, %v1059_v55  ;;  %v863_v22 = vsel %vm858_vm1, %v860_v47, %v862_v10  ;;  %v1112_v33 = vsel %vm957_vm5, %v1109_v20, %v1111_v42  ;;  %v941_v30 = vrot.slane %v934_v23, 5 }
  0x40   : > { %v867_v61 = vadd.f32 %v863_v22, %v847_v48  ;;  %v883_v5 = vsel %vm878_vm2, %v880_v50, %v882_v53  ;;  %v903_v36 = vsel %vm898_vm3, %v900_v57, %v902_v59  ;;  %v923_v37 = vsel %vm918_vm4, %v920_v8, %v922_v28 }
  0x41   : > { %v1097_v9 = vadd.f32 %v1093_v40, %v1078_v58  ;;  %v961_v6 = vrot.slane %v953_v29, 6  ;;  %v942_v32 = vsel %vm832_vm0, %v939_v49, %v941_v30  ;;  %v2228_v44 = vmov 0.0   ;;  %v1936_v40 = vld [vmem:[%s806_s28] ss:$0 sm:$0xff]  ;;  %v2153_v30 = vld [vmem:[%s2845_s12 + $0x18] sm:$0xff]  }
  0x42   : > { %v887_v63 = vadd.f32 %v883_v5, %v867_v61  ;;  %2022 = vmatprep.subr.bf16.mxu1 %v2228_v44  ;;  %2028 = vmatprep.mubr.msk.bf16.mxu1 %vm2229_vm7, %v2228_v44  ;;  %v1937_v58 = vld [vmem:[%s812_s25] ss:$0 sm:$0xff]  ;;  %v2150_v5 = vld [vmem:[%s2845_s12 + $0x30] sm:$0xff]   ;;  %s821_s25 = scalar_lea.vmem %s2853_s20, %s2389_s5 }
  0x43   : > { %v1116_v47 = vadd.f32 %v1112_v33, %v1097_v9  ;;  %v962_v43 = vsel %vm957_vm5, %v959_v62, %v961_v6  ;;  %2052 = vmatprep.subr.bf16.mxu0 %v2228_v44  ;;  %2068 = vmatprep.mubr.msk.bf16.mxu0 %vm2229_vm7, %v2228_v44  ;;  %v2149_v33 = vld [vmem:[%s2845_s12 + $0x38] sm:$0xff]   ;;  %v2151_v9 = vld [vmem:[%s2845_s12 + $0x28] sm:$0xff]  }
  0x44   : > { %v907_v0 = vadd.f32 %v903_v36, %v887_v63  ;;  %v2152_v36 = vld [vmem:[%s2845_s12 + $0x20] sm:$0xff]   ;;  %v2154_v63 = vld [vmem:[%s2845_s12 + $0x10] sm:$0xff]   ;;  %v2155_v6 = vld [vmem:[%s2845_s12 + $0x8] sm:$0xff]  }
  0x45   : > { %v1125_v20 = vadd.f32 %v2536_v52, %v1116_v47 }
  0x46   : > { %v927_v11 = vadd.f32 %v923_v37, %v907_v0  ;;  %v1934_v0 = vld [vmem:[%s803_s26] ss:$0 sm:$0xff] }
  0x47   : > { %v1130_v50 = vsel %vm1126_vm6, %v1125_v20, 0.0 }
  0x48   : > { %1131 = vadd.xlane.f32.xlu1 %v1130_v50  ;;  %v946_v57 = vadd.f32 %v942_v32, %v927_v11  ;;  %v2156_v11 = vld [vmem:[%s2845_s12] sm:$0xff]  }
  0x49   : > { %v1935_v50 = vld [vmem:[%s809_s23] ss:$0 sm:$0xff] }
  0x4a   : > { %v966_v38 = vadd.f32 %v962_v43, %v946_v57 }
  0x4c   : > { %v975_v2 = vadd.f32 %v1932_v24, %v966_v38  ;;  %v2146_v24 = vld [vmem:[%s2846_s13 + $0x10] sm:$0xff]  }
  0x4d   : > { %2023 = vmatpush3.bf16.msra.mxu1 %v2146_v24 }
  0x4e   : > { %978 = vadd.xlane.f32.xlu0 %v975_v2  ;;  %2024 = vmatprep.subr.bf16.mxu1 %v2228_v44 }
  0x51   : > { %2025 = vmatpush3.bf16.msra.mxu1 %v2147_v51 }
  0x52   : > { %2026 = vmatprep.subr.bf16.mxu1 %v2228_v44 }
  0x55   : > { %2027 = vmatpush3.bf16.msra.mxu1 %v2148_v17 }
  0x56   : > { %2032 = vmatprep.subr.bf16.mxu1 %v2228_v44 }
  0xc2   : > { %v1129_v3 = vpop.xlane.xlu1 %1128 }
  0xc8   : > { %v977_v60 = vpop.xlane.xlu0 %976 }
  0xc9   : > { %v1133_v12 = vadd.f32 %v1129_v3, %v977_v60  ;;  %v2158_v3 = vld [vmem:[%s2848_s15 + $0x30] sm:$0xff]   ;;  %v2159_v60 = vld [vmem:[%s2848_s15 + $0x28] sm:$0xff]  }
  0xcb   : > { %v1136_v8 = vmul.f32 0.0056818184, %v1133_v12  ;;  %v2160_v12 = vld [vmem:[%s2848_s15 + $0x20] sm:$0xff]  }
  0xcd   : > { %v2639_v4 = vsub.f32 %v974_v27, %v1136_v8  ;;  %v1146_v52 = vsub.f32 %v2570_v34, %v1136_v8  ;;  %v2161_v8 = vld [vmem:[%s2848_s15 + $0x18] sm:$0xff]  }
  0xcf   : > { %v1140_v49 = vmul.f32 %v2639_v4, %v2639_v4  ;;  %v1148_v7 = vmul.f32 %v1146_v52, %v1146_v52 }
  0xd1   : > { %1142 = vadd.xlane.f32.xlu0 %v1140_v49  ;;  %v1150_v62 = vsel %vm1126_vm6, %v1148_v7, 0.0  ;;  %v1132_v25 = vpop.xlane.xlu1 %1131  ;;  %v2164_v49 = vld [vmem:[%s2848_s15] sm:$0xff]   ;;  %v2169_v7 = vld [vmem:[%s2851_s18 + $0x10] sm:$0xff]  }
  0xd5   : > { %1151 = vadd.xlane.f32.xlu0 %v1150_v62  ;;  %v2171_v62 = vld [vmem:[%s2851_s18 + $0x8] sm:$0xff]  }
  0xd7   : > { %v979_v13 = vpop.xlane.xlu0 %978 }
  0xd8   : > { %v1134_v15 = vadd.f32 %v1132_v25, %v979_v13  ;;  %v2173_v25 = vld [vmem:[%s2851_s18] sm:$0xff]  }
  0xda   : > { %v1137_v19 = vmul.f32 0.0056818184, %v1134_v15 }
  0xdc   : > { %v2645_v26 = vsub.f32 %v975_v2, %v1137_v19  ;;  %v1147_v31 = vsub.f32 %v1125_v20, %v1137_v19  ;;  %v2157_v2 = vld [vmem:[%s2848_s15 + $0x38] sm:$0xff]  }
  0xdd   : > { %2053 = vmatpush3.bf16.msra.mxu0 %v2157_v2  ;;  %v1716_v2 = vadd.s32 8, %v2371_v1 }
  0xde   : > { %v1141_v39 = vmul.f32 %v2645_v26, %v2645_v26  ;;  %v1149_v16 = vmul.f32 %v1147_v31, %v1147_v31  ;;  %2054 = vmatprep.subr.bf16.mxu0 %v2228_v44 }
  0xe0   : > { %1144 = vadd.xlane.f32.xlu1 %v1141_v39  ;;  %v1153_v34 = vsel %vm1126_vm6, %v1149_v16, 0.0  ;;  %v1950_v39 = vld [vmem:[%s2847_s14] ss:$0 sm:$0xff] }
  0xe1   : > { %2055 = vmatpush3.bf16.msra.mxu0 %v2158_v3 }
  0xe2   : > { %2056 = vmatprep.subr.bf16.mxu0 %v2228_v44 }
  0xe4   : > { %1154 = vadd.xlane.f32.xlu1 %v1153_v34 }
  0xe5   : > { %2057 = vmatpush3.bf16.msra.mxu0 %v2159_v60  ;;  %v1718_v60 = vstv %s1975_s22 }
  0xe6   : > { %2058 = vmatprep.subr.bf16.mxu0 %v2228_v44 }
  0xe9   : > { %2059 = vmatpush3.bf16.msra.mxu0 %v2160_v12 }
  0xea   : > { %2060 = vmatprep.subr.bf16.mxu0 %v2228_v44 }
  0xed   : > { %2061 = vmatpush3.bf16.msra.mxu0 %v2161_v8  ;;  %v1974_v8 = vld [vmem:[%s2852_s19] ss:$0 sm:$0xff] }
  0xee   : > { %2062 = vmatprep.subr.bf16.mxu0 %v2228_v44 }
 0x15a   : > { %v1143_v18 = vpop.xlane.xlu0 %1142 }
 0x15e   : > { %v1152_v41 = vpop.xlane.xlu0 %1151 }
 0x15f   : > { %v1156_v46 = vadd.f32 %v1152_v41, %v1143_v18 }
 0x161   : > { %v1158_v54 = vmul.f32 0.0056818184, %v1156_v46 }
 0x163   : > { %v1160_v48 = vadd.f32 1e-06, %v1158_v54 }
 0x165   : > { %2180 = vrsqrt.f32 %v1160_v48 }
 0x169   : > { %v1145_v42 = vpop.xlane.xlu1 %1144 }
 0x16d   : > { %v1155_v56 = vpop.xlane.xlu1 %1154 }
 0x16e   : > { %v1157_v45 = vadd.f32 %v1155_v56, %v1145_v42 }
 0x170   : > { %v1159_v27 = vmul.f32 0.0056818184, %v1157_v45 }
 0x172   : > { %v1161_v55 = vadd.f32 1e-06, %v1159_v27  ;;  %v2181_v10 = vpop.eup %2180 }
 0x173   : > { %v1201_v35 = vmul.f32 %v2181_v10, %v1146_v52  ;;  %v1164_v37 = vmul.f32 %v2181_v10, %v2639_v4  ;;  %v2162_v4 = vld [vmem:[%s2848_s15 + $0x10] sm:$0xff]   ;;  %v2163_v52 = vld [vmem:[%s2848_s15 + $0x8] sm:$0xff]  }
 0x174   : > { %2182 = vrsqrt.f32 %v1161_v55  ;;  %2063 = vmatpush3.bf16.msra.mxu0 %v2162_v4  ;;  %v1719_v4 = vadd.s32 %v1718_v60, %v2371_v1 }
 0x175   : > { %v1210_v23 = vmul.f32 %v1936_v40, %v1201_v35  ;;  %v1173_v32 = vmul.f32 %v1934_v0, %v1164_v37  ;;  %2064 = vmatprep.subr.bf16.mxu0 %v2228_v44 }
 0x176   : > { %vm1721_vm8 = vcmp.lt.s32.totalorder %v1719_v4, 40 }
 0x177   : > { %v1219_v28 = vadd.f32 %v1937_v58, %v1210_v23  ;;  %v1182_v57 = vadd.f32 %v1935_v50, %v1173_v32 }
 0x178   : > { %2065 = vmatpush3.bf16.msra.mxu0 %v2163_v52 }
 0x179   : > { %2066 = vmatprep.subr.bf16.mxu0 %v2228_v44 }
 0x17c   : > { %2067 = vmatpush3.bf16.msra.mxu0 %v2164_v49  ;;  %v1720_v49 = vadd.s32 %v1718_v60, %v1716_v2 }
 0x17d   : > { %2082 = vmatprep.subr.bf16.mxu0 %v2228_v44 }
 0x17e   : > { %vm1722_vm9 = vcmp.lt.s32.totalorder %v1720_v49, 40 }
 0x181   : > { %v2183_v53 = vpop.eup %2182 }
 0x182   : > { %v1202_v59 = vmul.f32 %v2183_v53, %v1147_v31  ;;  %v1165_v47 = vmul.f32 %v2183_v53, %v2645_v26 }
 0x184   : > { %v1211_v22 = vmul.f32 %v1936_v40, %v1202_v59  ;;  %v1174_v20 = vmul.f32 %v1934_v0, %v1165_v47  ;;  %v2176_v47 = vld [vmem:[%s2850_s17] sm:$0xff]  }
 0x186   : > { %v1220_v29 = vadd.f32 %v1937_v58, %v1211_v22  ;;  %v1183_v43 = vadd.f32 %v1935_v50, %v1174_v20 }
 0x188   : > { %v1221_v61 = vpack.c.bf16 %v1220_v29, %v1219_v28  ;;  %v1184_v38 = vpack.c.bf16 %v1183_v43, %v1182_v57  ;;  %v2165_v29 = vld [vmem:[%s2850_s17 + $0x38] sm:$0xff]   ;;  %v1951_v57 = vld [vmem:[%s2849_s16] ss:$0 sm:$0xff] }
 0x18a   : > { %2029 = vmatmul.mubr.msk.bf16.vlgmr.msra.gmra.mxu1 %vm1126_vm6, %v1221_v61  ;;  %v2166_v61 = vld [vmem:[%s2850_s17 + $0x30] sm:$0xff]  }
 0x18b   : > { %2033 = vmatpush3.bf16.msra.mxu1 %v2149_v33  ;;  %2048 = vmatprep.mubr.msk.bf16.mxu1 %vm2229_vm7, %v2228_v44 }
 0x18c   : > { %2034 = vmatprep.subr.bf16.mxu1 %v2228_v44 }
 0x18f   : > { %2035 = vmatpush3.bf16.msra.mxu1 %v2150_v5  ;;  %v2167_v5 = vld [vmem:[%s2850_s17 + $0x28] sm:$0xff]  }
 0x190   : > { %2036 = vmatprep.subr.bf16.mxu1 %v2228_v44 }
 0x193   : > { %2037 = vmatpush3.bf16.msra.mxu1 %v2151_v9  ;;  %v2168_v9 = vld [vmem:[%s2850_s17 + $0x20] sm:$0xff]  }
 0x194   : > { %2038 = vmatprep.subr.bf16.mxu1 %v2228_v44 }
 0x197   : > { %2039 = vmatpush3.bf16.msra.mxu1 %v2152_v36  ;;  %v2170_v36 = vld [vmem:[%s2850_s17 + $0x18] sm:$0xff]  }
 0x198   : > { %2040 = vmatprep.subr.bf16.mxu1 %v2228_v44 }
 0x19b   : > { %2041 = vmatpush3.bf16.msra.mxu1 %v2153_v30  ;;  %v2172_v30 = vld [vmem:[%s2850_s17 + $0x10] sm:$0xff]  }
 0x19c   : > { %2042 = vmatprep.subr.bf16.mxu1 %v2228_v44 }
 0x19f   : > { %2043 = vmatpush3.bf16.msra.mxu1 %v2154_v63  ;;  %v2174_v63 = vld [vmem:[%s2850_s17 + $0x8] sm:$0xff]  }
 0x1a0   : > { %2044 = vmatprep.subr.bf16.mxu1 %v2228_v44 }
 0x1a3   : > { %2045 = vmatpush3.bf16.msra.mxu1 %v2155_v6 }
 0x1a4   : > { %2046 = vmatprep.subr.bf16.mxu1 %v2228_v44 }
 0x1a7   : > { %2047 = vmatpush3.bf16.msra.mxu1 %v2156_v11 }
 0x1a8   : > { %2072 = vmatprep.subr.bf16.mxu1 %v2228_v44 }
 0x1aa   : > { %2049 = vmatmul.mubr.bf16.vlgmr.msra.gmra.mxu1 %v1184_v38 }
 0x1ab   : > { %2078 = vmatprep.mubr.msk.bf16.mxu1 %vm2229_vm7, %v2228_v44  ;;  %2073 = vmatpush3.bf16.msra.mxu1 %v2169_v7 }
 0x1ac   : > { %2074 = vmatprep.subr.bf16.mxu1 %v2228_v44 }
 0x1af   : > { %2075 = vmatpush3.bf16.msra.mxu1 %v2171_v62 }
 0x1b0   : > { %2076 = vmatprep.subr.bf16.mxu1 %v2228_v44 }
 0x1b3   : > { %2077 = vmatpush3.bf16.msra.mxu1 %v2173_v25 }
 0x1b6   : > { %2079 = vmatmul.mubr.msk.bf16.vlgmr.msra.gmra.mxu1 %vm1126_vm6, %v2401_v14 }
 0x24a   : > { %v1283_v13 = vpop.f32.mrf.mxu1 }
 0x24c   : > { %v2030_v15 = vpop.f32.mrf.mxu1 }
 0x24e   : > { %v1286_v19 = vpop.f32.mrf.mxu1 }
 0x250   : > { %v2031_v26 = vpop.f32.mrf.mxu1 }
 0x26a   : > { %v1372_v31 = vpop.f32.mrf.mxu1 }
 0x26b   : > { %v1373_v16 = vadd.f32 %v1372_v31, %v1283_v13 }
 0x26c   : > { %v2050_v34 = vpop.f32.mrf.mxu1 }
 0x26d   : > { %v1386_v24 = vadd.f32 %v1950_v39, %v1373_v16 }
 0x26e   : > { %v1375_v51 = vpop.f32.mrf.mxu1 }
 0x26f   : > { %v1390_v17 = vmul.f32 0.044715, %v1386_v24  ;;  %v1376_v18 = vadd.f32 %v1375_v51, %v1286_v19  ;;  %v1388_v59 = vmul.f32 0.5, %v1386_v24 }
 0x270   : > { %v2051_v41 = vpop.f32.mrf.mxu1 }
 0x271   : > { %v1392_v46 = vmul.f32 %v1390_v17, %v1386_v24  ;;  %v1387_v54 = vadd.f32 %v1950_v39, %v1376_v18 }
 0x273   : > { %v1391_v42 = vmul.f32 0.044715, %v1387_v54  ;;  %v1394_v14 = vmul.f32 %v1392_v46, %v1386_v24  ;;  %v1389_v23 = vmul.f32 0.5, %v1387_v54 }
 0x275   : > { %v1393_v48 = vmul.f32 %v1391_v42, %v1387_v54  ;;  %v1396_v56 = vadd.f32 %v1394_v14, %v1386_v24 }
 0x276   : > { %v1601_v37 = vpop.f32.mrf.mxu1 }
 0x277   : > { %v1395_v45 = vmul.f32 %v1393_v48, %v1387_v54  ;;  %v1398_v27 = vmul.f32 0.7978846, %v1396_v56 }
 0x278   : > { %v2080_v6 = vpop.f32.mrf.mxu1 }
 0x279   : > { %v1397_v55 = vadd.f32 %v1395_v45, %v1387_v54  ;;  %2184 = vtanh.f32 %v1398_v27 }
 0x27a   : > { %v1604_v0 = vpop.f32.mrf.mxu1 }
 0x27b   : > { %v1399_v10 = vmul.f32 0.7978846, %v1397_v55 }
 0x27c   : > { %v2081_v20 = vpop.f32.mrf.mxu1 }
 0x27d   : > { %2186 = vtanh.f32 %v1399_v10 }
 0x286   : > { %v2185_v35 = vpop.eup %2184 }
 0x287   : > { %v1402_v40 = vadd.f32 1.0, %v2185_v35 }
 0x289   : > { %v1404_v22 = vmul.f32 %v1402_v40, %v1388_v59 }
 0x28a   : > { %v2187_v53 = vpop.eup %2186 }
 0x28b   : > { %v1403_v58 = vadd.f32 1.0, %v2187_v53 }
 0x28d   : > { %v1405_v28 = vmul.f32 %v1403_v58, %v1389_v23 }
 0x28f   : > { %v1406_v33 = vpack.c.bf16 %v1405_v28, %v1404_v22 }
 0x291   : > { %2069 = vmatmul.mubr.bf16.vlgmr.msra.gmra.mxu0 %v1406_v33 }
 0x292   : > { %2083 = vmatpush3.bf16.msra.mxu0 %v2165_v29  ;;  %2098 = vmatprep.mubr.msk.bf16.mxu0 %vm2229_vm7, %v2228_v44 }
 0x293   : > { %2084 = vmatprep.subr.bf16.mxu0 %v2228_v44 }
 0x296   : > { %2085 = vmatpush3.bf16.msra.mxu0 %v2166_v61 }
 0x297   : > { %2086 = vmatprep.subr.bf16.mxu0 %v2228_v44 }
 0x29a   : > { %2087 = vmatpush3.bf16.msra.mxu0 %v2167_v5 }
 0x29b   : > { %2088 = vmatprep.subr.bf16.mxu0 %v2228_v44 }
 0x29e   : > { %2089 = vmatpush3.bf16.msra.mxu0 %v2168_v9 }
 0x29f   : > { %2090 = vmatprep.subr.bf16.mxu0 %v2228_v44 }
 0x2a2   : > { %2091 = vmatpush3.bf16.msra.mxu0 %v2170_v36 }
 0x2a3   : > { %2092 = vmatprep.subr.bf16.mxu0 %v2228_v44 }
 0x2a6   : > { %2093 = vmatpush3.bf16.msra.mxu0 %v2172_v30 }
 0x2a7   : > { %2094 = vmatprep.subr.bf16.mxu0 %v2228_v44 }
 0x2aa   : > { %2095 = vmatpush3.bf16.msra.mxu0 %v2174_v63 }
 0x2ab   : > { %2096 = vmatprep.subr.bf16.mxu0 %v2228_v44 }
 0x2ae   : > { %2097 = vmatpush3.bf16.msra.mxu0 %v2176_v47 }
 0x2b1   : > { %2099 = vmatmul.mubr.bf16.vlgmr.msra.gmra.mxu0 %v2423_v21 }
 0x351   : > { %v1512_v32 = vpop.f32.mrf.mxu0 }
 0x352   : > { %v1513_v44 = vadd.f32 %v1951_v57, %v1512_v32 }
 0x353   : > { %v2070_v11 = vpop.f32.mrf.mxu0 }
 0x355   : > { %v1515_v50 = vpop.f32.mrf.mxu0 }
 0x356   : > { %v1516_v7 = vadd.f32 %v1951_v57, %v1515_v50 }
 0x357   : > { %v2071_v43 = vpop.f32.mrf.mxu0 }
 0x371   : > { %v1696_v38 = vpop.f32.mrf.mxu0 }
 0x372   : > { %v1697_v3 = vadd.f32 %v1696_v38, %v1601_v37 }
 0x373   : > { %v2100_v21 = vpop.f32.mrf.mxu0 }
 0x374   : > { %v1703_v12 = vadd.f32 %v1697_v3, %v1513_v44 }
 0x375   : > { %v1699_v52 = vpop.f32.mrf.mxu0 }
 0x376   : > { %v1700_v62 = vadd.f32 %v1699_v52, %v1604_v0  ;;  %v1712_v13 = vadd.f32 %v1974_v8, %v1703_v12 }
 0x377   : > { %v2101_v25 = vpop.f32.mrf.mxu0 }
 0x378   : > { %v1704_v15 = vadd.f32 %v1700_v62, %v1516_v7  ;;  %v1727_v26 = vsel %vm1721_vm8, %v1712_v13, 0.0 }
 0x37a   : > { %v1713_v19 = vadd.f32 %v1974_v8, %v1704_v15 }
 0x37c   : > { %v1728_v31 = vsel %vm1722_vm9, %v1713_v19, 0.0 }
 0x37d   : > { %v1985_v39 = vpack.c.bf16 %v1728_v31, %v1727_v26 }
 0x37f   : > { %1986 = vst [vmem:[%s821_s25] sm:$0xff] %v1985_v39  }
 0x380 PF: > { %s2874_s3 = sld [smem:[#allocation4_spill]] }
 0x381   : > { %s2875_s1 = sld [smem:[#allocation2_spill]] }
 0x382   : > { %s2876_s22 = sld [smem:[#allocation3_spill]] }
 0x383   : > { %s2877_s23 = sld [smem:[#allocation5_spill]] }
 0x384   : > { %s2878_s24 = sld [smem:[#allocation6_spill]] }
 0x386   : > { %s30_s2 = sadd.s32 1, %s2874_s3  }
 0x387   : > { %p27_p8 = scmp.ge.s32.totalorder %s30_s2, 8  }
 0x389   :  { %29 = sbr.rel (!%p27_p8) target bundleno = 7 (0x7), region = 151 }

// kernel: mel_decoder_forward.17
= control target key start
LH: loop header
LB: loop body
LE: loop exit
PB: predicated region body
PF: predicated region fallthrough
CT: control target
= control target key end

     0   :  { %s539_s12 = smov 0   ;;  %s541_s13 = smov 0   ;;  %s608_s0 = inlined_call_operand.vmem [shape: bf16[2,48,64], index: 0, kind: input, shape index: {}]   ;;  %s609_s1 = inlined_call_operand.vmem [shape: bf16[64,64], index: 1, kind: input, shape index: {}]   ;;  %s610_s2 = inlined_call_operand.vmem [shape: f32[1,64], index: 2, kind: input, shape index: {}]   ;;  %s611_s3 = inlined_call_operand.vmem [shape: f32[2,48,64], index: 3, kind: output, shape index: {}]  }
   0x1   :  { %s543_s14 = smov 0   ;;  %s545_s15 = smov 0  }
   0x2   :  { %s547_s16 = smov 0  }
   0x3 LB: > { %s22_s17 = sadd.s32 1, %s507_s14  ;;  %s25_s18 = sadd.s32 1, %s511_s15  ;;  %s515_s16 = sphi %s547_s16, %s13_s16   ;;  %s511_s15 = sphi %s545_s15, %s615_s15   ;;  %s507_s14 = sphi %s543_s14, %s614_s14   ;;  %s503_s13 = sphi %s541_s13, %s613_s13   ;;  %s499_s12 = sphi %s539_s12, %s612_s12  }
   0x4   : > { %p23_p0 = scmp.ge.s32.totalorder %s22_s17, 3  ;;  %p398_p1 = scmp.ge.s32.totalorder %s515_s16, 1 }
   0x5   : > { %p158_p2 = scmp.lt.s32.totalorder %s515_s16, 7 }
   0x6   : > { %s617_s17 = smov (%p23_p0, %s22_s17), 0  ;;  %s619_s18 = smov (!%p23_p0, %s25_s18), %s511_s15 }
   0x7   : > { %p159_p3 = pnand %p398_p1, %p158_p2  ;;  %p27_p4 = scmp.ge.s32.totalorder %s619_s18, 2 }
   0x8   : > { %s399_s23 = sshll.u32 (!%p159_p3), %s499_s12, 1  ;;  %p191_p5 = scmp.lt.s32.totalorder (!%p159_p3), %s503_s13, 1 }
   0x9   : > { %s621_s18 = smov (%p27_p4, %s619_s18), 0  ;;  %162 = sbr.rel (%p159_p3) target bundleno = 231 (0xe7), region = 32 }
   0xa   : > { %p193_p6 = scmp.lt.s32.totalorder (!%p159_p3), %s399_s23, 5 }
   0xe   : > { %v472_v0 = vld [vmem:[%s609_s1 + $0x18] sm:$0xff]   ;;  %v517_v1 = vmov 0.0   ;;  %v473_v2 = vld [vmem:[%s609_s1 + $0x10] sm:$0xff]   ;;  %vm518_vm0 = vmmov 0   ;;  %s623_s13 = smov (!%p191_p5, %s503_s13), 1  ;;  %v474_v3 = vld [vmem:[%s609_s1 + $0x8] sm:$0xff]  }
   0xf   : > { %417 = vmatprep.subr.bf16.mxu0 %v517_v1  ;;  %425 = vmatprep.mubr.msk.bf16.mxu0 %vm518_vm0, %v517_v1  ;;  %s625_s23 = smov (!%p193_p6, %s399_s23), 5  ;;  %s429_s26 = smul.u32 6, %s623_s13  ;;  %v475_v4 = vld [vmem:[%s609_s1] sm:$0xff]   ;;  %vm257_vm1 = vcmask 523264  }
  0x10   : > { %418 = vmatpush3.bf16.msra.mxu0 %v472_v0  ;;  %v403_v6 = vld [vmem:[%s610_s2] ss:$0 sm:$0xff] }
  0x11   : > { %419 = vmatprep.subr.bf16.mxu0 %v517_v1  ;;  %s196_s27 = sadd.s32 %s429_s26, %s625_s23 }
  0x12   : > { %s400_s30 = sshll.u32 %s196_s27, 2  ;;  %s402_s7 = sshll.u32 %s196_s27, 3 }
  0x13   : > { %s198_s6 = scalar_lea.vmem %s608_s0, %s400_s30  ;;  %s208_s12 = scalar_lea.vmem %s611_s3, %s402_s7 }
  0x14   : > { %420 = vmatpush3.bf16.msra.mxu0 %v473_v2  ;;  %v476_v5 = vld [vmem:[%s198_s6] sm:$0xff]  }
  0x15   : > { %421 = vmatprep.subr.bf16.mxu0 %v517_v1 }
  0x18   : > { %422 = vmatpush3.bf16.msra.mxu0 %v474_v3 }
  0x19   : > { %423 = vmatprep.subr.bf16.mxu0 %v517_v1 }
  0x1c   : > { %424 = vmatpush3.bf16.msra.mxu0 %v475_v4 }
  0x1f   : > { %426 = vmatmul.mubr.msk.bf16.vlgmr.msra.gmra.mxu0 %vm257_vm1, %v476_v5 }
  0xdf   : > { %v295_v7 = vpop.f32.mrf.mxu0 }
  0xe0   : > { %v296_v8 = vadd.f32 %v403_v6, %v295_v7 }
  0xe1   : > { %v427_v9 = vpop.f32.mrf.mxu0 }
  0xe2   : > { %302 = vst.msk [vmem:[%s208_s12] sm:$0xff] %vm257_vm1, %v296_v8 }
  0xe3   : > { %v298_v10 = vpop.f32.mrf.mxu0 }
  0xe4   : > { %v299_v11 = vadd.f32 %v403_v6, %v298_v10 }
  0xe5   : > { %v428_v12 = vpop.f32.mrf.mxu0 }
  0xe6   : > { %303 = vst.msk [vmem:[%s208_s12 + $0x8] sm:$0xff] %vm257_vm1, %v299_v11 }
  0xe7 PF: > { %s13_s16 = sadd.s32 1, %s515_s16   ;;  %s612_s12 = smov %s507_s14 }
  0xe8   : > { %p10_p7 = scmp.ge.s32.totalorder %s13_s16, 8   ;;  %s613_s13 = smov %s511_s15 }
  0xe9   : > { %s614_s14 = smov %s617_s17  ;;  %s615_s15 = smov %s621_s18 }
  0xea   :  { %12 = sbr.rel (!%p10_p7) target bundleno = 3 (0x3), region = 62 }

// kernel: mel_decoder_forward.15
= control target key start
LH: loop header
LB: loop body
LE: loop exit
PB: predicated region body
PF: predicated region fallthrough
CT: control target
= control target key end

     0   :  { %s1272_s13 = smov 0   ;;  %s1274_s14 = smov 0   ;;  %s1442_s0 = inlined_call_operand.vmem [shape: bf16[2,48,64], index: 0, kind: input, shape index: {}]   ;;  %s1443_s1 = inlined_call_operand.vmem [shape: bf16[2,3,8,64], index: 1, kind: input, shape index: {}]   ;;  %s1444_s2 = inlined_call_operand.vmem [shape: f32[7,64], index: 2, kind: input, shape index: {}]   ;;  %s1445_s3 = inlined_call_operand.vmem [shape: f32[1,64], index: 3, kind: input, shape index: {}]   ;;  %s1446_s4 = inlined_call_operand.vmem [shape: f32[2,1,64], index: 4, kind: input, shape index: {}]   ;;  %s1447_s5 = inlined_call_operand.vmem [shape: f32[2,1,64], index: 5, kind: input, shape index: {}]   ;;  %s1448_s6 = inlined_call_operand.vmem [shape: bf16[64,128], index: 6, kind: input, shape index: {}]   ;;  %s1449_s7 = inlined_call_operand.vmem [shape: f32[1,128], index: 7, kind: input, shape index: {}]   ;;  %s1450_s8 = inlined_call_operand.vmem [shape: bf16[128,64], index: 8, kind: input, shape index: {}]   ;;  %s1451_s9 = inlined_call_operand.vmem [shape: f32[1,64], index: 9, kind: input, shape index: {}]   ;;  %s1452_s10 = inlined_call_operand.vmem [shape: bf16[2,48,64], index: 10, kind: output, shape index: {}]  }
   0x1   :  { %s1276_s15 = smov 0   ;;  %s1278_s16 = smov 0  }
   0x2   :  { %s1280_s17 = smov 0  }
   0x3 LB: > { %s29_s18 = sadd.s32 1, %s1205_s15  ;;  %s32_s19 = sadd.s32 1, %s1209_s16  ;;  %s1213_s17 = sphi %s1280_s17, %s20_s17   ;;  %s1209_s16 = sphi %s1278_s16, %s1456_s16   ;;  %s1205_s15 = sphi %s1276_s15, %s1455_s15   ;;  %s1201_s14 = sphi %s1274_s14, %s1454_s14   ;;  %s1197_s13 = sphi %s1272_s13, %s1453_s13  }
   0x4   : > { %p30_p0 = scmp.ge.s32.totalorder %s29_s18, 3  ;;  %p1030_p1 = scmp.ge.s32.totalorder %s1213_s17, 1 }
   0x5   : > { %p364_p2 = scmp.lt.s32.totalorder %s1213_s17, 7 }
   0x6   : > { %s1458_s18 = smov (%p30_p0, %s29_s18), 0  ;;  %s1460_s19 = smov (!%p30_p0, %s32_s19), %s1209_s16 }
   0x7   : > { %p365_p3 = pnand %p1030_p1, %p364_p2  ;;  %p34_p4 = scmp.ge.s32.totalorder %s1460_s19, 2 }
   0x8   : > { %s1031_s20 = sshll.u32 (!%p365_p3), %s1197_s13, 1  ;;  %p425_p5 = scmp.lt.s32.totalorder (!%p365_p3), %s1201_s14, 1 }
   0x9   : > { %s1462_s19 = smov (%p34_p4, %s1460_s19), 0  ;;  %368 = sbr.rel (%p365_p3) target bundleno = 796 (0x31c), region = 60 }
   0xa   : > { %p427_p6 = scmp.lt.s32.totalorder (!%p365_p3), %s1031_s20, 5  ;;  %p436_p7 = scmp.lt.s32.totalorder (!%p365_p3), %s1197_s13, 2 }
   0xe   : > { %v477_v0 = vlaneseq  ;;  %s1464_s14 = smov (!%p425_p5, %s1201_s14), 1  ;;  %s1466_s20 = smov (!%p427_p6, %s1031_s20), 5  ;;  %vm467_vm0 = vcmask 1042432   ;;  %v476_v7 = vld [vmem:[%s1444_s2] sm:$0x7f]  ;;  %vm493_vm1 = vcmask 1046528  }
   0xf   : > { %s1111_s21 = smul.u32 6, %s1464_s14  ;;  %vm513_vm2 = vcmask 1045504   ;;  %vm533_vm3 = vcmask 1044480   ;;  %vm553_vm4 = vcmask 1043456   ;;  %vm592_vm5 = vcmask 1041408   ;;  %s447_s29 = scalar_lea.vmem %s1447_s5, %s1464_s14 }
  0x10   : > { %v1308_v1 = vshrl.u32 %v477_v0, 7  ;;  %s437_s22 = scalar_select %p436_p7, %s1197_s13, 2  ;;  %vm611_vm6 = vcmask 523264   ;;  %vm1216_vm7 = vmmov 0   ;;  %vm897_vm9 = vcmask 519168  }
  0x11   : > { %s1317_s23 = sadd.s32 %s1111_s21, %s1466_s20  ;;  %s1112_s24 = smul.u32 3, %s1464_s14 }
  0x12   : > { %v479_v2 = vsub.s32 0, %v1308_v1  ;;  %v485_v3 = vsub.s32 1, %v1308_v1  ;;  %v505_v4 = vsub.s32 2, %v1308_v1  ;;  %v525_v5 = vsub.s32 3, %v1308_v1  ;;  %s1032_s27 = sshll.u32 %s1317_s23, 2 }
  0x13   : > { %v545_v6 = vsub.s32 4, %v1308_v1  ;;  %v565_v8 = vsub.s32 5, %v1308_v1  ;;  %v584_v9 = vsub.s32 6, %v1308_v1  ;;  %s432_s30 = scalar_lea.vmem %s1442_s0, %s1032_s27  ;;  %s439_s11 = sadd.s32 %s1112_s24, %s437_s22 }
  0x14   : > { %s1033_s12 = sshll.u32 %s439_s11, 2  ;;  %v1331_v10 = vld [vmem:[%s432_s30] sm:$0xff]   ;;  %v480_v14 = vrot.slane %v476_v7, %v479_v2  ;;  %v486_v15 = vrot.slane %v476_v7, %v485_v3  ;;  %v506_v16 = vrot.slane %v476_v7, %v505_v4  ;;  %v526_v17 = vrot.slane %v476_v7, %v525_v5  ;;  %s444_s24 = scalar_lea.vmem %s1446_s4, %s1464_s14 }
  0x15   : > { %s441_s25 = scalar_lea.vmem %s1443_s1, %s1033_s12  ;;  %v1063_v11 = vunpack.c.l.bf16 %v1331_v10  ;;  %v1064_v12 = vunpack.c.h.bf16 %v1331_v10  ;;  %v546_v21 = vrot.slane %v476_v7, %v545_v6  ;;  %v566_v22 = vrot.slane %v476_v7, %v565_v8  ;;  %s456_s28 = scalar_lea.vmem %s1452_s10, %s1032_s27 }
  0x16   : > { %v463_v13 = vld [vmem:[%s441_s25] sm:$0xf]  ;;  %v585_v26 = vrot.slane %v476_v7, %v584_v9  ;;  %s1054_s25 = sshll.u32 %s1197_s13, 4 }
  0x17   : > { %v464_v18 = vunpack.c.l.bf16 %v463_v13  ;;  %v468_v19 = vrot.slane %v1063_v11, 5  ;;  %v469_v20 = vrot.slane %v1064_v12, 5 }
  0x19   : > { %v470_v23 = vsel %vm467_vm0, %v468_v19, %v469_v20  ;;  %v474_v24 = vsel %vm467_vm0, %v464_v18, %v468_v19  ;;  %v475_v25 = vsel %vm467_vm0, %v469_v20, %v464_v18  ;;  %v1036_v19 = vld [vmem:[%s1445_s3] ss:$0 sm:$0xff] }
  0x1a   : > { %v481_v27 = vmul.f32 %v480_v14, %v474_v24  ;;  %v487_v28 = vmul.f32 %v486_v15, %v474_v24  ;;  %v488_v29 = vmul.f32 %v486_v15, %v470_v23  ;;  %v507_v30 = vmul.f32 %v506_v16, %v474_v24 }
  0x1b   : > { %v508_v31 = vmul.f32 %v506_v16, %v470_v23  ;;  %v527_v32 = vmul.f32 %v526_v17, %v474_v24  ;;  %v528_v33 = vmul.f32 %v526_v17, %v470_v23  ;;  %v547_v34 = vmul.f32 %v546_v21, %v474_v24 }
  0x1c   : > { %v494_v35 = vrot.slane %v487_v28, 1  ;;  %v495_v36 = vrot.slane %v488_v29, 1  ;;  %v514_v37 = vrot.slane %v507_v30, 2  ;;  %v548_v38 = vmul.f32 %v546_v21, %v470_v23 }
  0x1d   : > { %v515_v39 = vrot.slane %v508_v31, 2  ;;  %v534_v40 = vrot.slane %v527_v32, 3  ;;  %v535_v41 = vrot.slane %v528_v33, 3  ;;  %v554_v42 = vrot.slane %v547_v34, 4 }
  0x1e   : > { %v496_v43 = vsel %vm493_vm1, %v494_v35, %v495_v36  ;;  %v555_v44 = vrot.slane %v548_v38, 4  ;;  %v567_v45 = vmul.f32 %v566_v22, %v474_v24  ;;  %v568_v46 = vmul.f32 %v566_v22, %v470_v23 }
  0x1f   : > { %v501_v47 = vadd.f32 %v496_v43, %v481_v27  ;;  %v516_v48 = vsel %vm513_vm2, %v514_v37, %v515_v39  ;;  %v586_v49 = vmul.f32 %v585_v26, %v474_v24  ;;  %v536_v50 = vsel %vm533_vm3, %v534_v40, %v535_v41 }
  0x20   : > { %v573_v51 = vrot.slane %v567_v45, 5  ;;  %v574_v52 = vrot.slane %v568_v46, 5  ;;  %v587_v53 = vmul.f32 %v585_v26, %v470_v23  ;;  %v556_v55 = vsel %vm553_vm4, %v554_v42, %v555_v44  ;;  %v1156_v46 = vld [vmem:[%s1448_s6 + $0x10] sm:$0xff]  }
  0x21   : > { %v521_v54 = vadd.f32 %v516_v48, %v501_v47  ;;  %v593_v56 = vrot.slane %v586_v49, 6  ;;  %v489_v57 = vmul.f32 %v486_v15, %v475_v25  ;;  %v482_v59 = vmul.f32 %v480_v14, %v470_v23  ;;  %v1157_v47 = vld [vmem:[%s1448_s6 + $0x8] sm:$0xff]   ;;  %v1158_v48 = vld [vmem:[%s1448_s6] sm:$0xff]  }
  0x22   : > { %v594_v58 = vrot.slane %v587_v53, 6  ;;  %v509_v60 = vmul.f32 %v506_v16, %v475_v25  ;;  %v529_v61 = vmul.f32 %v526_v17, %v475_v25  ;;  %v549_v0 = vmul.f32 %v546_v21, %v475_v25 }
  0x23   : > { %v541_v62 = vadd.f32 %v536_v50, %v521_v54  ;;  %v497_v63 = vrot.slane %v489_v57, 1  ;;  %v569_v2 = vmul.f32 %v566_v22, %v475_v25  ;;  %v575_v3 = vsel %vm467_vm0, %v573_v51, %v574_v52  ;;  %v1037_v57 = vld [vmem:[%s444_s24] ss:$0 sm:$0xff] }
  0x24   : > { %v517_v4 = vrot.slane %v509_v60, 2  ;;  %v537_v5 = vrot.slane %v529_v61, 3  ;;  %v557_v8 = vrot.slane %v549_v0, 4  ;;  %v588_v9 = vmul.f32 %v585_v26, %v475_v25  ;;  %v1038_v61 = vld [vmem:[%s447_s29] ss:$0 sm:$0xff] }
  0x25   : > { %v561_v6 = vadd.f32 %v556_v55, %v541_v62  ;;  %v498_v7 = vsel %vm493_vm1, %v495_v36, %v497_v63  ;;  %v595_v13 = vsel %vm592_vm5, %v593_v56, %v594_v58  ;;  %v576_v18 = vrot.slane %v569_v2, 5 }
  0x26   : > { %v502_v15 = vadd.f32 %v498_v7, %v482_v59  ;;  %v518_v14 = vsel %vm513_vm2, %v515_v39, %v517_v4  ;;  %v538_v17 = vsel %vm533_vm3, %v535_v41, %v537_v5  ;;  %v558_v22 = vsel %vm553_vm4, %v555_v44, %v557_v8  ;;  %v1155_v44 = vld [vmem:[%s1448_s6 + $0x18] sm:$0xff]   ;;  %v1160_v4 = vld [vmem:[%s1450_s8 + $0x30] sm:$0xff]   ;;  %v1161_v5 = vld [vmem:[%s1450_s8 + $0x28] sm:$0xff]  }
  0x27   : > { %v580_v16 = vadd.f32 %v575_v3, %v561_v6  ;;  %v596_v23 = vrot.slane %v588_v9, 6  ;;  %v577_v26 = vsel %vm467_vm0, %v574_v52, %v576_v18  ;;  %v1215_v45 = vmov 0.0   ;;  %v1159_v3 = vld [vmem:[%s1450_s8 + $0x38] sm:$0xff]   ;;  %v1162_v6 = vld [vmem:[%s1450_s8 + $0x20] sm:$0xff]   ;;  %v1164_v8 = vld [vmem:[%s1450_s8 + $0x10] sm:$0xff]  }
  0x28   : > { %v522_v20 = vadd.f32 %v518_v14, %v502_v15  ;;  %1079 = vmatprep.subr.bf16.mxu0 %v1215_v45  ;;  %1087 = vmatprep.mubr.msk.bf16.mxu0 %vm1216_vm7, %v1215_v45  ;;  %v1163_v7 = vld [vmem:[%s1450_s8 + $0x18] sm:$0xff]   ;;  %v1165_v9 = vld [vmem:[%s1450_s8 + $0x8] sm:$0xff]   ;;  %v1039_v15 = vld [vmem:[%s1449_s7] ss:$0 sm:$0xff] }
  0x29   : > { %v600_v21 = vadd.f32 %v595_v13, %v580_v16  ;;  %v597_v29 = vsel %vm592_vm5, %v594_v58, %v596_v23  ;;  %1080 = vmatpush3.bf16.msra.mxu0 %v1155_v44  ;;  %1091 = vmatprep.subr.bf16.mxu1 %v1215_v45  ;;  %v1166_v13 = vld [vmem:[%s1450_s8] sm:$0xff]  }
  0x2a   : > { %v542_v24 = vadd.f32 %v538_v17, %v522_v20  ;;  %1081 = vmatprep.subr.bf16.mxu0 %v1215_v45  ;;  %1107 = vmatprep.mubr.msk.bf16.mxu1 %vm1216_vm7, %v1215_v45 }
  0x2b   : > { %v609_v25 = vadd.f32 %v1036_v19, %v600_v21  ;;  %1092 = vmatpush3.bf16.msra.mxu1 %v1159_v3 }
  0x2c   : > { %v562_v27 = vadd.f32 %v558_v22, %v542_v24  ;;  %1093 = vmatprep.subr.bf16.mxu1 %v1215_v45 }
  0x2d   : > { %v612_v28 = vsel %vm611_vm6, %v609_v25, 0.0  ;;  %1082 = vmatpush3.bf16.msra.mxu0 %v1156_v46 }
  0x2e   : > { %613 = vadd.xlane.f32.xlu0 %v612_v28  ;;  %v581_v30 = vadd.f32 %v577_v26, %v562_v27  ;;  %1083 = vmatprep.subr.bf16.mxu0 %v1215_v45 }
  0x2f   : > { %1094 = vmatpush3.bf16.msra.mxu1 %v1160_v4 }
  0x30   : > { %v601_v31 = vadd.f32 %v597_v29, %v581_v30  ;;  %1095 = vmatprep.subr.bf16.mxu1 %v1215_v45 }
  0x31   : > { %1084 = vmatpush3.bf16.msra.mxu0 %v1157_v47 }
  0x32   : > { %v610_v32 = vadd.f32 %v1036_v19, %v601_v31  ;;  %1085 = vmatprep.subr.bf16.mxu0 %v1215_v45 }
  0x33   : > { %1096 = vmatpush3.bf16.msra.mxu1 %v1161_v5 }
  0x34   : > { %v615_v33 = vsel %vm611_vm6, %v610_v32, 0.0  ;;  %1097 = vmatprep.subr.bf16.mxu1 %v1215_v45 }
  0x35   : > { %616 = vadd.xlane.f32.xlu0 %v615_v33  ;;  %1086 = vmatpush3.bf16.msra.mxu0 %v1158_v48 }
  0x37   : > { %1098 = vmatpush3.bf16.msra.mxu1 %v1162_v6 }
  0x38   : > { %1099 = vmatprep.subr.bf16.mxu1 %v1215_v45 }
  0x3b   : > { %1100 = vmatpush3.bf16.msra.mxu1 %v1163_v7 }
  0x3c   : > { %1101 = vmatprep.subr.bf16.mxu1 %v1215_v45 }
  0x3f   : > { %1102 = vmatpush3.bf16.msra.mxu1 %v1164_v8 }
  0x40   : > { %1103 = vmatprep.subr.bf16.mxu1 %v1215_v45 }
  0x43   : > { %1104 = vmatpush3.bf16.msra.mxu1 %v1165_v9 }
  0x44   : > { %1105 = vmatprep.subr.bf16.mxu1 %v1215_v45 }
  0x47   : > { %1106 = vmatpush3.bf16.msra.mxu1 %v1166_v13 }
  0xb7   : > { %v614_v34 = vpop.xlane.xlu0 %613 }
  0xb8   : > { %v619_v35 = vmul.f32 0.015625, %v614_v34 }
  0xba   : > { %v621_v36 = vsub.f32 %v609_v25, %v619_v35 }
  0xbc   : > { %v623_v37 = vmul.f32 %v621_v36, %v621_v36 }
  0xbe   : > { %v617_v38 = vpop.xlane.xlu0 %616  ;;  %v625_v39 = vsel %vm611_vm6, %v623_v37, 0.0 }
  0xbf   : > { %v620_v40 = vmul.f32 0.015625, %v617_v38  ;;  %626 = vadd.xlane.f32.xlu1 %v625_v39 }
  0xc1   : > { %v622_v41 = vsub.f32 %v610_v32, %v620_v40  ;;  %v878_v40 = vstv %s1054_s25 }
  0xc3   : > { %v624_v42 = vmul.f32 %v622_v41, %v622_v41 }
  0xc5   : > { %v628_v43 = vsel %vm611_vm6, %v624_v42, 0.0  ;;  %v879_v42 = vadd.s32 %v878_v40, %v1308_v1 }
  0xc6   : > { %629 = vadd.xlane.f32.xlu1 %v628_v43  ;;  %v876_v43 = vadd.s32 8, %v1308_v1 }
  0xc7   : > { %vm881_vm8 = vcmp.lt.s32.totalorder %v879_v42, 40 }
  0xc8   : > { %v880_v47 = vadd.s32 %v878_v40, %v876_v43 }
  0xca   : > { %vm882_vm10 = vcmp.lt.s32.totalorder %v880_v47, 40 }
 0x148   : > { %v627_v49 = vpop.xlane.xlu1 %626 }
 0x149   : > { %v631_v50 = vmul.f32 0.015625, %v627_v49 }
 0x14b   : > { %v633_v51 = vadd.f32 1e-06, %v631_v50 }
 0x14d   : > { %1167 = vrsqrt.f32 %v633_v51 }
 0x14f   : > { %v630_v52 = vpop.xlane.xlu1 %629 }
 0x150   : > { %v632_v53 = vmul.f32 0.015625, %v630_v52 }
 0x152   : > { %v634_v54 = vadd.f32 1e-06, %v632_v53 }
 0x154   : > { %1169 = vrsqrt.f32 %v634_v54 }
 0x15a   : > { %v1168_v55 = vpop.eup %1167 }
 0x15b   : > { %v637_v56 = vmul.f32 %v1168_v55, %v621_v36 }
 0x15d   : > { %v646_v60 = vmul.f32 %v1037_v57, %v637_v56 }
 0x15f   : > { %v655_v63 = vadd.f32 %v1038_v61, %v646_v60 }
 0x161   : > { %v1170_v58 = vpop.eup %1169 }
 0x162   : > { %v638_v59 = vmul.f32 %v1170_v58, %v622_v41  ;;  %v1045_v41 = vld [vmem:[%s1451_s9] ss:$0 sm:$0xff] }
 0x164   : > { %v647_v62 = vmul.f32 %v1037_v57, %v638_v59 }
 0x166   : > { %v656_v0 = vadd.f32 %v1038_v61, %v647_v62 }
 0x168   : > { %v657_v2 = vpack.c.bf16 %v656_v0, %v655_v63 }
 0x16a   : > { %1088 = vmatmul.mubr.msk.bf16.vlgmr.msra.gmra.mxu0 %vm611_vm6, %v657_v2 }
 0x22a   : > { %v734_v14 = vpop.f32.mrf.mxu0 }
 0x22b   : > { %v735_v16 = vadd.f32 %v1039_v15, %v734_v14 }
 0x22c   : > { %v1089_v17 = vpop.f32.mrf.mxu0 }
 0x22d   : > { %v743_v18 = vmul.f32 0.044715, %v735_v16  ;;  %v741_v34 = vmul.f32 0.5, %v735_v16 }
 0x22e   : > { %v737_v19 = vpop.f32.mrf.mxu0 }
 0x22f   : > { %v745_v20 = vmul.f32 %v743_v18, %v735_v16  ;;  %v738_v21 = vadd.f32 %v1039_v15, %v737_v19 }
 0x230   : > { %v1090_v22 = vpop.f32.mrf.mxu0 }
 0x231   : > { %v747_v23 = vmul.f32 %v745_v20, %v735_v16  ;;  %v744_v24 = vmul.f32 0.044715, %v738_v21  ;;  %v742_v35 = vmul.f32 0.5, %v738_v21 }
 0x233   : > { %v746_v25 = vmul.f32 %v744_v24, %v738_v21  ;;  %v749_v26 = vadd.f32 %v747_v23, %v735_v16 }
 0x235   : > { %v748_v27 = vmul.f32 %v746_v25, %v738_v21  ;;  %v751_v28 = vmul.f32 0.7978846, %v749_v26 }
 0x237   : > { %v750_v29 = vadd.f32 %v748_v27, %v738_v21  ;;  %1171 = vtanh.f32 %v751_v28 }
 0x239   : > { %v752_v30 = vmul.f32 0.7978846, %v750_v29 }
 0x23b   : > { %1173 = vtanh.f32 %v752_v30 }
 0x244   : > { %v1172_v31 = vpop.eup %1171 }
 0x245   : > { %v755_v32 = vadd.f32 1.0, %v1172_v31 }
 0x247   : > { %v757_v37 = vmul.f32 %v755_v32, %v741_v34 }
 0x248   : > { %v1174_v33 = vpop.eup %1173 }
 0x249   : > { %v756_v36 = vadd.f32 1.0, %v1174_v33 }
 0x24b   : > { %v758_v38 = vmul.f32 %v756_v36, %v742_v35 }
 0x24d   : > { %v759_v39 = vpack.c.bf16 %v758_v38, %v757_v37 }
 0x24f   : > { %1108 = vmatmul.mubr.bf16.vlgmr.msra.gmra.mxu1 %v759_v39 }
 0x30f   : > { %v865_v44 = vpop.f32.mrf.mxu1 }
 0x310   : > { %v866_v45 = vadd.f32 %v1045_v41, %v865_v44 }
 0x311   : > { %v1109_v46 = vpop.f32.mrf.mxu1 }
 0x312   : > { %v872_v48 = vadd.f32 %v1063_v11, %v866_v45 }
 0x313   : > { %v868_v49 = vpop.f32.mrf.mxu1 }
 0x314   : > { %v887_v50 = vsel %vm881_vm8, %v872_v48, 0.0  ;;  %v869_v51 = vadd.f32 %v1045_v41, %v868_v49 }
 0x315   : > { %v1059_v52 = vpack.c.bf16 %v887_v50, %v887_v50  ;;  %v1110_v1 = vpop.f32.mrf.mxu1 }
 0x316   : > { %v873_v53 = vadd.f32 %v1064_v12, %v869_v51 }
 0x317   : > { %898 = vst.msk [vmem:[%s456_s28] sm:$0xf] %vm897_vm9, %v1059_v52 }
 0x318   : > { %v888_v54 = vsel %vm882_vm10, %v873_v53, 0.0 }
 0x319   : > { %v1060_v55 = vpack.c.bf16 %v888_v54, %v888_v54 }
 0x31b   : > { %899 = vst.msk [vmem:[%s456_s28 + $0x4] sm:$0xf] %vm897_vm9, %v1060_v55 }
 0x31c PF: > { %s20_s17 = sadd.s32 1, %s1213_s17   ;;  %s1453_s13 = smov %s1205_s15 }
 0x31d   : > { %p17_p8 = scmp.ge.s32.totalorder %s20_s17, 8   ;;  %s1454_s14 = smov %s1209_s16 }
 0x31e   : > { %s1455_s15 = smov %s1458_s18  ;;  %s1456_s16 = smov %s1462_s19 }
 0x31f   :  { %19 = sbr.rel (!%p17_p8) target bundleno = 3 (0x3), region = 99 }

// kernel: mel_decoder_forward.14
= control target key start
LH: loop header
LB: loop body
LE: loop exit
PB: predicated region body
PF: predicated region fallthrough
CT: control target
= control target key end

     0   :  { %s2333_s22 = smov 0   ;;  %s2335_s23 = smov 0   ;;  %s2829_s0 = inlined_call_operand.vmem [shape: bf16[2,48,128], index: 0, kind: input, shape index: {}]   ;;  %s2830_s1 = inlined_call_operand.vmem [shape: bf16[2,48,48], index: 1, kind: input, shape index: {}]   ;;  %s2831_s2 = inlined_call_operand.vmem [shape: bf16[2,3,8,128], index: 2, kind: input, shape index: {}]   ;;  %s2832_s3 = inlined_call_operand.vmem [shape: bf16[2,3,8,48], index: 3, kind: input, shape index: {}]   ;;  %s2833_s4 = inlined_call_operand.vmem [shape: f32[7,128], index: 4, kind: input, shape index: {}]   ;;  %s2834_s5 = inlined_call_operand.vmem [shape: f32[7,48], index: 5, kind: input, shape index: {}]   ;;  %s2835_s6 = inlined_call_operand.vmem [shape: f32[1,128], index: 6, kind: input, shape index: {}]   ;;  %s2836_s7 = inlined_call_operand.vmem [shape: f32[1,48], index: 7, kind: input, shape index: {}]   ;;  %s2837_s8 = inlined_call_operand.vmem [shape: f32[2,1,128], index: 8, kind: input, shape index: {}]   ;;  %s2838_s9 = inlined_call_operand.vmem [shape: f32[2,1,48], index: 9, kind: input, shape index: {}]   ;;  %s2839_s10 = inlined_call_operand.vmem [shape: f32[2,1,128], index: 10, kind: input, shape index: {}]   ;;  %s2840_s11 = inlined_call_operand.vmem [shape: f32[2,1,48], index: 11, kind: input, shape index: {}]   ;;  %s2841_s12 = inlined_call_operand.vmem [shape: bf16[128,128], index: 12, kind: input, shape index: {}]   ;;  %s2842_s13 = inlined_call_operand.vmem [shape: bf16[48,128], index: 13, kind: input, shape index: {}]   ;;  %s2843_s14 = inlined_call_operand.vmem [shape: f32[1,128], index: 14, kind: input, shape index: {}]   ;;  %s2844_s15 = inlined_call_operand.vmem [shape: bf16[128,64], index: 15, kind: input, shape index: {}]   ;;  %s2845_s16 = inlined_call_operand.vmem [shape: f32[1,64], index: 16, kind: input, shape index: {}]   ;;  %s2846_s17 = inlined_call_operand.vmem [shape: bf16[128,64], index: 17, kind: input, shape index: {}]   ;;  %s2847_s18 = inlined_call_operand.vmem [shape: bf16[48,64], index: 18, kind: input, shape index: {}]   ;;  %s2848_s19 = inlined_call_operand.vmem [shape: f32[1,64], index: 19, kind: input, shape index: {}]   ;;  %s2849_s20 = inlined_call_operand.vmem [shape: bf16[2,48,64], index: 20, kind: output, shape index: {}]  }
   0x1   :  { %2853 = sst [smem:[#allocation7_spill]] %s2829_s0  ;;  %s2337_s24 = smov 0  }
   0x2   :  { %2854 = sst [smem:[#allocation8_spill]] %s2830_s1  ;;  %s2331_s1 = smov 0  }
   0x3   :  { %2855 = sst [smem:[#allocation9_spill]] %s2831_s2  ;;  %s2339_s2 = smov 0  }
   0x4   :  { %2856 = sst [smem:[#allocation10_spill]] %s2832_s3 }
   0x5   :  { %2857 = sst [smem:[#allocation11_spill]] %s2833_s4 }
   0x6   :  { %2858 = sst [smem:[#allocation12_spill]] %s2834_s5 }
   0x7 LB: > { %2859 = sst [smem:[#allocation2_spill]] %s2214_s23  ;;  %s39_s25 = sadd.s32 1, %s2214_s23  ;;  %s2222_s2 = sphi %s2339_s2, %s30_s2   ;;  %s2218_s24 = sphi %s2337_s24, %s2874_s24   ;;  %s2214_s23 = sphi %s2335_s23, %s2873_s23   ;;  %s2210_s22 = sphi %s2333_s22, %s2872_s22   ;;  %s2206_s1 = sphi %s2331_s1, %s2871_s1  }
   0x8   : > { %2860 = sst [smem:[#allocation3_spill]] %s2218_s24  ;;  %s42_s3 = sadd.s32 1, %s2218_s24 }
   0x9   : > { %2861 = sst [smem:[#allocation4_spill]] %s2222_s2  ;;  %p40_p0 = scmp.ge.s32.totalorder %s39_s25, 3 }
   0xa   : > { %p1924_p1 = scmp.ge.s32.totalorder %s2222_s2, 1  ;;  %p662_p2 = scmp.lt.s32.totalorder %s2222_s2, 7 }
   0xb   : > { %s2876_s25 = smov (%p40_p0, %s39_s25), 0  ;;  %s2878_s3 = smov (!%p40_p0, %s42_s3), %s2218_s24 }
   0xc   : > { %2862 = sst [smem:[#allocation5_spill]] %s2876_s25  ;;  %p663_p3 = pnand %p1924_p1, %p662_p2 }
   0xd   : > { %p44_p4 = scmp.ge.s32.totalorder %s2878_s3, 2  ;;  %s1925_s26 = sshll.u32 (!%p663_p3), %s2206_s1, 1 }
   0xe   : > { %666 = sbr.rel (%p663_p3) target bundleno = 896 (0x380), region = 100  ;;  %p766_p5 = scmp.lt.s32.totalorder (!%p663_p3), %s2210_s22, 1 }
   0xf   : > { %s2880_s3 = smov (%p44_p4, %s2878_s3), 0  ;;  %p768_p6 = scmp.lt.s32.totalorder (!%p663_p3), %s1925_s26, 5 }
  0x10   : > { %2863 = sst [smem:[#allocation6_spill]] %s2880_s3  ;;  %p787_p7 = scmp.lt.s32.totalorder (!%p663_p3), %s2206_s1, 2 }
  0x11   : > { %s2864_s5 = sld [smem:[#allocation12_spill]] (!%p663_p3) }
  0x12   : > { %s2865_s21 = sld [smem:[#allocation11_spill]] (!%p663_p3) }
  0x13   : > { %v842_v0 = vlaneseq  ;;  %s2882_s22 = smov (!%p766_p5, %s2210_s22), 1  ;;  %s2884_s26 = smov (!%p768_p6, %s1925_s26), 5  ;;  %vm832_vm0 = vcmask 1042432   ;;  %vm858_vm1 = vcmask 1046528   ;;  %vm878_vm2 = vcmask 1045504  }
  0x14   : > { %s2098_s4 = smul.u32 6, %s2882_s22  ;;  %s2866_s24 = sld [smem:[#allocation8_spill]]  ;;  %vm898_vm3 = vcmask 1044480   ;;  %vm918_vm4 = vcmask 1043456   ;;  %vm957_vm5 = vcmask 1041408   ;;  %vm1126_vm6 = vcmask 392192  }
  0x15   : > { %v2367_v1 = vshrl.u32 %v842_v0, 7  ;;  %s788_s29 = scalar_select %p787_p7, %s2206_s1, 2  ;;  %vm2225_vm7 = vmmov 0   ;;  %vm1737_vm9 = vcmask 519168  }
  0x16   : > { %s771_s27 = sadd.s32 %s2098_s4, %s2884_s26  ;;  %s2099_s28 = smul.u32 3, %s2882_s22 }
  0x17   : > { %v996_v2 = vld [vmem:[%s2864_s5] sm:$0x7f]  ;;  %v844_v3 = vsub.s32 0, %v2367_v1  ;;  %v850_v4 = vsub.s32 1, %v2367_v1  ;;  %v870_v5 = vsub.s32 2, %v2367_v1  ;;  %v890_v6 = vsub.s32 3, %v2367_v1  ;;  %s812_s25 = scalar_lea.vmem %s2840_s11, %s2882_s22 }
  0x18   : > { %v910_v7 = vsub.s32 4, %v2367_v1  ;;  %v930_v8 = vsub.s32 5, %v2367_v1  ;;  %v949_v9 = vsub.s32 6, %v2367_v1  ;;  %v841_v10 = vld [vmem:[%s2865_s21] sm:$0x7f]  ;;  %s2385_s5 = sshll.u32 %s771_s27, 2  ;;  %s790_s2 = sadd.s32 %s2099_s28, %s788_s29 }
  0x19   : > { %v2391_v11 = vrot.slane %v996_v2, %v844_v3  ;;  %v2393_v12 = vrot.slane %v996_v2, %v850_v4  ;;  %v2395_v13 = vrot.slane %v996_v2, %v870_v5  ;;  %s1929_s30 = sshll.u32 %s790_s2, 2  ;;  %v2399_v15 = vrot.slane %v996_v2, %v890_v6  ;;  %s2867_s3 = sld [smem:[#allocation7_spill]] }
  0x1a   : > { %s783_s23 = scalar_lea.vmem %s2866_s24, %s2385_s5  ;;  %v2401_v16 = vrot.slane %v996_v2, %v910_v7  ;;  %v2403_v17 = vrot.slane %v996_v2, %v930_v8  ;;  %v2405_v18 = vrot.slane %v996_v2, %v949_v9  ;;  %s2868_s0 = sld [smem:[#allocation10_spill]]  ;;  %v2421_v22 = vrot.slane %v841_v10, %v844_v3 }
  0x1b   : > { %v2397_v14 = vld [vmem:[%s783_s23] sm:$0xff]   ;;  %s2869_s27 = sld [smem:[#allocation9_spill]]  ;;  %v2423_v23 = vrot.slane %v841_v10, %v850_v4  ;;  %v2429_v28 = vrot.slane %v841_v10, %v870_v5  ;;  %v2431_v29 = vrot.slane %v841_v10, %v890_v6  ;;  %v2433_v33 = vrot.slane %v841_v10, %v910_v7  ;;  %s809_s23 = scalar_lea.vmem %s2839_s10, %s2882_s22 }
  0x1c   : > { %v982_v19 = vunpack.c.l.bf16 %v2397_v14  ;;  %v983_v20 = vunpack.c.h.bf16 %v2397_v14  ;;  %v2437_v36 = vrot.slane %v841_v10, %v930_v8  ;;  %v2439_v37 = vrot.slane %v841_v10, %v949_v9  ;;  %s1976_s21 = sshll.u32 %s2206_s1, 4 }
  0x1e   : > { %v988_v31 = vrot.slane %v982_v19, 5  ;;  %v989_v32 = vrot.slane %v983_v20, 5 }
  0x1f   : > { %s773_s26 = scalar_lea.vmem %s2867_s3, %s2385_s5 }
  0x20   : > { %s800_s2 = scalar_lea.vmem %s2868_s0, %s1929_s30  ;;  %v2419_v21 = vld [vmem:[%s773_s26] sm:$0xff]   ;;  %v2442_v38 = vsel %vm832_vm0, %v988_v31, %v989_v32  ;;  %s803_s26 = scalar_lea.vmem %s2837_s8, %s2882_s22 }
  0x21   : > { %s792_s28 = scalar_lea.vmem %s2869_s27, %s1929_s30  ;;  %v984_v24 = vld [vmem:[%s800_s2] sm:$0xf]  ;;  %v826_v25 = vunpack.c.l.bf16 %v2419_v21  ;;  %v827_v26 = vunpack.c.h.bf16 %v2419_v21  ;;  %v2453_v44 = vmul.f32 %v2393_v12, %v2442_v38  ;;  %v2458_v46 = vmul.f32 %v2395_v13, %v2442_v38 }
  0x22   : > { %v2427_v27 = vld [vmem:[%s792_s28] sm:$0xf]  ;;  %v985_v30 = vunpack.c.l.bf16 %v984_v24  ;;  %v2463_v48 = vmul.f32 %v2399_v15, %v2442_v38  ;;  %v2469_v53 = vmul.f32 %v2401_v16, %v2442_v38  ;;  %v2480_v61 = vmul.f32 %v2403_v17, %v2442_v38  ;;  %s806_s28 = scalar_lea.vmem %s2838_s9, %s2882_s22 }
  0x23   : > { %v833_v34 = vrot.slane %v826_v25, 5  ;;  %v2435_v35 = vrot.slane %v827_v26, 5  ;;  %v829_v40 = vunpack.c.l.bf16 %v2427_v27  ;;  %v1014_v51 = vrot.slane %v2453_v44, 1 }
  0x24   : > { %v994_v39 = vsel %vm832_vm0, %v985_v30, %v988_v31  ;;  %v2447_v41 = vsel %vm832_vm0, %v989_v32, %v985_v30  ;;  %v1033_v54 = vrot.slane %v2458_v46, 2  ;;  %v1052_v56 = vrot.slane %v2463_v48, 3 }
  0x25   : > { %v1001_v42 = vmul.f32 %v2391_v11, %v994_v39  ;;  %v1007_v43 = vmul.f32 %v2393_v12, %v994_v39  ;;  %v1026_v45 = vmul.f32 %v2395_v13, %v994_v39  ;;  %v1045_v47 = vmul.f32 %v2399_v15, %v994_v39 }
  0x26   : > { %v1064_v49 = vmul.f32 %v2401_v16, %v994_v39  ;;  %v1071_v59 = vrot.slane %v2469_v53, 4  ;;  %v1083_v60 = vmul.f32 %v2403_v17, %v994_v39  ;;  %v1102_v2 = vmul.f32 %v2405_v18, %v994_v39 }
  0x27   : > { %v1013_v50 = vrot.slane %v1007_v43, 1  ;;  %v1032_v52 = vrot.slane %v1026_v45, 2  ;;  %v1051_v55 = vrot.slane %v1045_v47, 3  ;;  %v1090_v5 = vrot.slane %v2480_v61, 5 }
  0x28   : > { %v1070_v57 = vrot.slane %v1064_v49, 4  ;;  %v1089_v4 = vrot.slane %v1083_v60, 5  ;;  %v2495_v6 = vmul.f32 %v2405_v18, %v2442_v38  ;;  %v1108_v8 = vrot.slane %v1102_v2, 6 }
  0x29   : > { %v1015_v58 = vsel %vm858_vm1, %v1013_v50, %v1014_v51  ;;  %v1034_v63 = vsel %vm878_vm2, %v1032_v52, %v1033_v54  ;;  %v1053_v0 = vsel %vm898_vm3, %v1051_v55, %v1052_v56  ;;  %v2499_v9 = vsel %vm832_vm0, %v833_v34, %v2435_v35  ;;  %v2532_v52 = vld [vmem:[%s2836_s7] ss:$0 sm:$0xff] }
  0x2a   : > { %v1020_v62 = vadd.f32 %v1015_v58, %v1001_v42  ;;  %v1072_v3 = vsel %vm918_vm4, %v1070_v57, %v1071_v59  ;;  %v839_v10 = vsel %vm832_vm0, %v829_v40, %v833_v34  ;;  %v1091_v19 = vsel %vm832_vm0, %v1089_v4, %v1090_v5 }
  0x2b   : > { %v1109_v20 = vrot.slane %v2495_v6, 6  ;;  %v846_v24 = vmul.f32 %v2421_v22, %v839_v10  ;;  %v852_v25 = vmul.f32 %v2423_v23, %v839_v10  ;;  %v2512_v30 = vmul.f32 %v2423_v23, %v2499_v9 }
  0x2c   : > { %v1039_v7 = vadd.f32 %v1034_v63, %v1020_v62  ;;  %v872_v31 = vmul.f32 %v2429_v28, %v839_v10  ;;  %v2517_v32 = vmul.f32 %v2429_v28, %v2499_v9  ;;  %v892_v42 = vmul.f32 %v2431_v29, %v839_v10 }
  0x2d   : > { %v1110_v34 = vsel %vm957_vm5, %v1108_v8, %v1109_v20  ;;  %v859_v39 = vrot.slane %v852_v25, 1  ;;  %v2525_v43 = vmul.f32 %v2431_v29, %v2499_v9  ;;  %v860_v47 = vrot.slane %v2512_v30, 1 }
  0x2e   : > { %v1058_v26 = vadd.f32 %v1053_v0, %v1039_v7  ;;  %v879_v49 = vrot.slane %v872_v31, 2  ;;  %v880_v50 = vrot.slane %v2517_v32, 2  ;;  %v899_v55 = vrot.slane %v892_v42, 3 }
  0x2f   : > { %v900_v57 = vrot.slane %v2525_v43, 3  ;;  %v912_v58 = vmul.f32 %v2433_v33, %v839_v10  ;;  %v2538_v60 = vmul.f32 %v2433_v33, %v2499_v9  ;;  %v861_v63 = vsel %vm858_vm1, %v859_v39, %v860_v47 }
  0x30   : > { %v1077_v45 = vadd.f32 %v1072_v3, %v1058_v26  ;;  %v881_v0 = vsel %vm878_vm2, %v879_v49, %v880_v50  ;;  %v932_v2 = vmul.f32 %v2437_v36, %v839_v10  ;;  %v866_v3 = vadd.f32 %v861_v63, %v846_v24 }
  0x31   : > { %v901_v4 = vsel %vm898_vm3, %v899_v55, %v900_v57  ;;  %v919_v7 = vrot.slane %v912_v58, 4  ;;  %v920_v8 = vrot.slane %v2538_v60, 4  ;;  %v951_v31 = vmul.f32 %v2439_v37, %v839_v10 }
  0x32   : > { %v1096_v62 = vadd.f32 %v1091_v19, %v1077_v45  ;;  %v2553_v19 = vmul.f32 %v2437_v36, %v2499_v9  ;;  %v938_v26 = vrot.slane %v932_v2, 5  ;;  %v886_v39 = vadd.f32 %v881_v0, %v866_v3 }
  0x33   : > { %v921_v24 = vsel %vm918_vm4, %v919_v7, %v920_v8  ;;  %v2561_v42 = vmul.f32 %v2439_v37, %v2499_v9  ;;  %v1002_v45 = vmul.f32 %v2391_v11, %v2442_v38  ;;  %v958_v55 = vrot.slane %v951_v31, 6 }
  0x34   : > { %v1115_v25 = vadd.f32 %v1110_v34, %v1096_v62  ;;  %v939_v49 = vrot.slane %v2553_v19, 5  ;;  %v1009_v10 = vmul.f32 %v2393_v12, %v2447_v41  ;;  %v906_v58 = vadd.f32 %v901_v4, %v886_v39 }
  0x35   : > { %v959_v62 = vrot.slane %v2561_v42, 6  ;;  %v1028_v63 = vmul.f32 %v2395_v13, %v2447_v41  ;;  %v1047_v0 = vmul.f32 %v2399_v15, %v2447_v41  ;;  %v1066_v3 = vmul.f32 %v2401_v16, %v2447_v41 }
  0x36   : > { %v2566_v34 = vadd.f32 %v2532_v52, %v1115_v25  ;;  %v940_v38 = vsel %vm832_vm0, %v938_v26, %v939_v49  ;;  %v1016_v2 = vrot.slane %v1009_v10, 1  ;;  %v926_v12 = vadd.f32 %v921_v24, %v906_v58  ;;  %v1933_v24 = vld [vmem:[%s2835_s6] ss:$0 sm:$0xff] }
  0x37   : > { %v960_v4 = vsel %vm957_vm5, %v958_v55, %v959_v62  ;;  %v1035_v7 = vrot.slane %v1028_v63, 2  ;;  %v1054_v25 = vrot.slane %v1047_v0, 3  ;;  %v1073_v15 = vrot.slane %v1066_v3, 4 }
  0x38   : > { %v1127_v11 = vsel %vm1126_vm6, %v2566_v34, 0.0  ;;  %v1017_v13 = vsel %vm858_vm1, %v1014_v51, %v1016_v2  ;;  %v1085_v19 = vmul.f32 %v2403_v17, %v2447_v41  ;;  %v1104_v26 = vmul.f32 %v2405_v18, %v2447_v41 }
  0x39   : > { %1128 = vadd.xlane.f32.xlu1 %v1127_v11  ;;  %v945_v31 = vadd.f32 %v940_v38, %v926_v12  ;;  %v1021_v39 = vadd.f32 %v1017_v13, %v1002_v45  ;;  %v1036_v16 = vsel %vm878_vm2, %v1033_v54, %v1035_v7  ;;  %v1055_v44 = vsel %vm898_vm3, %v1052_v56, %v1054_v25 }
  0x3a   : > { %v1092_v51 = vrot.slane %v1085_v19, 5  ;;  %v840_v17 = vsel %vm832_vm0, %v2435_v35, %v829_v40  ;;  %v1074_v46 = vsel %vm918_vm4, %v1071_v59, %v1073_v15  ;;  %v1111_v42 = vrot.slane %v1104_v26, 6 }
  0x3b   : > { %v965_v18 = vadd.f32 %v960_v4, %v945_v31  ;;  %v1040_v41 = vadd.f32 %v1036_v16, %v1021_v39  ;;  %v854_v54 = vmul.f32 %v2423_v23, %v840_v17  ;;  %v847_v48 = vmul.f32 %v2421_v22, %v2499_v9 }
  0x3c   : > { %v874_v56 = vmul.f32 %v2429_v28, %v840_v17  ;;  %v894_v45 = vmul.f32 %v2431_v29, %v840_v17  ;;  %v914_v35 = vmul.f32 %v2433_v33, %v840_v17  ;;  %v1093_v40 = vsel %vm832_vm0, %v1090_v5, %v1092_v51  ;;  %v2143_v51 = vld [vmem:[%s2842_s13 + $0x8] sm:$0xff]  }
  0x3d   : > { %v974_v27 = vadd.f32 %v1933_v24, %v965_v18  ;;  %v1059_v55 = vadd.f32 %v1055_v44, %v1040_v41  ;;  %v862_v10 = vrot.slane %v854_v54, 1  ;;  %v934_v23 = vmul.f32 %v2437_v36, %v840_v17 }
  0x3e   : > { %v882_v53 = vrot.slane %v874_v56, 2  ;;  %v902_v59 = vrot.slane %v894_v45, 3  ;;  %v922_v28 = vrot.slane %v914_v35, 4  ;;  %v953_v29 = vmul.f32 %v2439_v37, %v840_v17  ;;  %v2144_v17 = vld [vmem:[%s2842_s13] sm:$0xff]  }
  0x3f   : > { %976 = vadd.xlane.f32.xlu0 %v974_v27  ;;  %v1078_v58 = vadd.f32 %v1074_v46, %v1059_v55  ;;  %v863_v22 = vsel %vm858_vm1, %v860_v47, %v862_v10  ;;  %v1112_v33 = vsel %vm957_vm5, %v1109_v20, %v1111_v42  ;;  %v941_v30 = vrot.slane %v934_v23, 5 }
  0x40   : > { %v867_v61 = vadd.f32 %v863_v22, %v847_v48  ;;  %v883_v5 = vsel %vm878_vm2, %v880_v50, %v882_v53  ;;  %v903_v36 = vsel %vm898_vm3, %v900_v57, %v902_v59  ;;  %v923_v37 = vsel %vm918_vm4, %v920_v8, %v922_v28 }
  0x41   : > { %v1097_v9 = vadd.f32 %v1093_v40, %v1078_v58  ;;  %v961_v6 = vrot.slane %v953_v29, 6  ;;  %v942_v32 = vsel %vm832_vm0, %v939_v49, %v941_v30  ;;  %v2224_v44 = vmov 0.0   ;;  %v1937_v40 = vld [vmem:[%s806_s28] ss:$0 sm:$0xff]  ;;  %v2149_v30 = vld [vmem:[%s2841_s12 + $0x18] sm:$0xff]  }
  0x42   : > { %v887_v63 = vadd.f32 %v883_v5, %v867_v61  ;;  %2018 = vmatprep.subr.bf16.mxu1 %v2224_v44  ;;  %2024 = vmatprep.mubr.msk.bf16.mxu1 %vm2225_vm7, %v2224_v44  ;;  %v1938_v58 = vld [vmem:[%s812_s25] ss:$0 sm:$0xff]  ;;  %v2146_v5 = vld [vmem:[%s2841_s12 + $0x30] sm:$0xff]   ;;  %s821_s25 = scalar_lea.vmem %s2849_s20, %s2385_s5 }
  0x43   : > { %v1116_v47 = vadd.f32 %v1112_v33, %v1097_v9  ;;  %v962_v43 = vsel %vm957_vm5, %v959_v62, %v961_v6  ;;  %2048 = vmatprep.subr.bf16.mxu0 %v2224_v44  ;;  %2064 = vmatprep.mubr.msk.bf16.mxu0 %vm2225_vm7, %v2224_v44  ;;  %v2145_v33 = vld [vmem:[%s2841_s12 + $0x38] sm:$0xff]   ;;  %v2147_v9 = vld [vmem:[%s2841_s12 + $0x28] sm:$0xff]  }
  0x44   : > { %v907_v0 = vadd.f32 %v903_v36, %v887_v63  ;;  %v2148_v36 = vld [vmem:[%s2841_s12 + $0x20] sm:$0xff]   ;;  %v2150_v63 = vld [vmem:[%s2841_s12 + $0x10] sm:$0xff]   ;;  %v2151_v6 = vld [vmem:[%s2841_s12 + $0x8] sm:$0xff]  }
  0x45   : > { %v1125_v20 = vadd.f32 %v2532_v52, %v1116_v47 }
  0x46   : > { %v927_v11 = vadd.f32 %v923_v37, %v907_v0  ;;  %v1935_v0 = vld [vmem:[%s803_s26] ss:$0 sm:$0xff] }
  0x47   : > { %v1130_v50 = vsel %vm1126_vm6, %v1125_v20, 0.0 }
  0x48   : > { %1131 = vadd.xlane.f32.xlu1 %v1130_v50  ;;  %v946_v57 = vadd.f32 %v942_v32, %v927_v11  ;;  %v2152_v11 = vld [vmem:[%s2841_s12] sm:$0xff]  }
  0x49   : > { %v1936_v50 = vld [vmem:[%s809_s23] ss:$0 sm:$0xff] }
  0x4a   : > { %v966_v38 = vadd.f32 %v962_v43, %v946_v57 }
  0x4c   : > { %v975_v2 = vadd.f32 %v1933_v24, %v966_v38  ;;  %v2142_v24 = vld [vmem:[%s2842_s13 + $0x10] sm:$0xff]  }
  0x4d   : > { %2019 = vmatpush3.bf16.msra.mxu1 %v2142_v24 }
  0x4e   : > { %978 = vadd.xlane.f32.xlu0 %v975_v2  ;;  %2020 = vmatprep.subr.bf16.mxu1 %v2224_v44 }
  0x51   : > { %2021 = vmatpush3.bf16.msra.mxu1 %v2143_v51 }
  0x52   : > { %2022 = vmatprep.subr.bf16.mxu1 %v2224_v44 }
  0x55   : > { %2023 = vmatpush3.bf16.msra.mxu1 %v2144_v17 }
  0x56   : > { %2028 = vmatprep.subr.bf16.mxu1 %v2224_v44 }
  0xc2   : > { %v1129_v3 = vpop.xlane.xlu1 %1128 }
  0xc8   : > { %v977_v60 = vpop.xlane.xlu0 %976 }
  0xc9   : > { %v1133_v12 = vadd.f32 %v1129_v3, %v977_v60  ;;  %v2154_v3 = vld [vmem:[%s2844_s15 + $0x30] sm:$0xff]   ;;  %v2155_v60 = vld [vmem:[%s2844_s15 + $0x28] sm:$0xff]  }
  0xcb   : > { %v1136_v8 = vmul.f32 0.0056818184, %v1133_v12  ;;  %v2156_v12 = vld [vmem:[%s2844_s15 + $0x20] sm:$0xff]  }
  0xcd   : > { %v2635_v4 = vsub.f32 %v974_v27, %v1136_v8  ;;  %v1146_v52 = vsub.f32 %v2566_v34, %v1136_v8  ;;  %v2157_v8 = vld [vmem:[%s2844_s15 + $0x18] sm:$0xff]  }
  0xcf   : > { %v1140_v49 = vmul.f32 %v2635_v4, %v2635_v4  ;;  %v1148_v7 = vmul.f32 %v1146_v52, %v1146_v52 }
  0xd1   : > { %1142 = vadd.xlane.f32.xlu0 %v1140_v49  ;;  %v1150_v62 = vsel %vm1126_vm6, %v1148_v7, 0.0  ;;  %v1132_v25 = vpop.xlane.xlu1 %1131  ;;  %v2160_v49 = vld [vmem:[%s2844_s15] sm:$0xff]   ;;  %v2165_v7 = vld [vmem:[%s2847_s18 + $0x10] sm:$0xff]  }
  0xd5   : > { %1151 = vadd.xlane.f32.xlu0 %v1150_v62  ;;  %v2167_v62 = vld [vmem:[%s2847_s18 + $0x8] sm:$0xff]  }
  0xd7   : > { %v979_v13 = vpop.xlane.xlu0 %978 }
  0xd8   : > { %v1134_v15 = vadd.f32 %v1132_v25, %v979_v13  ;;  %v2169_v25 = vld [vmem:[%s2847_s18] sm:$0xff]  }
  0xda   : > { %v1137_v19 = vmul.f32 0.0056818184, %v1134_v15 }
  0xdc   : > { %v2641_v26 = vsub.f32 %v975_v2, %v1137_v19  ;;  %v1147_v31 = vsub.f32 %v1125_v20, %v1137_v19  ;;  %v2153_v2 = vld [vmem:[%s2844_s15 + $0x38] sm:$0xff]  }
  0xdd   : > { %2049 = vmatpush3.bf16.msra.mxu0 %v2153_v2 }
  0xde   : > { %v1141_v39 = vmul.f32 %v2641_v26, %v2641_v26  ;;  %v1149_v16 = vmul.f32 %v1147_v31, %v1147_v31  ;;  %2050 = vmatprep.subr.bf16.mxu0 %v2224_v44 }
  0xe0   : > { %1144 = vadd.xlane.f32.xlu1 %v1141_v39  ;;  %v1153_v34 = vsel %vm1126_vm6, %v1149_v16, 0.0  ;;  %v1951_v39 = vld [vmem:[%s2843_s14] ss:$0 sm:$0xff] }
  0xe1   : > { %2051 = vmatpush3.bf16.msra.mxu0 %v2154_v3 }
  0xe2   : > { %2052 = vmatprep.subr.bf16.mxu0 %v2224_v44 }
  0xe4   : > { %1154 = vadd.xlane.f32.xlu1 %v1153_v34 }
  0xe5   : > { %2053 = vmatpush3.bf16.msra.mxu0 %v2155_v60 }
  0xe6   : > { %2054 = vmatprep.subr.bf16.mxu0 %v2224_v44 }
  0xe9   : > { %2055 = vmatpush3.bf16.msra.mxu0 %v2156_v12  ;;  %v1975_v12 = vld [vmem:[%s2848_s19] ss:$0 sm:$0xff] }
  0xea   : > { %2056 = vmatprep.subr.bf16.mxu0 %v2224_v44 }
  0xed   : > { %2057 = vmatpush3.bf16.msra.mxu0 %v2157_v8 }
  0xee   : > { %2058 = vmatprep.subr.bf16.mxu0 %v2224_v44 }
 0x15a   : > { %v1143_v18 = vpop.xlane.xlu0 %1142 }
 0x15e   : > { %v1152_v41 = vpop.xlane.xlu0 %1151 }
 0x15f   : > { %v1156_v46 = vadd.f32 %v1152_v41, %v1143_v18 }
 0x161   : > { %v1158_v54 = vmul.f32 0.0056818184, %v1156_v46 }
 0x163   : > { %v1160_v48 = vadd.f32 1e-06, %v1158_v54 }
 0x165   : > { %2176 = vrsqrt.f32 %v1160_v48 }
 0x169   : > { %v1145_v42 = vpop.xlane.xlu1 %1144 }
 0x16d   : > { %v1155_v56 = vpop.xlane.xlu1 %1154 }
 0x16e   : > { %v1157_v45 = vadd.f32 %v1155_v56, %v1145_v42 }
 0x170   : > { %v1159_v27 = vmul.f32 0.0056818184, %v1157_v45 }
 0x172   : > { %v1161_v55 = vadd.f32 1e-06, %v1159_v27  ;;  %v2177_v10 = vpop.eup %2176 }
 0x173   : > { %v1201_v35 = vmul.f32 %v2177_v10, %v1146_v52  ;;  %v1164_v37 = vmul.f32 %v2177_v10, %v2635_v4  ;;  %v2158_v4 = vld [vmem:[%s2844_s15 + $0x10] sm:$0xff]   ;;  %v2159_v52 = vld [vmem:[%s2844_s15 + $0x8] sm:$0xff]  }
 0x174   : > { %2178 = vrsqrt.f32 %v1161_v55  ;;  %2059 = vmatpush3.bf16.msra.mxu0 %v2158_v4 }
 0x175   : > { %v1210_v23 = vmul.f32 %v1937_v40, %v1201_v35  ;;  %v1173_v32 = vmul.f32 %v1935_v0, %v1164_v37  ;;  %2060 = vmatprep.subr.bf16.mxu0 %v2224_v44 }
 0x177   : > { %v1219_v28 = vadd.f32 %v1938_v58, %v1210_v23  ;;  %v1182_v57 = vadd.f32 %v1936_v50, %v1173_v32 }
 0x178   : > { %2061 = vmatpush3.bf16.msra.mxu0 %v2159_v52 }
 0x179   : > { %2062 = vmatprep.subr.bf16.mxu0 %v2224_v44 }
 0x17c   : > { %2063 = vmatpush3.bf16.msra.mxu0 %v2160_v49 }
 0x17d   : > { %2078 = vmatprep.subr.bf16.mxu0 %v2224_v44 }
 0x181   : > { %v2179_v53 = vpop.eup %2178 }
 0x182   : > { %v1202_v59 = vmul.f32 %v2179_v53, %v1147_v31  ;;  %v1165_v47 = vmul.f32 %v2179_v53, %v2641_v26 }
 0x184   : > { %v1211_v22 = vmul.f32 %v1937_v40, %v1202_v59  ;;  %v1174_v20 = vmul.f32 %v1935_v0, %v1165_v47  ;;  %v2172_v47 = vld [vmem:[%s2846_s17] sm:$0xff]  }
 0x186   : > { %v1220_v29 = vadd.f32 %v1938_v58, %v1211_v22  ;;  %v1183_v43 = vadd.f32 %v1936_v50, %v1174_v20 }
 0x188   : > { %v1221_v61 = vpack.c.bf16 %v1220_v29, %v1219_v28  ;;  %v1184_v38 = vpack.c.bf16 %v1183_v43, %v1182_v57  ;;  %v2161_v29 = vld [vmem:[%s2846_s17 + $0x38] sm:$0xff]   ;;  %v1718_v57 = vstv %s1976_s21 }
 0x18a   : > { %2025 = vmatmul.mubr.msk.bf16.vlgmr.msra.gmra.mxu1 %vm1126_vm6, %v1221_v61  ;;  %v2162_v61 = vld [vmem:[%s2846_s17 + $0x30] sm:$0xff]  }
 0x18b   : > { %2029 = vmatpush3.bf16.msra.mxu1 %v2145_v33  ;;  %2044 = vmatprep.mubr.msk.bf16.mxu1 %vm2225_vm7, %v2224_v44 }
 0x18c   : > { %2030 = vmatprep.subr.bf16.mxu1 %v2224_v44 }
 0x18f   : > { %2031 = vmatpush3.bf16.msra.mxu1 %v2146_v5  ;;  %v2163_v5 = vld [vmem:[%s2846_s17 + $0x28] sm:$0xff]  }
 0x190   : > { %2032 = vmatprep.subr.bf16.mxu1 %v2224_v44 }
 0x193   : > { %2033 = vmatpush3.bf16.msra.mxu1 %v2147_v9  ;;  %v2164_v9 = vld [vmem:[%s2846_s17 + $0x20] sm:$0xff]  }
 0x194   : > { %2034 = vmatprep.subr.bf16.mxu1 %v2224_v44 }
 0x197   : > { %2035 = vmatpush3.bf16.msra.mxu1 %v2148_v36  ;;  %v2166_v36 = vld [vmem:[%s2846_s17 + $0x18] sm:$0xff]  }
 0x198   : > { %2036 = vmatprep.subr.bf16.mxu1 %v2224_v44 }
 0x19b   : > { %2037 = vmatpush3.bf16.msra.mxu1 %v2149_v30  ;;  %v2168_v30 = vld [vmem:[%s2846_s17 + $0x10] sm:$0xff]  }
 0x19c   : > { %2038 = vmatprep.subr.bf16.mxu1 %v2224_v44 }
 0x19f   : > { %2039 = vmatpush3.bf16.msra.mxu1 %v2150_v63  ;;  %v2170_v63 = vld [vmem:[%s2846_s17 + $0x8] sm:$0xff]  }
 0x1a0   : > { %2040 = vmatprep.subr.bf16.mxu1 %v2224_v44 }
 0x1a3   : > { %2041 = vmatpush3.bf16.msra.mxu1 %v2151_v6 }
 0x1a4   : > { %2042 = vmatprep.subr.bf16.mxu1 %v2224_v44 }
 0x1a7   : > { %2043 = vmatpush3.bf16.msra.mxu1 %v2152_v11 }
 0x1a8   : > { %2068 = vmatprep.subr.bf16.mxu1 %v2224_v44 }
 0x1aa   : > { %2045 = vmatmul.mubr.bf16.vlgmr.msra.gmra.mxu1 %v1184_v38  ;;  %v1952_v38 = vld [vmem:[%s2845_s16] ss:$0 sm:$0xff] }
 0x1ab   : > { %2074 = vmatprep.mubr.msk.bf16.mxu1 %vm2225_vm7, %v2224_v44  ;;  %2069 = vmatpush3.bf16.msra.mxu1 %v2165_v7 }
 0x1ac   : > { %2070 = vmatprep.subr.bf16.mxu1 %v2224_v44 }
 0x1af   : > { %2071 = vmatpush3.bf16.msra.mxu1 %v2167_v62 }
 0x1b0   : > { %2072 = vmatprep.subr.bf16.mxu1 %v2224_v44 }
 0x1b3   : > { %2073 = vmatpush3.bf16.msra.mxu1 %v2169_v25 }
 0x1b6   : > { %2075 = vmatmul.mubr.msk.bf16.vlgmr.msra.gmra.mxu1 %vm1126_vm6, %v2397_v14 }
 0x24a   : > { %v1283_v13 = vpop.f32.mrf.mxu1 }
 0x24c   : > { %v2026_v15 = vpop.f32.mrf.mxu1 }
 0x24e   : > { %v1286_v19 = vpop.f32.mrf.mxu1 }
 0x250   : > { %v2027_v26 = vpop.f32.mrf.mxu1 }
 0x26a   : > { %v1372_v31 = vpop.f32.mrf.mxu1 }
 0x26b   : > { %v1373_v16 = vadd.f32 %v1372_v31, %v1283_v13 }
 0x26c   : > { %v2046_v34 = vpop.f32.mrf.mxu1 }
 0x26d   : > { %v1386_v24 = vadd.f32 %v1951_v39, %v1373_v16 }
 0x26e   : > { %v1375_v51 = vpop.f32.mrf.mxu1 }
 0x26f   : > { %v1390_v17 = vmul.f32 0.044715, %v1386_v24  ;;  %v1376_v18 = vadd.f32 %v1375_v51, %v1286_v19  ;;  %v1388_v59 = vmul.f32 0.5, %v1386_v24 }
 0x270   : > { %v2047_v41 = vpop.f32.mrf.mxu1 }
 0x271   : > { %v1392_v46 = vmul.f32 %v1390_v17, %v1386_v24  ;;  %v1387_v54 = vadd.f32 %v1951_v39, %v1376_v18 }
 0x273   : > { %v1391_v42 = vmul.f32 0.044715, %v1387_v54  ;;  %v1394_v14 = vmul.f32 %v1392_v46, %v1386_v24  ;;  %v1389_v23 = vmul.f32 0.5, %v1387_v54 }
 0x275   : > { %v1393_v48 = vmul.f32 %v1391_v42, %v1387_v54  ;;  %v1396_v56 = vadd.f32 %v1394_v14, %v1386_v24 }
 0x276   : > { %v1601_v37 = vpop.f32.mrf.mxu1 }
 0x277   : > { %v1395_v45 = vmul.f32 %v1393_v48, %v1387_v54  ;;  %v1398_v27 = vmul.f32 0.7978846, %v1396_v56 }
 0x278   : > { %v2076_v6 = vpop.f32.mrf.mxu1 }
 0x279   : > { %v1397_v55 = vadd.f32 %v1395_v45, %v1387_v54  ;;  %2180 = vtanh.f32 %v1398_v27 }
 0x27a   : > { %v1604_v0 = vpop.f32.mrf.mxu1 }
 0x27b   : > { %v1399_v10 = vmul.f32 0.7978846, %v1397_v55 }
 0x27c   : > { %v2077_v20 = vpop.f32.mrf.mxu1 }
 0x27d   : > { %2182 = vtanh.f32 %v1399_v10 }
 0x286   : > { %v2181_v35 = vpop.eup %2180 }
 0x287   : > { %v1402_v40 = vadd.f32 1.0, %v2181_v35 }
 0x289   : > { %v1404_v22 = vmul.f32 %v1402_v40, %v1388_v59 }
 0x28a   : > { %v2183_v53 = vpop.eup %2182 }
 0x28b   : > { %v1403_v58 = vadd.f32 1.0, %v2183_v53 }
 0x28d   : > { %v1405_v28 = vmul.f32 %v1403_v58, %v1389_v23 }
 0x28f   : > { %v1406_v33 = vpack.c.bf16 %v1405_v28, %v1404_v22 }
 0x291   : > { %2065 = vmatmul.mubr.bf16.vlgmr.msra.gmra.mxu0 %v1406_v33 }
 0x292   : > { %2079 = vmatpush3.bf16.msra.mxu0 %v2161_v29  ;;  %2094 = vmatprep.mubr.msk.bf16.mxu0 %vm2225_vm7, %v2224_v44 }
 0x293   : > { %2080 = vmatprep.subr.bf16.mxu0 %v2224_v44 }
 0x296   : > { %2081 = vmatpush3.bf16.msra.mxu0 %v2162_v61 }
 0x297   : > { %2082 = vmatprep.subr.bf16.mxu0 %v2224_v44 }
 0x29a   : > { %2083 = vmatpush3.bf16.msra.mxu0 %v2163_v5 }
 0x29b   : > { %2084 = vmatprep.subr.bf16.mxu0 %v2224_v44 }
 0x29e   : > { %2085 = vmatpush3.bf16.msra.mxu0 %v2164_v9 }
 0x29f   : > { %2086 = vmatprep.subr.bf16.mxu0 %v2224_v44 }
 0x2a2   : > { %2087 = vmatpush3.bf16.msra.mxu0 %v2166_v36 }
 0x2a3   : > { %2088 = vmatprep.subr.bf16.mxu0 %v2224_v44 }
 0x2a6   : > { %2089 = vmatpush3.bf16.msra.mxu0 %v2168_v30 }
 0x2a7   : > { %2090 = vmatprep.subr.bf16.mxu0 %v2224_v44 }
 0x2aa   : > { %2091 = vmatpush3.bf16.msra.mxu0 %v2170_v63 }
 0x2ab   : > { %2092 = vmatprep.subr.bf16.mxu0 %v2224_v44  ;;  %v1719_v44 = vadd.s32 %v1718_v57, %v2367_v1 }
 0x2ad   : > { %vm1721_vm8 = vcmp.lt.s32.totalorder %v1719_v44, 40 }
 0x2ae   : > { %2093 = vmatpush3.bf16.msra.mxu0 %v2172_v47 }
 0x2b1   : > { %2095 = vmatmul.mubr.bf16.vlgmr.msra.gmra.mxu0 %v2419_v21  ;;  %v1716_v21 = vadd.s32 8, %v2367_v1 }
 0x2b3   : > { %v1720_v49 = vadd.s32 %v1718_v57, %v1716_v21 }
 0x2b5   : > { %vm1722_vm10 = vcmp.lt.s32.totalorder %v1720_v49, 40 }
 0x351   : > { %v1512_v32 = vpop.f32.mrf.mxu0 }
 0x352   : > { %v1513_v3 = vadd.f32 %v1952_v38, %v1512_v32 }
 0x353   : > { %v2066_v11 = vpop.f32.mrf.mxu0 }
 0x355   : > { %v1515_v50 = vpop.f32.mrf.mxu0 }
 0x356   : > { %v1516_v7 = vadd.f32 %v1952_v38, %v1515_v50 }
 0x357   : > { %v2067_v43 = vpop.f32.mrf.mxu0 }
 0x371   : > { %v1696_v2 = vpop.f32.mrf.mxu0 }
 0x372   : > { %v1697_v60 = vadd.f32 %v1696_v2, %v1601_v37 }
 0x373   : > { %v2096_v8 = vpop.f32.mrf.mxu0 }
 0x374   : > { %v1703_v4 = vadd.f32 %v1697_v60, %v1513_v3 }
 0x375   : > { %v1699_v52 = vpop.f32.mrf.mxu0 }
 0x376   : > { %v1712_v62 = vadd.f32 %v1975_v12, %v1703_v4  ;;  %v1700_v25 = vadd.f32 %v1699_v52, %v1604_v0 }
 0x377   : > { %v2097_v13 = vpop.f32.mrf.mxu0 }
 0x378   : > { %v1727_v1 = vsel %vm1721_vm8, %v1712_v62, 0.0  ;;  %v1704_v15 = vadd.f32 %v1700_v25, %v1516_v7 }
 0x379   : > { %v1981_v19 = vpack.c.bf16 %v1727_v1, %v1727_v1 }
 0x37a   : > { %v1713_v26 = vadd.f32 %v1975_v12, %v1704_v15 }
 0x37b   : > { %1738 = vst.msk [vmem:[%s821_s25] sm:$0xf] %vm1737_vm9, %v1981_v19 }
 0x37c   : > { %v1728_v31 = vsel %vm1722_vm10, %v1713_v26, 0.0 }
 0x37d   : > { %v1982_v39 = vpack.c.bf16 %v1728_v31, %v1728_v31 }
 0x37f   : > { %1739 = vst.msk [vmem:[%s821_s25 + $0x4] sm:$0xf] %vm1737_vm9, %v1982_v39 }
 0x380 PF: > { %s2870_s3 = sld [smem:[#allocation4_spill]] }
 0x381   : > { %s2871_s1 = sld [smem:[#allocation2_spill]] }
 0x382   : > { %s2872_s22 = sld [smem:[#allocation3_spill]] }
 0x383   : > { %s2873_s23 = sld [smem:[#allocation5_spill]] }
 0x384   : > { %s2874_s24 = sld [smem:[#allocation6_spill]] }
 0x386   : > { %s30_s2 = sadd.s32 1, %s2870_s3  }
 0x387   : > { %p27_p8 = scmp.ge.s32.totalorder %s30_s2, 8  }
 0x389   :  { %29 = sbr.rel (!%p27_p8) target bundleno = 7 (0x7), region = 151 }

</bundles_post_ra>
